<compile_context>
chip_gen: v7x
topology: tpu7x:2x2x1
jax: 0.10.0
libtpu: 0.0.40
codegen_flags: <defaults>
</compile_context>

<pallas_src>
import functools

import jax
import jax.numpy as jnp
from jax import lax
from jax.experimental import pallas as pl
from jax.experimental.pallas import tpu as pltpu

LANE = 128
ALIGN = 16          # bf16 sublane packing: keep interior store offsets aligned
BN_EPS = 1e-5
_TAPS = tuple((ki, kj) for ki in range(3) for kj in range(3))


def _round_up(v, m):
    return (v + m - 1) // m * m


def _geom(H, W):
    """Flat padded-activation geometry shared by kernel inputs and outputs."""
    Wp = W + 2                                  # 2 spare cols -> no row collisions
    OFF = _round_up(Wp + 1, ALIGN)              # interior start (aligned store)
    Mo = H * Wp                                 # rows of the per-sample work slab
    R = _round_up(OFF + (H + 1) * Wp + 1, ALIGN)  # total rows (covers all tap reads)
    return Wp, OFF, Mo, R


def _pick_batch_block(n, max_b=4):
    """Samples per grid step: amortize per-step overhead, keep grid >= 2 (v7x)."""
    divisors = [b for b in range(1, min(n, max_b) + 1) if n % b == 0]
    two_plus = [b for b in divisors if n // b >= 2]
    return max(two_plus) if two_plus else max(divisors)


# ------------------------------ Pallas kernel -------------------------------

def _block_kernel(x_ref, w1_ref, w2_ref, s_ref, b_ref, m_ref, *rest,
                  Wp, OFF, Mo, B, has_ds):
    """Fused BasicBlock forward for B samples (stride=1).

    x_ref  : (B, R, Cin_p) bf16  flat haloed activation
    w1_ref : (9, Cin_p, Cp) bf16 conv1 taps      (resident)
    w2_ref : (9, Cp,   Cp)  bf16 conv2 taps      (resident)
    s_ref/b_ref : (1, Cp)   f32  folded batch_norm2 scale/bias (after BOTH convs)
    m_ref  : (Mo, 1)        f32  1.0 on real columns, 0.0 on garbage/halo columns
    [wd_ref (Cin_p, Cp) bf16, sd_ref/bd_ref (1, Cp) f32]   optional downsample
    o_ref  : (B, R, Cp)     bf16 output, same flat haloed layout
    acc_ref: (Mo, Cp)       f32  VMEM matmul accumulator
    h1p_ref: (R, Cp)        bf16 VMEM staging of conv1 activation (with halo)
    """
    if has_ds:
        wd_ref, sd_ref, bd_ref, o_ref, acc_ref, h1p_ref = rest
    else:
        o_ref, acc_ref, h1p_ref = rest

    cp = o_ref.shape[-1]
    R = o_ref.shape[1]
    tail = R - OFF - Mo
    scale = s_ref[...]
    bias = b_ref[...]
    mask = m_ref[...]

    # Zero only the staging buffer's halo rows (interior rows are fully
    # rewritten per sample; in-range halo positions are zeroed via `mask`).
    h1p_ref[pl.ds(0, OFF), :] = jnp.zeros((OFF, cp), jnp.bfloat16)
    h1p_ref[pl.ds(OFF + Mo, tail), :] = jnp.zeros((tail, cp), jnp.bfloat16)

    for b in range(B):
        # ---- conv1 (3x3, pad=1) + bn2 + ReLU: contiguous tap slabs on MXU ----
        for t, (ki, kj) in enumerate(_TAPS):
            start = OFF - Wp - 1 + ki * Wp + kj           # static row offset
            prod = jnp.dot(x_ref[b, pl.ds(start, Mo), :], w1_ref[t],
                           preferred_element_type=jnp.float32)
            if t == 0:
                acc_ref[...] = prod
            else:
                acc_ref[...] += prod
        h1 = jnp.maximum(acc_ref[...] * scale + bias, 0.0) * mask
        h1p_ref[pl.ds(OFF, Mo), :] = h1.astype(jnp.bfloat16)   # aligned store

        # ---- conv2 (3x3, pad=1) + bn2 ----
        for t, (ki, kj) in enumerate(_TAPS):
            start = OFF - Wp - 1 + ki * Wp + kj
            prod = jnp.dot(h1p_ref[pl.ds(start, Mo), :], w2_ref[t],
                           preferred_element_type=jnp.float32)
            if t == 0:
                acc_ref[...] = prod
            else:
                acc_ref[...] += prod
        y = acc_ref[...] * scale + bias

        # ---- identity (+ optional 1x1 conv + BN), residual add, ReLU (f32) ----
        xi = x_ref[b, pl.ds(OFF, Mo), :]
        if has_ds:
            idn = jnp.dot(xi, wd_ref[...], preferred_element_type=jnp.float32)
            idn = idn * sd_ref[...] + bd_ref[...]
        else:
            idn = xi.astype(jnp.float32)

        out = jnp.maximum(y + idn, 0.0) * mask
        o_ref[b, pl.ds(OFF, Mo), :] = out.astype(jnp.bfloat16)
        o_ref[b, pl.ds(0, OFF), :] = jnp.zeros((OFF, cp), jnp.bfloat16)
        o_ref[b, pl.ds(OFF + Mo, tail), :] = jnp.zeros((tail, cp), jnp.bfloat16)


# ------------------------------ layout helpers -------------------------------

def to_padded(x_nchw, cin_p):
    """NCHW f32 -> flat haloed bf16 (N, R, cin_p).  Done once per chain."""
    N, C, H, W = x_nchw.shape
    Wp, OFF, Mo, R = _geom(H, W)
    xh = jnp.transpose(x_nchw, (0, 2, 3, 1))
    xh = jnp.pad(xh, ((0, 0), (0, 0), (0, Wp - W), (0, cin_p - C)))
    xf = xh.reshape(N, Mo, cin_p)
    xf = jnp.pad(xf, ((0, 0), (OFF, R - OFF - Mo), (0, 0)))
    return xf.astype(jnp.bfloat16)


def from_padded(xf, C, H, W):
    """Flat haloed bf16 (N, R, Cp) -> NCHW f32 with real channel count C."""
    Wp, OFF, Mo, R = _geom(H, W)
    N = xf.shape[0]
    xi = xf[:, OFF:OFF + Mo, :].reshape(N, H, Wp, xf.shape[-1])
    return jnp.transpose(xi[:, :, :W, :C], (0, 3, 1, 2)).astype(jnp.float32)


def _prep_conv3x3(w, cin_p, cout_p):
    cout, cin, kh, kw = w.shape
    wt = jnp.transpose(w, (2, 3, 1, 0))
    wt = jnp.pad(wt, ((0, 0), (0, 0), (0, cin_p - cin), (0, cout_p - cout)))
    return wt.reshape(kh * kw, cin_p, cout_p).astype(jnp.bfloat16)


def _prep_conv1x1(w, cin_p, cout_p):
    cout, cin = w.shape[0], w.shape[1]
    wt = jnp.transpose(w[:, :, 0, 0], (1, 0))
    wt = jnp.pad(wt, ((0, cin_p - cin), (0, cout_p - cout)))
    return wt.astype(jnp.bfloat16)


def _prep_affine(s, b, cout_p):
    cout = s.shape[0]
    s = jnp.pad(s, (0, cout_p - cout)).reshape(1, cout_p).astype(jnp.float32)
    b = jnp.pad(b, (0, cout_p - cout)).reshape(1, cout_p).astype(jnp.float32)
    return s, b


# ------------------------------- JAX wrappers ---------------------------------

def block_forward_padded(xp, params, H, W, stride=1):
    """One Block, input/output in the flat haloed bf16 layout (for chaining)."""
    if stride != 1:
        # TODO(synk): the reference forward applies `stride` to BOTH 3x3 convs,
        # making the residual add shape-inconsistent for stride > 1; only the
        # runnable stride=1 configuration is implemented.
        raise NotImplementedError("Block Pallas kernel implemented for stride=1.")

    N = xp.shape[0]
    cin_p = xp.shape[-1]
    Wp, OFF, Mo, R = _geom(H, W)
    Cin, Cout = params["w1"].shape[1], params["w1"].shape[0]
    assert xp.shape == (N, R, cin_p) and cin_p % LANE == 0 and cin_p >= Cin
    cout_p = _round_up(Cout, LANE)
    has_ds = "ds_w" in params
    if not has_ds and cin_p != cout_p:
        raise ValueError("identity add requires Cin_p == Cout_p without downsample")

    B = _pick_batch_block(N)

    w1 = _prep_conv3x3(params["w1"], cin_p, cout_p)
    w2 = _prep_conv3x3(params["w2"], cout_p, cout_p)
    s2, b2 = _prep_affine(params["bn2_s"], params["bn2_b"], cout_p)
    mask = ((jnp.arange(Mo, dtype=jnp.int32) % Wp) < W)
    mask = mask.astype(jnp.float32).reshape(Mo, 1)

    inputs = [xp, w1, w2, s2, b2, mask]
    in_specs = [
        pl.BlockSpec((B, R, cin_p), lambda n: (n, 0, 0)),
        pl.BlockSpec((9, cin_p, cout_p), lambda n: (0, 0, 0)),   # resident
        pl.BlockSpec((9, cout_p, cout_p), lambda n: (0, 0, 0)),  # resident
        pl.BlockSpec((1, cout_p), lambda n: (0, 0)),             # resident
        pl.BlockSpec((1, cout_p), lambda n: (0, 0)),             # resident
        pl.BlockSpec((Mo, 1), lambda n: (0, 0)),                 # resident
    ]
    flops = 2 * Mo * 9 * (cin_p * cout_p + cout_p * cout_p)
    if has_ds:
        wd = _prep_conv1x1(params["ds_w"], cin_p, cout_p)
        sd, bd = _prep_affine(params["ds_s"], params["ds_b"], cout_p)
        inputs += [wd, sd, bd]
        in_specs += [
            pl.BlockSpec((cin_p, cout_p), lambda n: (0, 0)),
            pl.BlockSpec((1, cout_p), lambda n: (0, 0)),
            pl.BlockSpec((1, cout_p), lambda n: (0, 0)),
        ]
        flops += 2 * Mo * cin_p * cout_p
    flops *= N
    bytes_accessed = sum(int(a.size) * a.dtype.itemsize for a in inputs)
    bytes_accessed += N * R * cout_p * 2

    kern = functools.partial(_block_kernel, Wp=Wp, OFF=OFF, Mo=Mo, B=B,
                             has_ds=has_ds)
    return pl.pallas_call(
        kern,
        grid=(N // B,),
        in_specs=in_specs,
        out_specs=pl.BlockSpec((B, R, cout_p), lambda n: (n, 0, 0)),
        out_shape=jax.ShapeDtypeStruct((N, R, cout_p), jnp.bfloat16),
        scratch_shapes=[pltpu.VMEM((Mo, cout_p), jnp.float32),
                        pltpu.VMEM((R, cout_p), jnp.bfloat16)],
        compiler_params=pltpu.CompilerParams(
            dimension_semantics=("parallel",)),
        cost_estimate=pl.CostEstimate(
            flops=int(flops), transcendentals=0,
            bytes_accessed=int(bytes_accessed)),
    )(*inputs)


def block_forward(x_nchw, params, stride=1):
    """Single-block convenience wrapper: NCHW f32 in, NCHW f32 out."""
    N, Cin, H, W = x_nchw.shape
    xp = to_padded(x_nchw, _round_up(Cin, LANE))
    yp = block_forward_padded(xp, params, H, W, stride=stride)
    return from_padded(yp, params["w1"].shape[0], H, W)


@functools.partial(jax.jit, static_argnames=("H", "W"))
def run_chain(x, pa, pb, *, H, W):
    """Two chained blocks; NCHW<->flat conversions only at the chain ends."""
    xp = to_padded(x, _round_up(x.shape[1], LANE))
    y1p = block_forward_padded(xp, pa, H, W)
    y2p = block_forward_padded(y1p, pb, H, W)
    return (from_padded(y1p, pa["w1"].shape[0], H, W),
            from_padded(y2p, pb["w1"].shape[0], H, W))


# ------------------------- parameters & f32 reference ------------------------

def _fold_bn(key, c):
    k1, k2, k3, k4 = jax.random.split(key, 4)
    gamma = 1.0 + 0.1 * jax.random.normal(k1, (c,), jnp.float32)
    beta = 0.1 * jax.random.normal(k2, (c,), jnp.float32)
    mean = 0.1 * jax.random.normal(k3, (c,), jnp.float32)
    var = 1.0 + 0.1 * jnp.abs(jax.random.normal(k4, (c,), jnp.float32))
    scale = gamma * lax.rsqrt(var + BN_EPS)
    return scale, beta - mean * scale


def make_block_params(key, cin, cout, downsample=False):
    ks = jax.random.split(key, 5)
    p = {
        "w1": 0.08 * jax.random.normal(ks[0], (cout, cin, 3, 3), jnp.float32),
        "w2": 0.08 * jax.random.normal(ks[1], (cout, cout, 3, 3), jnp.float32),
    }
    p["bn2_s"], p["bn2_b"] = _fold_bn(ks[2], cout)
    if downsample:
        p["ds_w"] = 0.08 * jax.random.normal(ks[3], (cout, cin, 1, 1), jnp.float32)
        p["ds_s"], p["ds_b"] = _fold_bn(ks[4], cout)
    return p


def block_reference(x, p):
    """Pure-JAX f32 reference with the exact semantics of Block.forward."""
    def conv(a, w, pad):
        return lax.conv_general_dilated(
            a, w, window_strides=(1, 1), padding=((pad, pad), (pad, pad)),
            dimension_numbers=("NCHW", "OIHW", "NCHW"))

    def bn(a, s, b):
        return a * s[None, :, None, None] + b[None, :, None, None]

    identity = x
    h = jax.nn.relu(bn(conv(x, p["w1"], 1), p["bn2_s"], p["bn2_b"]))
    h = bn(conv(h, p["w2"], 1), p["bn2_s"], p["bn2_b"])
    if "ds_w" in p:
        identity = bn(conv(identity, p["ds_w"], 0), p["ds_s"], p["ds_b"])
    return jax.nn.relu(h + identity)


# ---------------------------------- main -------------------------------------

if __name__ == "__main__":
    key = jax.random.PRNGKey(0)
    kx, ka, kb = jax.random.split(key, 3)

    N, Cin, H, W = 2, 32, 16, 16
    x = jax.random.normal(kx, (N, Cin, H, W), jnp.float32)

    # Block 1: plain identity residual (in == out channels, stride=1).
    pa = make_block_params(ka, Cin, 32, downsample=False)
    # Block 2: channel expansion with a 1x1-conv + BN downsample on the identity.
    pb = make_block_params(kb, 32, 64, downsample=True)

    y1, y2 = run_chain(x, pa, pb, H=H, W=W)
    jax.block_until_ready((y1, y2))

    assert y1.shape == (N, 32, H, W), y1.shape
    assert y2.shape == (N, 64, H, W), y2.shape

    # Loose-tolerance check against the f32 reference (kernel matmuls, staging
    # and inter-block activations are bf16).
    r1 = block_reference(x, pa)
    r2 = block_reference(r1, pb)
    for got, ref in ((y1, r1), (y2, r2)):
        err = float(jnp.max(jnp.abs(got - ref)))
        mag = float(jnp.max(jnp.abs(ref))) + 1e-6
        assert err <= 0.08 * mag, (err, mag)
    assert bool(jnp.all(jnp.isfinite(y2)))
    print("KERNEL_OK")
</pallas_src>

<mosaic_0001>
module attributes {stable_mosaic.version = 11 : i64} {
  func.func @_block_kernel(%arg0: i32, %arg1: memref<1x352x128xbf16, #tpu.memory_space<vmem>>, %arg2: memref<9x128x128xbf16, #tpu.memory_space<vmem>>, %arg3: memref<9x128x128xbf16, #tpu.memory_space<vmem>>, %arg4: memref<1x128xf32, #tpu.memory_space<vmem>>, %arg5: memref<1x128xf32, #tpu.memory_space<vmem>>, %arg6: memref<288x1xf32, #tpu.memory_space<vmem>>, %arg7: memref<1x352x128xbf16, #tpu.memory_space<vmem>>, %arg8: memref<288x128xf32, #tpu.memory_space<vmem>>, %arg9: memref<352x128xbf16, #tpu.memory_space<vmem>>) attributes {dimension_semantics = [#tpu.dimension_semantics<parallel>], iteration_bounds = array<i64: 2>, scalar_prefetch = 0 : i64, scratch_operands = 2 : i64, tpu.core_type = #tpu.core_type<tc>, window_params = [{transform_indices = @transform_0, window_bounds = array<i64: 1, 352, 128>}, {pipeline_mode = #tpu.pipeline_mode<synchronous>, transform_indices = @transform_1, window_bounds = array<i64: 9, 128, 128>}, {pipeline_mode = #tpu.pipeline_mode<synchronous>, transform_indices = @transform_2, window_bounds = array<i64: 9, 128, 128>}, {pipeline_mode = #tpu.pipeline_mode<synchronous>, transform_indices = @transform_3, window_bounds = array<i64: 1, 128>}, {pipeline_mode = #tpu.pipeline_mode<synchronous>, transform_indices = @transform_4, window_bounds = array<i64: 1, 128>}, {pipeline_mode = #tpu.pipeline_mode<synchronous>, transform_indices = @transform_5, window_bounds = array<i64: 288, 1>}, {transform_indices = @transform_6, window_bounds = array<i64: 1, 352, 128>}]} {
    %c0 = arith.constant 0 : index
    %c0_0 = arith.constant 0 : index
    %0 = vector.load %arg4[%c0, %c0_0] : memref<1x128xf32, #tpu.memory_space<vmem>>, vector<1x128xf32>
    %c0_1 = arith.constant 0 : index
    %c0_2 = arith.constant 0 : index
    %1 = vector.load %arg5[%c0_1, %c0_2] : memref<1x128xf32, #tpu.memory_space<vmem>>, vector<1x128xf32>
    %c0_3 = arith.constant 0 : index
    %c0_4 = arith.constant 0 : index
    %2 = vector.load %arg6[%c0_3, %c0_4] : memref<288x1xf32, #tpu.memory_space<vmem>>, vector<288x1xf32>
    %cst = arith.constant 0.000000e+00 : bf16
    %3 = vector.broadcast %cst : bf16 to vector<32x128xbf16>
    %c0_5 = arith.constant 0 : index
    %c0_6 = arith.constant 0 : index
    %4 = vector.load %arg9[%c0_5, %c0_6] : memref<352x128xbf16, #tpu.memory_space<vmem>>, vector<32x128xbf16>
    tpu.vector_store %arg9[%c0_5, %c0_6], %3 {strides = array<i32>} : memref<352x128xbf16, #tpu.memory_space<vmem>>, vector<32x128xbf16>,
    %cst_7 = arith.constant 0.000000e+00 : bf16
    %5 = vector.broadcast %cst_7 : bf16 to vector<32x128xbf16>
    %c320 = arith.constant 320 : index
    %c0_8 = arith.constant 0 : index
    %6 = vector.load %arg9[%c320, %c0_8] : memref<352x128xbf16, #tpu.memory_space<vmem>>, vector<32x128xbf16>
    tpu.vector_store %arg9[%c320, %c0_8], %5 {strides = array<i32>} : memref<352x128xbf16, #tpu.memory_space<vmem>>, vector<32x128xbf16>,
    %c0_9 = arith.constant 0 : index
    %c13 = arith.constant 13 : index
    %c0_10 = arith.constant 0 : index
    %7 = vector.load %arg1[%c0_9, %c13, %c0_10] : memref<1x352x128xbf16, #tpu.memory_space<vmem>>, vector<1x288x128xbf16>
    %8 = vector.shape_cast %7 : vector<1x288x128xbf16> to vector<288x128xbf16>
    %c0_11 = arith.constant 0 : index
    %c0_12 = arith.constant 0 : index
    %c0_13 = arith.constant 0 : index
    %9 = vector.load %arg2[%c0_11, %c0_12, %c0_13] : memref<9x128x128xbf16, #tpu.memory_space<vmem>>, vector<1x128x128xbf16>
    %10 = vector.shape_cast %9 : vector<1x128x128xbf16> to vector<128x128xbf16>
    %cst_14 = arith.constant dense<0.000000e+00> : vector<288x128xf32>
    %11 = tpu.matmul %8, %10, %cst_14 {dimension_numbers = #tpu.dot_dimension_numbers<[1], [0], [0], [1], [0, 0, 1, 1], [], []>} : vector<288x128xbf16>, vector<128x128xbf16>, vector<288x128xf32> -> vector<288x128xf32>
    %c0_15 = arith.constant 0 : index
    %c0_16 = arith.constant 0 : index
    %12 = vector.load %arg8[%c0_15, %c0_16] : memref<288x128xf32, #tpu.memory_space<vmem>>, vector<288x128xf32>
    tpu.vector_store %arg8[%c0_15, %c0_16], %11 {strides = array<i32>} : memref<288x128xf32, #tpu.memory_space<vmem>>, vector<288x128xf32>,
    %c0_17 = arith.constant 0 : index
    %c14 = arith.constant 14 : index
    %c0_18 = arith.constant 0 : index
    %13 = vector.load %arg1[%c0_17, %c14, %c0_18] : memref<1x352x128xbf16, #tpu.memory_space<vmem>>, vector<1x288x128xbf16>
    %14 = vector.shape_cast %13 : vector<1x288x128xbf16> to vector<288x128xbf16>
    %c1 = arith.constant 1 : index
    %c0_19 = arith.constant 0 : index
    %c0_20 = arith.constant 0 : index
    %15 = vector.load %arg2[%c1, %c0_19, %c0_20] : memref<9x128x128xbf16, #tpu.memory_space<vmem>>, vector<1x128x128xbf16>
    %16 = vector.shape_cast %15 : vector<1x128x128xbf16> to vector<128x128xbf16>
    %cst_21 = arith.constant dense<0.000000e+00> : vector<288x128xf32>
    %17 = tpu.matmul %14, %16, %cst_21 {dimension_numbers = #tpu.dot_dimension_numbers<[1], [0], [0], [1], [0, 0, 1, 1], [], []>} : vector<288x128xbf16>, vector<128x128xbf16>, vector<288x128xf32> -> vector<288x128xf32>
    %c0_22 = arith.constant 0 : index
    %c0_23 = arith.constant 0 : index
    %18 = vector.load %arg8[%c0_22, %c0_23] : memref<288x128xf32, #tpu.memory_space<vmem>>, vector<288x128xf32>
    %19 = arith.addf %18, %17 : vector<288x128xf32>
    %c0_24 = arith.constant 0 : index
    %c0_25 = arith.constant 0 : index
    %20 = vector.load %arg8[%c0_24, %c0_25] : memref<288x128xf32, #tpu.memory_space<vmem>>, vector<288x128xf32>
    tpu.vector_store %arg8[%c0_24, %c0_25], %19 {strides = array<i32>} : memref<288x128xf32, #tpu.memory_space<vmem>>, vector<288x128xf32>,
    %c0_26 = arith.constant 0 : index
    %c15 = arith.constant 15 : index
    %c0_27 = arith.constant 0 : index
    %21 = vector.load %arg1[%c0_26, %c15, %c0_27] : memref<1x352x128xbf16, #tpu.memory_space<vmem>>, vector<1x288x128xbf16>
    %22 = vector.shape_cast %21 : vector<1x288x128xbf16> to vector<288x128xbf16>
    %c2 = arith.constant 2 : index
    %c0_28 = arith.constant 0 : index
    %c0_29 = arith.constant 0 : index
    %23 = vector.load %arg2[%c2, %c0_28, %c0_29] : memref<9x128x128xbf16, #tpu.memory_space<vmem>>, vector<1x128x128xbf16>
    %24 = vector.shape_cast %23 : vector<1x128x128xbf16> to vector<128x128xbf16>
    %cst_30 = arith.constant dense<0.000000e+00> : vector<288x128xf32>
    %25 = tpu.matmul %22, %24, %cst_30 {dimension_numbers = #tpu.dot_dimension_numbers<[1], [0], [0], [1], [0, 0, 1, 1], [], []>} : vector<288x128xbf16>, vector<128x128xbf16>, vector<288x128xf32> -> vector<288x128xf32>
    %c0_31 = arith.constant 0 : index
    %c0_32 = arith.constant 0 : index
    %26 = vector.load %arg8[%c0_31, %c0_32] : memref<288x128xf32, #tpu.memory_space<vmem>>, vector<288x128xf32>
    %27 = arith.addf %26, %25 : vector<288x128xf32>
    %c0_33 = arith.constant 0 : index
    %c0_34 = arith.constant 0 : index
    %28 = vector.load %arg8[%c0_33, %c0_34] : memref<288x128xf32, #tpu.memory_space<vmem>>, vector<288x128xf32>
    tpu.vector_store %arg8[%c0_33, %c0_34], %27 {strides = array<i32>} : memref<288x128xf32, #tpu.memory_space<vmem>>, vector<288x128xf32>,
    %c0_35 = arith.constant 0 : index
    %c31 = arith.constant 31 : index
    %c0_36 = arith.constant 0 : index
    %29 = vector.load %arg1[%c0_35, %c31, %c0_36] : memref<1x352x128xbf16, #tpu.memory_space<vmem>>, vector<1x288x128xbf16>
    %30 = vector.shape_cast %29 : vector<1x288x128xbf16> to vector<288x128xbf16>
    %c3 = arith.constant 3 : index
    %c0_37 = arith.constant 0 : index
    %c0_38 = arith.constant 0 : index
    %31 = vector.load %arg2[%c3, %c0_37, %c0_38] : memref<9x128x128xbf16, #tpu.memory_space<vmem>>, vector<1x128x128xbf16>
    %32 = vector.shape_cast %31 : vector<1x128x128xbf16> to vector<128x128xbf16>
    %cst_39 = arith.constant dense<0.000000e+00> : vector<288x128xf32>
    %33 = tpu.matmul %30, %32, %cst_39 {dimension_numbers = #tpu.dot_dimension_numbers<[1], [0], [0], [1], [0, 0, 1, 1], [], []>} : vector<288x128xbf16>, vector<128x128xbf16>, vector<288x128xf32> -> vector<288x128xf32>
    %c0_40 = arith.constant 0 : index
    %c0_41 = arith.constant 0 : index
    %34 = vector.load %arg8[%c0_40, %c0_41] : memref<288x128xf32, #tpu.memory_space<vmem>>, vector<288x128xf32>
    %35 = arith.addf %34, %33 : vector<288x128xf32>
    %c0_42 = arith.constant 0 : index
    %c0_43 = arith.constant 0 : index
    %36 = vector.load %arg8[%c0_42, %c0_43] : memref<288x128xf32, #tpu.memory_space<vmem>>, vector<288x128xf32>
    tpu.vector_store %arg8[%c0_42, %c0_43], %35 {strides = array<i32>} : memref<288x128xf32, #tpu.memory_space<vmem>>, vector<288x128xf32>,
    %c0_44 = arith.constant 0 : index
    %c32 = arith.constant 32 : index
    %c0_45 = arith.constant 0 : index
    %37 = vector.load %arg1[%c0_44, %c32, %c0_45] : memref<1x352x128xbf16, #tpu.memory_space<vmem>>, vector<1x288x128xbf16>
    %38 = vector.shape_cast %37 : vector<1x288x128xbf16> to vector<288x128xbf16>
    %c4 = arith.constant 4 : index
    %c0_46 = arith.constant 0 : index
    %c0_47 = arith.constant 0 : index
    %39 = vector.load %arg2[%c4, %c0_46, %c0_47] : memref<9x128x128xbf16, #tpu.memory_space<vmem>>, vector<1x128x128xbf16>
    %40 = vector.shape_cast %39 : vector<1x128x128xbf16> to vector<128x128xbf16>
    %cst_48 = arith.constant dense<0.000000e+00> : vector<288x128xf32>
    %41 = tpu.matmul %38, %40, %cst_48 {dimension_numbers = #tpu.dot_dimension_numbers<[1], [0], [0], [1], [0, 0, 1, 1], [], []>} : vector<288x128xbf16>, vector<128x128xbf16>, vector<288x128xf32> -> vector<288x128xf32>
    %c0_49 = arith.constant 0 : index
    %c0_50 = arith.constant 0 : index
    %42 = vector.load %arg8[%c0_49, %c0_50] : memref<288x128xf32, #tpu.memory_space<vmem>>, vector<288x128xf32>
    %43 = arith.addf %42, %41 : vector<288x128xf32>
    %c0_51 = arith.constant 0 : index
    %c0_52 = arith.constant 0 : index
    %44 = vector.load %arg8[%c0_51, %c0_52] : memref<288x128xf32, #tpu.memory_space<vmem>>, vector<288x128xf32>
    tpu.vector_store %arg8[%c0_51, %c0_52], %43 {strides = array<i32>} : memref<288x128xf32, #tpu.memory_space<vmem>>, vector<288x128xf32>,
    %c0_53 = arith.constant 0 : index
    %c33 = arith.constant 33 : index
    %c0_54 = arith.constant 0 : index
    %45 = vector.load %arg1[%c0_53, %c33, %c0_54] : memref<1x352x128xbf16, #tpu.memory_space<vmem>>, vector<1x288x128xbf16>
    %46 = vector.shape_cast %45 : vector<1x288x128xbf16> to vector<288x128xbf16>
    %c5 = arith.constant 5 : index
    %c0_55 = arith.constant 0 : index
    %c0_56 = arith.constant 0 : index
    %47 = vector.load %arg2[%c5, %c0_55, %c0_56] : memref<9x128x128xbf16, #tpu.memory_space<vmem>>, vector<1x128x128xbf16>
    %48 = vector.shape_cast %47 : vector<1x128x128xbf16> to vector<128x128xbf16>
    %cst_57 = arith.constant dense<0.000000e+00> : vector<288x128xf32>
    %49 = tpu.matmul %46, %48, %cst_57 {dimension_numbers = #tpu.dot_dimension_numbers<[1], [0], [0], [1], [0, 0, 1, 1], [], []>} : vector<288x128xbf16>, vector<128x128xbf16>, vector<288x128xf32> -> vector<288x128xf32>
    %c0_58 = arith.constant 0 : index
    %c0_59 = arith.constant 0 : index
    %50 = vector.load %arg8[%c0_58, %c0_59] : memref<288x128xf32, #tpu.memory_space<vmem>>, vector<288x128xf32>
    %51 = arith.addf %50, %49 : vector<288x128xf32>
    %c0_60 = arith.constant 0 : index
    %c0_61 = arith.constant 0 : index
    %52 = vector.load %arg8[%c0_60, %c0_61] : memref<288x128xf32, #tpu.memory_space<vmem>>, vector<288x128xf32>
    tpu.vector_store %arg8[%c0_60, %c0_61], %51 {strides = array<i32>} : memref<288x128xf32, #tpu.memory_space<vmem>>, vector<288x128xf32>,
    %c0_62 = arith.constant 0 : index
    %c49 = arith.constant 49 : index
    %c0_63 = arith.constant 0 : index
    %53 = vector.load %arg1[%c0_62, %c49, %c0_63] : memref<1x352x128xbf16, #tpu.memory_space<vmem>>, vector<1x288x128xbf16>
    %54 = vector.shape_cast %53 : vector<1x288x128xbf16> to vector<288x128xbf16>
    %c6 = arith.constant 6 : index
    %c0_64 = arith.constant 0 : index
    %c0_65 = arith.constant 0 : index
    %55 = vector.load %arg2[%c6, %c0_64, %c0_65] : memref<9x128x128xbf16, #tpu.memory_space<vmem>>, vector<1x128x128xbf16>
    %56 = vector.shape_cast %55 : vector<1x128x128xbf16> to vector<128x128xbf16>
    %cst_66 = arith.constant dense<0.000000e+00> : vector<288x128xf32>
    %57 = tpu.matmul %54, %56, %cst_66 {dimension_numbers = #tpu.dot_dimension_numbers<[1], [0], [0], [1], [0, 0, 1, 1], [], []>} : vector<288x128xbf16>, vector<128x128xbf16>, vector<288x128xf32> -> vector<288x128xf32>
    %c0_67 = arith.constant 0 : index
    %c0_68 = arith.constant 0 : index
    %58 = vector.load %arg8[%c0_67, %c0_68] : memref<288x128xf32, #tpu.memory_space<vmem>>, vector<288x128xf32>
    %59 = arith.addf %58, %57 : vector<288x128xf32>
    %c0_69 = arith.constant 0 : index
    %c0_70 = arith.constant 0 : index
    %60 = vector.load %arg8[%c0_69, %c0_70] : memref<288x128xf32, #tpu.memory_space<vmem>>, vector<288x128xf32>
    tpu.vector_store %arg8[%c0_69, %c0_70], %59 {strides = array<i32>} : memref<288x128xf32, #tpu.memory_space<vmem>>, vector<288x128xf32>,
    %c0_71 = arith.constant 0 : index
    %c50 = arith.constant 50 : index
    %c0_72 = arith.constant 0 : index
    %61 = vector.load %arg1[%c0_71, %c50, %c0_72] : memref<1x352x128xbf16, #tpu.memory_space<vmem>>, vector<1x288x128xbf16>
    %62 = vector.shape_cast %61 : vector<1x288x128xbf16> to vector<288x128xbf16>
    %c7 = arith.constant 7 : index
    %c0_73 = arith.constant 0 : index
    %c0_74 = arith.constant 0 : index
    %63 = vector.load %arg2[%c7, %c0_73, %c0_74] : memref<9x128x128xbf16, #tpu.memory_space<vmem>>, vector<1x128x128xbf16>
    %64 = vector.shape_cast %63 : vector<1x128x128xbf16> to vector<128x128xbf16>
    %cst_75 = arith.constant dense<0.000000e+00> : vector<288x128xf32>
    %65 = tpu.matmul %62, %64, %cst_75 {dimension_numbers = #tpu.dot_dimension_numbers<[1], [0], [0], [1], [0, 0, 1, 1], [], []>} : vector<288x128xbf16>, vector<128x128xbf16>, vector<288x128xf32> -> vector<288x128xf32>
    %c0_76 = arith.constant 0 : index
    %c0_77 = arith.constant 0 : index
    %66 = vector.load %arg8[%c0_76, %c0_77] : memref<288x128xf32, #tpu.memory_space<vmem>>, vector<288x128xf32>
    %67 = arith.addf %66, %65 : vector<288x128xf32>
    %c0_78 = arith.constant 0 : index
    %c0_79 = arith.constant 0 : index
    %68 = vector.load %arg8[%c0_78, %c0_79] : memref<288x128xf32, #tpu.memory_space<vmem>>, vector<288x128xf32>
    tpu.vector_store %arg8[%c0_78, %c0_79], %67 {strides = array<i32>} : memref<288x128xf32, #tpu.memory_space<vmem>>, vector<288x128xf32>,
    %c0_80 = arith.constant 0 : index
    %c51 = arith.constant 51 : index
    %c0_81 = arith.constant 0 : index
    %69 = vector.load %arg1[%c0_80, %c51, %c0_81] : memref<1x352x128xbf16, #tpu.memory_space<vmem>>, vector<1x288x128xbf16>
    %70 = vector.shape_cast %69 : vector<1x288x128xbf16> to vector<288x128xbf16>
    %c8 = arith.constant 8 : index
    %c0_82 = arith.constant 0 : index
    %c0_83 = arith.constant 0 : index
    %71 = vector.load %arg2[%c8, %c0_82, %c0_83] : memref<9x128x128xbf16, #tpu.memory_space<vmem>>, vector<1x128x128xbf16>
    %72 = vector.shape_cast %71 : vector<1x128x128xbf16> to vector<128x128xbf16>
    %cst_84 = arith.constant dense<0.000000e+00> : vector<288x128xf32>
    %73 = tpu.matmul %70, %72, %cst_84 {dimension_numbers = #tpu.dot_dimension_numbers<[1], [0], [0], [1], [0, 0, 1, 1], [], []>} : vector<288x128xbf16>, vector<128x128xbf16>, vector<288x128xf32> -> vector<288x128xf32>
    %c0_85 = arith.constant 0 : index
    %c0_86 = arith.constant 0 : index
    %74 = vector.load %arg8[%c0_85, %c0_86] : memref<288x128xf32, #tpu.memory_space<vmem>>, vector<288x128xf32>
    %75 = arith.addf %74, %73 : vector<288x128xf32>
    %c0_87 = arith.constant 0 : index
    %c0_88 = arith.constant 0 : index
    %76 = vector.load %arg8[%c0_87, %c0_88] : memref<288x128xf32, #tpu.memory_space<vmem>>, vector<288x128xf32>
    tpu.vector_store %arg8[%c0_87, %c0_88], %75 {strides = array<i32>} : memref<288x128xf32, #tpu.memory_space<vmem>>, vector<288x128xf32>,
    %c0_89 = arith.constant 0 : index
    %c0_90 = arith.constant 0 : index
    %77 = vector.load %arg8[%c0_89, %c0_90] : memref<288x128xf32, #tpu.memory_space<vmem>>, vector<288x128xf32>
    %78 = vector.broadcast %0 : vector<1x128xf32> to vector<288x128xf32>
    %79 = arith.mulf %77, %78 : vector<288x128xf32>
    %80 = vector.broadcast %1 : vector<1x128xf32> to vector<288x128xf32>
    %81 = arith.addf %79, %80 : vector<288x128xf32>
    %cst_91 = arith.constant 0.000000e+00 : f32
    %82 = vector.broadcast %cst_91 : f32 to vector<288x128xf32>
    %83 = arith.maximumf %81, %82 : vector<288x128xf32>
    %84 = vector.broadcast %2 : vector<288x1xf32> to vector<288x128xf32>
    %85 = arith.mulf %83, %84 : vector<288x128xf32>
    %86 = arith.truncf %85 : vector<288x128xf32> to vector<288x128xbf16>
    %c32_92 = arith.constant 32 : index
    %c0_93 = arith.constant 0 : index
    %87 = vector.load %arg9[%c32_92, %c0_93] : memref<352x128xbf16, #tpu.memory_space<vmem>>, vector<288x128xbf16>
    tpu.vector_store %arg9[%c32_92, %c0_93], %86 {strides = array<i32>} : memref<352x128xbf16, #tpu.memory_space<vmem>>, vector<288x128xbf16>,
    %c13_94 = arith.constant 13 : index
    %c0_95 = arith.constant 0 : index
    %88 = vector.load %arg9[%c13_94, %c0_95] : memref<352x128xbf16, #tpu.memory_space<vmem>>, vector<288x128xbf16>
    %c0_96 = arith.constant 0 : index
    %c0_97 = arith.constant 0 : index
    %c0_98 = arith.constant 0 : index
    %89 = vector.load %arg3[%c0_96, %c0_97, %c0_98] : memref<9x128x128xbf16, #tpu.memory_space<vmem>>, vector<1x128x128xbf16>
    %90 = vector.shape_cast %89 : vector<1x128x128xbf16> to vector<128x128xbf16>
    %cst_99 = arith.constant dense<0.000000e+00> : vector<288x128xf32>
    %91 = tpu.matmul %88, %90, %cst_99 {dimension_numbers = #tpu.dot_dimension_numbers<[1], [0], [0], [1], [0, 0, 1, 1], [], []>} : vector<288x128xbf16>, vector<128x128xbf16>, vector<288x128xf32> -> vector<288x128xf32>
    %c0_100 = arith.constant 0 : index
    %c0_101 = arith.constant 0 : index
    %92 = vector.load %arg8[%c0_100, %c0_101] : memref<288x128xf32, #tpu.memory_space<vmem>>, vector<288x128xf32>
    tpu.vector_store %arg8[%c0_100, %c0_101], %91 {strides = array<i32>} : memref<288x128xf32, #tpu.memory_space<vmem>>, vector<288x128xf32>,
    %c14_102 = arith.constant 14 : index
    %c0_103 = arith.constant 0 : index
    %93 = vector.load %arg9[%c14_102, %c0_103] : memref<352x128xbf16, #tpu.memory_space<vmem>>, vector<288x128xbf16>
    %c1_104 = arith.constant 1 : index
    %c0_105 = arith.constant 0 : index
    %c0_106 = arith.constant 0 : index
    %94 = vector.load %arg3[%c1_104, %c0_105, %c0_106] : memref<9x128x128xbf16, #tpu.memory_space<vmem>>, vector<1x128x128xbf16>
    %95 = vector.shape_cast %94 : vector<1x128x128xbf16> to vector<128x128xbf16>
    %cst_107 = arith.constant dense<0.000000e+00> : vector<288x128xf32>
    %96 = tpu.matmul %93, %95, %cst_107 {dimension_numbers = #tpu.dot_dimension_numbers<[1], [0], [0], [1], [0, 0, 1, 1], [], []>} : vector<288x128xbf16>, vector<128x128xbf16>, vector<288x128xf32> -> vector<288x128xf32>
    %c0_108 = arith.constant 0 : index
    %c0_109 = arith.constant 0 : index
    %97 = vector.load %arg8[%c0_108, %c0_109] : memref<288x128xf32, #tpu.memory_space<vmem>>, vector<288x128xf32>
    %98 = arith.addf %97, %96 : vector<288x128xf32>
    %c0_110 = arith.constant 0 : index
    %c0_111 = arith.constant 0 : index
    %99 = vector.load %arg8[%c0_110, %c0_111] : memref<288x128xf32, #tpu.memory_space<vmem>>, vector<288x128xf32>
    tpu.vector_store %arg8[%c0_110, %c0_111], %98 {strides = array<i32>} : memref<288x128xf32, #tpu.memory_space<vmem>>, vector<288x128xf32>,
    %c15_112 = arith.constant 15 : index
    %c0_113 = arith.constant 0 : index
    %100 = vector.load %arg9[%c15_112, %c0_113] : memref<352x128xbf16, #tpu.memory_space<vmem>>, vector<288x128xbf16>
    %c2_114 = arith.constant 2 : index
    %c0_115 = arith.constant 0 : index
    %c0_116 = arith.constant 0 : index
    %101 = vector.load %arg3[%c2_114, %c0_115, %c0_116] : memref<9x128x128xbf16, #tpu.memory_space<vmem>>, vector<1x128x128xbf16>
    %102 = vector.shape_cast %101 : vector<1x128x128xbf16> to vector<128x128xbf16>
    %cst_117 = arith.constant dense<0.000000e+00> : vector<288x128xf32>
    %103 = tpu.matmul %100, %102, %cst_117 {dimension_numbers = #tpu.dot_dimension_numbers<[1], [0], [0], [1], [0, 0, 1, 1], [], []>} : vector<288x128xbf16>, vector<128x128xbf16>, vector<288x128xf32> -> vector<288x128xf32>
    %c0_118 = arith.constant 0 : index
    %c0_119 = arith.constant 0 : index
    %104 = vector.load %arg8[%c0_118, %c0_119] : memref<288x128xf32, #tpu.memory_space<vmem>>, vector<288x128xf32>
    %105 = arith.addf %104, %103 : vector<288x128xf32>
    %c0_120 = arith.constant 0 : index
    %c0_121 = arith.constant 0 : index
    %106 = vector.load %arg8[%c0_120, %c0_121] : memref<288x128xf32, #tpu.memory_space<vmem>>, vector<288x128xf32>
    tpu.vector_store %arg8[%c0_120, %c0_121], %105 {strides = array<i32>} : memref<288x128xf32, #tpu.memory_space<vmem>>, vector<288x128xf32>,
    %c31_122 = arith.constant 31 : index
    %c0_123 = arith.constant 0 : index
    %107 = vector.load %arg9[%c31_122, %c0_123] : memref<352x128xbf16, #tpu.memory_space<vmem>>, vector<288x128xbf16>
    %c3_124 = arith.constant 3 : index
    %c0_125 = arith.constant 0 : index
    %c0_126 = arith.constant 0 : index
    %108 = vector.load %arg3[%c3_124, %c0_125, %c0_126] : memref<9x128x128xbf16, #tpu.memory_space<vmem>>, vector<1x128x128xbf16>
    %109 = vector.shape_cast %108 : vector<1x128x128xbf16> to vector<128x128xbf16>
    %cst_127 = arith.constant dense<0.000000e+00> : vector<288x128xf32>
    %110 = tpu.matmul %107, %109, %cst_127 {dimension_numbers = #tpu.dot_dimension_numbers<[1], [0], [0], [1], [0, 0, 1, 1], [], []>} : vector<288x128xbf16>, vector<128x128xbf16>, vector<288x128xf32> -> vector<288x128xf32>
    %c0_128 = arith.constant 0 : index
    %c0_129 = arith.constant 0 : index
    %111 = vector.load %arg8[%c0_128, %c0_129] : memref<288x128xf32, #tpu.memory_space<vmem>>, vector<288x128xf32>
    %112 = arith.addf %111, %110 : vector<288x128xf32>
    %c0_130 = arith.constant 0 : index
    %c0_131 = arith.constant 0 : index
    %113 = vector.load %arg8[%c0_130, %c0_131] : memref<288x128xf32, #tpu.memory_space<vmem>>, vector<288x128xf32>
    tpu.vector_store %arg8[%c0_130, %c0_131], %112 {strides = array<i32>} : memref<288x128xf32, #tpu.memory_space<vmem>>, vector<288x128xf32>,
    %c32_132 = arith.constant 32 : index
    %c0_133 = arith.constant 0 : index
    %114 = vector.load %arg9[%c32_132, %c0_133] : memref<352x128xbf16, #tpu.memory_space<vmem>>, vector<288x128xbf16>
    %c4_134 = arith.constant 4 : index
    %c0_135 = arith.constant 0 : index
    %c0_136 = arith.constant 0 : index
    %115 = vector.load %arg3[%c4_134, %c0_135, %c0_136] : memref<9x128x128xbf16, #tpu.memory_space<vmem>>, vector<1x128x128xbf16>
    %116 = vector.shape_cast %115 : vector<1x128x128xbf16> to vector<128x128xbf16>
    %cst_137 = arith.constant dense<0.000000e+00> : vector<288x128xf32>
    %117 = tpu.matmul %114, %116, %cst_137 {dimension_numbers = #tpu.dot_dimension_numbers<[1], [0], [0], [1], [0, 0, 1, 1], [], []>} : vector<288x128xbf16>, vector<128x128xbf16>, vector<288x128xf32> -> vector<288x128xf32>
    %c0_138 = arith.constant 0 : index
    %c0_139 = arith.constant 0 : index
    %118 = vector.load %arg8[%c0_138, %c0_139] : memref<288x128xf32, #tpu.memory_space<vmem>>, vector<288x128xf32>
    %119 = arith.addf %118, %117 : vector<288x128xf32>
    %c0_140 = arith.constant 0 : index
    %c0_141 = arith.constant 0 : index
    %120 = vector.load %arg8[%c0_140, %c0_141] : memref<288x128xf32, #tpu.memory_space<vmem>>, vector<288x128xf32>
    tpu.vector_store %arg8[%c0_140, %c0_141], %119 {strides = array<i32>} : memref<288x128xf32, #tpu.memory_space<vmem>>, vector<288x128xf32>,
    %c33_142 = arith.constant 33 : index
    %c0_143 = arith.constant 0 : index
    %121 = vector.load %arg9[%c33_142, %c0_143] : memref<352x128xbf16, #tpu.memory_space<vmem>>, vector<288x128xbf16>
    %c5_144 = arith.constant 5 : index
    %c0_145 = arith.constant 0 : index
    %c0_146 = arith.constant 0 : index
    %122 = vector.load %arg3[%c5_144, %c0_145, %c0_146] : memref<9x128x128xbf16, #tpu.memory_space<vmem>>, vector<1x128x128xbf16>
    %123 = vector.shape_cast %122 : vector<1x128x128xbf16> to vector<128x128xbf16>
    %cst_147 = arith.constant dense<0.000000e+00> : vector<288x128xf32>
    %124 = tpu.matmul %121, %123, %cst_147 {dimension_numbers = #tpu.dot_dimension_numbers<[1], [0], [0], [1], [0, 0, 1, 1], [], []>} : vector<288x128xbf16>, vector<128x128xbf16>, vector<288x128xf32> -> vector<288x128xf32>
    %c0_148 = arith.constant 0 : index
    %c0_149 = arith.constant 0 : index
    %125 = vector.load %arg8[%c0_148, %c0_149] : memref<288x128xf32, #tpu.memory_space<vmem>>, vector<288x128xf32>
    %126 = arith.addf %125, %124 : vector<288x128xf32>
    %c0_150 = arith.constant 0 : index
    %c0_151 = arith.constant 0 : index
    %127 = vector.load %arg8[%c0_150, %c0_151] : memref<288x128xf32, #tpu.memory_space<vmem>>, vector<288x128xf32>
    tpu.vector_store %arg8[%c0_150, %c0_151], %126 {strides = array<i32>} : memref<288x128xf32, #tpu.memory_space<vmem>>, vector<288x128xf32>,
    %c49_152 = arith.constant 49 : index
    %c0_153 = arith.constant 0 : index
    %128 = vector.load %arg9[%c49_152, %c0_153] : memref<352x128xbf16, #tpu.memory_space<vmem>>, vector<288x128xbf16>
    %c6_154 = arith.constant 6 : index
    %c0_155 = arith.constant 0 : index
    %c0_156 = arith.constant 0 : index
    %129 = vector.load %arg3[%c6_154, %c0_155, %c0_156] : memref<9x128x128xbf16, #tpu.memory_space<vmem>>, vector<1x128x128xbf16>
    %130 = vector.shape_cast %129 : vector<1x128x128xbf16> to vector<128x128xbf16>
    %cst_157 = arith.constant dense<0.000000e+00> : vector<288x128xf32>
    %131 = tpu.matmul %128, %130, %cst_157 {dimension_numbers = #tpu.dot_dimension_numbers<[1], [0], [0], [1], [0, 0, 1, 1], [], []>} : vector<288x128xbf16>, vector<128x128xbf16>, vector<288x128xf32> -> vector<288x128xf32>
    %c0_158 = arith.constant 0 : index
    %c0_159 = arith.constant 0 : index
    %132 = vector.load %arg8[%c0_158, %c0_159] : memref<288x128xf32, #tpu.memory_space<vmem>>, vector<288x128xf32>
    %133 = arith.addf %132, %131 : vector<288x128xf32>
    %c0_160 = arith.constant 0 : index
    %c0_161 = arith.constant 0 : index
    %134 = vector.load %arg8[%c0_160, %c0_161] : memref<288x128xf32, #tpu.memory_space<vmem>>, vector<288x128xf32>
    tpu.vector_store %arg8[%c0_160, %c0_161], %133 {strides = array<i32>} : memref<288x128xf32, #tpu.memory_space<vmem>>, vector<288x128xf32>,
    %c50_162 = arith.constant 50 : index
    %c0_163 = arith.constant 0 : index
    %135 = vector.load %arg9[%c50_162, %c0_163] : memref<352x128xbf16, #tpu.memory_space<vmem>>, vector<288x128xbf16>
    %c7_164 = arith.constant 7 : index
    %c0_165 = arith.constant 0 : index
    %c0_166 = arith.constant 0 : index
    %136 = vector.load %arg3[%c7_164, %c0_165, %c0_166] : memref<9x128x128xbf16, #tpu.memory_space<vmem>>, vector<1x128x128xbf16>
    %137 = vector.shape_cast %136 : vector<1x128x128xbf16> to vector<128x128xbf16>
    %cst_167 = arith.constant dense<0.000000e+00> : vector<288x128xf32>
    %138 = tpu.matmul %135, %137, %cst_167 {dimension_numbers = #tpu.dot_dimension_numbers<[1], [0], [0], [1], [0, 0, 1, 1], [], []>} : vector<288x128xbf16>, vector<128x128xbf16>, vector<288x128xf32> -> vector<288x128xf32>
    %c0_168 = arith.constant 0 : index
    %c0_169 = arith.constant 0 : index
    %139 = vector.load %arg8[%c0_168, %c0_169] : memref<288x128xf32, #tpu.memory_space<vmem>>, vector<288x128xf32>
    %140 = arith.addf %139, %138 : vector<288x128xf32>
    %c0_170 = arith.constant 0 : index
    %c0_171 = arith.constant 0 : index
    %141 = vector.load %arg8[%c0_170, %c0_171] : memref<288x128xf32, #tpu.memory_space<vmem>>, vector<288x128xf32>
    tpu.vector_store %arg8[%c0_170, %c0_171], %140 {strides = array<i32>} : memref<288x128xf32, #tpu.memory_space<vmem>>, vector<288x128xf32>,
    %c51_172 = arith.constant 51 : index
    %c0_173 = arith.constant 0 : index
    %142 = vector.load %arg9[%c51_172, %c0_173] : memref<352x128xbf16, #tpu.memory_space<vmem>>, vector<288x128xbf16>
    %c8_174 = arith.constant 8 : index
    %c0_175 = arith.constant 0 : index
    %c0_176 = arith.constant 0 : index
    %143 = vector.load %arg3[%c8_174, %c0_175, %c0_176] : memref<9x128x128xbf16, #tpu.memory_space<vmem>>, vector<1x128x128xbf16>
    %144 = vector.shape_cast %143 : vector<1x128x128xbf16> to vector<128x128xbf16>
    %cst_177 = arith.constant dense<0.000000e+00> : vector<288x128xf32>
    %145 = tpu.matmul %142, %144, %cst_177 {dimension_numbers = #tpu.dot_dimension_numbers<[1], [0], [0], [1], [0, 0, 1, 1], [], []>} : vector<288x128xbf16>, vector<128x128xbf16>, vector<288x128xf32> -> vector<288x128xf32>
    %c0_178 = arith.constant 0 : index
    %c0_179 = arith.constant 0 : index
    %146 = vector.load %arg8[%c0_178, %c0_179] : memref<288x128xf32, #tpu.memory_space<vmem>>, vector<288x128xf32>
    %147 = arith.addf %146, %145 : vector<288x128xf32>
    %c0_180 = arith.constant 0 : index
    %c0_181 = arith.constant 0 : index
    %148 = vector.load %arg8[%c0_180, %c0_181] : memref<288x128xf32, #tpu.memory_space<vmem>>, vector<288x128xf32>
    tpu.vector_store %arg8[%c0_180, %c0_181], %147 {strides = array<i32>} : memref<288x128xf32, #tpu.memory_space<vmem>>, vector<288x128xf32>,
    %c0_182 = arith.constant 0 : index
    %c0_183 = arith.constant 0 : index
    %149 = vector.load %arg8[%c0_182, %c0_183] : memref<288x128xf32, #tpu.memory_space<vmem>>, vector<288x128xf32>
    %150 = vector.broadcast %0 : vector<1x128xf32> to vector<288x128xf32>
    %151 = arith.mulf %149, %150 : vector<288x128xf32>
    %152 = vector.broadcast %1 : vector<1x128xf32> to vector<288x128xf32>
    %153 = arith.addf %151, %152 : vector<288x128xf32>
    %c0_184 = arith.constant 0 : index
    %c32_185 = arith.constant 32 : index
    %c0_186 = arith.constant 0 : index
    %154 = vector.load %arg1[%c0_184, %c32_185, %c0_186] : memref<1x352x128xbf16, #tpu.memory_space<vmem>>, vector<1x288x128xbf16>
    %155 = vector.shape_cast %154 : vector<1x288x128xbf16> to vector<288x128xbf16>
    %156 = arith.extf %155 : vector<288x128xbf16> to vector<288x128xf32>
    %157 = arith.addf %153, %156 : vector<288x128xf32>
    %cst_187 = arith.constant 0.000000e+00 : f32
    %158 = vector.broadcast %cst_187 : f32 to vector<288x128xf32>
    %159 = arith.maximumf %157, %158 : vector<288x128xf32>
    %160 = vector.broadcast %2 : vector<288x1xf32> to vector<288x128xf32>
    %161 = arith.mulf %159, %160 : vector<288x128xf32>
    %162 = arith.truncf %161 : vector<288x128xf32> to vector<288x128xbf16>
    %c0_188 = arith.constant 0 : index
    %c32_189 = arith.constant 32 : index
    %c0_190 = arith.constant 0 : index
    %163 = vector.load %arg7[%c0_188, %c32_189, %c0_190] : memref<1x352x128xbf16, #tpu.memory_space<vmem>>, vector<1x288x128xbf16>
    %164 = vector.shape_cast %163 : vector<1x288x128xbf16> to vector<288x128xbf16>
    %165 = vector.shape_cast %162 : vector<288x128xbf16> to vector<1x288x128xbf16>
    tpu.vector_store %arg7[%c0_188, %c32_189, %c0_190], %165 {strides = array<i32>} : memref<1x352x128xbf16, #tpu.memory_space<vmem>>, vector<1x288x128xbf16>,
    %cst_191 = arith.constant 0.000000e+00 : bf16
    %166 = vector.broadcast %cst_191 : bf16 to vector<32x128xbf16>
    %c0_192 = arith.constant 0 : index
    %c0_193 = arith.constant 0 : index
    %c0_194 = arith.constant 0 : index
    %167 = vector.load %arg7[%c0_192, %c0_193, %c0_194] : memref<1x352x128xbf16, #tpu.memory_space<vmem>>, vector<1x32x128xbf16>
    %168 = vector.shape_cast %167 : vector<1x32x128xbf16> to vector<32x128xbf16>
    %169 = vector.shape_cast %166 : vector<32x128xbf16> to vector<1x32x128xbf16>
    tpu.vector_store %arg7[%c0_192, %c0_193, %c0_194], %169 {strides = array<i32>} : memref<1x352x128xbf16, #tpu.memory_space<vmem>>, vector<1x32x128xbf16>,
    %cst_195 = arith.constant 0.000000e+00 : bf16
    %170 = vector.broadcast %cst_195 : bf16 to vector<32x128xbf16>
    %c0_196 = arith.constant 0 : index
    %c320_197 = arith.constant 320 : index
    %c0_198 = arith.constant 0 : index
    %171 = vector.load %arg7[%c0_196, %c320_197, %c0_198] : memref<1x352x128xbf16, #tpu.memory_space<vmem>>, vector<1x32x128xbf16>
    %172 = vector.shape_cast %171 : vector<1x32x128xbf16> to vector<32x128xbf16>
    %173 = vector.shape_cast %170 : vector<32x128xbf16> to vector<1x32x128xbf16>
    tpu.vector_store %arg7[%c0_196, %c320_197, %c0_198], %173 {strides = array<i32>} : memref<1x352x128xbf16, #tpu.memory_space<vmem>>, vector<1x32x128xbf16>,
    return
  }
  func.func @transform_0(%arg0: i32) -> (i32, i32, i32) {
    %c0_i32 = arith.constant 0 : i32
    %c0_i32_0 = arith.constant 0 : i32
    %c0_i32_1 = arith.constant 0 : i32
    return %arg0, %c0_i32, %c0_i32_0 : i32, i32, i32
  }
  func.func @transform_1(%arg0: i32) -> (i32, i32, i32) {
    %c0_i32 = arith.constant 0 : i32
    %c0_i32_0 = arith.constant 0 : i32
    %c0_i32_1 = arith.constant 0 : i32
    %c0_i32_2 = arith.constant 0 : i32
    return %c0_i32, %c0_i32_0, %c0_i32_1 : i32, i32, i32
  }
  func.func @transform_2(%arg0: i32) -> (i32, i32, i32) {
    %c0_i32 = arith.constant 0 : i32
    %c0_i32_0 = arith.constant 0 : i32
    %c0_i32_1 = arith.constant 0 : i32
    %c0_i32_2 = arith.constant 0 : i32
    return %c0_i32, %c0_i32_0, %c0_i32_1 : i32, i32, i32
  }
  func.func @transform_3(%arg0: i32) -> (i32, i32) {
    %c0_i32 = arith.constant 0 : i32
    %c0_i32_0 = arith.constant 0 : i32
    %c0_i32_1 = arith.constant 0 : i32
    return %c0_i32, %c0_i32_0 : i32, i32
  }
  func.func @transform_4(%arg0: i32) -> (i32, i32) {
    %c0_i32 = arith.constant 0 : i32
    %c0_i32_0 = arith.constant 0 : i32
    %c0_i32_1 = arith.constant 0 : i32
    return %c0_i32, %c0_i32_0 : i32, i32
  }
  func.func @transform_5(%arg0: i32) -> (i32, i32) {
    %c0_i32 = arith.constant 0 : i32
    %c0_i32_0 = arith.constant 0 : i32
    %c0_i32_1 = arith.constant 0 : i32
    return %c0_i32, %c0_i32_0 : i32, i32
  }
  func.func @transform_6(%arg0: i32) -> (i32, i32, i32) {
    %c0_i32 = arith.constant 0 : i32
    %c0_i32_0 = arith.constant 0 : i32
    %c0_i32_1 = arith.constant 0 : i32
    return %arg0, %c0_i32, %c0_i32_0 : i32, i32, i32
  }
}

module attributes {stable_mosaic.version = 11 : i64} {
  func.func @_block_kernel(%arg0: i32, %arg1: memref<1x352x128xbf16, #tpu.memory_space<vmem>>, %arg2: memref<9x128x128xbf16, #tpu.memory_space<vmem>>, %arg3: memref<9x128x128xbf16, #tpu.memory_space<vmem>>, %arg4: memref<1x128xf32, #tpu.memory_space<vmem>>, %arg5: memref<1x128xf32, #tpu.memory_space<vmem>>, %arg6: memref<288x1xf32, #tpu.memory_space<vmem>>, %arg7: memref<128x128xbf16, #tpu.memory_space<vmem>>, %arg8: memref<1x128xf32, #tpu.memory_space<vmem>>, %arg9: memref<1x128xf32, #tpu.memory_space<vmem>>, %arg10: memref<1x352x128xbf16, #tpu.memory_space<vmem>>, %arg11: memref<288x128xf32, #tpu.memory_space<vmem>>, %arg12: memref<352x128xbf16, #tpu.memory_space<vmem>>) attributes {dimension_semantics = [#tpu.dimension_semantics<parallel>], iteration_bounds = array<i64: 2>, scalar_prefetch = 0 : i64, scratch_operands = 2 : i64, tpu.core_type = #tpu.core_type<tc>, window_params = [{transform_indices = @transform_0, window_bounds = array<i64: 1, 352, 128>}, {pipeline_mode = #tpu.pipeline_mode<synchronous>, transform_indices = @transform_1, window_bounds = array<i64: 9, 128, 128>}, {pipeline_mode = #tpu.pipeline_mode<synchronous>, transform_indices = @transform_2, window_bounds = array<i64: 9, 128, 128>}, {pipeline_mode = #tpu.pipeline_mode<synchronous>, transform_indices = @transform_3, window_bounds = array<i64: 1, 128>}, {pipeline_mode = #tpu.pipeline_mode<synchronous>, transform_indices = @transform_4, window_bounds = array<i64: 1, 128>}, {pipeline_mode = #tpu.pipeline_mode<synchronous>, transform_indices = @transform_5, window_bounds = array<i64: 288, 1>}, {pipeline_mode = #tpu.pipeline_mode<synchronous>, transform_indices = @transform_6, window_bounds = array<i64: 128, 128>}, {pipeline_mode = #tpu.pipeline_mode<synchronous>, transform_indices = @transform_7, window_bounds = array<i64: 1, 128>}, {pipeline_mode = #tpu.pipeline_mode<synchronous>, transform_indices = @transform_8, window_bounds = array<i64: 1, 128>}, {transform_indices = @transform_9, window_bounds = array<i64: 1, 352, 128>}]} {
    %c0 = arith.constant 0 : index
    %c0_0 = arith.constant 0 : index
    %0 = vector.load %arg4[%c0, %c0_0] : memref<1x128xf32, #tpu.memory_space<vmem>>, vector<1x128xf32>
    %c0_1 = arith.constant 0 : index
    %c0_2 = arith.constant 0 : index
    %1 = vector.load %arg5[%c0_1, %c0_2] : memref<1x128xf32, #tpu.memory_space<vmem>>, vector<1x128xf32>
    %c0_3 = arith.constant 0 : index
    %c0_4 = arith.constant 0 : index
    %2 = vector.load %arg6[%c0_3, %c0_4] : memref<288x1xf32, #tpu.memory_space<vmem>>, vector<288x1xf32>
    %cst = arith.constant 0.000000e+00 : bf16
    %3 = vector.broadcast %cst : bf16 to vector<32x128xbf16>
    %c0_5 = arith.constant 0 : index
    %c0_6 = arith.constant 0 : index
    %4 = vector.load %arg12[%c0_5, %c0_6] : memref<352x128xbf16, #tpu.memory_space<vmem>>, vector<32x128xbf16>
    tpu.vector_store %arg12[%c0_5, %c0_6], %3 {strides = array<i32>} : memref<352x128xbf16, #tpu.memory_space<vmem>>, vector<32x128xbf16>,
    %cst_7 = arith.constant 0.000000e+00 : bf16
    %5 = vector.broadcast %cst_7 : bf16 to vector<32x128xbf16>
    %c320 = arith.constant 320 : index
    %c0_8 = arith.constant 0 : index
    %6 = vector.load %arg12[%c320, %c0_8] : memref<352x128xbf16, #tpu.memory_space<vmem>>, vector<32x128xbf16>
    tpu.vector_store %arg12[%c320, %c0_8], %5 {strides = array<i32>} : memref<352x128xbf16, #tpu.memory_space<vmem>>, vector<32x128xbf16>,
    %c0_9 = arith.constant 0 : index
    %c13 = arith.constant 13 : index
    %c0_10 = arith.constant 0 : index
    %7 = vector.load %arg1[%c0_9, %c13, %c0_10] : memref<1x352x128xbf16, #tpu.memory_space<vmem>>, vector<1x288x128xbf16>
    %8 = vector.shape_cast %7 : vector<1x288x128xbf16> to vector<288x128xbf16>
    %c0_11 = arith.constant 0 : index
    %c0_12 = arith.constant 0 : index
    %c0_13 = arith.constant 0 : index
    %9 = vector.load %arg2[%c0_11, %c0_12, %c0_13] : memref<9x128x128xbf16, #tpu.memory_space<vmem>>, vector<1x128x128xbf16>
    %10 = vector.shape_cast %9 : vector<1x128x128xbf16> to vector<128x128xbf16>
    %cst_14 = arith.constant dense<0.000000e+00> : vector<288x128xf32>
    %11 = tpu.matmul %8, %10, %cst_14 {dimension_numbers = #tpu.dot_dimension_numbers<[1], [0], [0], [1], [0, 0, 1, 1], [], []>} : vector<288x128xbf16>, vector<128x128xbf16>, vector<288x128xf32> -> vector<288x128xf32>
    %c0_15 = arith.constant 0 : index
    %c0_16 = arith.constant 0 : index
    %12 = vector.load %arg11[%c0_15, %c0_16] : memref<288x128xf32, #tpu.memory_space<vmem>>, vector<288x128xf32>
    tpu.vector_store %arg11[%c0_15, %c0_16], %11 {strides = array<i32>} : memref<288x128xf32, #tpu.memory_space<vmem>>, vector<288x128xf32>,
    %c0_17 = arith.constant 0 : index
    %c14 = arith.constant 14 : index
    %c0_18 = arith.constant 0 : index
    %13 = vector.load %arg1[%c0_17, %c14, %c0_18] : memref<1x352x128xbf16, #tpu.memory_space<vmem>>, vector<1x288x128xbf16>
    %14 = vector.shape_cast %13 : vector<1x288x128xbf16> to vector<288x128xbf16>
    %c1 = arith.constant 1 : index
    %c0_19 = arith.constant 0 : index
    %c0_20 = arith.constant 0 : index
    %15 = vector.load %arg2[%c1, %c0_19, %c0_20] : memref<9x128x128xbf16, #tpu.memory_space<vmem>>, vector<1x128x128xbf16>
    %16 = vector.shape_cast %15 : vector<1x128x128xbf16> to vector<128x128xbf16>
    %cst_21 = arith.constant dense<0.000000e+00> : vector<288x128xf32>
    %17 = tpu.matmul %14, %16, %cst_21 {dimension_numbers = #tpu.dot_dimension_numbers<[1], [0], [0], [1], [0, 0, 1, 1], [], []>} : vector<288x128xbf16>, vector<128x128xbf16>, vector<288x128xf32> -> vector<288x128xf32>
    %c0_22 = arith.constant 0 : index
    %c0_23 = arith.constant 0 : index
    %18 = vector.load %arg11[%c0_22, %c0_23] : memref<288x128xf32, #tpu.memory_space<vmem>>, vector<288x128xf32>
    %19 = arith.addf %18, %17 : vector<288x128xf32>
    %c0_24 = arith.constant 0 : index
    %c0_25 = arith.constant 0 : index
    %20 = vector.load %arg11[%c0_24, %c0_25] : memref<288x128xf32, #tpu.memory_space<vmem>>, vector<288x128xf32>
    tpu.vector_store %arg11[%c0_24, %c0_25], %19 {strides = array<i32>} : memref<288x128xf32, #tpu.memory_space<vmem>>, vector<288x128xf32>,
    %c0_26 = arith.constant 0 : index
    %c15 = arith.constant 15 : index
    %c0_27 = arith.constant 0 : index
    %21 = vector.load %arg1[%c0_26, %c15, %c0_27] : memref<1x352x128xbf16, #tpu.memory_space<vmem>>, vector<1x288x128xbf16>
    %22 = vector.shape_cast %21 : vector<1x288x128xbf16> to vector<288x128xbf16>
    %c2 = arith.constant 2 : index
    %c0_28 = arith.constant 0 : index
    %c0_29 = arith.constant 0 : index
    %23 = vector.load %arg2[%c2, %c0_28, %c0_29] : memref<9x128x128xbf16, #tpu.memory_space<vmem>>, vector<1x128x128xbf16>
    %24 = vector.shape_cast %23 : vector<1x128x128xbf16> to vector<128x128xbf16>
    %cst_30 = arith.constant dense<0.000000e+00> : vector<288x128xf32>
    %25 = tpu.matmul %22, %24, %cst_30 {dimension_numbers = #tpu.dot_dimension_numbers<[1], [0], [0], [1], [0, 0, 1, 1], [], []>} : vector<288x128xbf16>, vector<128x128xbf16>, vector<288x128xf32> -> vector<288x128xf32>
    %c0_31 = arith.constant 0 : index
    %c0_32 = arith.constant 0 : index
    %26 = vector.load %arg11[%c0_31, %c0_32] : memref<288x128xf32, #tpu.memory_space<vmem>>, vector<288x128xf32>
    %27 = arith.addf %26, %25 : vector<288x128xf32>
    %c0_33 = arith.constant 0 : index
    %c0_34 = arith.constant 0 : index
    %28 = vector.load %arg11[%c0_33, %c0_34] : memref<288x128xf32, #tpu.memory_space<vmem>>, vector<288x128xf32>
    tpu.vector_store %arg11[%c0_33, %c0_34], %27 {strides = array<i32>} : memref<288x128xf32, #tpu.memory_space<vmem>>, vector<288x128xf32>,
    %c0_35 = arith.constant 0 : index
    %c31 = arith.constant 31 : index
    %c0_36 = arith.constant 0 : index
    %29 = vector.load %arg1[%c0_35, %c31, %c0_36] : memref<1x352x128xbf16, #tpu.memory_space<vmem>>, vector<1x288x128xbf16>
    %30 = vector.shape_cast %29 : vector<1x288x128xbf16> to vector<288x128xbf16>
    %c3 = arith.constant 3 : index
    %c0_37 = arith.constant 0 : index
    %c0_38 = arith.constant 0 : index
    %31 = vector.load %arg2[%c3, %c0_37, %c0_38] : memref<9x128x128xbf16, #tpu.memory_space<vmem>>, vector<1x128x128xbf16>
    %32 = vector.shape_cast %31 : vector<1x128x128xbf16> to vector<128x128xbf16>
    %cst_39 = arith.constant dense<0.000000e+00> : vector<288x128xf32>
    %33 = tpu.matmul %30, %32, %cst_39 {dimension_numbers = #tpu.dot_dimension_numbers<[1], [0], [0], [1], [0, 0, 1, 1], [], []>} : vector<288x128xbf16>, vector<128x128xbf16>, vector<288x128xf32> -> vector<288x128xf32>
    %c0_40 = arith.constant 0 : index
    %c0_41 = arith.constant 0 : index
    %34 = vector.load %arg11[%c0_40, %c0_41] : memref<288x128xf32, #tpu.memory_space<vmem>>, vector<288x128xf32>
    %35 = arith.addf %34, %33 : vector<288x128xf32>
    %c0_42 = arith.constant 0 : index
    %c0_43 = arith.constant 0 : index
    %36 = vector.load %arg11[%c0_42, %c0_43] : memref<288x128xf32, #tpu.memory_space<vmem>>, vector<288x128xf32>
    tpu.vector_store %arg11[%c0_42, %c0_43], %35 {strides = array<i32>} : memref<288x128xf32, #tpu.memory_space<vmem>>, vector<288x128xf32>,
    %c0_44 = arith.constant 0 : index
    %c32 = arith.constant 32 : index
    %c0_45 = arith.constant 0 : index
    %37 = vector.load %arg1[%c0_44, %c32, %c0_45] : memref<1x352x128xbf16, #tpu.memory_space<vmem>>, vector<1x288x128xbf16>
    %38 = vector.shape_cast %37 : vector<1x288x128xbf16> to vector<288x128xbf16>
    %c4 = arith.constant 4 : index
    %c0_46 = arith.constant 0 : index
    %c0_47 = arith.constant 0 : index
    %39 = vector.load %arg2[%c4, %c0_46, %c0_47] : memref<9x128x128xbf16, #tpu.memory_space<vmem>>, vector<1x128x128xbf16>
    %40 = vector.shape_cast %39 : vector<1x128x128xbf16> to vector<128x128xbf16>
    %cst_48 = arith.constant dense<0.000000e+00> : vector<288x128xf32>
    %41 = tpu.matmul %38, %40, %cst_48 {dimension_numbers = #tpu.dot_dimension_numbers<[1], [0], [0], [1], [0, 0, 1, 1], [], []>} : vector<288x128xbf16>, vector<128x128xbf16>, vector<288x128xf32> -> vector<288x128xf32>
    %c0_49 = arith.constant 0 : index
    %c0_50 = arith.constant 0 : index
    %42 = vector.load %arg11[%c0_49, %c0_50] : memref<288x128xf32, #tpu.memory_space<vmem>>, vector<288x128xf32>
    %43 = arith.addf %42, %41 : vector<288x128xf32>
    %c0_51 = arith.constant 0 : index
    %c0_52 = arith.constant 0 : index
    %44 = vector.load %arg11[%c0_51, %c0_52] : memref<288x128xf32, #tpu.memory_space<vmem>>, vector<288x128xf32>
    tpu.vector_store %arg11[%c0_51, %c0_52], %43 {strides = array<i32>} : memref<288x128xf32, #tpu.memory_space<vmem>>, vector<288x128xf32>,
    %c0_53 = arith.constant 0 : index
    %c33 = arith.constant 33 : index
    %c0_54 = arith.constant 0 : index
    %45 = vector.load %arg1[%c0_53, %c33, %c0_54] : memref<1x352x128xbf16, #tpu.memory_space<vmem>>, vector<1x288x128xbf16>
    %46 = vector.shape_cast %45 : vector<1x288x128xbf16> to vector<288x128xbf16>
    %c5 = arith.constant 5 : index
    %c0_55 = arith.constant 0 : index
    %c0_56 = arith.constant 0 : index
    %47 = vector.load %arg2[%c5, %c0_55, %c0_56] : memref<9x128x128xbf16, #tpu.memory_space<vmem>>, vector<1x128x128xbf16>
    %48 = vector.shape_cast %47 : vector<1x128x128xbf16> to vector<128x128xbf16>
    %cst_57 = arith.constant dense<0.000000e+00> : vector<288x128xf32>
    %49 = tpu.matmul %46, %48, %cst_57 {dimension_numbers = #tpu.dot_dimension_numbers<[1], [0], [0], [1], [0, 0, 1, 1], [], []>} : vector<288x128xbf16>, vector<128x128xbf16>, vector<288x128xf32> -> vector<288x128xf32>
    %c0_58 = arith.constant 0 : index
    %c0_59 = arith.constant 0 : index
    %50 = vector.load %arg11[%c0_58, %c0_59] : memref<288x128xf32, #tpu.memory_space<vmem>>, vector<288x128xf32>
    %51 = arith.addf %50, %49 : vector<288x128xf32>
    %c0_60 = arith.constant 0 : index
    %c0_61 = arith.constant 0 : index
    %52 = vector.load %arg11[%c0_60, %c0_61] : memref<288x128xf32, #tpu.memory_space<vmem>>, vector<288x128xf32>
    tpu.vector_store %arg11[%c0_60, %c0_61], %51 {strides = array<i32>} : memref<288x128xf32, #tpu.memory_space<vmem>>, vector<288x128xf32>,
    %c0_62 = arith.constant 0 : index
    %c49 = arith.constant 49 : index
    %c0_63 = arith.constant 0 : index
    %53 = vector.load %arg1[%c0_62, %c49, %c0_63] : memref<1x352x128xbf16, #tpu.memory_space<vmem>>, vector<1x288x128xbf16>
    %54 = vector.shape_cast %53 : vector<1x288x128xbf16> to vector<288x128xbf16>
    %c6 = arith.constant 6 : index
    %c0_64 = arith.constant 0 : index
    %c0_65 = arith.constant 0 : index
    %55 = vector.load %arg2[%c6, %c0_64, %c0_65] : memref<9x128x128xbf16, #tpu.memory_space<vmem>>, vector<1x128x128xbf16>
    %56 = vector.shape_cast %55 : vector<1x128x128xbf16> to vector<128x128xbf16>
    %cst_66 = arith.constant dense<0.000000e+00> : vector<288x128xf32>
    %57 = tpu.matmul %54, %56, %cst_66 {dimension_numbers = #tpu.dot_dimension_numbers<[1], [0], [0], [1], [0, 0, 1, 1], [], []>} : vector<288x128xbf16>, vector<128x128xbf16>, vector<288x128xf32> -> vector<288x128xf32>
    %c0_67 = arith.constant 0 : index
    %c0_68 = arith.constant 0 : index
    %58 = vector.load %arg11[%c0_67, %c0_68] : memref<288x128xf32, #tpu.memory_space<vmem>>, vector<288x128xf32>
    %59 = arith.addf %58, %57 : vector<288x128xf32>
    %c0_69 = arith.constant 0 : index
    %c0_70 = arith.constant 0 : index
    %60 = vector.load %arg11[%c0_69, %c0_70] : memref<288x128xf32, #tpu.memory_space<vmem>>, vector<288x128xf32>
    tpu.vector_store %arg11[%c0_69, %c0_70], %59 {strides = array<i32>} : memref<288x128xf32, #tpu.memory_space<vmem>>, vector<288x128xf32>,
    %c0_71 = arith.constant 0 : index
    %c50 = arith.constant 50 : index
    %c0_72 = arith.constant 0 : index
    %61 = vector.load %arg1[%c0_71, %c50, %c0_72] : memref<1x352x128xbf16, #tpu.memory_space<vmem>>, vector<1x288x128xbf16>
    %62 = vector.shape_cast %61 : vector<1x288x128xbf16> to vector<288x128xbf16>
    %c7 = arith.constant 7 : index
    %c0_73 = arith.constant 0 : index
    %c0_74 = arith.constant 0 : index
    %63 = vector.load %arg2[%c7, %c0_73, %c0_74] : memref<9x128x128xbf16, #tpu.memory_space<vmem>>, vector<1x128x128xbf16>
    %64 = vector.shape_cast %63 : vector<1x128x128xbf16> to vector<128x128xbf16>
    %cst_75 = arith.constant dense<0.000000e+00> : vector<288x128xf32>
    %65 = tpu.matmul %62, %64, %cst_75 {dimension_numbers = #tpu.dot_dimension_numbers<[1], [0], [0], [1], [0, 0, 1, 1], [], []>} : vector<288x128xbf16>, vector<128x128xbf16>, vector<288x128xf32> -> vector<288x128xf32>
    %c0_76 = arith.constant 0 : index
    %c0_77 = arith.constant 0 : index
    %66 = vector.load %arg11[%c0_76, %c0_77] : memref<288x128xf32, #tpu.memory_space<vmem>>, vector<288x128xf32>
    %67 = arith.addf %66, %65 : vector<288x128xf32>
    %c0_78 = arith.constant 0 : index
    %c0_79 = arith.constant 0 : index
    %68 = vector.load %arg11[%c0_78, %c0_79] : memref<288x128xf32, #tpu.memory_space<vmem>>, vector<288x128xf32>
    tpu.vector_store %arg11[%c0_78, %c0_79], %67 {strides = array<i32>} : memref<288x128xf32, #tpu.memory_space<vmem>>, vector<288x128xf32>,
    %c0_80 = arith.constant 0 : index
    %c51 = arith.constant 51 : index
    %c0_81 = arith.constant 0 : index
    %69 = vector.load %arg1[%c0_80, %c51, %c0_81] : memref<1x352x128xbf16, #tpu.memory_space<vmem>>, vector<1x288x128xbf16>
    %70 = vector.shape_cast %69 : vector<1x288x128xbf16> to vector<288x128xbf16>
    %c8 = arith.constant 8 : index
    %c0_82 = arith.constant 0 : index
    %c0_83 = arith.constant 0 : index
    %71 = vector.load %arg2[%c8, %c0_82, %c0_83] : memref<9x128x128xbf16, #tpu.memory_space<vmem>>, vector<1x128x128xbf16>
    %72 = vector.shape_cast %71 : vector<1x128x128xbf16> to vector<128x128xbf16>
    %cst_84 = arith.constant dense<0.000000e+00> : vector<288x128xf32>
    %73 = tpu.matmul %70, %72, %cst_84 {dimension_numbers = #tpu.dot_dimension_numbers<[1], [0], [0], [1], [0, 0, 1, 1], [], []>} : vector<288x128xbf16>, vector<128x128xbf16>, vector<288x128xf32> -> vector<288x128xf32>
    %c0_85 = arith.constant 0 : index
    %c0_86 = arith.constant 0 : index
    %74 = vector.load %arg11[%c0_85, %c0_86] : memref<288x128xf32, #tpu.memory_space<vmem>>, vector<288x128xf32>
    %75 = arith.addf %74, %73 : vector<288x128xf32>
    %c0_87 = arith.constant 0 : index
    %c0_88 = arith.constant 0 : index
    %76 = vector.load %arg11[%c0_87, %c0_88] : memref<288x128xf32, #tpu.memory_space<vmem>>, vector<288x128xf32>
    tpu.vector_store %arg11[%c0_87, %c0_88], %75 {strides = array<i32>} : memref<288x128xf32, #tpu.memory_space<vmem>>, vector<288x128xf32>,
    %c0_89 = arith.constant 0 : index
    %c0_90 = arith.constant 0 : index
    %77 = vector.load %arg11[%c0_89, %c0_90] : memref<288x128xf32, #tpu.memory_space<vmem>>, vector<288x128xf32>
    %78 = vector.broadcast %0 : vector<1x128xf32> to vector<288x128xf32>
    %79 = arith.mulf %77, %78 : vector<288x128xf32>
    %80 = vector.broadcast %1 : vector<1x128xf32> to vector<288x128xf32>
    %81 = arith.addf %79, %80 : vector<288x128xf32>
    %cst_91 = arith.constant 0.000000e+00 : f32
    %82 = vector.broadcast %cst_91 : f32 to vector<288x128xf32>
    %83 = arith.maximumf %81, %82 : vector<288x128xf32>
    %84 = vector.broadcast %2 : vector<288x1xf32> to vector<288x128xf32>
    %85 = arith.mulf %83, %84 : vector<288x128xf32>
    %86 = arith.truncf %85 : vector<288x128xf32> to vector<288x128xbf16>
    %c32_92 = arith.constant 32 : index
    %c0_93 = arith.constant 0 : index
    %87 = vector.load %arg12[%c32_92, %c0_93] : memref<352x128xbf16, #tpu.memory_space<vmem>>, vector<288x128xbf16>
    tpu.vector_store %arg12[%c32_92, %c0_93], %86 {strides = array<i32>} : memref<352x128xbf16, #tpu.memory_space<vmem>>, vector<288x128xbf16>,
    %c13_94 = arith.constant 13 : index
    %c0_95 = arith.constant 0 : index
    %88 = vector.load %arg12[%c13_94, %c0_95] : memref<352x128xbf16, #tpu.memory_space<vmem>>, vector<288x128xbf16>
    %c0_96 = arith.constant 0 : index
    %c0_97 = arith.constant 0 : index
    %c0_98 = arith.constant 0 : index
    %89 = vector.load %arg3[%c0_96, %c0_97, %c0_98] : memref<9x128x128xbf16, #tpu.memory_space<vmem>>, vector<1x128x128xbf16>
    %90 = vector.shape_cast %89 : vector<1x128x128xbf16> to vector<128x128xbf16>
    %cst_99 = arith.constant dense<0.000000e+00> : vector<288x128xf32>
    %91 = tpu.matmul %88, %90, %cst_99 {dimension_numbers = #tpu.dot_dimension_numbers<[1], [0], [0], [1], [0, 0, 1, 1], [], []>} : vector<288x128xbf16>, vector<128x128xbf16>, vector<288x128xf32> -> vector<288x128xf32>
    %c0_100 = arith.constant 0 : index
    %c0_101 = arith.constant 0 : index
    %92 = vector.load %arg11[%c0_100, %c0_101] : memref<288x128xf32, #tpu.memory_space<vmem>>, vector<288x128xf32>
    tpu.vector_store %arg11[%c0_100, %c0_101], %91 {strides = array<i32>} : memref<288x128xf32, #tpu.memory_space<vmem>>, vector<288x128xf32>,
    %c14_102 = arith.constant 14 : index
    %c0_103 = arith.constant 0 : index
    %93 = vector.load %arg12[%c14_102, %c0_103] : memref<352x128xbf16, #tpu.memory_space<vmem>>, vector<288x128xbf16>
    %c1_104 = arith.constant 1 : index
    %c0_105 = arith.constant 0 : index
    %c0_106 = arith.constant 0 : index
    %94 = vector.load %arg3[%c1_104, %c0_105, %c0_106] : memref<9x128x128xbf16, #tpu.memory_space<vmem>>, vector<1x128x128xbf16>
    %95 = vector.shape_cast %94 : vector<1x128x128xbf16> to vector<128x128xbf16>
    %cst_107 = arith.constant dense<0.000000e+00> : vector<288x128xf32>
    %96 = tpu.matmul %93, %95, %cst_107 {dimension_numbers = #tpu.dot_dimension_numbers<[1], [0], [0], [1], [0, 0, 1, 1], [], []>} : vector<288x128xbf16>, vector<128x128xbf16>, vector<288x128xf32> -> vector<288x128xf32>
    %c0_108 = arith.constant 0 : index
    %c0_109 = arith.constant 0 : index
    %97 = vector.load %arg11[%c0_108, %c0_109] : memref<288x128xf32, #tpu.memory_space<vmem>>, vector<288x128xf32>
    %98 = arith.addf %97, %96 : vector<288x128xf32>
    %c0_110 = arith.constant 0 : index
    %c0_111 = arith.constant 0 : index
    %99 = vector.load %arg11[%c0_110, %c0_111] : memref<288x128xf32, #tpu.memory_space<vmem>>, vector<288x128xf32>
    tpu.vector_store %arg11[%c0_110, %c0_111], %98 {strides = array<i32>} : memref<288x128xf32, #tpu.memory_space<vmem>>, vector<288x128xf32>,
    %c15_112 = arith.constant 15 : index
    %c0_113 = arith.constant 0 : index
    %100 = vector.load %arg12[%c15_112, %c0_113] : memref<352x128xbf16, #tpu.memory_space<vmem>>, vector<288x128xbf16>
    %c2_114 = arith.constant 2 : index
    %c0_115 = arith.constant 0 : index
    %c0_116 = arith.constant 0 : index
    %101 = vector.load %arg3[%c2_114, %c0_115, %c0_116] : memref<9x128x128xbf16, #tpu.memory_space<vmem>>, vector<1x128x128xbf16>
    %102 = vector.shape_cast %101 : vector<1x128x128xbf16> to vector<128x128xbf16>
    %cst_117 = arith.constant dense<0.000000e+00> : vector<288x128xf32>
    %103 = tpu.matmul %100, %102, %cst_117 {dimension_numbers = #tpu.dot_dimension_numbers<[1], [0], [0], [1], [0, 0, 1, 1], [], []>} : vector<288x128xbf16>, vector<128x128xbf16>, vector<288x128xf32> -> vector<288x128xf32>
    %c0_118 = arith.constant 0 : index
    %c0_119 = arith.constant 0 : index
    %104 = vector.load %arg11[%c0_118, %c0_119] : memref<288x128xf32, #tpu.memory_space<vmem>>, vector<288x128xf32>
    %105 = arith.addf %104, %103 : vector<288x128xf32>
    %c0_120 = arith.constant 0 : index
    %c0_121 = arith.constant 0 : index
    %106 = vector.load %arg11[%c0_120, %c0_121] : memref<288x128xf32, #tpu.memory_space<vmem>>, vector<288x128xf32>
    tpu.vector_store %arg11[%c0_120, %c0_121], %105 {strides = array<i32>} : memref<288x128xf32, #tpu.memory_space<vmem>>, vector<288x128xf32>,
    %c31_122 = arith.constant 31 : index
    %c0_123 = arith.constant 0 : index
    %107 = vector.load %arg12[%c31_122, %c0_123] : memref<352x128xbf16, #tpu.memory_space<vmem>>, vector<288x128xbf16>
    %c3_124 = arith.constant 3 : index
    %c0_125 = arith.constant 0 : index
    %c0_126 = arith.constant 0 : index
    %108 = vector.load %arg3[%c3_124, %c0_125, %c0_126] : memref<9x128x128xbf16, #tpu.memory_space<vmem>>, vector<1x128x128xbf16>
    %109 = vector.shape_cast %108 : vector<1x128x128xbf16> to vector<128x128xbf16>
    %cst_127 = arith.constant dense<0.000000e+00> : vector<288x128xf32>
    %110 = tpu.matmul %107, %109, %cst_127 {dimension_numbers = #tpu.dot_dimension_numbers<[1], [0], [0], [1], [0, 0, 1, 1], [], []>} : vector<288x128xbf16>, vector<128x128xbf16>, vector<288x128xf32> -> vector<288x128xf32>
    %c0_128 = arith.constant 0 : index
    %c0_129 = arith.constant 0 : index
    %111 = vector.load %arg11[%c0_128, %c0_129] : memref<288x128xf32, #tpu.memory_space<vmem>>, vector<288x128xf32>
    %112 = arith.addf %111, %110 : vector<288x128xf32>
    %c0_130 = arith.constant 0 : index
    %c0_131 = arith.constant 0 : index
    %113 = vector.load %arg11[%c0_130, %c0_131] : memref<288x128xf32, #tpu.memory_space<vmem>>, vector<288x128xf32>
    tpu.vector_store %arg11[%c0_130, %c0_131], %112 {strides = array<i32>} : memref<288x128xf32, #tpu.memory_space<vmem>>, vector<288x128xf32>,
    %c32_132 = arith.constant 32 : index
    %c0_133 = arith.constant 0 : index
    %114 = vector.load %arg12[%c32_132, %c0_133] : memref<352x128xbf16, #tpu.memory_space<vmem>>, vector<288x128xbf16>
    %c4_134 = arith.constant 4 : index
    %c0_135 = arith.constant 0 : index
    %c0_136 = arith.constant 0 : index
    %115 = vector.load %arg3[%c4_134, %c0_135, %c0_136] : memref<9x128x128xbf16, #tpu.memory_space<vmem>>, vector<1x128x128xbf16>
    %116 = vector.shape_cast %115 : vector<1x128x128xbf16> to vector<128x128xbf16>
    %cst_137 = arith.constant dense<0.000000e+00> : vector<288x128xf32>
    %117 = tpu.matmul %114, %116, %cst_137 {dimension_numbers = #tpu.dot_dimension_numbers<[1], [0], [0], [1], [0, 0, 1, 1], [], []>} : vector<288x128xbf16>, vector<128x128xbf16>, vector<288x128xf32> -> vector<288x128xf32>
    %c0_138 = arith.constant 0 : index
    %c0_139 = arith.constant 0 : index
    %118 = vector.load %arg11[%c0_138, %c0_139] : memref<288x128xf32, #tpu.memory_space<vmem>>, vector<288x128xf32>
    %119 = arith.addf %118, %117 : vector<288x128xf32>
    %c0_140 = arith.constant 0 : index
    %c0_141 = arith.constant 0 : index
    %120 = vector.load %arg11[%c0_140, %c0_141] : memref<288x128xf32, #tpu.memory_space<vmem>>, vector<288x128xf32>
    tpu.vector_store %arg11[%c0_140, %c0_141], %119 {strides = array<i32>} : memref<288x128xf32, #tpu.memory_space<vmem>>, vector<288x128xf32>,
    %c33_142 = arith.constant 33 : index
    %c0_143 = arith.constant 0 : index
    %121 = vector.load %arg12[%c33_142, %c0_143] : memref<352x128xbf16, #tpu.memory_space<vmem>>, vector<288x128xbf16>
    %c5_144 = arith.constant 5 : index
    %c0_145 = arith.constant 0 : index
    %c0_146 = arith.constant 0 : index
    %122 = vector.load %arg3[%c5_144, %c0_145, %c0_146] : memref<9x128x128xbf16, #tpu.memory_space<vmem>>, vector<1x128x128xbf16>
    %123 = vector.shape_cast %122 : vector<1x128x128xbf16> to vector<128x128xbf16>
    %cst_147 = arith.constant dense<0.000000e+00> : vector<288x128xf32>
    %124 = tpu.matmul %121, %123, %cst_147 {dimension_numbers = #tpu.dot_dimension_numbers<[1], [0], [0], [1], [0, 0, 1, 1], [], []>} : vector<288x128xbf16>, vector<128x128xbf16>, vector<288x128xf32> -> vector<288x128xf32>
    %c0_148 = arith.constant 0 : index
    %c0_149 = arith.constant 0 : index
    %125 = vector.load %arg11[%c0_148, %c0_149] : memref<288x128xf32, #tpu.memory_space<vmem>>, vector<288x128xf32>
    %126 = arith.addf %125, %124 : vector<288x128xf32>
    %c0_150 = arith.constant 0 : index
    %c0_151 = arith.constant 0 : index
    %127 = vector.load %arg11[%c0_150, %c0_151] : memref<288x128xf32, #tpu.memory_space<vmem>>, vector<288x128xf32>
    tpu.vector_store %arg11[%c0_150, %c0_151], %126 {strides = array<i32>} : memref<288x128xf32, #tpu.memory_space<vmem>>, vector<288x128xf32>,
    %c49_152 = arith.constant 49 : index
    %c0_153 = arith.constant 0 : index
    %128 = vector.load %arg12[%c49_152, %c0_153] : memref<352x128xbf16, #tpu.memory_space<vmem>>, vector<288x128xbf16>
    %c6_154 = arith.constant 6 : index
    %c0_155 = arith.constant 0 : index
    %c0_156 = arith.constant 0 : index
    %129 = vector.load %arg3[%c6_154, %c0_155, %c0_156] : memref<9x128x128xbf16, #tpu.memory_space<vmem>>, vector<1x128x128xbf16>
    %130 = vector.shape_cast %129 : vector<1x128x128xbf16> to vector<128x128xbf16>
    %cst_157 = arith.constant dense<0.000000e+00> : vector<288x128xf32>
    %131 = tpu.matmul %128, %130, %cst_157 {dimension_numbers = #tpu.dot_dimension_numbers<[1], [0], [0], [1], [0, 0, 1, 1], [], []>} : vector<288x128xbf16>, vector<128x128xbf16>, vector<288x128xf32> -> vector<288x128xf32>
    %c0_158 = arith.constant 0 : index
    %c0_159 = arith.constant 0 : index
    %132 = vector.load %arg11[%c0_158, %c0_159] : memref<288x128xf32, #tpu.memory_space<vmem>>, vector<288x128xf32>
    %133 = arith.addf %132, %131 : vector<288x128xf32>
    %c0_160 = arith.constant 0 : index
    %c0_161 = arith.constant 0 : index
    %134 = vector.load %arg11[%c0_160, %c0_161] : memref<288x128xf32, #tpu.memory_space<vmem>>, vector<288x128xf32>
    tpu.vector_store %arg11[%c0_160, %c0_161], %133 {strides = array<i32>} : memref<288x128xf32, #tpu.memory_space<vmem>>, vector<288x128xf32>,
    %c50_162 = arith.constant 50 : index
    %c0_163 = arith.constant 0 : index
    %135 = vector.load %arg12[%c50_162, %c0_163] : memref<352x128xbf16, #tpu.memory_space<vmem>>, vector<288x128xbf16>
    %c7_164 = arith.constant 7 : index
    %c0_165 = arith.constant 0 : index
    %c0_166 = arith.constant 0 : index
    %136 = vector.load %arg3[%c7_164, %c0_165, %c0_166] : memref<9x128x128xbf16, #tpu.memory_space<vmem>>, vector<1x128x128xbf16>
    %137 = vector.shape_cast %136 : vector<1x128x128xbf16> to vector<128x128xbf16>
    %cst_167 = arith.constant dense<0.000000e+00> : vector<288x128xf32>
    %138 = tpu.matmul %135, %137, %cst_167 {dimension_numbers = #tpu.dot_dimension_numbers<[1], [0], [0], [1], [0, 0, 1, 1], [], []>} : vector<288x128xbf16>, vector<128x128xbf16>, vector<288x128xf32> -> vector<288x128xf32>
    %c0_168 = arith.constant 0 : index
    %c0_169 = arith.constant 0 : index
    %139 = vector.load %arg11[%c0_168, %c0_169] : memref<288x128xf32, #tpu.memory_space<vmem>>, vector<288x128xf32>
    %140 = arith.addf %139, %138 : vector<288x128xf32>
    %c0_170 = arith.constant 0 : index
    %c0_171 = arith.constant 0 : index
    %141 = vector.load %arg11[%c0_170, %c0_171] : memref<288x128xf32, #tpu.memory_space<vmem>>, vector<288x128xf32>
    tpu.vector_store %arg11[%c0_170, %c0_171], %140 {strides = array<i32>} : memref<288x128xf32, #tpu.memory_space<vmem>>, vector<288x128xf32>,
    %c51_172 = arith.constant 51 : index
    %c0_173 = arith.constant 0 : index
    %142 = vector.load %arg12[%c51_172, %c0_173] : memref<352x128xbf16, #tpu.memory_space<vmem>>, vector<288x128xbf16>
    %c8_174 = arith.constant 8 : index
    %c0_175 = arith.constant 0 : index
    %c0_176 = arith.constant 0 : index
    %143 = vector.load %arg3[%c8_174, %c0_175, %c0_176] : memref<9x128x128xbf16, #tpu.memory_space<vmem>>, vector<1x128x128xbf16>
    %144 = vector.shape_cast %143 : vector<1x128x128xbf16> to vector<128x128xbf16>
    %cst_177 = arith.constant dense<0.000000e+00> : vector<288x128xf32>
    %145 = tpu.matmul %142, %144, %cst_177 {dimension_numbers = #tpu.dot_dimension_numbers<[1], [0], [0], [1], [0, 0, 1, 1], [], []>} : vector<288x128xbf16>, vector<128x128xbf16>, vector<288x128xf32> -> vector<288x128xf32>
    %c0_178 = arith.constant 0 : index
    %c0_179 = arith.constant 0 : index
    %146 = vector.load %arg11[%c0_178, %c0_179] : memref<288x128xf32, #tpu.memory_space<vmem>>, vector<288x128xf32>
    %147 = arith.addf %146, %145 : vector<288x128xf32>
    %c0_180 = arith.constant 0 : index
    %c0_181 = arith.constant 0 : index
    %148 = vector.load %arg11[%c0_180, %c0_181] : memref<288x128xf32, #tpu.memory_space<vmem>>, vector<288x128xf32>
    tpu.vector_store %arg11[%c0_180, %c0_181], %147 {strides = array<i32>} : memref<288x128xf32, #tpu.memory_space<vmem>>, vector<288x128xf32>,
    %c0_182 = arith.constant 0 : index
    %c0_183 = arith.constant 0 : index
    %149 = vector.load %arg11[%c0_182, %c0_183] : memref<288x128xf32, #tpu.memory_space<vmem>>, vector<288x128xf32>
    %150 = vector.broadcast %0 : vector<1x128xf32> to vector<288x128xf32>
    %151 = arith.mulf %149, %150 : vector<288x128xf32>
    %152 = vector.broadcast %1 : vector<1x128xf32> to vector<288x128xf32>
    %153 = arith.addf %151, %152 : vector<288x128xf32>
    %c0_184 = arith.constant 0 : index
    %c32_185 = arith.constant 32 : index
    %c0_186 = arith.constant 0 : index
    %154 = vector.load %arg1[%c0_184, %c32_185, %c0_186] : memref<1x352x128xbf16, #tpu.memory_space<vmem>>, vector<1x288x128xbf16>
    %155 = vector.shape_cast %154 : vector<1x288x128xbf16> to vector<288x128xbf16>
    %c0_187 = arith.constant 0 : index
    %c0_188 = arith.constant 0 : index
    %156 = vector.load %arg7[%c0_187, %c0_188] : memref<128x128xbf16, #tpu.memory_space<vmem>>, vector<128x128xbf16>
    %cst_189 = arith.constant dense<0.000000e+00> : vector<288x128xf32>
    %157 = tpu.matmul %155, %156, %cst_189 {dimension_numbers = #tpu.dot_dimension_numbers<[1], [0], [0], [1], [0, 0, 1, 1], [], []>} : vector<288x128xbf16>, vector<128x128xbf16>, vector<288x128xf32> -> vector<288x128xf32>
    %c0_190 = arith.constant 0 : index
    %c0_191 = arith.constant 0 : index
    %158 = vector.load %arg8[%c0_190, %c0_191] : memref<1x128xf32, #tpu.memory_space<vmem>>, vector<1x128xf32>
    %159 = vector.broadcast %158 : vector<1x128xf32> to vector<288x128xf32>
    %160 = arith.mulf %157, %159 : vector<288x128xf32>
    %c0_192 = arith.constant 0 : index
    %c0_193 = arith.constant 0 : index
    %161 = vector.load %arg9[%c0_192, %c0_193] : memref<1x128xf32, #tpu.memory_space<vmem>>, vector<1x128xf32>
    %162 = vector.broadcast %161 : vector<1x128xf32> to vector<288x128xf32>
    %163 = arith.addf %160, %162 : vector<288x128xf32>
    %164 = arith.addf %153, %163 : vector<288x128xf32>
    %cst_194 = arith.constant 0.000000e+00 : f32
    %165 = vector.broadcast %cst_194 : f32 to vector<288x128xf32>
    %166 = arith.maximumf %164, %165 : vector<288x128xf32>
    %167 = vector.broadcast %2 : vector<288x1xf32> to vector<288x128xf32>
    %168 = arith.mulf %166, %167 : vector<288x128xf32>
    %169 = arith.truncf %168 : vector<288x128xf32> to vector<288x128xbf16>
    %c0_195 = arith.constant 0 : index
    %c32_196 = arith.constant 32 : index
    %c0_197 = arith.constant 0 : index
    %170 = vector.load %arg10[%c0_195, %c32_196, %c0_197] : memref<1x352x128xbf16, #tpu.memory_space<vmem>>, vector<1x288x128xbf16>
    %171 = vector.shape_cast %170 : vector<1x288x128xbf16> to vector<288x128xbf16>
    %172 = vector.shape_cast %169 : vector<288x128xbf16> to vector<1x288x128xbf16>
    tpu.vector_store %arg10[%c0_195, %c32_196, %c0_197], %172 {strides = array<i32>} : memref<1x352x128xbf16, #tpu.memory_space<vmem>>, vector<1x288x128xbf16>,
    %cst_198 = arith.constant 0.000000e+00 : bf16
    %173 = vector.broadcast %cst_198 : bf16 to vector<32x128xbf16>
    %c0_199 = arith.constant 0 : index
    %c0_200 = arith.constant 0 : index
    %c0_201 = arith.constant 0 : index
    %174 = vector.load %arg10[%c0_199, %c0_200, %c0_201] : memref<1x352x128xbf16, #tpu.memory_space<vmem>>, vector<1x32x128xbf16>
    %175 = vector.shape_cast %174 : vector<1x32x128xbf16> to vector<32x128xbf16>
    %176 = vector.shape_cast %173 : vector<32x128xbf16> to vector<1x32x128xbf16>
    tpu.vector_store %arg10[%c0_199, %c0_200, %c0_201], %176 {strides = array<i32>} : memref<1x352x128xbf16, #tpu.memory_space<vmem>>, vector<1x32x128xbf16>,
    %cst_202 = arith.constant 0.000000e+00 : bf16
    %177 = vector.broadcast %cst_202 : bf16 to vector<32x128xbf16>
    %c0_203 = arith.constant 0 : index
    %c320_204 = arith.constant 320 : index
    %c0_205 = arith.constant 0 : index
    %178 = vector.load %arg10[%c0_203, %c320_204, %c0_205] : memref<1x352x128xbf16, #tpu.memory_space<vmem>>, vector<1x32x128xbf16>
    %179 = vector.shape_cast %178 : vector<1x32x128xbf16> to vector<32x128xbf16>
    %180 = vector.shape_cast %177 : vector<32x128xbf16> to vector<1x32x128xbf16>
    tpu.vector_store %arg10[%c0_203, %c320_204, %c0_205], %180 {strides = array<i32>} : memref<1x352x128xbf16, #tpu.memory_space<vmem>>, vector<1x32x128xbf16>,
    return
  }
  func.func @transform_0(%arg0: i32) -> (i32, i32, i32) {
    %c0_i32 = arith.constant 0 : i32
    %c0_i32_0 = arith.constant 0 : i32
    %c0_i32_1 = arith.constant 0 : i32
    return %arg0, %c0_i32, %c0_i32_0 : i32, i32, i32
  }
  func.func @transform_1(%arg0: i32) -> (i32, i32, i32) {
    %c0_i32 = arith.constant 0 : i32
    %c0_i32_0 = arith.constant 0 : i32
    %c0_i32_1 = arith.constant 0 : i32
    %c0_i32_2 = arith.constant 0 : i32
    return %c0_i32, %c0_i32_0, %c0_i32_1 : i32, i32, i32
  }
  func.func @transform_2(%arg0: i32) -> (i32, i32, i32) {
    %c0_i32 = arith.constant 0 : i32
    %c0_i32_0 = arith.constant 0 : i32
    %c0_i32_1 = arith.constant 0 : i32
    %c0_i32_2 = arith.constant 0 : i32
    return %c0_i32, %c0_i32_0, %c0_i32_1 : i32, i32, i32
  }
  func.func @transform_3(%arg0: i32) -> (i32, i32) {
    %c0_i32 = arith.constant 0 : i32
    %c0_i32_0 = arith.constant 0 : i32
    %c0_i32_1 = arith.constant 0 : i32
    return %c0_i32, %c0_i32_0 : i32, i32
  }
  func.func @transform_4(%arg0: i32) -> (i32, i32) {
    %c0_i32 = arith.constant 0 : i32
    %c0_i32_0 = arith.constant 0 : i32
    %c0_i32_1 = arith.constant 0 : i32
    return %c0_i32, %c0_i32_0 : i32, i32
  }
  func.func @transform_5(%arg0: i32) -> (i32, i32) {
    %c0_i32 = arith.constant 0 : i32
    %c0_i32_0 = arith.constant 0 : i32
    %c0_i32_1 = arith.constant 0 : i32
    return %c0_i32, %c0_i32_0 : i32, i32
  }
  func.func @transform_6(%arg0: i32) -> (i32, i32) {
    %c0_i32 = arith.constant 0 : i32
    %c0_i32_0 = arith.constant 0 : i32
    %c0_i32_1 = arith.constant 0 : i32
    return %c0_i32, %c0_i32_0 : i32, i32
  }
  func.func @transform_7(%arg0: i32) -> (i32, i32) {
    %c0_i32 = arith.constant 0 : i32
    %c0_i32_0 = arith.constant 0 : i32
    %c0_i32_1 = arith.constant 0 : i32
    return %c0_i32, %c0_i32_0 : i32, i32
  }
  func.func @transform_8(%arg0: i32) -> (i32, i32) {
    %c0_i32 = arith.constant 0 : i32
    %c0_i32_0 = arith.constant 0 : i32
    %c0_i32_1 = arith.constant 0 : i32
    return %c0_i32, %c0_i32_0 : i32, i32
  }
  func.func @transform_9(%arg0: i32) -> (i32, i32, i32) {
    %c0_i32 = arith.constant 0 : i32
    %c0_i32_0 = arith.constant 0 : i32
    %c0_i32_1 = arith.constant 0 : i32
    return %arg0, %c0_i32, %c0_i32_0 : i32, i32, i32
  }
}

</mosaic_0001>

<bundles_post_ra>
// kernel: run_chain.2
= control target key start
LH: loop header
LB: loop body
LE: loop exit
PB: predicated region body
PF: predicated region fallthrough
CT: control target
= control target key end

     0   :  { %s14339_s21 = smov 0   ;;  %s16687_s0 = inlined_call_operand.vmem [shape: bf16[2,352,128], index: 0, kind: input, shape index: {}]   ;;  %s16688_s1 = inlined_call_operand.vmem [shape: bf16[9,128,128], index: 1, kind: input, shape index: {}]   ;;  %s16689_s2 = inlined_call_operand.vmem [shape: bf16[9,128,128], index: 2, kind: input, shape index: {}]   ;;  %s16690_s3 = inlined_call_operand.vmem [shape: f32[1,128], index: 3, kind: input, shape index: {}]   ;;  %s16691_s4 = inlined_call_operand.vmem [shape: f32[1,128], index: 4, kind: input, shape index: {}]   ;;  %s16692_s5 = inlined_call_operand.vmem [shape: f32[288,1], index: 5, kind: input, shape index: {}]   ;;  %s16693_s6 = inlined_call_operand.vmem [shape: bf16[2,352,128], index: 6, kind: output, shape index: {}]  }
   0x1 LB: > { %s11133_s22 = sadd.s32 4294967295, %s14301_s21   ;;  %p11137_p0 = scmp.ge.s32.totalorder %s14301_s21, 1  ;;  %s14301_s21 = sphi %s14339_s21, %s16_s21  }
   0x2   : > { %p212_p1 = scmp.lt.s32.totalorder %s14301_s21, 3 }
   0x4   : > { %p213_p2 = pnand %p11137_p0, %p212_p1 }
   0x6   : > { %216 = sbr.rel (%p213_p2) target bundleno = 1732 (0x6c4), region = 44 }
   0xd   : > { %v13976_v0 = vld [vmem:[%s16688_s1] sm:$0xff]   ;;  %p242_p3 = scmp.lt.s32.totalorder %s11133_s22, 1  ;;  %v13977_v1 = vld [vmem:[%s16688_s1 + $0x8] sm:$0xff]   ;;  %v13978_v2 = vld [vmem:[%s16688_s1 + $0x10] sm:$0xff]   ;;  %vm441_vm0 = vsmask.f32 5376 }
   0xe   : > { %12452 = vmatprep.subr.bf16.mxu0 %v13976_v0  ;;  %v13979_v3 = vld [vmem:[%s16688_s1 + $0x18] sm:$0xff]   ;;  %v13980_v6 = vld [vmem:[%s16688_s1 + $0x20] sm:$0xff]   ;;  %v13981_v18 = vld [vmem:[%s16688_s1 + $0x28] sm:$0xff]   ;;  %vm1038_vm1 = vcmask 1044480   ;;  %vm1574_vm2 = vsmask.f32 4352 }
   0xf   : > { %s17078_s22 = smov (!%p242_p3, %s11133_s22), 1  ;;  %12453 = vmatpush3.bf16.msra.mxu0 %v13976_v0  ;;  %v13982_v21 = vld [vmem:[%s16688_s1 + $0x30] sm:$0xff]   ;;  %v13983_v29 = vld [vmem:[%s16688_s1 + $0x38] sm:$0xff]   ;;  %v13987_v34 = vld [vmem:[%s16688_s1 + $0x40] sm:$0xff]   ;;  %vm3405_vm3 = vsmask.f32 7424 }
  0x10   : > { %12454 = vmatprep.subr.bf16.mxu0 %v13977_v1  ;;  %s13964_s29 = smul.u32 176, %s17078_s22  ;;  %v13990_v45 = vld [vmem:[%s16688_s1 + $0x48] sm:$0xff]   ;;  %v13993_v52 = vld [vmem:[%s16688_s1 + $0x50] sm:$0xff]   ;;  %v13996_v0 = vld [vmem:[%s16688_s1 + $0x58] sm:$0xff]   ;;  %vm4698_vm4 = vcmask 1046528   ;;  %vm6704_vm7 = vcmask 1040384  }
  0x11   : > { %vm5234_vm5 = vsmask.f32 6400  ;;  %vm6199_vm6 = vsmask.f32 1280  ;;  %vm7129_vm8 = vsmask.f32 256 }
  0x12   : > { %s14364_s8 = scalar_lea.vmem %s16687_s0, %s13964_s29  ;;  %s14868_s15 = scalar_lea.vmem %s16693_s6, %s13964_s29 }
  0x13   : > { %12455 = vmatpush3.bf16.msra.mxu0 %v13977_v1  ;;  %v13984_v4 = vld [vmem:[%s14364_s8 + $0x4] sm:$0xfc]   ;;  %v13985_v5 = vld [vmem:[%s14364_s8 + $0xc] sm:$0xff]   ;;  %v13986_v15 = vld [vmem:[%s14364_s8 + $0x14] sm:$0xff]  }
  0x14   : > { %12456 = vmatprep.subr.bf16.mxu0 %v13978_v2  ;;  %v443_v7 = vshrl.u32 %v13984_v4, 16  ;;  %v446_v8 = vshll.u32 %v13984_v4, 16  ;;  %v451_v9 = vshrl.u32 %v13985_v5, 16  ;;  %v454_v10 = vshll.u32 %v13985_v5, 16  ;;  %v13988_v19 = vld [vmem:[%s14364_s8 + $0x1c] sm:$0xff]   ;;  %v13989_v26 = vld [vmem:[%s14364_s8 + $0x24] sm:$0xff]  }
  0x15   : > { %v460_v22 = vshrl.u32 %v13986_v15, 16  ;;  %v463_v23 = vshll.u32 %v13986_v15, 16  ;;  %v469_v24 = vshrl.u32 %v13988_v19, 16  ;;  %v472_v25 = vshll.u32 %v13988_v19, 16  ;;  %v13991_v32 = vld [vmem:[%s14364_s8 + $0x2c] sm:$0xff]   ;;  %v13992_v43 = vld [vmem:[%s14364_s8 + $0x34] sm:$0xff]  }
  0x16   : > { %v445_v11 = vrot.slane %v443_v7, 2  ;;  %v448_v12 = vrot.slane %v446_v8, 3  ;;  %v453_v13 = vrot.slane %v451_v9, 2  ;;  %v456_v14 = vrot.slane %v454_v10, 3  ;;  %v13994_v48 = vld [vmem:[%s14364_s8 + $0x3c] sm:$0xff]   ;;  %v13995_v56 = vld [vmem:[%s14364_s8 + $0x44] sm:$0xff]  }
  0x17   : > { %12457 = vmatpush3.bf16.msra.mxu0 %v13978_v2  ;;  %v462_v27 = vrot.slane %v460_v22, 2  ;;  %v465_v28 = vrot.slane %v463_v23, 3  ;;  %v471_v30 = vrot.slane %v469_v24, 2  ;;  %v474_v31 = vrot.slane %v472_v25, 3  ;;  %v13997_v57 = vld [vmem:[%s14364_s8 + $0x4c] sm:$0xff]   ;;  %v13999_v7 = vld [vmem:[%s16688_s1 + $0x60] sm:$0xff]  }
  0x18   : > { %12458 = vmatprep.subr.bf16.mxu0 %v13979_v3  ;;  %v449_v16 = vor.u32 %v448_v12, %v445_v11  ;;  %v457_v17 = vor.u32 %v456_v14, %v453_v13  ;;  %v478_v35 = vshrl.u32 %v13989_v26, 16  ;;  %v481_v36 = vshll.u32 %v13989_v26, 16  ;;  %v13998_v10 = vld [vmem:[%s14364_s8 + $0x54] sm:$0xff]   ;;  %v14000_v14 = vld [vmem:[%s14364_s8 + $0x5c] sm:$0xff]   ;;  %v14002_v15 = vld [vmem:[%s16688_s1 + $0x68] sm:$0xff]  }
  0x19   : > { %v466_v33 = vor.u32 %v465_v28, %v462_v27  ;;  %v475_v37 = vor.u32 %v474_v31, %v471_v30  ;;  %v487_v38 = vshrl.u32 %v13991_v32, 16  ;;  %v490_v39 = vshll.u32 %v13991_v32, 16  ;;  %v14005_v23 = vld [vmem:[%s16688_s1 + $0x70] sm:$0xff]   ;;  %v14001_v24 = vld [vmem:[%s14364_s8 + $0x64] sm:$0xff]   ;;  %v14009_v32 = vld [vmem:[%s16688_s1 + $0x78] sm:$0xff]  }
  0x1a   : > { %v458_v20 = vsel %vm441_vm0, %v449_v16, %v457_v17  ;;  %v480_v41 = vrot.slane %v478_v35, 2  ;;  %v483_v42 = vrot.slane %v481_v36, 3  ;;  %v496_v50 = vshrl.u32 %v13992_v43, 16 }
  0x1b   : > { %12459 = vmatpush3.bf16.msra.mxu0 %v13979_v3  ;;  %12468 = vmatprep.mubr.bf16.mxu0 %v458_v20  ;;  %v467_v40 = vsel %vm441_vm0, %v457_v17, %v466_v33  ;;  %v476_v44 = vsel %vm441_vm0, %v466_v33, %v475_v37  ;;  %v489_v46 = vrot.slane %v487_v38, 2  ;;  %v492_v47 = vrot.slane %v490_v39, 3  ;;  %v14431_v39 = vld [vmem:[%s16688_s1 + $0x80] sm:$0xff]  }
  0x1c   : > { %12460 = vmatprep.subr.bf16.mxu0 %v13980_v6  ;;  %v484_v49 = vor.u32 %v483_v42, %v480_v41  ;;  %v499_v51 = vshll.u32 %v13992_v43, 16  ;;  %v505_v54 = vshrl.u32 %v13994_v48, 16  ;;  %v508_v55 = vshll.u32 %v13994_v48, 16  ;;  %v14004_v41 = vld [vmem:[%s14364_s8 + $0x74] sm:$0xff]  }
  0x1d   : > { %v493_v53 = vor.u32 %v492_v47, %v489_v46  ;;  %v498_v59 = vrot.slane %v496_v50, 2  ;;  %v514_v1 = vshrl.u32 %v13995_v56, 16  ;;  %v517_v2 = vshll.u32 %v13995_v56, 16  ;;  %v14006_v47 = vld [vmem:[%s14364_s8 + $0x7c] sm:$0xff]   ;;  %v14007_v56 = vld [vmem:[%s14364_s8 + $0x84] sm:$0xff]  }
  0x1e   : > { %v485_v58 = vsel %vm441_vm0, %v475_v37, %v484_v49  ;;  %v501_v60 = vrot.slane %v499_v51, 3  ;;  %v507_v62 = vrot.slane %v505_v54, 2  ;;  %v510_v63 = vrot.slane %v508_v55, 3 }
  0x1f   : > { %12461 = vmatpush3.bf16.msra.mxu0 %v13980_v6  ;;  %v494_v61 = vsel %vm441_vm0, %v484_v49, %v493_v53  ;;  %v523_v3 = vshrl.u32 %v13997_v57, 16  ;;  %v526_v4 = vshll.u32 %v13997_v57, 16  ;;  %v516_v8 = vrot.slane %v514_v1, 2 }
  0x20   : > { %12462 = vmatprep.subr.bf16.mxu0 %v13981_v18  ;;  %v502_v5 = vor.u32 %v501_v60, %v498_v59  ;;  %v511_v6 = vor.u32 %v510_v63, %v507_v62  ;;  %v519_v9 = vrot.slane %v517_v2, 3  ;;  %v532_v17 = vshrl.u32 %v13998_v10, 16 }
  0x21   : > { %v525_v12 = vrot.slane %v523_v3, 2  ;;  %v528_v13 = vrot.slane %v526_v4, 3  ;;  %v541_v20 = vshrl.u32 %v14000_v14, 16  ;;  %v544_v22 = vshll.u32 %v14000_v14, 16 }
  0x22   : > { %v503_v11 = vsel %vm441_vm0, %v493_v53, %v502_v5  ;;  %v512_v16 = vsel %vm441_vm0, %v502_v5, %v511_v6  ;;  %v520_v19 = vor.u32 %v519_v9, %v516_v8  ;;  %v534_v25 = vrot.slane %v532_v17, 2  ;;  %v14010_v4 = vld [vmem:[%s14364_s8 + $0x94] ss:$0 sps:$4 sm:$0x77]  }
  0x23   : > { %12463 = vmatpush3.bf16.msra.mxu0 %v13981_v18  ;;  %v535_v18 = vshll.u32 %v13998_v10, 16  ;;  %v543_v28 = vrot.slane %v541_v20, 2  ;;  %v546_v31 = vrot.slane %v544_v22, 3  ;;  %v550_v33 = vshrl.u32 %v14001_v24, 16  ;;  %v14011_v20 = vld [vmem:[%s14364_s8 + $0x4] sm:$0xf8]  }
  0x24   : > { %12464 = vmatprep.subr.bf16.mxu0 %v13982_v21  ;;  %v521_v27 = vsel %vm441_vm0, %v511_v6, %v520_v19  ;;  %v553_v35 = vshll.u32 %v14001_v24, 16  ;;  %v568_v48 = vshrl.u32 %v14004_v41, 16  ;;  %v571_v49 = vshll.u32 %v14004_v41, 16 }
  0x25   : > { %v537_v26 = vrot.slane %v535_v18, 3  ;;  %v547_v37 = vor.u32 %v546_v31, %v543_v28  ;;  %v580_v53 = vshll.u32 %v14006_v47, 16  ;;  %v586_v63 = vshrl.u32 %v14007_v56, 16  ;;  %v14012_v18 = vld [vmem:[%s14364_s8 + $0xc] sm:$0xff]   ;;  %v14016_v31 = vld [vmem:[%s14364_s8 + $0x24] sm:$0xff]  }
  0x26   : > { %v555_v43 = vrot.slane %v553_v35, 3  ;;  %v570_v54 = vrot.slane %v568_v48, 2  ;;  %v573_v55 = vrot.slane %v571_v49, 3  ;;  %v1039_v22 = vrot.slane %v14011_v20, 3 }
  0x27   : > { %12465 = vmatpush3.bf16.msra.mxu0 %v13982_v21  ;;  %v529_v21 = vor.u32 %v528_v13, %v525_v12  ;;  %v582_v60 = vrot.slane %v580_v53, 3  ;;  %v588_v6 = vrot.slane %v586_v63, 2  ;;  %v604_v12 = vshrl.u32 %v14010_v4, 16  ;;  %v14025_v53 = vld [vmem:[%s14364_s8 + $0x54] sm:$0xff]  }
  0x28   : > { %12466 = vmatprep.subr.bf16.mxu0 %v13983_v29  ;;  %v574_v62 = vor.u32 %v573_v55, %v570_v54  ;;  %v607_v13 = vshll.u32 %v14010_v4, 16  ;;  %v1046_v35 = vrot.slane %v14016_v31, 3  ;;  %v14032_v54 = vld [vmem:[%s16688_s1 + $0xb0] sm:$0xff]   ;;  %v14027_v55 = vld [vmem:[%s14364_s8 + $0x5c] sm:$0xff]   ;;  %v14038_v4 = vld [vmem:[%s14364_s8 + $0x4] sm:$0xf8]  }
  0x29   : > { %v530_v30 = vsel %vm441_vm0, %v520_v19, %v529_v21  ;;  %v14031_v63 = vld [vmem:[%s14364_s8 + $0x74] sm:$0xff]  }
  0x2a   : > { %v609_v17 = vrot.slane %v607_v13, 3  ;;  %v14516_v13 = vld [vmem:[%s14364_s8 + $0x94] ss:$0 sps:$4 sm:$0x77]  }
  0x2b   : > { %12467 = vmatpush3.bf16.msra.mxu0 %v13983_v29  ;;  %v14003_v29 = vld [vmem:[%s14364_s8 + $0x6c] sm:$0xff]  }
  0x2c   : > { %12504 = vmatprep.subr.bf16.mxu0 %v13987_v34  ;;  %v559_v36 = vshrl.u32 %v14003_v29, 16  ;;  %v562_v38 = vshll.u32 %v14003_v29, 16 }
  0x2e   : > { %12469 = vmatmul.mubr.bf16.vlgmr.msra.gmra.mrb[0].mxu0 %v467_v40  ;;  %v552_v40 = vrot.slane %v550_v33, 2  ;;  %v564_v46 = vrot.slane %v562_v38, 3  ;;  %v14017_v33 = vld [vmem:[%s16688_s1 + $0x88] sm:$0xff]   ;;  %v14019_v38 = vld [vmem:[%s14364_s8 + $0x34] sm:$0xff]  }
  0x2f   : > { %12505 = vmatpush3.bf16.msra.mxu0 %v13987_v34  ;;  %12472 = vmatprep.mubr.bf16.mxu0 %v476_v44  ;;  %v538_v34 = vor.u32 %v537_v26, %v534_v25  ;;  %v561_v44 = vrot.slane %v559_v36, 2  ;;  %v14013_v25 = vld [vmem:[%s14364_s8 + $0x14] sm:$0xff]  }
  0x30   : > { %12506 = vmatprep.subr.bf16.mxu0 %v13990_v45  ;;  %v556_v50 = vor.u32 %v555_v43, %v552_v40  ;;  %v1042_v28 = vrot.slane %v14013_v25, 3  ;;  %v1050_v43 = vrot.slane %v14019_v38, 3  ;;  %v14043_v25 = vld [vmem:[%s14364_s8 + $0x24] sm:$0xff]  }
  0x31   : > { %v539_v42 = vsel %vm441_vm0, %v529_v21, %v538_v34  ;;  %v565_v51 = vor.u32 %v564_v46, %v561_v44  ;;  %v14022_v46 = vld [vmem:[%s14364_s8 + $0x44] sm:$0xff]  }
  0x32   : > { %v557_v57 = vsel %vm441_vm0, %v547_v37, %v556_v50 }
  0x33   : > { %12507 = vmatpush3.bf16.msra.mxu0 %v13990_v45  ;;  %v548_v45 = vsel %vm441_vm0, %v538_v34, %v547_v37  ;;  %v575_v5 = vsel %vm441_vm0, %v565_v51, %v574_v62  ;;  %v14018_v34 = vld [vmem:[%s14364_s8 + $0x2c] sm:$0xff]  }
  0x34   : > { %12508 = vmatprep.subr.bf16.mxu0 %v13993_v52  ;;  %v1048_v36 = vrot.slane %v14018_v34, 3  ;;  %v14020_v37 = vld [vmem:[%s16688_s1 + $0x90] sm:$0xff]   ;;  %v1611_v34 = vshrl.u32 %v14043_v25, 16 }
  0x36   : > { %12473 = vmatmul.mubr.bf16.gmra.mrb[4].mxu0 %v485_v58  ;;  %v566_v58 = vsel %vm441_vm0, %v556_v50, %v565_v51  ;;  %v1049_v41 = vsel %vm1038_vm1, %v1046_v35, %v1048_v36  ;;  %v1051_v48 = vsel %vm1038_vm1, %v1048_v36, %v1050_v43  ;;  %v14029_v50 = vld [vmem:[%s16688_s1 + $0xa8] sm:$0xff]   ;;  %v1054_v51 = vrot.slane %v14022_v46, 3 }
  0x37   : > { %12476 = vmatprep.mubr.bf16.mxu0 %v494_v61  ;;  %12509 = vmatpush3.bf16.msra.mxu0 %v13993_v52  ;;  %v577_v52 = vshrl.u32 %v14006_v47, 16  ;;  %v14008_v61 = vld [vmem:[%s14364_s8 + $0x8c] sm:$0xff]  }
  0x38   : > { %12510 = vmatprep.subr.bf16.mxu0 %v13996_v0  ;;  %v595_v2 = vshrl.u32 %v14008_v61, 16  ;;  %v598_v3 = vshll.u32 %v14008_v61, 16  ;;  %v14024_v47 = vld [vmem:[%s14364_s8 + $0x4c] sm:$0xff]  }
  0x39   : > { %v579_v59 = vrot.slane %v577_v52, 2  ;;  %v1056_v52 = vrot.slane %v14024_v47, 3  ;;  %v14030_v61 = vld [vmem:[%s14364_s8 + $0x6c] sm:$0xff]  }
  0x3a   : > { %v597_v9 = vrot.slane %v595_v2, 2  ;;  %v600_v10 = vrot.slane %v598_v3, 3  ;;  %v14498_v2 = vld [vmem:[%s14364_s8 + $0x84] sm:$0xff]  }
  0x3b   : > { %12511 = vmatpush3.bf16.msra.mxu0 %v13996_v0  ;;  %v589_v0 = vshll.u32 %v14007_v56, 16  ;;  %v583_v1 = vor.u32 %v582_v60, %v579_v59  ;;  %v14028_v56 = vld [vmem:[%s14364_s8 + $0x64] sm:$0xff]   ;;  %v14036_v59 = vld [vmem:[%s16688_s1 + $0xb8] sm:$0xff]   ;;  %v1058_v60 = vrot.slane %v14025_v53, 3 }
  0x3c   : > { %12512 = vmatprep.subr.bf16.mxu0 %v13999_v7  ;;  %v601_v14 = vor.u32 %v600_v10, %v597_v9  ;;  %v14503_v3 = vld [vmem:[%s16688_s1 + $0xc0] sm:$0xff]   ;;  %v1066_v9 = vrot.slane %v14031_v63, 3 }
  0x3d   : > { %v584_v8 = vsel %vm441_vm0, %v574_v62, %v583_v1  ;;  %v1060_v62 = vrot.slane %v14027_v55, 3  ;;  %v14051_v55 = vld [vmem:[%s14364_s8 + $0x4c] sm:$0xff]  }
  0x3e   : > { %12477 = vmatmul.mubr.bf16.gmra.mrb[8].mxu0 %v503_v11 }
  0x3f   : > { %12480 = vmatprep.mubr.bf16.mxu0 %v512_v16  ;;  %12513 = vmatpush3.bf16.msra.mxu0 %v13999_v7  ;;  %v591_v7 = vrot.slane %v589_v0, 3  ;;  %v606_v16 = vrot.slane %v604_v12, 2  ;;  %v14495_v0 = vld [vmem:[%s14364_s8 + $0x7c] sm:$0xff]   ;;  %v14513_v12 = vld [vmem:[%s14364_s8 + $0x8c] sm:$0xff]  }
  0x40   : > { %12514 = vmatprep.subr.bf16.mxu0 %v14002_v15  ;;  %v1068_v10 = vrot.slane %v14495_v0, 3 }
  0x41   : > { %v592_v11 = vor.u32 %v591_v7, %v588_v6  ;;  %v610_v21 = vor.u32 %v609_v17, %v606_v16  ;;  %v1061_v6 = vsel %vm1038_vm1, %v1058_v60, %v1060_v62  ;;  %v1064_v7 = vrot.slane %v14030_v61, 3 }
  0x42   : > { %v1579_v16 = vshll.u32 %v14038_v4, 16 }
  0x43   : > { %12515 = vmatpush3.bf16.msra.mxu0 %v14002_v15  ;;  %v593_v15 = vsel %vm441_vm0, %v583_v1, %v592_v11  ;;  %v602_v19 = vsel %vm441_vm0, %v592_v11, %v601_v14  ;;  %v611_v24 = vsel %vm441_vm0, %v601_v14, %v610_v21  ;;  %v1062_v1 = vrot.slane %v14028_v56, 3 }
  0x44   : > { %12516 = vmatprep.subr.bf16.mxu0 %v14005_v23  ;;  %v1070_v11 = vrot.slane %v14498_v2, 3  ;;  %v1576_v14 = vshrl.u32 %v14038_v4, 16  ;;  %v1067_v36 = vsel %vm1038_vm1, %v1064_v7, %v1066_v9  ;;  %v1656_v2 = vshrl.u32 %v14051_v55, 16  ;;  %v14052_v4 = vld [vmem:[%s14364_s8 + $0x54] sm:$0xff]  }
  0x45   : > { %v1063_v20 = vsel %vm1038_vm1, %v1060_v62, %v1062_v1  ;;  %v1065_v21 = vsel %vm1038_vm1, %v1062_v1, %v1064_v7 }
  0x46   : > { %12481 = vmatmul.mubr.bf16.gmra.mrb[12].mxu0 %v521_v27  ;;  %v14015_v27 = vld [vmem:[%s14364_s8 + $0x1c] sm:$0xff]  }
  0x47   : > { %12484 = vmatprep.mubr.bf16.mxu0 %v530_v30  ;;  %12517 = vmatpush3.bf16.msra.mxu0 %v14005_v23  ;;  %v1040_v23 = vrot.slane %v14012_v18, 3  ;;  %v1044_v29 = vrot.slane %v14015_v27, 3  ;;  %v1581_v27 = vrot.slane %v1579_v16, 4  ;;  %v1668_v16 = vshll.u32 %v14052_v4, 16 }
  0x48   : > { %12518 = vmatprep.subr.bf16.mxu0 %v14009_v32 }
  0x49   : > { %v1041_v26 = vsel %vm1038_vm1, %v1039_v22, %v1040_v23  ;;  %v1043_v30 = vsel %vm1038_vm1, %v1040_v23, %v1042_v28  ;;  %v1047_v40 = vsel %vm1038_vm1, %v1044_v29, %v1046_v35  ;;  %v1072_v22 = vrot.slane %v14513_v12, 3  ;;  %v14046_v35 = vld [vmem:[%s14364_s8 + $0x34] sm:$0xff]   ;;  %v14057_v12 = vld [vmem:[%s14364_s8 + $0x6c] sm:$0xff]  }
  0x4a   : > { %v1074_v23 = vrot.slane %v14516_v13, 3  ;;  %v1629_v47 = vshrl.u32 %v14046_v35, 16  ;;  %v14552_v13 = vrot.slane %v1656_v2, 3 }
  0x4b   : > { %12519 = vmatpush3.bf16.msra.mxu0 %v14009_v32  ;;  %v1045_v32 = vsel %vm1038_vm1, %v1042_v28, %v1044_v29  ;;  %v1073_v53 = vsel %vm1038_vm1, %v1070_v11, %v1072_v22 }
  0x4c   : > { %12556 = vmatprep.subr.bf16.mxu0 %v14431_v39  ;;  %v1075_v7 = vsel %vm1038_vm1, %v1072_v22, %v1074_v23  ;;  %v14058_v22 = vld [vmem:[%s14364_s8 + $0x74] sm:$0xff]  }
  0x4e   : > { %12485 = vmatmul.mubr.bf16.gmra.mrb[16].mxu0 %v539_v42  ;;  %v14021_v42 = vld [vmem:[%s14364_s8 + $0x3c] sm:$0xff]  }
  0x4f   : > { %12488 = vmatprep.mubr.bf16.mxu0 %v548_v45  ;;  %v1052_v44 = vrot.slane %v14021_v42, 3  ;;  %v14026_v45 = vld [vmem:[%s16688_s1 + $0xa0] sm:$0xff]  }
  0x51   : > { %v1053_v49 = vsel %vm1038_vm1, %v1050_v43, %v1052_v44  ;;  %v1613_v43 = vrot.slane %v1611_v34, 3  ;;  %v1670_v34 = vrot.slane %v1668_v16, 4 }
  0x56   : > { %12489 = vmatmul.mubr.bf16.gmra.mrb[20].mxu0 %v557_v57  ;;  %v1055_v57 = vsel %vm1038_vm1, %v1052_v44, %v1054_v51  ;;  %v1614_v44 = vshll.u32 %v14043_v25, 16  ;;  %v14044_v25 = vld [vmem:[%s16688_s1 + $0xc8] sm:$0xff]  }
  0x57   : > { %12492 = vmatprep.mubr.bf16.mxu0 %v566_v58  ;;  %v1057_v58 = vsel %vm1038_vm1, %v1054_v51, %v1056_v52  ;;  %v14049_v51 = vld [vmem:[%s14364_s8 + $0x44] sm:$0xff]  }
  0x58   : > { %v1647_v61 = vshrl.u32 %v14049_v51, 16  ;;  %v1650_v63 = vshll.u32 %v14049_v51, 16 }
  0x5e   : > { %12493 = vmatmul.mubr.bf16.gmra.mrb[24].mxu0 %v575_v5  ;;  %v1059_v5 = vsel %vm1038_vm1, %v1056_v52, %v1058_v60  ;;  %v1071_v52 = vsel %vm1038_vm1, %v1068_v10, %v1070_v11  ;;  %v14549_v11 = vrot.slane %v1650_v63, 4 }
  0x5f   : > { %12496 = vmatprep.mubr.bf16.mxu0 %v584_v8  ;;  %v14039_v8 = vld [vmem:[%s14364_s8 + $0xc] sm:$0xff]  }
  0x60   : > { %v1584_v17 = vshrl.u32 %v14039_v8, 16  ;;  %v1587_v18 = vshll.u32 %v14039_v8, 16 }
  0x62   : > { %v1586_v28 = vrot.slane %v1584_v17, 3 }
  0x66   : > { %12497 = vmatmul.mubr.bf16.gmra.mrb[28].mxu0 %v593_v15  ;;  %v14040_v15 = vld [vmem:[%s14364_s8 + $0x14] sm:$0xff]  }
  0x67   : > { %12500 = vmatprep.mubr.bf16.mxu0 %v602_v19  ;;  %v14042_v19 = vld [vmem:[%s14364_s8 + $0x1c] sm:$0xff]   ;;  %v1596_v29 = vshll.u32 %v14040_v15, 16 }
  0x68   : > { %v1602_v31 = vshrl.u32 %v14042_v19, 16 }
  0x6a   : > { %v1604_v42 = vrot.slane %v1602_v31, 3  ;;  %v1704_v31 = vshll.u32 %v14058_v22, 16 }
  0x6e   : > { %12501 = vmatmul.mubr.bf16.gmra.mrb[32].mxu0 %v611_v24  ;;  %v1593_v24 = vshrl.u32 %v14040_v15, 16  ;;  %v1665_v15 = vshrl.u32 %v14052_v4, 16 }
  0x6f   : > { %12520 = vmatprep.mubr.bf16.mxu0 %v1041_v26  ;;  %v1578_v26 = vrot.slane %v1576_v14, 3 }
  0x70   : > { %v1595_v38 = vrot.slane %v1593_v24, 3  ;;  %v1692_v24 = vshrl.u32 %v14057_v12, 16 }
  0x71   : > { %v1582_v0 = vor.u32 %v1581_v27, %v1578_v26 }
  0x76   : > { %12521 = vmatmul.mubr.bf16.vlgmr.msra.gmra.mrb[0].mxu0 %v1043_v30  ;;  %v1589_v30 = vrot.slane %v1587_v18, 4 }
  0x77   : > { %12557 = vmatpush3.bf16.msra.mxu0 %v14431_v39  ;;  %12524 = vmatprep.mubr.bf16.mxu0 %v1045_v32  ;;  %v14023_v39 = vld [vmem:[%s16688_s1 + $0x98] sm:$0xff]   ;;  %v1605_v32 = vshll.u32 %v14042_v19, 16 }
  0x78   : > { %12558 = vmatprep.subr.bf16.mxu0 %v14017_v33  ;;  %v1590_v1 = vor.u32 %v1589_v30, %v1586_v28  ;;  %v1695_v28 = vshll.u32 %v14057_v12, 16  ;;  %v14562_v30 = vrot.slane %v1665_v15, 3  ;;  %v14621_v15 = vld [vmem:[%s16688_s1 + $0x100] sm:$0xff]  }
  0x7a   : > { %v1591_v8 = vsel %vm1574_vm2, %v1582_v0, %v1590_v1 }
  0x7b   : > { %12559 = vmatpush3.bf16.msra.mxu0 %v14017_v33  ;;  %v14045_v33 = vld [vmem:[%s14364_s8 + $0x2c] sm:$0xff]  }
  0x7c   : > { %12560 = vmatprep.subr.bf16.mxu0 %v14020_v37  ;;  %v1623_v46 = vshll.u32 %v14045_v33, 16 }
  0x7e   : > { %12525 = vmatmul.mubr.bf16.gmra.mrb[4].mxu0 %v1047_v40  ;;  %v14048_v40 = vld [vmem:[%s14364_s8 + $0x3c] sm:$0xff]  }
  0x7f   : > { %12528 = vmatprep.mubr.bf16.mxu0 %v1049_v41  ;;  %12561 = vmatpush3.bf16.msra.mxu0 %v14020_v37  ;;  %v1069_v37 = vsel %vm1038_vm1, %v1066_v9, %v1068_v10  ;;  %v1598_v41 = vrot.slane %v1596_v29, 4  ;;  %v14546_v9 = vrot.slane %v1647_v61, 3  ;;  %v14055_v10 = vld [vmem:[%s14364_s8 + $0x64] sm:$0xff]   ;;  %v1701_v29 = vshrl.u32 %v14058_v22, 16 }
  0x80   : > { %12562 = vmatprep.subr.bf16.mxu0 %v14023_v39  ;;  %v1686_v23 = vshll.u32 %v14055_v10, 16 }
  0x81   : > { %v1599_v17 = vor.u32 %v1598_v41, %v1595_v38 }
  0x82   : > { %v14572_v38 = vrot.slane %v1686_v23, 4 }
  0x83   : > { %12563 = vmatpush3.bf16.msra.mxu0 %v14023_v39  ;;  %v1607_v39 = vrot.slane %v1605_v32, 4  ;;  %v1600_v26 = vsel %vm1574_vm2, %v1590_v1, %v1599_v17 }
  0x84   : > { %12564 = vmatprep.subr.bf16.mxu0 %v14026_v45 }
  0x86   : > { %12529 = vmatmul.mubr.bf16.gmra.mrb[8].mxu0 %v1051_v48  ;;  %v1632_v48 = vshll.u32 %v14046_v35, 16 }
  0x87   : > { %12532 = vmatprep.mubr.bf16.mxu0 %v1053_v49  ;;  %12565 = vmatpush3.bf16.msra.mxu0 %v14026_v45  ;;  %v1620_v45 = vshrl.u32 %v14045_v33, 16  ;;  %v1638_v49 = vshrl.u32 %v14048_v40, 16  ;;  %v14047_v33 = vld [vmem:[%s16688_s1 + $0xd0] sm:$0xff]  }
  0x88   : > { %12566 = vmatprep.subr.bf16.mxu0 %v14029_v50 }
  0x89   : > { %v1622_v56 = vrot.slane %v1620_v45, 3  ;;  %v14538_v60 = vrot.slane %v1638_v49, 3  ;;  %v14061_v45 = vld [vmem:[%s14364_s8 + $0x84] sm:$0xff]  }
  0x8b   : > { %12567 = vmatpush3.bf16.msra.mxu0 %v14029_v50  ;;  %v1641_v50 = vshll.u32 %v14048_v40, 16  ;;  %v14574_v40 = vrot.slane %v1692_v24, 3 }
  0x8c   : > { %12568 = vmatprep.subr.bf16.mxu0 %v14032_v54 }
  0x8d   : > { %v14540_v62 = vrot.slane %v1641_v50, 4 }
  0x8e   : > { %12533 = vmatmul.mubr.bf16.gmra.mrb[12].mxu0 %v1055_v57  ;;  %v1625_v57 = vrot.slane %v1623_v46, 4 }
  0x8f   : > { %12536 = vmatprep.mubr.bf16.mxu0 %v1057_v58  ;;  %12569 = vmatpush3.bf16.msra.mxu0 %v14032_v54  ;;  %v1616_v54 = vrot.slane %v1614_v44, 4  ;;  %v14534_v58 = vrot.slane %v1629_v47, 3  ;;  %v14581_v44 = vrot.slane %v1704_v31, 4 }
  0x90   : > { %12570 = vmatprep.subr.bf16.mxu0 %v14036_v59  ;;  %v1626_v41 = vor.u32 %v1625_v57, %v1622_v56  ;;  %v14064_v56 = vld [vmem:[%s14364_s8 + $0x94] ss:$0 sps:$4 sm:$0xff]   ;;  %v14056_v57 = vld [vmem:[%s16688_s1 + $0xe8] sm:$0xff]  }
  0x91   : > { %v1617_v32 = vor.u32 %v1616_v54, %v1613_v43  ;;  %v14060_v43 = vld [vmem:[%s14364_s8 + $0x7c] sm:$0xff]   ;;  %v1644_v54 = vor.u32 %v14540_v62, %v14538_v60  ;;  %v1737_v4 = vshrl.u32 %v14064_v56, 16  ;;  %v1740_v12 = vshll.u32 %v14064_v56, 16 }
  0x92   : > { %v1710_v49 = vshrl.u32 %v14060_v43, 16  ;;  %v1713_v50 = vshll.u32 %v14060_v43, 16 }
  0x93   : > { %12571 = vmatpush3.bf16.msra.mxu0 %v14036_v59  ;;  %v14536_v59 = vrot.slane %v1632_v48, 4  ;;  %v1627_v47 = vsel %vm1574_vm2, %v1617_v32, %v1626_v41  ;;  %v14053_v48 = vld [vmem:[%s16688_s1 + $0xe0] sm:$0xff]   ;;  %v1742_v22 = vrot.slane %v1740_v12, 4  ;;  %v14076_v12 = vld [vmem:[%s14364_s8 + $0x4c] sm:$0xff]  }
  0x94   : > { %12608 = vmatprep.subr.bf16.mxu0 %v14503_v3  ;;  %v1712_v60 = vrot.slane %v1710_v49, 3  ;;  %v1715_v62 = vrot.slane %v1713_v50, 4 }
  0x95   : > { %v1635_v51 = vor.u32 %v14536_v59, %v14534_v58  ;;  %v1653_v58 = vor.u32 %v14549_v11, %v14546_v9  ;;  %v14059_v59 = vld [vmem:[%s16688_s1 + $0xf0] sm:$0xff]  }
  0x96   : > { %12537 = vmatmul.mubr.bf16.gmra.mrb[16].mxu0 %v1059_v5  ;;  %v1659_v5 = vshll.u32 %v14051_v55, 16  ;;  %v14062_v55 = vld [vmem:[%s14364_s8 + $0x8c] sm:$0xff]   ;;  %v1716_v43 = vor.u32 %v1715_v62, %v1712_v60 }
  0x97   : > { %12540 = vmatprep.mubr.bf16.mxu0 %v1061_v6  ;;  %v14054_v6 = vld [vmem:[%s14364_s8 + $0x5c] sm:$0xff]   ;;  %v1636_v61 = vsel %vm1574_vm2, %v1626_v41, %v1635_v51  ;;  %v1645_v63 = vsel %vm1574_vm2, %v1635_v51, %v1644_v54  ;;  %v1728_v1 = vshrl.u32 %v14062_v55, 16  ;;  %v1731_v2 = vshll.u32 %v14062_v55, 16 }
  0x98   : > { %v14554_v14 = vrot.slane %v1659_v5, 4  ;;  %v1674_v18 = vshrl.u32 %v14054_v6, 16  ;;  %v1677_v19 = vshll.u32 %v14054_v6, 16  ;;  %v14063_v6 = vld [vmem:[%s16688_s1 + $0xf8] sm:$0xff]  }
  0x99   : > { %v1733_v11 = vrot.slane %v1731_v2, 4 }
  0x9a   : > { %v14567_v35 = vrot.slane %v1674_v18, 3  ;;  %v1662_v5 = vor.u32 %v14554_v14, %v14552_v13  ;;  %v1671_v13 = vor.u32 %v1670_v34, %v14562_v30  ;;  %v14616_v14 = vrot.slane %v1737_v4, 3  ;;  %v14066_v18 = vld [vmem:[%s14364_s8 + $0x14] sm:$0xff]   ;;  %v14069_v30 = vld [vmem:[%s14364_s8 + $0x24] sm:$0xff]  }
  0x9b   : > { %v2270_v41 = vshrl.u32 %v14069_v30, 16 }
  0x9d   : > { %v2272_v50 = vrot.slane %v2270_v41, 3 }
  0x9e   : > { %12541 = vmatmul.mubr.bf16.gmra.mrb[20].mxu0 %v1063_v20  ;;  %v1608_v20 = vor.u32 %v1607_v39, %v1604_v42  ;;  %v14576_v42 = vrot.slane %v1695_v28, 4  ;;  %v14578_v39 = vrot.slane %v1701_v29, 3 }
  0x9f   : > { %12544 = vmatprep.mubr.bf16.mxu0 %v1065_v21  ;;  %v1683_v21 = vshrl.u32 %v14055_v10, 16  ;;  %v1730_v10 = vrot.slane %v1728_v1, 3 }
  0xa0   : > { %v1609_v27 = vsel %vm1574_vm2, %v1599_v17, %v1608_v20  ;;  %v1618_v46 = vsel %vm1574_vm2, %v1608_v20, %v1617_v32  ;;  %v14065_v17 = vld [vmem:[%s14364_s8 + $0xc] sm:$0xf8]   ;;  %v1672_v20 = vsel %vm1574_vm2, %v1662_v5, %v1671_v13  ;;  %v1698_v29 = vor.u32 %v14576_v42, %v14574_v40 }
  0xa1   : > { %v2244_v23 = vshrl.u32 %v14065_v17, 16  ;;  %v2247_v24 = vshll.u32 %v14065_v17, 16  ;;  %v14070_v40 = vld [vmem:[%s14364_s8 + $0x2c] sm:$0xff]  }
  0xa2   : > { %v2282_v51 = vshll.u32 %v14070_v40, 16  ;;  %v14074_v17 = vld [vmem:[%s16688_s1 + $0x110] sm:$0xff]  }
  0xa3   : > { %v2249_v34 = vrot.slane %v2247_v24, 4 }
  0xa4   : > { %v2284_v4 = vrot.slane %v2282_v51, 4 }
  0xa6   : > { %12545 = vmatmul.mubr.bf16.gmra.mrb[24].mxu0 %v1067_v36  ;;  %v1679_v36 = vrot.slane %v1677_v19, 4  ;;  %v14067_v19 = vld [vmem:[%s14364_s8 + $0x1c] sm:$0xff]  }
  0xa7   : > { %12548 = vmatprep.mubr.bf16.mxu0 %v1069_v37  ;;  %v14570_v37 = vrot.slane %v1683_v21, 3  ;;  %v2261_v28 = vshrl.u32 %v14067_v19, 16 }
  0xa8   : > { %v1680_v16 = vor.u32 %v1679_v36, %v14567_v35  ;;  %v2264_v36 = vshll.u32 %v14067_v19, 16 }
  0xaa   : > { %v1681_v21 = vsel %vm1574_vm2, %v1671_v13, %v1680_v16  ;;  %v14071_v13 = vld [vmem:[%s16688_s1 + $0x108] sm:$0xff]  }
  0xae   : > { %12549 = vmatmul.mubr.bf16.gmra.mrb[28].mxu0 %v1071_v52  ;;  %v1719_v52 = vshrl.u32 %v14061_v45, 16 }
  0xaf   : > { %12552 = vmatprep.mubr.bf16.mxu0 %v1073_v53  ;;  %v1722_v53 = vshll.u32 %v14061_v45, 16 }
  0xb0   : > { %v1721_v0 = vrot.slane %v1719_v52, 3  ;;  %v14073_v52 = vld [vmem:[%s14364_s8 + $0x3c] sm:$0xff]  }
  0xb1   : > { %v1724_v9 = vrot.slane %v1722_v53, 4 }
  0xb3   : > { %v1725_v49 = vor.u32 %v1724_v9, %v1721_v0  ;;  %v14075_v0 = vld [vmem:[%s14364_s8 + $0x44] sm:$0xff]  }
  0xb5   : > { %v1726_v53 = vsel %vm1574_vm2, %v1716_v43, %v1725_v49 }
  0xb6   : > { %12553 = vmatmul.mubr.bf16.gmra.mrb[32].mxu0 %v1075_v7  ;;  %v1654_v7 = vsel %vm1574_vm2, %v1644_v54, %v1653_v58 }
  0xb7   : > { %12572 = vmatprep.mubr.bf16.mxu0 %v1591_v8  ;;  %v1663_v8 = vsel %vm1574_vm2, %v1653_v58, %v1662_v5  ;;  %v2297_v58 = vshrl.u32 %v14073_v52, 16 }
  0xbe   : > { %12573 = vmatmul.mubr.bf16.vlgmr.msra.gmra.mrb[0].mxu0 %v1600_v26  ;;  %v1689_v26 = vor.u32 %v14572_v38, %v14570_v37  ;;  %v1707_v37 = vor.u32 %v14581_v44, %v14578_v39  ;;  %v1734_v39 = vor.u32 %v1733_v11, %v1730_v10  ;;  %v14072_v44 = vld [vmem:[%s14364_s8 + $0x34] sm:$0xff]   ;;  %v2306_v10 = vshrl.u32 %v14075_v0, 16 }
  0xbf   : > { %12609 = vmatpush3.bf16.msra.mxu0 %v14503_v3  ;;  %12576 = vmatprep.mubr.bf16.mxu0 %v1609_v27  ;;  %v14050_v3 = vld [vmem:[%s16688_s1 + $0xd8] sm:$0xff]   ;;  %v2255_v27 = vshll.u32 %v14066_v18, 16 }
  0xc0   : > { %12610 = vmatprep.subr.bf16.mxu0 %v14044_v25  ;;  %v1690_v31 = vsel %vm1574_vm2, %v1680_v16, %v1689_v26  ;;  %v1699_v32 = vsel %vm1574_vm2, %v1689_v26, %v1698_v29  ;;  %v1708_v42 = vsel %vm1574_vm2, %v1698_v29, %v1707_v37  ;;  %v1717_v45 = vsel %vm1574_vm2, %v1707_v37, %v1716_v43  ;;  %v14082_v43 = vld [vmem:[%s14364_s8 + $0x6c] sm:$0xff]  }
  0xc1   : > { %v2257_v38 = vrot.slane %v2255_v27, 4  ;;  %v1735_v54 = vsel %vm1574_vm2, %v1725_v49, %v1734_v39  ;;  %v2351_v51 = vshrl.u32 %v14082_v43, 16 }
  0xc3   : > { %12611 = vmatpush3.bf16.msra.mxu0 %v14044_v25  ;;  %v2252_v25 = vshrl.u32 %v14066_v18, 16  ;;  %v2309_v18 = vshll.u32 %v14075_v0, 16 }
  0xc4   : > { %12612 = vmatprep.subr.bf16.mxu0 %v14047_v33 }
  0xc5   : > { %v2254_v35 = vrot.slane %v2252_v25, 3  ;;  %v14079_v25 = vld [vmem:[%s14364_s8 + $0x5c] sm:$0xff]  }
  0xc6   : > { %12577 = vmatmul.mubr.bf16.gmra.mrb[4].mxu0 %v1618_v46  ;;  %v2266_v46 = vrot.slane %v2264_v36, 4  ;;  %v2336_v37 = vshll.u32 %v14079_v25, 16 }
  0xc7   : > { %12580 = vmatprep.mubr.bf16.mxu0 %v1627_v47  ;;  %12613 = vmatpush3.bf16.msra.mxu0 %v14047_v33  ;;  %v2246_v33 = vrot.slane %v2244_v23, 3  ;;  %v2273_v47 = vshll.u32 %v14069_v30, 16  ;;  %v2258_v62 = vor.u32 %v2257_v38, %v2254_v35  ;;  %v14078_v23 = vld [vmem:[%s14364_s8 + $0x54] sm:$0xff]   ;;  %v14081_v35 = vld [vmem:[%s14364_s8 + $0x64] sm:$0xff]  }
  0xc8   : > { %12614 = vmatprep.subr.bf16.mxu0 %v14050_v3  ;;  %v2324_v29 = vshrl.u32 %v14078_v23, 16  ;;  %v14080_v38 = vld [vmem:[%s16688_s1 + $0x120] sm:$0xff]  }
  0xc9   : > { %v2275_v55 = vrot.slane %v2273_v47, 4  ;;  %v2250_v60 = vor.u32 %v2249_v34, %v2246_v33  ;;  %v2327_v33 = vshll.u32 %v14078_v23, 16  ;;  %v2333_v34 = vshrl.u32 %v14079_v25, 16 }
  0xca   : > { %v2326_v41 = vrot.slane %v2324_v29, 3 }
  0xcb   : > { %12615 = vmatpush3.bf16.msra.mxu0 %v14050_v3  ;;  %v2263_v3 = vrot.slane %v2261_v28, 3  ;;  %v2259_v2 = vsel %vm1574_vm2, %v2250_v60, %v2258_v62  ;;  %v2276_v11 = vor.u32 %v2275_v55, %v2272_v50  ;;  %v2311_v28 = vrot.slane %v2309_v18, 4  ;;  %v14085_v55 = vld [vmem:[%s14364_s8 + $0x7c] sm:$0xff]  }
  0xcc   : > { %12616 = vmatprep.subr.bf16.mxu0 %v14053_v48  ;;  %v2335_v47 = vrot.slane %v2333_v34, 3  ;;  %v2345_v50 = vshll.u32 %v14081_v35, 16 }
  0xce   : > { %12581 = vmatmul.mubr.bf16.gmra.mrb[8].mxu0 %v1636_v61  ;;  %v2291_v61 = vshll.u32 %v14072_v44, 16 }
  0xcf   : > { %12584 = vmatprep.mubr.bf16.mxu0 %v1645_v63  ;;  %12617 = vmatpush3.bf16.msra.mxu0 %v14053_v48  ;;  %v2279_v48 = vshrl.u32 %v14070_v40, 16  ;;  %v1743_v63 = vor.u32 %v1742_v22, %v14616_v14  ;;  %v2318_v22 = vshll.u32 %v14076_v12, 16 }
  0xd0   : > { %12618 = vmatprep.subr.bf16.mxu0 %v14056_v57 }
  0xd1   : > { %v2281_v56 = vrot.slane %v2279_v48, 3  ;;  %v1744_v1 = vsel %vm1574_vm2, %v1734_v39, %v1743_v63  ;;  %v2338_v48 = vrot.slane %v2336_v37, 4  ;;  %v2354_v39 = vshll.u32 %v14082_v43, 16 }
  0xd3   : > { %12619 = vmatpush3.bf16.msra.mxu0 %v14056_v57  ;;  %v2288_v57 = vshrl.u32 %v14072_v44, 16  ;;  %v2285_v19 = vor.u32 %v2284_v4, %v2281_v56  ;;  %v14086_v44 = vld [vmem:[%s16688_s1 + $0x130] sm:$0xff]   ;;  %v2339_v60 = vor.u32 %v2338_v48, %v2335_v47  ;;  %v14093_v48 = vld [vmem:[%s14364_s8 + $0x18] sm:$0xff]  }
  0xd4   : > { %12620 = vmatprep.subr.bf16.mxu0 %v14059_v59  ;;  %v14092_v47 = vld [vmem:[%s14364_s8 + $0x10] sm:$0xff]  }
  0xd5   : > { %v2290_v5 = vrot.slane %v2288_v57, 3  ;;  %v2286_v26 = vsel %vm1574_vm2, %v2276_v11, %v2285_v19  ;;  %v2347_v57 = vrot.slane %v2345_v50, 4  ;;  %v14097_v50 = vld [vmem:[%s16688_s1 + $0x148] sm:$0xff]  }
  0xd6   : > { %12585 = vmatmul.mubr.bf16.gmra.mrb[12].mxu0 %v1654_v7  ;;  %v2299_v7 = vrot.slane %v2297_v58, 3  ;;  %v2353_v58 = vrot.slane %v2351_v51, 3  ;;  %v14100_v51 = vld [vmem:[%s16688_s1 + $0x150] sm:$0xff]  }
  0xd7   : > { %12588 = vmatprep.mubr.bf16.mxu0 %v1663_v8  ;;  %12621 = vmatpush3.bf16.msra.mxu0 %v14059_v59  ;;  %v2300_v59 = vshll.u32 %v14073_v52, 16  ;;  %v2267_v8 = vor.u32 %v2266_v46, %v2263_v3  ;;  %v2342_v46 = vshrl.u32 %v14081_v35, 16 }
  0xd8   : > { %12622 = vmatprep.subr.bf16.mxu0 %v14063_v6 }
  0xd9   : > { %v2302_v9 = vrot.slane %v2300_v59, 4  ;;  %v2268_v14 = vsel %vm1574_vm2, %v2258_v62, %v2267_v8  ;;  %v2277_v16 = vsel %vm1574_vm2, %v2267_v8, %v2276_v11  ;;  %v2356_v59 = vrot.slane %v2354_v39, 4  ;;  %v14096_v39 = vld [vmem:[%s14364_s8 + $0x28] sm:$0xff]  }
  0xdb   : > { %12623 = vmatpush3.bf16.msra.mxu0 %v14063_v6  ;;  %v2293_v6 = vrot.slane %v2291_v61, 4  ;;  %v14090_v61 = vld [vmem:[%s16688_s1 + $0x138] sm:$0xff]  }
  0xdc   : > { %12660 = vmatprep.subr.bf16.mxu0 %v14621_v15 }
  0xdd   : > { %v2294_v24 = vor.u32 %v2293_v6, %v2290_v5  ;;  %v2372_v5 = vshll.u32 %v14085_v55, 16  ;;  %v14087_v6 = vld [vmem:[%s14364_s8 + $0x84] sm:$0xff]  }
  0xde   : > { %12589 = vmatmul.mubr.bf16.gmra.mrb[16].mxu0 %v1672_v20  ;;  %v2308_v20 = vrot.slane %v2306_v10, 3  ;;  %v2378_v11 = vshrl.u32 %v14087_v6, 16 }
  0xdf   : > { %12592 = vmatprep.mubr.bf16.mxu0 %v1681_v21  ;;  %v2315_v21 = vshrl.u32 %v14076_v12, 16  ;;  %v2295_v27 = vsel %vm1574_vm2, %v2285_v19, %v2294_v24  ;;  %v2357_v12 = vor.u32 %v2356_v59, %v2353_v58  ;;  %v14088_v19 = vld [vmem:[%s14364_s8 + $0x8c] sm:$0xff]   ;;  %v14116_v58 = vld [vmem:[%s16688_s1 + $0x178] sm:$0xff]   ;;  %v14121_v59 = vld [vmem:[%s16688_s1 + $0x180] sm:$0xff]  }
  0xe0   : > { %v2312_v36 = vor.u32 %v2311_v28, %v2308_v20  ;;  %v2380_v18 = vrot.slane %v2378_v11, 3  ;;  %v2390_v25 = vshll.u32 %v14088_v19, 16 }
  0xe1   : > { %v2317_v30 = vrot.slane %v2315_v21, 3 }
  0xe6   : > { %12593 = vmatmul.mubr.bf16.gmra.mrb[20].mxu0 %v1690_v31  ;;  %v2303_v31 = vor.u32 %v2302_v9, %v2299_v7 }
  0xe7   : > { %12596 = vmatprep.mubr.bf16.mxu0 %v1699_v32  ;;  %v2320_v32 = vrot.slane %v2318_v22, 4  ;;  %v14089_v22 = vld [vmem:[%s14364_s8 + $0x94] sm:$0xff]  }
  0xe8   : > { %v2304_v40 = vsel %vm1574_vm2, %v2294_v24, %v2303_v31  ;;  %v2313_v3 = vsel %vm1574_vm2, %v2303_v31, %v2312_v36  ;;  %v2387_v24 = vshrl.u32 %v14088_v19, 16  ;;  %v2399_v28 = vshll.u32 %v14089_v22, 16 }
  0xe9   : > { %v2321_v49 = vor.u32 %v2320_v32, %v2317_v30  ;;  %v2392_v30 = vrot.slane %v2390_v25, 4  ;;  %v14091_v32 = vld [vmem:[%s14364_s8 + $0x9c] ss:$0 sps:$4 sm:$0xff]   ;;  %v14123_v25 = vld [vmem:[%s14364_s8 + $0x30] sm:$0xff]  }
  0xea   : > { %v2389_v29 = vrot.slane %v2387_v24, 3  ;;  %v2401_v35 = vrot.slane %v2399_v28, 4  ;;  %v2405_v37 = vshrl.u32 %v14091_v32, 16 }
  0xeb   : > { %v2322_v56 = vsel %vm1574_vm2, %v2312_v36, %v2321_v49 }
  0xec   : > { %v2393_v36 = vor.u32 %v2392_v30, %v2389_v29  ;;  %v3438_v29 = vshll.u32 %v14123_v25, 16 }
  0xee   : > { %12597 = vmatmul.mubr.bf16.gmra.mrb[24].mxu0 %v1708_v42  ;;  %v2329_v42 = vrot.slane %v2327_v33, 4 }
  0xef   : > { %12600 = vmatprep.mubr.bf16.mxu0 %v1717_v45  ;;  %v14083_v45 = vld [vmem:[%s16688_s1 + $0x128] sm:$0xff]  }
  0xf0   : > { %v2330_v52 = vor.u32 %v2329_v42, %v2326_v41 }
  0xf2   : > { %v2331_v63 = vsel %vm1574_vm2, %v2321_v49, %v2330_v52  ;;  %v2340_v7 = vsel %vm1574_vm2, %v2330_v52, %v2339_v60  ;;  %v14095_v49 = vld [vmem:[%s14364_s8 + $0x20] sm:$0xff]   ;;  %v14103_v52 = vld [vmem:[%s16688_s1 + $0x158] sm:$0xff]  }
  0xf6   : > { %12601 = vmatmul.mubr.bf16.gmra.mrb[28].mxu0 %v1726_v53  ;;  %v2344_v53 = vrot.slane %v2342_v46, 3 }
  0xf7   : > { %12604 = vmatprep.mubr.bf16.mxu0 %v1735_v54  ;;  %v14084_v54 = vld [vmem:[%s14364_s8 + $0x74] sm:$0xff]  }
  0xf8   : > { %v2360_v62 = vshrl.u32 %v14084_v54, 16  ;;  %v2363_v0 = vshll.u32 %v14084_v54, 16  ;;  %v2348_v4 = vor.u32 %v2347_v57, %v2344_v53  ;;  %v14106_v53 = vld [vmem:[%s16688_s1 + $0x160] sm:$0xff]   ;;  %v14099_v54 = vld [vmem:[%s14364_s8 + $0x38] sm:$0xff]   ;;  %v14112_v57 = vld [vmem:[%s16688_s1 + $0x170] sm:$0xff]  }
  0xfa   : > { %v2362_v8 = vrot.slane %v2360_v62, 3  ;;  %v2365_v9 = vrot.slane %v2363_v0, 4  ;;  %v2349_v10 = vsel %vm1574_vm2, %v2339_v60, %v2348_v4  ;;  %v2358_v20 = vsel %vm1574_vm2, %v2348_v4, %v2357_v12  ;;  %v14105_v60 = vld [vmem:[%s14364_s8 + $0x58] sm:$0xff]   ;;  %v14107_v62 = vld [vmem:[%s14364_s8 + $0x60] sm:$0xff]   ;;  %v14108_v0 = vld [vmem:[%s14364_s8 + $0x68] sm:$0xff]  }
  0xfb   : > { %v14113_v4 = vld [vmem:[%s14364_s8 + $0x80] sm:$0xff]  }
  0xfe   : > { %12605 = vmatmul.mubr.bf16.gmra.mrb[32].mxu0 %v1744_v1  ;;  %v2369_v1 = vshrl.u32 %v14085_v55, 16  ;;  %v14101_v55 = vld [vmem:[%s14364_s8 + $0x40] sm:$0xff]  }
  0xff   : > { %12624 = vmatprep.mubr.bf16.mxu0 %v2259_v2  ;;  %v14094_v2 = vld [vmem:[%s16688_s1 + $0x140] sm:$0xff]  }
 0x106   : > { %12625 = vmatmul.mubr.bf16.vlgmr.msra.gmra.mrb[0].mxu0 %v2268_v14  ;;  %v2374_v14 = vrot.slane %v2372_v5, 4  ;;  %v14118_v5 = vld [vmem:[%s14364_s8 + $0x10] sm:$0xff]  }
 0x107   : > { %12661 = vmatpush3.bf16.msra.mxu0 %v14621_v15  ;;  %12628 = vmatprep.mubr.bf16.mxu0 %v2277_v16  ;;  %v14077_v15 = vld [vmem:[%s16688_s1 + $0x118] sm:$0xff]   ;;  %v2381_v16 = vshll.u32 %v14087_v6, 16 }
 0x108   : > { %12662 = vmatprep.subr.bf16.mxu0 %v14071_v13  ;;  %v14119_v6 = vld [vmem:[%s14364_s8 + $0x18] sm:$0xff]  }
 0x109   : > { %v2383_v21 = vrot.slane %v2381_v16, 4 }
 0x10b   : > { %12663 = vmatpush3.bf16.msra.mxu0 %v14071_v13  ;;  %v2371_v13 = vrot.slane %v2369_v1, 3  ;;  %v14110_v1 = vld [vmem:[%s14364_s8 + $0x70] sm:$0xff]  }
 0x10c   : > { %12664 = vmatprep.subr.bf16.mxu0 %v14074_v17 }
 0x10e   : > { %12629 = vmatmul.mubr.bf16.gmra.mrb[4].mxu0 %v2286_v26  ;;  %v2375_v26 = vor.u32 %v2374_v14, %v2371_v13  ;;  %v14120_v13 = vld [vmem:[%s14364_s8 + $0x20] sm:$0xff]  }
 0x10f   : > { %12632 = vmatprep.mubr.bf16.mxu0 %v2295_v27  ;;  %12665 = vmatpush3.bf16.msra.mxu0 %v14074_v17  ;;  %v2366_v17 = vor.u32 %v2365_v9, %v2362_v8  ;;  %v2396_v27 = vshrl.u32 %v14089_v22, 16  ;;  %v14114_v8 = vld [vmem:[%s14364_s8 + $0x88] sm:$0xff]   ;;  %v14115_v9 = vld [vmem:[%s14364_s8 + $0x90] sm:$0xff]   ;;  %v3422_v19 = vshll.u32 %v14120_v13, 16  ;;  %v3426_v22 = vshrl.u32 %v14120_v13, 16  ;;  %v14143_v13 = vld [vmem:[%s16688_s1 + $0x1b8] sm:$0xff]  }
 0x110   : > { %12666 = vmatprep.subr.bf16.mxu0 %v14077_v15 }
 0x111   : > { %v2367_v23 = vsel %vm1574_vm2, %v2357_v12, %v2366_v17  ;;  %v2376_v31 = vsel %vm1574_vm2, %v2366_v17, %v2375_v26  ;;  %v2398_v34 = vrot.slane %v2396_v27, 3  ;;  %v3414_v12 = vshll.u32 %v14119_v6, 16  ;;  %v14122_v17 = vld [vmem:[%s14364_s8 + $0x28] sm:$0xff]  }
 0x112   : > { %v3424_v24 = vrot.slane %v3422_v19, 1 }
 0x113   : > { %12667 = vmatpush3.bf16.msra.mxu0 %v14077_v15  ;;  %v2384_v15 = vor.u32 %v2383_v21, %v2380_v18  ;;  %v2402_v41 = vor.u32 %v2401_v35, %v2398_v34  ;;  %v3416_v16 = vrot.slane %v3414_v12, 1  ;;  %v14117_v18 = vld [vmem:[%s14364_s8 + $0x98] sm:$0xff]   ;;  %v3442_v34 = vshrl.u32 %v14123_v25, 16 }
 0x114   : > { %12668 = vmatprep.subr.bf16.mxu0 %v14080_v38  ;;  %v3428_v27 = vor.u32 %v3426_v22, %v3424_v24 }
 0x115   : > { %v2385_v33 = vsel %vm1574_vm2, %v2375_v26, %v2384_v15  ;;  %v2394_v43 = vsel %vm1574_vm2, %v2384_v15, %v2393_v36  ;;  %v14125_v15 = vld [vmem:[%s14364_s8 + $0x38] sm:$0xff]  }
 0x116   : > { %12633 = vmatmul.mubr.bf16.gmra.mrb[8].mxu0 %v2304_v40  ;;  %v2407_v40 = vrot.slane %v2405_v37, 3  ;;  %v3446_v35 = vshll.u32 %v14125_v15, 16  ;;  %v14126_v37 = vld [vmem:[%s14364_s8 + $0x40] sm:$0xff]  }
 0x117   : > { %12636 = vmatprep.mubr.bf16.mxu0 %v2313_v3  ;;  %12669 = vmatpush3.bf16.msra.mxu0 %v14080_v38  ;;  %v2408_v38 = vshll.u32 %v14091_v32, 16 }
 0x118   : > { %12670 = vmatprep.subr.bf16.mxu0 %v14083_v45 }
 0x119   : > { %v2410_v42 = vrot.slane %v2408_v38, 4 }
 0x11b   : > { %12671 = vmatpush3.bf16.msra.mxu0 %v14083_v45  ;;  %v2403_v45 = vsel %vm1574_vm2, %v2393_v36, %v2402_v41  ;;  %v2411_v3 = vor.u32 %v2410_v42, %v2407_v40  ;;  %v3440_v36 = vrot.slane %v3438_v29, 1  ;;  %v14127_v40 = vld [vmem:[%s16688_s1 + $0x190] sm:$0xff]   ;;  %v14128_v42 = vld [vmem:[%s14364_s8 + $0x48] sm:$0xff]  }
 0x11c   : > { %12672 = vmatprep.subr.bf16.mxu0 %v14086_v44 }
 0x11d   : > { %v2412_v46 = vsel %vm1574_vm2, %v2402_v41, %v2411_v3  ;;  %v3444_v41 = vor.u32 %v3442_v34, %v3440_v36 }
 0x11e   : > { %12637 = vmatmul.mubr.bf16.gmra.mrb[12].mxu0 %v2322_v56  ;;  %v14109_v56 = vld [vmem:[%s16688_s1 + $0x168] sm:$0xff]  }
 0x11f   : > { %12640 = vmatprep.mubr.bf16.mxu0 %v2331_v63  ;;  %12673 = vmatpush3.bf16.msra.mxu0 %v14086_v44  ;;  %v14098_v44 = vld [vmem:[%s14364_s8 + $0x30] sm:$0xff]  }
 0x120   : > { %12674 = vmatprep.subr.bf16.mxu0 %v14090_v61  ;;  %v14104_v63 = vld [vmem:[%s14364_s8 + $0x50] sm:$0xff]  }
 0x123   : > { %12675 = vmatpush3.bf16.msra.mxu0 %v14090_v61  ;;  %v14102_v61 = vld [vmem:[%s14364_s8 + $0x48] sm:$0xff]  }
 0x124   : > { %12712 = vmatprep.subr.bf16.mxu0 %v14094_v2 }
 0x126   : > { %12641 = vmatmul.mubr.bf16.gmra.mrb[16].mxu0 %v2340_v7  ;;  %v3409_v7 = vshll.u32 %v14118_v5, 16 }
 0x127   : > { %12644 = vmatprep.mubr.bf16.mxu0 %v2349_v10  ;;  %v3407_v10 = vshrl.u32 %v14118_v5, 16  ;;  %v14134_v5 = vld [vmem:[%s14364_s8 + $0x68] sm:$0xff]  }
 0x128   : > { %v3411_v11 = vrot.slane %v3409_v7, 1  ;;  %v3494_v12 = vshll.u32 %v14134_v5, 16 }
 0x12a   : > { %v3412_v14 = vor.u32 %v3411_v11, %v3407_v10  ;;  %v3496_v19 = vrot.slane %v3494_v12, 1 }
 0x12c   : > { %v3417_v21 = vsel %vm3405_vm3, %v3412_v14, %v3416_v16 }
 0x12e   : > { %12645 = vmatmul.mubr.bf16.gmra.mrb[20].mxu0 %v2358_v20  ;;  %v3418_v20 = vshrl.u32 %v14119_v6, 16  ;;  %v14139_v6 = vld [vmem:[%s16688_s1 + $0x1b0] sm:$0xff]  }
 0x12f   : > { %12648 = vmatprep.mubr.bf16.mxu0 %v2367_v23  ;;  %v3430_v23 = vshll.u32 %v14122_v17, 16 }
 0x130   : > { %v3420_v26 = vor.u32 %v3418_v20, %v3416_v16  ;;  %v14135_v16 = vld [vmem:[%s14364_s8 + $0x70] sm:$0xff]   ;;  %v14137_v20 = vld [vmem:[%s14364_s8 + $0x78] sm:$0xff]  }
 0x131   : > { %v3432_v28 = vrot.slane %v3430_v23, 1  ;;  %v3502_v22 = vshll.u32 %v14135_v16, 16 }
 0x132   : > { %v3425_v30 = vsel %vm3405_vm3, %v3420_v26, %v3424_v24  ;;  %v3498_v24 = vshrl.u32 %v14134_v5, 16  ;;  %v3506_v26 = vshrl.u32 %v14135_v16, 16  ;;  %v14150_v16 = vld [vmem:[%s14364_s8 + $0x38] sm:$0xff]  }
 0x133   : > { %v3433_v32 = vsel %vm3405_vm3, %v3428_v27, %v3432_v28  ;;  %v3510_v27 = vshll.u32 %v14137_v20, 16 }
 0x134   : > { %v3500_v29 = vor.u32 %v3498_v24, %v3496_v19 }
 0x136   : > { %12649 = vmatmul.mubr.bf16.gmra.mrb[24].mxu0 %v2376_v31  ;;  %v3434_v31 = vshrl.u32 %v14122_v17, 16 }
 0x137   : > { %12652 = vmatprep.mubr.bf16.mxu0 %v2385_v33  ;;  %v14124_v33 = vld [vmem:[%s16688_s1 + $0x188] sm:$0xff]  }
 0x138   : > { %v3436_v38 = vor.u32 %v3434_v31, %v3432_v28  ;;  %v3504_v28 = vrot.slane %v3502_v22, 1  ;;  %v3512_v31 = vrot.slane %v3510_v27, 1  ;;  %v4084_v22 = vshll.u32 %v14150_v16, 16 }
 0x139   : > { %v4088_v27 = vshrl.u32 %v14150_v16, 16 }
 0x13a   : > { %v3441_v3 = vsel %vm3405_vm3, %v3436_v38, %v3440_v36  ;;  %v3505_v34 = vsel %vm3405_vm3, %v3500_v29, %v3504_v28  ;;  %v14153_v29 = vld [vmem:[%s14364_s8 + $0x48] sm:$0xff]  }
 0x13e   : > { %12653 = vmatmul.mubr.bf16.gmra.mrb[28].mxu0 %v2394_v43  ;;  %v3448_v43 = vrot.slane %v3446_v35, 1  ;;  %v3514_v35 = vshrl.u32 %v14137_v20, 16  ;;  %v14152_v20 = vld [vmem:[%s14364_s8 + $0x40] sm:$0xff]  }
 0x13f   : > { %12656 = vmatprep.mubr.bf16.mxu0 %v2403_v45  ;;  %v3454_v45 = vshll.u32 %v14126_v37, 16 }
 0x146   : > { %12657 = vmatmul.mubr.bf16.gmra.mrb[32].mxu0 %v2412_v46  ;;  %v3450_v46 = vshrl.u32 %v14125_v15, 16  ;;  %v14138_v15 = vld [vmem:[%s14364_s8 + $0x80] sm:$0xff]  }
 0x147   : > { %12676 = vmatprep.mubr.bf16.mxu0 %v14092_v47  ;;  %v3449_v47 = vsel %vm3405_vm3, %v3444_v41, %v3448_v43 }
 0x14e   : > { %12677 = vmatmul.mubr.bf16.vlgmr.msra.gmra.mrb[0].mxu0 %v14093_v48  ;;  %v3458_v48 = vshrl.u32 %v14126_v37, 16  ;;  %v3522_v37 = vshrl.u32 %v14138_v15, 16 }
 0x14f   : > { %12713 = vmatpush3.bf16.msra.mxu0 %v14094_v2  ;;  %12680 = vmatprep.mubr.bf16.mxu0 %v14095_v49  ;;  %v14111_v2 = vld [vmem:[%s14364_s8 + $0x78] sm:$0xff]   ;;  %v3462_v49 = vshll.u32 %v14128_v42, 16 }
 0x150   : > { %12714 = vmatprep.subr.bf16.mxu0 %v14097_v50 }
 0x153   : > { %12715 = vmatpush3.bf16.msra.mxu0 %v14097_v50  ;;  %v14130_v50 = vld [vmem:[%s16688_s1 + $0x198] sm:$0xff]  }
 0x154   : > { %12716 = vmatprep.subr.bf16.mxu0 %v14100_v51 }
 0x156   : > { %12681 = vmatmul.mubr.bf16.gmra.mrb[4].mxu0 %v14096_v39  ;;  %v14129_v39 = vld [vmem:[%s14364_s8 + $0x50] sm:$0xff]  }
 0x157   : > { %12684 = vmatprep.mubr.bf16.mxu0 %v14098_v44  ;;  %12717 = vmatpush3.bf16.msra.mxu0 %v14100_v51  ;;  %v3456_v51 = vrot.slane %v3454_v45, 1  ;;  %v3452_v44 = vor.u32 %v3450_v46, %v3448_v43  ;;  %v14141_v43 = vld [vmem:[%s14364_s8 + $0x90] sm:$0xff]  }
 0x158   : > { %12718 = vmatprep.subr.bf16.mxu0 %v14103_v52  ;;  %v3534_v46 = vshll.u32 %v14141_v43, 16 }
 0x15b   : > { %12719 = vmatpush3.bf16.msra.mxu0 %v14103_v52  ;;  %v3460_v52 = vor.u32 %v3458_v48, %v3456_v51 }
 0x15c   : > { %12720 = vmatprep.subr.bf16.mxu0 %v14106_v53 }
 0x15e   : > { %12685 = vmatmul.mubr.bf16.gmra.mrb[8].mxu0 %v14099_v54  ;;  %v14131_v54 = vld [vmem:[%s14364_s8 + $0x58] sm:$0xff]  }
 0x15f   : > { %12688 = vmatprep.mubr.bf16.mxu0 %v14101_v55  ;;  %12721 = vmatpush3.bf16.msra.mxu0 %v14106_v53  ;;  %v3464_v53 = vrot.slane %v3462_v49, 1  ;;  %v14133_v55 = vld [vmem:[%s16688_s1 + $0x1a0] sm:$0xff]  }
 0x160   : > { %12722 = vmatprep.subr.bf16.mxu0 %v14109_v56 }
 0x163   : > { %12723 = vmatpush3.bf16.msra.mxu0 %v14109_v56  ;;  %v3470_v56 = vshll.u32 %v14129_v39, 16 }
 0x164   : > { %12724 = vmatprep.subr.bf16.mxu0 %v14112_v57 }
 0x166   : > { %12689 = vmatmul.mubr.bf16.gmra.mrb[12].mxu0 %v14102_v61  ;;  %v3466_v61 = vshrl.u32 %v14128_v42, 16 }
 0x167   : > { %12692 = vmatprep.mubr.bf16.mxu0 %v14104_v63  ;;  %12725 = vmatpush3.bf16.msra.mxu0 %v14112_v57  ;;  %v3457_v57 = vsel %vm3405_vm3, %v3452_v44, %v3456_v51  ;;  %v3465_v63 = vsel %vm3405_vm3, %v3460_v52, %v3464_v53  ;;  %v3536_v44 = vrot.slane %v3534_v46, 1 }
 0x168   : > { %12726 = vmatprep.subr.bf16.mxu0 %v14116_v58 }
 0x16b   : > { %12727 = vmatpush3.bf16.msra.mxu0 %v14116_v58  ;;  %v3474_v58 = vshrl.u32 %v14129_v39, 16  ;;  %v14145_v39 = vld [vmem:[%s14364_s8 + $0x18] sm:$0xff]  }
 0x16c   : > { %12764 = vmatprep.subr.bf16.mxu0 %v14121_v59 }
 0x16e   : > { %12693 = vmatmul.mubr.bf16.gmra.mrb[16].mxu0 %v14105_v60  ;;  %v14136_v60 = vld [vmem:[%s16688_s1 + $0x1a8] sm:$0xff]  }
 0x16f   : > { %12696 = vmatprep.mubr.bf16.mxu0 %v14107_v62  ;;  %v3472_v62 = vrot.slane %v3470_v56, 1  ;;  %v14146_v56 = vld [vmem:[%s14364_s8 + $0x20] sm:$0xff]  }
 0x176   : > { %12697 = vmatmul.mubr.bf16.gmra.mrb[20].mxu0 %v14108_v0  ;;  %v14132_v0 = vld [vmem:[%s14364_s8 + $0x60] sm:$0xff]  }
 0x177   : > { %12700 = vmatprep.mubr.bf16.mxu0 %v14110_v1  ;;  %v3468_v1 = vor.u32 %v3466_v61, %v3464_v53  ;;  %v3486_v7 = vshll.u32 %v14132_v0, 16  ;;  %v3490_v11 = vshrl.u32 %v14132_v0, 16  ;;  %v14144_v53 = vld [vmem:[%s14364_s8 + $0xa0] ss:$0 sps:$4 sm:$0x11]   ;;  %v4060_v0 = vshll.u32 %v14146_v56, 16 }
 0x179   : > { %v3488_v14 = vrot.slane %v3486_v7, 1  ;;  %v14149_v7 = vld [vmem:[%s14364_s8 + $0x30] sm:$0xff]  }
 0x17a   : > { %v4080_v24 = vshrl.u32 %v14149_v7, 16 }
 0x17e   : > { %12701 = vmatmul.mubr.bf16.gmra.mrb[24].mxu0 %v14111_v2  ;;  %v3476_v2 = vor.u32 %v3474_v58, %v3472_v62  ;;  %v3550_v58 = vshll.u32 %v14144_v53, 16  ;;  %v14163_v53 = vld [vmem:[%s16688_s1 + $0x1e8] sm:$0xff]  }
 0x17f   : > { %12704 = vmatprep.mubr.bf16.mxu0 %v14113_v4 }
 0x186   : > { %12705 = vmatmul.mubr.bf16.gmra.mrb[28].mxu0 %v14114_v8  ;;  %v3473_v8 = vsel %vm3405_vm3, %v3468_v1, %v3472_v62  ;;  %v14147_v1 = vld [vmem:[%s14364_s8 + $0x28] sm:$0xff]  }
 0x187   : > { %12708 = vmatprep.mubr.bf16.mxu0 %v14115_v9  ;;  %v3482_v9 = vshrl.u32 %v14131_v54, 16  ;;  %v4072_v12 = vshrl.u32 %v14147_v1, 16 }
 0x18e   : > { %12709 = vmatmul.mubr.bf16.gmra.mrb[32].mxu0 %v14117_v18  ;;  %v3492_v18 = vor.u32 %v3490_v11, %v3488_v14 }
 0x18f   : > { %12728 = vmatprep.mubr.bf16.mxu0 %v3417_v21  ;;  %v14792_v21 = vld [vmem:[%s16688_s1 + $0x1c0] sm:$0xff]  }
 0x190   : > { %v3497_v25 = vsel %vm3405_vm3, %v3492_v18, %v3496_v19 }
 0x196   : > { %12729 = vmatmul.mubr.bf16.vlgmr.msra.gmra.mrb[0].mxu0 %v3425_v30  ;;  %v3508_v30 = vor.u32 %v3506_v26, %v3504_v28  ;;  %v14151_v26 = vld [vmem:[%s16688_s1 + $0x1c8] sm:$0xff]   ;;  %v4092_v28 = vshll.u32 %v14152_v20, 16 }
 0x197   : > { %12765 = vmatpush3.bf16.msra.mxu0 %v14121_v59  ;;  %12732 = vmatprep.mubr.bf16.mxu0 %v3433_v32  ;;  %v3478_v59 = vshll.u32 %v14131_v54, 16  ;;  %v14140_v32 = vld [vmem:[%s14364_s8 + $0x88] sm:$0xff]  }
 0x198   : > { %12766 = vmatprep.subr.bf16.mxu0 %v14124_v33  ;;  %v3513_v36 = vsel %vm3405_vm3, %v3508_v30, %v3512_v31  ;;  %v3526_v38 = vshll.u32 %v14140_v32, 16  ;;  %v3530_v48 = vshrl.u32 %v14140_v32, 16  ;;  %v4094_v32 = vrot.slane %v4092_v28, 1 }
 0x199   : > { %v3480_v4 = vrot.slane %v3478_v59, 1 }
 0x19a   : > { %v3528_v45 = vrot.slane %v3526_v38, 1 }
 0x19b   : > { %12767 = vmatpush3.bf16.msra.mxu0 %v14124_v33  ;;  %v3481_v10 = vsel %vm3405_vm3, %v3476_v2, %v3480_v4  ;;  %v3484_v17 = vor.u32 %v3482_v9, %v3480_v4  ;;  %v3518_v33 = vshll.u32 %v14138_v15, 16  ;;  %v3552_v4 = vrot.slane %v3550_v58, 1  ;;  %v14166_v58 = vld [vmem:[%s16688_s1 + $0x1f0] sm:$0xff]  }
 0x19c   : > { %12768 = vmatprep.subr.bf16.mxu0 %v14127_v40  ;;  %v3532_v52 = vor.u32 %v3530_v48, %v3528_v45  ;;  %v4086_v15 = vrot.slane %v4084_v22, 1  ;;  %v14160_v48 = vld [vmem:[%s16688_s1 + $0x1e0] sm:$0xff]  }
 0x19d   : > { %v3489_v23 = vsel %vm3405_vm3, %v3484_v17, %v3488_v14  ;;  %v3520_v41 = vrot.slane %v3518_v33, 1  ;;  %v14154_v33 = vld [vmem:[%s16688_s1 + $0x1d0] sm:$0xff]   ;;  %v255_v22 = vld [vmem:[%s16692_s5] sm:$0xff] }
 0x19e   : > { %12733 = vmatmul.mubr.bf16.gmra.mrb[4].mxu0 %v3441_v3  ;;  %v14142_v3 = vld [vmem:[%s14364_s8 + $0x98] sm:$0xff]   ;;  %v3537_v61 = vsel %vm3405_vm3, %v3532_v52, %v3536_v44 }
 0x19f   : > { %12736 = vmatprep.mubr.bf16.mxu0 %v3449_v47  ;;  %12769 = vmatpush3.bf16.msra.mxu0 %v14127_v40  ;;  %v3516_v40 = vor.u32 %v3514_v35, %v3512_v31  ;;  %v3524_v42 = vor.u32 %v3522_v37, %v3520_v41  ;;  %v3542_v51 = vshll.u32 %v14142_v3, 16  ;;  %v4090_v31 = vor.u32 %v4088_v27, %v4086_v15  ;;  %v14167_v27 = vld [vmem:[%s14364_s8 + $0x90] sm:$0xff]  }
 0x1a0   : > { %12770 = vmatprep.subr.bf16.mxu0 %v14130_v50  ;;  %v4100_v35 = vshll.u32 %v14153_v29, 16  ;;  %v4096_v37 = vshrl.u32 %v14152_v20, 16  ;;  %v14165_v20 = vld [vmem:[%s14364_s8 + $0x88] sm:$0xff]  }
 0x1a1   : > { %v3521_v47 = vsel %vm3405_vm3, %v3516_v40, %v3520_v41  ;;  %v3529_v49 = vsel %vm3405_vm3, %v3524_v42, %v3528_v45  ;;  %v4095_v38 = vsel %vm3405_vm3, %v4090_v31, %v4094_v32  ;;  %v14156_v42 = vld [vmem:[%s14364_s8 + $0x58] sm:$0xff]   ;;  %v4164_v28 = vshll.u32 %v14165_v20, 16 }
 0x1a2   : > { %v4102_v40 = vrot.slane %v4100_v35, 1  ;;  %v4098_v45 = vor.u32 %v4096_v37, %v4094_v32  ;;  %v4168_v31 = vshrl.u32 %v14165_v20, 16  ;;  %v4172_v32 = vshll.u32 %v14167_v27, 16  ;;  %v257_v35 = vld [vmem:[%s16692_s5 + $0x10] sm:$0xff]  ;;  %v14177_v20 = vld [vmem:[%s14364_s8 + $0x38] sm:$0xff]  }
 0x1a3   : > { %12771 = vmatpush3.bf16.msra.mxu0 %v14130_v50  ;;  %v3538_v50 = vshrl.u32 %v14141_v43, 16  ;;  %v14157_v43 = vld [vmem:[%s16688_s1 + $0x1d8] sm:$0xff]  }
 0x1a4   : > { %12772 = vmatprep.subr.bf16.mxu0 %v14133_v55 }
 0x1a5   : > { %v3540_v54 = vor.u32 %v3538_v50, %v3536_v44  ;;  %v4103_v50 = vsel %vm3405_vm3, %v4098_v45, %v4102_v40  ;;  %v4120_v44 = vshrl.u32 %v14156_v42, 16 }
 0x1a6   : > { %12737 = vmatmul.mubr.bf16.gmra.mrb[8].mxu0 %v3457_v57  ;;  %v4055_v57 = vshll.u32 %v14145_v39, 16 }
 0x1a7   : > { %12740 = vmatprep.mubr.bf16.mxu0 %v3465_v63  ;;  %12773 = vmatpush3.bf16.msra.mxu0 %v14133_v55  ;;  %v3544_v55 = vrot.slane %v3542_v51, 1  ;;  %v3546_v63 = vshrl.u32 %v14142_v3, 16 }
 0x1a8   : > { %12774 = vmatprep.subr.bf16.mxu0 %v14136_v60  ;;  %v4057_v62 = vrot.slane %v4055_v57, 1 }
 0x1a9   : > { %v3545_v59 = vsel %vm3405_vm3, %v3540_v54, %v3544_v55  ;;  %v3548_v2 = vor.u32 %v3546_v63, %v3544_v55  ;;  %v14159_v55 = vld [vmem:[%s14364_s8 + $0x68] sm:$0xff]   ;;  %v14161_v63 = vld [vmem:[%s14364_s8 + $0x70] sm:$0xff]  }
 0x1ab   : > { %12775 = vmatpush3.bf16.msra.mxu0 %v14136_v60  ;;  %v4053_v60 = vshrl.u32 %v14145_v39, 16  ;;  %v3553_v9 = vsel %vm3405_vm3, %v3548_v2, %v3552_v4  ;;  %v4140_v2 = vshll.u32 %v14161_v63, 16  ;;  %v14170_v4 = vld [vmem:[%s16688_s1 + $0x1f8] sm:$0xff]  }
 0x1ac   : > { %12776 = vmatprep.subr.bf16.mxu0 %v14139_v6 }
 0x1ad   : > { %v4058_v5 = vor.u32 %v4057_v62, %v4053_v60 }
 0x1ae   : > { %12741 = vmatmul.mubr.bf16.gmra.mrb[12].mxu0 %v3473_v8  ;;  %v4068_v8 = vshll.u32 %v14147_v1, 16  ;;  %v4136_v1 = vshrl.u32 %v14159_v55, 16 }
 0x1af   : > { %12744 = vmatprep.mubr.bf16.mxu0 %v3481_v10  ;;  %12777 = vmatpush3.bf16.msra.mxu0 %v14139_v6  ;;  %v4062_v6 = vrot.slane %v4060_v0, 1  ;;  %v4064_v10 = vshrl.u32 %v14146_v56, 16 }
 0x1b0   : > { %12778 = vmatprep.subr.bf16.mxu0 %v14143_v13  ;;  %v4070_v14 = vrot.slane %v4068_v8, 1 }
 0x1b1   : > { %v4063_v11 = vsel %vm3405_vm3, %v4058_v5, %v4062_v6  ;;  %v4066_v17 = vor.u32 %v4064_v10, %v4062_v6  ;;  %v14162_v6 = vld [vmem:[%s14364_s8 + $0x78] sm:$0xff]   ;;  %v14164_v10 = vld [vmem:[%s14364_s8 + $0x80] sm:$0xff]  }
 0x1b2   : > { %v4074_v18 = vor.u32 %v4072_v12, %v4070_v14  ;;  %v4148_v12 = vshll.u32 %v14162_v6, 16 }
 0x1b3   : > { %12779 = vmatpush3.bf16.msra.mxu0 %v14143_v13  ;;  %v4076_v13 = vshll.u32 %v14149_v7, 16 }
 0x1b4   : > { %12816 = vmatprep.subr.bf16.mxu0 %v14792_v21 }
 0x1b5   : > { %v4078_v19 = vrot.slane %v4076_v13, 1 }
 0x1b6   : > { %12745 = vmatmul.mubr.bf16.gmra.mrb[16].mxu0 %v3489_v23  ;;  %v4071_v23 = vsel %vm3405_vm3, %v4066_v17, %v4070_v14  ;;  %v4144_v14 = vshrl.u32 %v14161_v63, 16  ;;  %v4152_v17 = vshrl.u32 %v14162_v6, 16  ;;  %v267_v6 = vld [vmem:[%s16692_s5 + $0x60] sm:$0xff] }
 0x1b7   : > { %12748 = vmatprep.mubr.bf16.mxu0 %v3497_v25  ;;  %v4079_v25 = vsel %vm3405_vm3, %v4074_v18, %v4078_v19  ;;  %v4082_v30 = vor.u32 %v4080_v24, %v4078_v19  ;;  %v4156_v18 = vshll.u32 %v14164_v10, 16  ;;  %v4150_v19 = vrot.slane %v4148_v12, 1  ;;  %v268_v12 = vld [vmem:[%s16692_s5 + $0x68] sm:$0xff] }
 0x1b8   : > { %v14303_v24 = vmov 0  }
 0x1b9   : > { %13974 = vset.pattern.permute.xlu0 %v14303_v24  ;;  %11070 = vst [vmem:[%s14868_s15] sm:$0xf] %v14303_v24  ;;  %11071 = vst [vmem:[%s14868_s15 + $0x4] sm:$0xf] %v14303_v24  ;;  %13975 = vset.pattern.permute.xlu1 %v14303_v24 }
 0x1ba   : > { %11072 = vst [vmem:[%s14868_s15 + $0x8] sm:$0xf] %v14303_v24  ;;  %11073 = vst [vmem:[%s14868_s15 + $0xc] sm:$0xf] %v14303_v24  ;;  %5914 = vperm.xlu0 %13974, %v255_v22   ;;  %5924 = vperm.xlu1 %13975, %v257_v35   ;;  %v14184_v35 = vld [vmem:[%s16688_s1 + $0x218] sm:$0xff]  }
 0x1bb   : > { %11074 = vst [vmem:[%s14868_s15 + $0xa0] sm:$0xf] %v14303_v24  ;;  %11075 = vst [vmem:[%s14868_s15 + $0xa4] sm:$0xf] %v14303_v24 }
 0x1bc   : > { %11076 = vst [vmem:[%s14868_s15 + $0xa8] sm:$0xf] %v14303_v24  ;;  %11077 = vst [vmem:[%s14868_s15 + $0xac] sm:$0xf] %v14303_v24 }
 0x1bd   : > { %291 = vst [vmem:[#allocation3] sm:$0xff] %v14303_v24  ;;  %292 = vst [vmem:[#allocation3 + $0x8] sm:$0xff] %v14303_v24 }
 0x1be   : > { %12749 = vmatmul.mubr.bf16.gmra.mrb[20].mxu0 %v3505_v34  ;;  %v14155_v34 = vld [vmem:[%s14364_s8 + $0x50] sm:$0xff]   ;;  %293 = vst [vmem:[#allocation3 + $0xa0] sm:$0xff] %v14303_v24  ;;  %294 = vst [vmem:[#allocation3 + $0xa8] sm:$0xff] %v14303_v24 }
 0x1bf   : > { %12752 = vmatprep.mubr.bf16.mxu0 %v3513_v36  ;;  %v4087_v36 = vsel %vm3405_vm3, %v4082_v30, %v4086_v15  ;;  %v4108_v41 = vshll.u32 %v14155_v34, 16  ;;  %v4112_v51 = vshrl.u32 %v14155_v34, 16  ;;  %v14168_v34 = vld [vmem:[%s14364_s8 + $0x98] sm:$0xff]  }
 0x1c1   : > { %v4110_v46 = vrot.slane %v4108_v41, 1  ;;  %v14169_v41 = vld [vmem:[%s14364_s8 + $0xa0] sm:$0xff]  }
 0x1c3   : > { %v4114_v56 = vor.u32 %v4112_v51, %v4110_v46  ;;  %v261_v51 = vld [vmem:[%s16692_s5 + $0x30] sm:$0xff] }
 0x1c6   : > { %12753 = vmatmul.mubr.bf16.gmra.mrb[24].mxu0 %v3521_v47  ;;  %v14158_v47 = vld [vmem:[%s14364_s8 + $0x60] sm:$0xff]  }
 0x1c7   : > { %12756 = vmatprep.mubr.bf16.mxu0 %v3529_v49  ;;  %v4116_v49 = vshll.u32 %v14156_v42, 16  ;;  %v4124_v52 = vshll.u32 %v14158_v47, 16  ;;  %v4128_v62 = vshrl.u32 %v14158_v47, 16  ;;  %v4180_v42 = vshll.u32 %v14168_v34, 16 }
 0x1c8   : > { %v4184_v47 = vshrl.u32 %v14168_v34, 16  ;;  %v14182_v34 = vld [vmem:[%s14364_s8 + $0x50] sm:$0xff]  }
 0x1c9   : > { %v4118_v54 = vrot.slane %v4116_v49, 1  ;;  %v4182_v49 = vrot.slane %v4180_v42, 1 }
 0x1cb   : > { %v4122_v57 = vor.u32 %v4120_v44, %v4118_v54  ;;  %v4119_v60 = vsel %vm3405_vm3, %v4114_v56, %v4118_v54  ;;  %v14171_v44 = vld [vmem:[%s14364_s8 + $0xa8] ss:$0 sps:$4 sm:$0x11]   ;;  %v262_v54 = vld [vmem:[%s16692_s5 + $0x38] sm:$0xff] }
 0x1ce   : > { %12757 = vmatmul.mubr.bf16.gmra.mrb[28].mxu0 %v3537_v61  ;;  %v4126_v61 = vrot.slane %v4124_v52, 1  ;;  %v4186_v52 = vor.u32 %v4184_v47, %v4182_v49  ;;  %v14190_v47 = vld [vmem:[%s16688_s1 + $0x228] sm:$0xff]  }
 0x1cf   : > { %12760 = vmatprep.mubr.bf16.mxu0 %v3545_v59  ;;  %v4132_v59 = vshll.u32 %v14159_v55, 16  ;;  %v263_v55 = vld [vmem:[%s16692_s5 + $0x40] sm:$0xff] }
 0x1d0   : > { %v4127_v0 = vsel %vm3405_vm3, %v4122_v57, %v4126_v61  ;;  %v4130_v7 = vor.u32 %v4128_v62, %v4126_v61  ;;  %v4192_v57 = vshrl.u32 %v14169_v41, 16  ;;  %v4196_v61 = vshll.u32 %v14171_v44, 16  ;;  %v265_v62 = vld [vmem:[%s16692_s5 + $0x50] sm:$0xff]  ;;  %v282_v44 = vld [vmem:[%s16692_s5 + $0xd8] sm:$0xff] }
 0x1d1   : > { %v4134_v5 = vrot.slane %v4132_v59, 1  ;;  %v14173_v59 = vld [vmem:[%s14364_s8 + $0x20] sm:$0xff]  }
 0x1d3   : > { %v4138_v8 = vor.u32 %v4136_v1, %v4134_v5  ;;  %v4135_v13 = vsel %vm3405_vm3, %v4130_v7, %v4134_v5  ;;  %v4198_v1 = vrot.slane %v4196_v61, 1  ;;  %v266_v5 = vld [vmem:[%s16692_s5 + $0x58] sm:$0xff]  ;;  %v14218_v61 = vld [vmem:[%s16689_s2] sm:$0xff]  }
 0x1d4   : > { %12920 = vmatprep.subr.bf16.mxu1 %v14218_v61 }
 0x1d5   : > { %12921 = vmatpush3.bf16.msra.mxu1 %v14218_v61 }
 0x1d6   : > { %12761 = vmatmul.mubr.bf16.gmra.mrb[32].mxu0 %v3553_v9  ;;  %v4142_v9 = vrot.slane %v4140_v2, 1 }
 0x1d7   : > { %12780 = vmatprep.mubr.bf16.mxu0 %v4063_v11  ;;  %v14857_v11 = vld [vmem:[%s16688_s1 + $0x200] sm:$0xff]  }
 0x1d8   : > { %v4143_v16 = vsel %vm3405_vm3, %v4138_v8, %v4142_v9  ;;  %v14174_v8 = vld [vmem:[%s14364_s8 + $0x28] sm:$0xff]  }
 0x1de   : > { %12781 = vmatmul.mubr.bf16.vlgmr.msra.gmra.mrb[0].mxu0 %v4071_v23  ;;  %v4146_v23 = vor.u32 %v4144_v14, %v4142_v9  ;;  %v4702_v14 = vrot.slane %v14174_v8, 1 }
 0x1df   : > { %12817 = vmatpush3.bf16.msra.mxu0 %v14792_v21  ;;  %12784 = vmatprep.mubr.bf16.mxu0 %v4079_v25  ;;  %v4104_v21 = vshrl.u32 %v14153_v29, 16  ;;  %v4154_v25 = vor.u32 %v4152_v17, %v4150_v19  ;;  %v4160_v29 = vshrl.u32 %v14164_v10, 16  ;;  %v14176_v10 = vld [vmem:[%s14364_s8 + $0x30] sm:$0xff]   ;;  %v270_v17 = vld [vmem:[%s16692_s5 + $0x78] sm:$0xff] }
 0x1e0   : > { %12818 = vmatprep.subr.bf16.mxu0 %v14151_v26  ;;  %v4151_v15 = vsel %vm3405_vm3, %v4146_v23, %v4150_v19  ;;  %v14178_v23 = vld [vmem:[%s16688_s1 + $0x208] sm:$0xff]  }
 0x1e1   : > { %v4106_v3 = vor.u32 %v4104_v21, %v4102_v40  ;;  %v4174_v21 = vrot.slane %v4172_v32, 1  ;;  %v259_v40 = vld [vmem:[%s16692_s5 + $0x20] sm:$0xff]  ;;  %v14180_v32 = vld [vmem:[%s14364_s8 + $0x48] sm:$0xff]  }
 0x1e3   : > { %12819 = vmatpush3.bf16.msra.mxu0 %v14151_v26  ;;  %v4111_v39 = vsel %vm3405_vm3, %v4106_v3, %v4110_v46  ;;  %v4158_v26 = vrot.slane %v4156_v18, 1  ;;  %v4176_v3 = vshrl.u32 %v14167_v27, 16  ;;  %v271_v18 = vld [vmem:[%s16692_s5 + $0x80] sm:$0xff]  ;;  %v273_v27 = vld [vmem:[%s16692_s5 + $0x90] sm:$0xff] }
 0x1e4   : > { %12820 = vmatprep.subr.bf16.mxu0 %v14154_v33 }
 0x1e5   : > { %v4159_v30 = vsel %vm3405_vm3, %v4154_v25, %v4158_v26  ;;  %v4162_v37 = vor.u32 %v4160_v29, %v4158_v26  ;;  %v14179_v25 = vld [vmem:[%s14364_s8 + $0x40] sm:$0xff]   ;;  %v272_v26 = vld [vmem:[%s16692_s5 + $0x88] sm:$0xff]  ;;  %v14181_v29 = vld [vmem:[%s16688_s1 + $0x210] sm:$0xff]  }
 0x1e6   : > { %12785 = vmatmul.mubr.bf16.gmra.mrb[4].mxu0 %v4087_v36  ;;  %v256_v36 = vld [vmem:[%s16692_s5 + $0x8] sm:$0xff] }
 0x1e7   : > { %12788 = vmatprep.mubr.bf16.mxu0 %v4095_v38  ;;  %12821 = vmatpush3.bf16.msra.mxu0 %v14154_v33  ;;  %v4166_v33 = vrot.slane %v4164_v28, 1  ;;  %v4706_v28 = vrot.slane %v14177_v20, 1  ;;  %v14195_v20 = vld [vmem:[%s14364_s8 + $0x98] sm:$0xff]  }
 0x1e8   : > { %12822 = vmatprep.subr.bf16.mxu0 %v14157_v43  ;;  %5919 = vperm.xlu0 %13974, %v256_v36   ;;  %v276_v36 = vld [vmem:[%s16692_s5 + $0xa8] sm:$0xff] }
 0x1e9   : > { %v4170_v38 = vor.u32 %v4168_v31, %v4166_v33  ;;  %v4167_v45 = vsel %vm3405_vm3, %v4162_v37, %v4166_v33  ;;  %v275_v31 = vld [vmem:[%s16692_s5 + $0xa0] sm:$0xff]  ;;  %v277_v37 = vld [vmem:[%s16692_s5 + $0xb0] sm:$0xff] }
 0x1eb   : > { %12823 = vmatpush3.bf16.msra.mxu0 %v14157_v43  ;;  %v258_v43 = vld [vmem:[%s16692_s5 + $0x18] sm:$0xff]  ;;  %v4175_v46 = vsel %vm3405_vm3, %v4170_v38, %v4174_v21  ;;  %v4710_v38 = vrot.slane %v14180_v32, 1 }
 0x1ec   : > { %12824 = vmatprep.subr.bf16.mxu0 %v14160_v48  ;;  %5929 = vperm.xlu1 %13975, %v258_v43   ;;  %v278_v43 = vld [vmem:[%s16692_s5 + $0xb8] sm:$0xff] }
 0x1ed   : > { %5934 = vperm.xlu0 %13974, %v259_v40   ;;  %v279_v40 = vld [vmem:[%s16692_s5 + $0xc0] sm:$0xff] }
 0x1ee   : > { %12789 = vmatmul.mubr.bf16.gmra.mrb[8].mxu0 %v4103_v50  ;;  %v260_v50 = vld [vmem:[%s16692_s5 + $0x28] sm:$0xff] }
 0x1ef   : > { %12792 = vmatprep.mubr.bf16.mxu0 %v4111_v39  ;;  %12825 = vmatpush3.bf16.msra.mxu0 %v14160_v48  ;;  %v4188_v48 = vshll.u32 %v14169_v41, 16  ;;  %v4178_v39 = vor.u32 %v4176_v3, %v4174_v21  ;;  %v4712_v21 = vrot.slane %v14182_v34, 1  ;;  %v14187_v41 = vld [vmem:[%s16688_s1 + $0x220] sm:$0xff]   ;;  %v14201_v34 = vld [vmem:[%s14364_s8 + $0x28] sm:$0xff]  }
 0x1f0   : > { %12826 = vmatprep.subr.bf16.mxu0 %v14163_v53  ;;  %5939 = vperm.xlu1 %13975, %v260_v50  }
 0x1f1   : > { %5944 = vperm.xlu0 %13974, %v261_v51   ;;  %v4183_v56 = vsel %vm3405_vm3, %v4178_v39, %v4182_v49  ;;  %v4713_v3 = vsel %vm4698_vm4, %v4710_v38, %v4712_v21  ;;  %v281_v49 = vld [vmem:[%s16692_s5 + $0xd0] sm:$0xff] }
 0x1f2   : > { %v14193_v39 = vld [vmem:[%s16688_s1 + $0x230] sm:$0xff]  }
 0x1f3   : > { %12827 = vmatpush3.bf16.msra.mxu0 %v14163_v53  ;;  %v4190_v53 = vrot.slane %v4188_v48, 1  ;;  %v280_v48 = vld [vmem:[%s16692_s5 + $0xc8] sm:$0xff] }
 0x1f4   : > { %12828 = vmatprep.subr.bf16.mxu0 %v14166_v58  ;;  %5949 = vperm.xlu1 %13975, %v262_v54   ;;  %v14186_v54 = vld [vmem:[%s14364_s8 + $0x68] sm:$0xff]  }
 0x1f5   : > { %v4191_v63 = vsel %vm3405_vm3, %v4186_v52, %v4190_v53  ;;  %5954 = vperm.xlu0 %13974, %v263_v55   ;;  %v283_v52 = vld [vmem:[%s16692_s5 + $0xe0] sm:$0xff] }
 0x1f6   : > { %12793 = vmatmul.mubr.bf16.gmra.mrb[12].mxu0 %v4119_v60  ;;  %v264_v60 = vld [vmem:[%s16692_s5 + $0x48] sm:$0xff] }
 0x1f7   : > { %12796 = vmatprep.mubr.bf16.mxu0 %v4127_v0  ;;  %12829 = vmatpush3.bf16.msra.mxu0 %v14166_v58  ;;  %v14172_v58 = vld [vmem:[%s14364_s8 + $0x18] sm:$0xfe]   ;;  %v4194_v0 = vor.u32 %v4192_v57, %v4190_v53 }
 0x1f8   : > { %12830 = vmatprep.subr.bf16.mxu0 %v14170_v4  ;;  %5959 = vperm.xlu1 %13975, %v264_v60   ;;  %v4699_v2 = vrot.slane %v14172_v58, 1  ;;  %v14197_v57 = vld [vmem:[%s16688_s1 + $0x238] sm:$0xff]   ;;  %v285_v58 = vld [vmem:[%s16692_s5 + $0xf0] sm:$0xff] }
 0x1f9   : > { %5964 = vperm.xlu0 %13974, %v265_v62   ;;  %v4199_v7 = vsel %vm3405_vm3, %v4194_v0, %v4198_v1  ;;  %v286_v62 = vld [vmem:[%s16692_s5 + $0xf8] sm:$0xff]  ;;  %v287_v0 = vld [vmem:[%s16692_s5 + $0x100] sm:$0xff] }
 0x1fb   : > { %12831 = vmatpush3.bf16.msra.mxu0 %v14170_v4  ;;  %v4700_v4 = vrot.slane %v14173_v59, 1  ;;  %v4718_v59 = vrot.slane %v14186_v54, 1 }
 0x1fc   : > { %12868 = vmatprep.subr.bf16.mxu0 %v14857_v11  ;;  %5969 = vperm.xlu1 %13975, %v266_v5   ;;  %v14191_v5 = vld [vmem:[%s14364_s8 + $0x80] sm:$0xff]  }
 0x1fd   : > { %v4701_v9 = vsel %vm4698_vm4, %v4699_v2, %v4700_v4  ;;  %5974 = vperm.xlu0 %13974, %v267_v6   ;;  %v4703_v19 = vsel %vm4698_vm4, %v4700_v4, %v4702_v14  ;;  %v14189_v2 = vld [vmem:[%s14364_s8 + $0x78] sm:$0xff]   ;;  %v288_v6 = vld [vmem:[%s16692_s5 + $0x108] sm:$0xff] }
 0x1fe   : > { %12797 = vmatmul.mubr.bf16.gmra.mrb[16].mxu0 %v4135_v13  ;;  %v269_v13 = vld [vmem:[%s16692_s5 + $0x70] sm:$0xff]  ;;  %v4722_v8 = vrot.slane %v14189_v2, 1 }
 0x1ff   : > { %12800 = vmatprep.mubr.bf16.mxu0 %v4143_v16  ;;  %v4704_v16 = vrot.slane %v14176_v10, 1  ;;  %v290_v10 = vld [vmem:[%s16692_s5 + $0x118] sm:$0xff]  ;;  %v14206_v2 = vld [vmem:[%s14364_s8 + $0x50] sm:$0xff]  }
 0x200   : > { %5979 = vperm.xlu1 %13975, %v268_v12  }
 0x201   : > { %5984 = vperm.xlu0 %13974, %v269_v13   ;;  %v4705_v22 = vsel %vm4698_vm4, %v4702_v14, %v4704_v16  ;;  %v14192_v13 = vld [vmem:[%s14364_s8 + $0x88] sm:$0xff]  }
 0x204   : > { %5989 = vperm.xlu1 %13975, %v270_v17   ;;  %v4726_v17 = vrot.slane %v14192_v13, 1 }
 0x205   : > { %5994 = vperm.xlu0 %13974, %v271_v18  }
 0x206   : > { %12801 = vmatmul.mubr.bf16.gmra.mrb[20].mxu0 %v4151_v15  ;;  %v4708_v15 = vrot.slane %v14179_v25, 1  ;;  %v14199_v25 = vld [vmem:[%s14364_s8 + $0x18] sm:$0xfe]  }
 0x207   : > { %12804 = vmatprep.mubr.bf16.mxu0 %v4159_v30  ;;  %v274_v30 = vld [vmem:[%s16692_s5 + $0x98] sm:$0xff] }
 0x208   : > { %5999 = vperm.xlu1 %13975, %v272_v26   ;;  %v4709_v33 = vsel %vm4698_vm4, %v4706_v28, %v4708_v15  ;;  %v4711_v42 = vsel %vm4698_vm4, %v4708_v15, %v4710_v38  ;;  %v14200_v26 = vld [vmem:[%s14364_s8 + $0x20] sm:$0xff]   ;;  %v5236_v15 = vshrl.u32 %v14199_v25, 16 }
 0x209   : > { %6004 = vperm.xlu0 %13974, %v273_v27   ;;  %v4730_v27 = vrot.slane %v14195_v20, 1 }
 0x20c   : > { %6009 = vperm.xlu1 %13975, %v274_v30   ;;  %v5244_v30 = vshrl.u32 %v14200_v26, 16 }
 0x20d   : > { %6014 = vperm.xlu0 %13974, %v275_v31   ;;  %v5247_v31 = vshll.u32 %v14200_v26, 16 }
 0x20e   : > { %12805 = vmatmul.mubr.bf16.gmra.mrb[24].mxu0 %v4167_v45  ;;  %v14183_v45 = vld [vmem:[%s14364_s8 + $0x58] sm:$0xff]  }
 0x20f   : > { %12808 = vmatprep.mubr.bf16.mxu0 %v4175_v46  ;;  %v14185_v46 = vld [vmem:[%s14364_s8 + $0x60] sm:$0xff]   ;;  %v4714_v50 = vrot.slane %v14183_v45, 1  ;;  %v5249_v38 = vrot.slane %v5247_v31, 2 }
 0x210   : > { %6019 = vperm.xlu1 %13975, %v276_v36   ;;  %v4716_v51 = vrot.slane %v14185_v46, 1 }
 0x211   : > { %6024 = vperm.xlu0 %13974, %v277_v37   ;;  %v4715_v53 = vsel %vm4698_vm4, %v4712_v21, %v4714_v50  ;;  %v5246_v37 = vrot.slane %v5244_v30, 1  ;;  %v14202_v21 = vld [vmem:[%s14364_s8 + $0x30] sm:$0xff]   ;;  %v14209_v30 = vld [vmem:[%s14364_s8 + $0x68] sm:$0xff]  }
 0x212   : > { %v4717_v55 = vsel %vm4698_vm4, %v4714_v50, %v4716_v51  ;;  %v4719_v1 = vsel %vm4698_vm4, %v4716_v51, %v4718_v59  ;;  %v5265_v46 = vshll.u32 %v14202_v21, 16  ;;  %v14203_v50 = vld [vmem:[%s14364_s8 + $0x38] sm:$0xff]  }
 0x213   : > { %v5250_v45 = vor.u32 %v5249_v38, %v5246_v37  ;;  %v5271_v54 = vshrl.u32 %v14203_v50, 16 }
 0x214   : > { %6029 = vperm.xlu1 %13975, %v278_v43   ;;  %v5253_v43 = vshrl.u32 %v14201_v34, 16 }
 0x215   : > { %6034 = vperm.xlu0 %13974, %v279_v40   ;;  %v5256_v40 = vshll.u32 %v14201_v34, 16 }
 0x216   : > { %12809 = vmatmul.mubr.bf16.gmra.mrb[28].mxu0 %v4183_v56  ;;  %v14188_v56 = vld [vmem:[%s14364_s8 + $0x70] sm:$0xff]  }
 0x217   : > { %12812 = vmatprep.mubr.bf16.mxu0 %v4191_v63  ;;  %v284_v63 = vld [vmem:[%s16692_s5 + $0xe8] sm:$0xff]  ;;  %v4720_v60 = vrot.slane %v14188_v56, 1 }
 0x218   : > { %6039 = vperm.xlu1 %13975, %v280_v48   ;;  %v5255_v48 = vrot.slane %v5253_v43, 1 }
 0x219   : > { %6044 = vperm.xlu0 %13974, %v281_v49   ;;  %v4721_v4 = vsel %vm4698_vm4, %v4718_v59, %v4720_v60  ;;  %v4723_v12 = vsel %vm4698_vm4, %v4720_v60, %v4722_v8  ;;  %v5258_v49 = vrot.slane %v5256_v40, 2  ;;  %v14205_v60 = vld [vmem:[%s14364_s8 + $0x48] sm:$0xff]  }
 0x21c   : > { %6049 = vperm.xlu1 %13975, %v282_v44   ;;  %v5267_v44 = vrot.slane %v5265_v46, 2 }
 0x21d   : > { %6054 = vperm.xlu0 %13974, %v283_v52   ;;  %v14204_v52 = vld [vmem:[%s14364_s8 + $0x40] sm:$0xff]  }
 0x21e   : > { %12813 = vmatmul.mubr.bf16.gmra.mrb[32].mxu0 %v4199_v7  ;;  %v289_v7 = vld [vmem:[%s16692_s5 + $0x110] sm:$0xff]  ;;  %v5283_v61 = vshll.u32 %v14204_v52, 16 }
 0x21f   : > { %12832 = vmatprep.mubr.bf16.mxu0 %v4701_v9  ;;  %v4724_v9 = vrot.slane %v14191_v5, 1  ;;  %v5289_v5 = vshrl.u32 %v14205_v60, 16 }
 0x220   : > { %6059 = vperm.xlu1 %13975, %v284_v63  }
 0x221   : > { %6064 = vperm.xlu0 %13974, %v285_v58   ;;  %v4725_v14 = vsel %vm4698_vm4, %v4722_v8, %v4724_v9  ;;  %v5273_v58 = vrot.slane %v5271_v54, 1  ;;  %v5298_v8 = vshrl.u32 %v14206_v2, 16 }
 0x224   : > { %6069 = vperm.xlu1 %13975, %v286_v62  }
 0x225   : > { %6074 = vperm.xlu0 %13974, %v287_v0  }
 0x226   : > { %12833 = vmatmul.mubr.bf16.vlgmr.msra.gmra.mrb[0].mxu0 %v4703_v19  ;;  %v4727_v19 = vsel %vm4698_vm4, %v4724_v9, %v4726_v17  ;;  %v5301_v9 = vshll.u32 %v14206_v2, 16 }
 0x227   : > { %12869 = vmatpush3.bf16.msra.mxu0 %v14857_v11  ;;  %12836 = vmatprep.mubr.bf16.mxu0 %v4705_v22  ;;  %v4707_v11 = vsel %vm4698_vm4, %v4704_v16, %v4706_v28  ;;  %v14194_v16 = vld [vmem:[%s14364_s8 + $0x90] sm:$0xff]   ;;  %v14196_v22 = vld [vmem:[%s14364_s8 + $0xa0] sm:$0xff]  }
 0x228   : > { %12870 = vmatprep.subr.bf16.mxu0 %v14178_v23  ;;  %6079 = vperm.xlu1 %13975, %v288_v6   ;;  %v4728_v18 = vrot.slane %v14194_v16, 1  ;;  %v4732_v28 = vrot.slane %v14196_v22, 1  ;;  %v5292_v6 = vshll.u32 %v14205_v60, 16 }
 0x229   : > { %6084 = vperm.xlu0 %13974, %v289_v7  }
 0x22a   : > { %v4733_v32 = vsel %vm4698_vm4, %v4730_v27, %v4732_v28  ;;  %v5294_v13 = vrot.slane %v5292_v6, 2  ;;  %v14215_v6 = vld [vmem:[%s14364_s8 + $0x98] sm:$0xff]  }
 0x22b   : > { %12871 = vmatpush3.bf16.msra.mxu0 %v14178_v23  ;;  %v4729_v23 = vsel %vm4698_vm4, %v4726_v17, %v4728_v18  ;;  %v5300_v17 = vrot.slane %v5298_v8, 1 }
 0x22c   : > { %12872 = vmatprep.subr.bf16.mxu0 %v14181_v29  ;;  %6089 = vperm.xlu1 %13975, %v290_v10  }
 0x22e   : > { %12837 = vmatmul.mubr.bf16.gmra.mrb[4].mxu0 %v4707_v11  ;;  %v4731_v11 = vsel %vm4698_vm4, %v4728_v18, %v4730_v27  ;;  %v5303_v18 = vrot.slane %v5301_v9, 2 }
 0x22f   : > { %12840 = vmatprep.mubr.bf16.mxu0 %v4709_v33  ;;  %12873 = vmatpush3.bf16.msra.mxu0 %v14181_v29  ;;  %v5239_v29 = vshll.u32 %v14199_v25, 16  ;;  %v14198_v33 = vld [vmem:[%s14364_s8 + $0xa8] ss:$0 sps:$4 sm:$0x11]  }
 0x230   : > { %12874 = vmatprep.subr.bf16.mxu0 %v14184_v35  ;;  %v5304_v25 = vor.u32 %v5303_v18, %v5300_v17 }
 0x231   : > { %v5241_v36 = vrot.slane %v5239_v29, 2 }
 0x233   : > { %12875 = vmatpush3.bf16.msra.mxu0 %v14184_v35  ;;  %v5238_v35 = vrot.slane %v5236_v15, 1 }
 0x234   : > { %12876 = vmatprep.subr.bf16.mxu0 %v14187_v41 }
 0x236   : > { %12841 = vmatmul.mubr.bf16.gmra.mrb[8].mxu0 %v4711_v42  ;;  %v5242_v42 = vor.u32 %v5241_v36, %v5238_v35  ;;  %v5325_v35 = vshrl.u32 %v14209_v30, 16  ;;  %v5328_v36 = vshll.u32 %v14209_v30, 16 }
 0x237   : > { %12844 = vmatprep.mubr.bf16.mxu0 %v4713_v3  ;;  %12877 = vmatpush3.bf16.msra.mxu0 %v14187_v41  ;;  %v4734_v41 = vrot.slane %v14198_v33, 1  ;;  %v5262_v3 = vshrl.u32 %v14202_v21, 16  ;;  %v14210_v33 = vld [vmem:[%s14364_s8 + $0x70] sm:$0xff]  }
 0x238   : > { %12878 = vmatprep.subr.bf16.mxu0 %v14190_v47  ;;  %v5251_v51 = vsel %vm5234_vm5, %v5242_v42, %v5250_v45  ;;  %v5334_v38 = vshrl.u32 %v14210_v33, 16  ;;  %v5337_v21 = vshll.u32 %v14210_v33, 16  ;;  %v5327_v43 = vrot.slane %v5325_v35, 1  ;;  %v14211_v42 = vld [vmem:[%s14364_s8 + $0x78] sm:$0xff]  }
 0x239   : > { %v5330_v40 = vrot.slane %v5328_v36, 2  ;;  %v14219_v36 = vld [vmem:[%s16689_s2 + $0x8] sm:$0xff]  }
 0x23a   : > { %v5339_v46 = vrot.slane %v5337_v21, 2  ;;  %12922 = vmatprep.subr.bf16.mxu1 %v14219_v36  ;;  %v14222_v21 = vld [vmem:[%s16689_s2 + $0x20] sm:$0xff]  }
 0x23b   : > { %12879 = vmatpush3.bf16.msra.mxu0 %v14190_v47  ;;  %v4735_v47 = vsel %vm4698_vm4, %v4732_v28, %v4734_v41  ;;  %12923 = vmatpush3.bf16.msra.mxu1 %v14219_v36 }
 0x23c   : > { %12880 = vmatprep.subr.bf16.mxu0 %v14193_v39 }
 0x23e   : > { %12845 = vmatmul.mubr.bf16.gmra.mrb[12].mxu0 %v4715_v53  ;;  %v5259_v53 = vor.u32 %v5258_v49, %v5255_v48  ;;  %v5331_v48 = vor.u32 %v5330_v40, %v5327_v43  ;;  %v5343_v49 = vshrl.u32 %v14211_v42, 16  ;;  %v14224_v43 = vld [vmem:[%s16689_s2 + $0x30] sm:$0xff]   ;;  %v6164_v40 = vld [vmem:[#allocation3] sm:$0xc0] }
 0x23f   : > { %12848 = vmatprep.mubr.bf16.mxu0 %v4717_v55  ;;  %12881 = vmatpush3.bf16.msra.mxu0 %v14193_v39  ;;  %v5264_v39 = vrot.slane %v5262_v3, 1  ;;  %v5274_v55 = vshll.u32 %v14203_v50, 16  ;;  %v5336_v3 = vrot.slane %v5334_v38, 1  ;;  %v5346_v50 = vshll.u32 %v14211_v42, 16  ;;  %v14221_v38 = vld [vmem:[%s16689_s2 + $0x18] sm:$0xff]  }
 0x240   : > { %12882 = vmatprep.subr.bf16.mxu0 %v14197_v57  ;;  %v5260_v63 = vsel %vm5234_vm5, %v5250_v45, %v5259_v53  ;;  %v6201_v42 = vshrl.u32 %v6164_v40, 16 }
 0x241   : > { %v5268_v56 = vor.u32 %v5267_v44, %v5264_v39  ;;  %v5276_v59 = vrot.slane %v5274_v55, 2  ;;  %v5348_v54 = vrot.slane %v5346_v50, 2  ;;  %v14213_v55 = vld [vmem:[%s14364_s8 + $0x88] sm:$0xff]  }
 0x242   : > { %v5364_v60 = vshll.u32 %v14213_v55, 16 }
 0x243   : > { %12883 = vmatpush3.bf16.msra.mxu0 %v14197_v57  ;;  %v5280_v57 = vshrl.u32 %v14204_v52, 16  ;;  %v5269_v62 = vsel %vm5234_vm5, %v5259_v53, %v5268_v56  ;;  %v5345_v53 = vrot.slane %v5343_v49, 1  ;;  %v15133_v49 = vrot.slane %v14303_v24, 7 }
 0x245   : > { %v5282_v0 = vrot.slane %v5280_v57, 1 }
 0x246   : > { %12849 = vmatmul.mubr.bf16.gmra.mrb[16].mxu0 %v4719_v1  ;;  %v5285_v1 = vrot.slane %v5283_v61, 2 }
 0x247   : > { %12852 = vmatprep.mubr.bf16.mxu0 %v4721_v4  ;;  %v5277_v4 = vor.u32 %v5276_v59, %v5273_v58  ;;  %v5349_v58 = vor.u32 %v5348_v54, %v5345_v53  ;;  %v5361_v59 = vshrl.u32 %v14213_v55, 16 }
 0x248   : > { %v5286_v7 = vor.u32 %v5285_v1, %v5282_v0 }
 0x249   : > { %v5278_v10 = vsel %vm5234_vm5, %v5268_v56, %v5277_v4 }
 0x24a   : > { %v5287_v16 = vsel %vm5234_vm5, %v5277_v4, %v5286_v7  ;;  %v5363_v4 = vrot.slane %v5361_v59, 1 }
 0x24e   : > { %12853 = vmatmul.mubr.bf16.gmra.mrb[20].mxu0 %v4723_v12  ;;  %v5291_v12 = vrot.slane %v5289_v5, 1  ;;  %v5366_v5 = vrot.slane %v5364_v60, 2  ;;  %v15171_v60 = vld [vmem:[%s16690_s3] ss:$0 sm:$0xff] }
 0x24f   : > { %12856 = vmatprep.mubr.bf16.mxu0 %v4725_v14  ;;  %v14207_v14 = vld [vmem:[%s14364_s8 + $0x58] sm:$0xff]  }
 0x250   : > { %v5295_v20 = vor.u32 %v5294_v13, %v5291_v12  ;;  %v5307_v22 = vshrl.u32 %v14207_v14, 16  ;;  %v5367_v12 = vor.u32 %v5366_v5, %v5363_v4  ;;  %v5379_v13 = vshrl.u32 %v14215_v6, 16 }
 0x252   : > { %v5296_v28 = vsel %vm5234_vm5, %v5286_v7, %v5295_v20  ;;  %v5309_v15 = vrot.slane %v5307_v22, 1  ;;  %v5305_v31 = vsel %vm5234_vm5, %v5295_v20, %v5304_v25  ;;  %v5381_v20 = vrot.slane %v5379_v13, 1 }
 0x256   : > { %12857 = vmatmul.mubr.bf16.gmra.mrb[24].mxu0 %v4727_v19  ;;  %v14208_v19 = vld [vmem:[%s14364_s8 + $0x60] sm:$0xff]  }
 0x257   : > { %12860 = vmatprep.mubr.bf16.mxu0 %v4729_v23  ;;  %v5310_v23 = vshll.u32 %v14207_v14, 16  ;;  %v5316_v26 = vshrl.u32 %v14208_v19, 16  ;;  %v5319_v27 = vshll.u32 %v14208_v19, 16  ;;  %v5382_v14 = vshll.u32 %v14215_v6, 16 }
 0x259   : > { %v5312_v29 = vrot.slane %v5310_v23, 2  ;;  %v5384_v22 = vrot.slane %v5382_v14, 2  ;;  %v14217_v23 = vld [vmem:[%s14364_s8 + $0xa8] ss:$0 sps:$4 sm:$0x33]  }
 0x25b   : > { %v5313_v34 = vor.u32 %v5312_v29, %v5309_v15  ;;  %v5397_v15 = vshrl.u32 %v14217_v23, 16  ;;  %v5400_v29 = vshll.u32 %v14217_v23, 16 }
 0x25d   : > { %v5314_v41 = vsel %vm5234_vm5, %v5304_v25, %v5313_v34 }
 0x25e   : > { %12861 = vmatmul.mubr.bf16.gmra.mrb[28].mxu0 %v4731_v11  ;;  %v5318_v11 = vrot.slane %v5316_v26, 1 }
 0x25f   : > { %12864 = vmatprep.mubr.bf16.mxu0 %v4733_v32  ;;  %v5321_v32 = vrot.slane %v5319_v27, 2 }
 0x261   : > { %v5322_v37 = vor.u32 %v5321_v32, %v5318_v11  ;;  %v5399_v11 = vrot.slane %v5397_v15, 1  ;;  %v5402_v32 = vrot.slane %v5400_v29, 2 }
 0x263   : > { %v5323_v45 = vsel %vm5234_vm5, %v5313_v34, %v5322_v37  ;;  %v5332_v52 = vsel %vm5234_vm5, %v5322_v37, %v5331_v48  ;;  %v5403_v34 = vor.u32 %v5402_v32, %v5399_v11  ;;  %v14220_v37 = vld [vmem:[%s16689_s2 + $0x10] sm:$0xff]  }
 0x264   : > { %12924 = vmatprep.subr.bf16.mxu1 %v14220_v37 }
 0x265   : > { %12925 = vmatpush3.bf16.msra.mxu1 %v14220_v37 }
 0x266   : > { %12865 = vmatmul.mubr.bf16.gmra.mrb[32].mxu0 %v4735_v47  ;;  %v14212_v47 = vld [vmem:[%s14364_s8 + $0x80] sm:$0xff]   ;;  %12926 = vmatprep.subr.bf16.mxu1 %v14221_v38 }
 0x267   : > { %12884 = vmatprep.mubr.bf16.mxu0 %v5251_v51  ;;  %v5340_v51 = vor.u32 %v5339_v46, %v5336_v3  ;;  %v5352_v39 = vshrl.u32 %v14212_v47, 16  ;;  %v5355_v44 = vshll.u32 %v14212_v47, 16  ;;  %v14225_v3 = vld [vmem:[%s16689_s2 + $0x38] sm:$0xff]   ;;  %v6203_v46 = vrot.slane %v6201_v42, 6 }
 0x269   : > { %v5341_v56 = vsel %vm5234_vm5, %v5331_v48, %v5340_v51  ;;  %v5354_v57 = vrot.slane %v5352_v39, 1  ;;  %v5357_v61 = vrot.slane %v5355_v44, 2  ;;  %v5350_v2 = vsel %vm5234_vm5, %v5340_v51, %v5349_v58  ;;  %12927 = vmatpush3.bf16.msra.mxu1 %v14221_v38  ;;  %v15143_v44 = vld [vmem:[%s16689_s2 + $0x40] sm:$0xff]  }
 0x26a   : > { %12928 = vmatprep.subr.bf16.mxu1 %v14222_v21  ;;  %v6211_v48 = vrot.slane %v14303_v24, 6  ;;  %v15146_v24 = vpop.permute.xlu0 %5914 }
 0x26b   : > { %16799 = vst [vmem:[#allocation4_spill] sm:$0xff] %v15146_v24 }
 0x26c   : > { %v15136_v51 = vor.u32 %v15133_v49, %v6211_v48 }
 0x26d   : > { %12929 = vmatpush3.bf16.msra.mxu1 %v14222_v21 }
 0x26e   : > { %12885 = vmatmul.mubr.bf16.vlgmr.msra.gmra.mrb[0].mxu0 %v5260_v63  ;;  %v14214_v63 = vld [vmem:[%s14364_s8 + $0x90] sm:$0xff]   ;;  %v15150_v53 = vpop.permute.xlu0 %5919 }
 0x26f   : > { %12888 = vmatprep.mubr.bf16.mxu0 %v5269_v62  ;;  %v5358_v62 = vor.u32 %v5357_v61, %v5354_v57  ;;  %v5370_v0 = vshrl.u32 %v14214_v63, 16  ;;  %v5373_v1 = vshll.u32 %v14214_v63, 16  ;;  %16801 = vst [vmem:[#allocation6_spill] sm:$0xff] %v15150_v53 }
 0x271   : > { %v5359_v7 = vsel %vm5234_vm5, %v5349_v58, %v5358_v62  ;;  %v5372_v8 = vrot.slane %v5370_v0, 1  ;;  %v5375_v9 = vrot.slane %v5373_v1, 2  ;;  %v5368_v19 = vsel %vm5234_vm5, %v5358_v62, %v5367_v12  ;;  %v15178_v0 = vld [vmem:[%s16691_s4] ss:$0 sm:$0xff] }
 0x272   : > { %v15154_v55 = vpop.permute.xlu0 %5934 }
 0x273   : > { %16803 = vst [vmem:[#allocation8_spill] sm:$0xff] %v15154_v55 }
 0x276   : > { %12889 = vmatmul.mubr.bf16.gmra.mrb[4].mxu0 %v5278_v10  ;;  %v14216_v10 = vld [vmem:[%s14364_s8 + $0xa0] sm:$0xff]   ;;  %v15158_v57 = vpop.permute.xlu0 %5944 }
 0x277   : > { %12892 = vmatprep.mubr.bf16.mxu0 %v5287_v16  ;;  %v5376_v16 = vor.u32 %v5375_v9, %v5372_v8  ;;  %v5388_v17 = vshrl.u32 %v14216_v10, 16  ;;  %v5391_v18 = vshll.u32 %v14216_v10, 16  ;;  %16805 = vst [vmem:[#allocation10_spill] sm:$0xff] %v15158_v57 }
 0x279   : > { %v5377_v25 = vsel %vm5234_vm5, %v5367_v12, %v5376_v16  ;;  %v5390_v26 = vrot.slane %v5388_v17, 1  ;;  %v5393_v27 = vrot.slane %v5391_v18, 2 }
 0x27a   : > { %v15162_v63 = vpop.permute.xlu0 %5954 }
 0x27b   : > { %v5394_v30 = vor.u32 %v5393_v27, %v5390_v26  ;;  %16807 = vst [vmem:[#allocation12_spill] sm:$0xff] %v15162_v63 }
 0x27d   : > { %v5404_v35 = vsel %vm5234_vm5, %v5394_v30, %v5403_v34 }
 0x27e   : > { %12893 = vmatmul.mubr.bf16.gmra.mrb[8].mxu0 %v5296_v28  ;;  %v5385_v28 = vor.u32 %v5384_v22, %v5381_v20  ;;  %v15166_v59 = vpop.permute.xlu0 %5964 }
 0x27f   : > { %12896 = vmatprep.mubr.bf16.mxu0 %v5305_v31  ;;  %16809 = vst [vmem:[#allocation14_spill] sm:$0xff] %v15166_v59 }
 0x280   : > { %v5386_v31 = vsel %vm5234_vm5, %v5376_v16, %v5385_v28  ;;  %v5395_v33 = vsel %vm5234_vm5, %v5385_v28, %v5394_v30 }
 0x282   : > { %v15184_v10 = vpop.permute.xlu0 %5974 }
 0x283   : > { %16811 = vst [vmem:[#allocation16_spill] sm:$0xff] %v15184_v10 }
 0x286   : > { %12897 = vmatmul.mubr.bf16.gmra.mrb[12].mxu0 %v5314_v41  ;;  %v14223_v41 = vld [vmem:[%s16689_s2 + $0x28] sm:$0xff]   ;;  %v15195_v15 = vpop.permute.xlu0 %5984 }
 0x287   : > { %12900 = vmatprep.mubr.bf16.mxu0 %v5323_v45  ;;  %12930 = vmatprep.subr.bf16.mxu1 %v14223_v41  ;;  %v6204_v45 = vshll.u32 %v6164_v40, 16  ;;  %16813 = vst [vmem:[#allocation18_spill] sm:$0xff] %v15195_v15 }
 0x288   : > { %12931 = vmatpush3.bf16.msra.mxu1 %v14223_v41 }
 0x289   : > { %12932 = vmatprep.subr.bf16.mxu1 %v14224_v43  ;;  %v6206_v47 = vrot.slane %v6204_v45, 7 }
 0x28b   : > { %v6207_v50 = vor.u32 %v6206_v47, %v6203_v46 }
 0x28c   : > { %12933 = vmatpush3.bf16.msra.mxu1 %v14224_v43 }
 0x28d   : > { %12934 = vmatprep.subr.bf16.mxu1 %v14225_v3  ;;  %v6216_v39 = vsel %vm6199_vm6, %v6207_v50, %v15136_v51 }
 0x28e   : > { %12901 = vmatmul.mubr.bf16.gmra.mrb[16].mxu0 %v5332_v52  ;;  %12936 = vmatprep.mubr.bf16.mxu1 %v6216_v39  ;;  %v15148_v52 = vpop.permute.xlu1 %5924 }
 0x28f   : > { %12904 = vmatprep.mubr.bf16.mxu0 %v5341_v56  ;;  %16800 = vst [vmem:[#allocation5_spill] sm:$0xff] %v15148_v52 }
 0x290   : > { %12935 = vmatpush3.bf16.msra.mxu1 %v14225_v3 }
 0x291   : > { %12972 = vmatprep.subr.bf16.mxu1 %v15143_v44 }
 0x292   : > { %v15152_v54 = vpop.permute.xlu1 %5929 }
 0x293   : > { %16802 = vst [vmem:[#allocation7_spill] sm:$0xff] %v15152_v54 }
 0x296   : > { %12905 = vmatmul.mubr.bf16.gmra.mrb[20].mxu0 %v5350_v2  ;;  %v15156_v56 = vpop.permute.xlu1 %5939 }
 0x297   : > { %12908 = vmatprep.mubr.bf16.mxu0 %v5359_v7  ;;  %16804 = vst [vmem:[#allocation9_spill] sm:$0xff] %v15156_v56 }
 0x29a   : > { %v15160_v61 = vpop.permute.xlu1 %5949 }
 0x29b   : > { %16806 = vst [vmem:[#allocation11_spill] sm:$0xff] %v15160_v61 }
 0x29e   : > { %12909 = vmatmul.mubr.bf16.gmra.mrb[24].mxu0 %v5368_v19  ;;  %v15164_v58 = vpop.permute.xlu1 %5959 }
 0x29f   : > { %12912 = vmatprep.mubr.bf16.mxu0 %v5377_v25  ;;  %16808 = vst [vmem:[#allocation13_spill] sm:$0xff] %v15164_v58 }
 0x2a2   : > { %v15173_v62 = vpop.permute.xlu1 %5969 }
 0x2a3   : > { %16810 = vst [vmem:[#allocation15_spill] sm:$0xff] %v15173_v62 }
 0x2a6   : > { %12913 = vmatmul.mubr.bf16.gmra.mrb[28].mxu0 %v5386_v31  ;;  %v15189_v17 = vpop.permute.xlu1 %5979 }
 0x2a7   : > { %12916 = vmatprep.mubr.bf16.mxu0 %v5395_v33  ;;  %16812 = vst [vmem:[#allocation17_spill] sm:$0xff] %v15189_v17 }
 0x2aa   : > { %v15204_v36 = vpop.permute.xlu1 %5989 }
 0x2ab   : > { %16814 = vst [vmem:[#allocation19_spill] sm:$0xff] %v15204_v36 }
 0x2ae   : > { %12917 = vmatmul.mubr.bf16.gmra.mrb[32].mxu0 %v5404_v35 }
 0x341   : > { %v12886_v1 = vpop.f32.mrb[0].mxu0 }
 0x342   : > { %v5800_v2 = vmul.f32 %v12886_v1, %v15171_v60  ;;  %v5505_v4 = vpop.f32.mrb[1].mxu0  ;;  %v15218_v1 = vpop.permute.xlu0 %5994 }
 0x343   : > { %v5798_v5 = vmul.f32 %v15171_v60, %v5505_v4  ;;  %v12887_v6 = vpop.f32.mrb[2].mxu0  ;;  %16815 = vst [vmem:[#allocation20_spill] sm:$0xff] %v15218_v1 }
 0x344   : > { %v5842_v7 = vadd.f32 %v15178_v0, %v5800_v2  ;;  %v5801_v8 = vmul.f32 %v12887_v6, %v15171_v60  ;;  %v5508_v9 = vpop.f32.mrb[3].mxu0 }
 0x345   : > { %v5840_v12 = vadd.f32 %v15178_v0, %v5798_v5  ;;  %v5799_v13 = vmul.f32 %v15171_v60, %v5508_v9 }
 0x346   : > { %v5878_v14 = vmax.f32 %v5842_v7, 0.0  ;;  %v5843_v16 = vadd.f32 %v15178_v0, %v5801_v8 }
 0x347   : > { %v5876_v18 = vmax.f32 %v5840_v12, 0.0  ;;  %v5841_v19 = vadd.f32 %v15178_v0, %v5799_v13 }
 0x348   : > { %v5879_v20 = vmax.f32 %v5843_v16, 0.0  ;;  %v6094_v25 = vmul.f32 %v15148_v52, %v5878_v14  ;;  %v15226_v16 = vpop.permute.xlu1 %5999  ;;  %v14238_v52 = vld [vmem:[%s16689_s2 + $0xa0] sm:$0xff]  }
 0x349   : > { %v5877_v22 = vmax.f32 %v5841_v19, 0.0  ;;  %v12890_v23 = vpop.f32.mrb[4].mxu0  ;;  %v6092_v29 = vmul.f32 %v15146_v24, %v5876_v18  ;;  %16816 = vst [vmem:[#allocation21_spill] sm:$0xff] %v15226_v16 }
 0x34a   : > { %v6095_v26 = vmul.f32 %v15152_v54, %v5879_v20  ;;  %v5804_v27 = vmul.f32 %v12890_v23, %v15171_v60  ;;  %v5521_v28 = vpop.f32.mrb[5].mxu0 }
 0x34b   : > { %v6093_v30 = vmul.f32 %v15150_v53, %v5877_v22  ;;  %v5802_v31 = vmul.f32 %v15171_v60, %v5521_v28  ;;  %v12891_v11 = vpop.f32.mrb[6].mxu0 }
 0x34c   : > { %v15200_v32 = vpack.c.bf16 %v6095_v26, %v6094_v25  ;;  %v5846_v33 = vadd.f32 %v15178_v0, %v5804_v27  ;;  %v5805_v34 = vmul.f32 %v12891_v11, %v15171_v60  ;;  %v5524_v35 = vpop.f32.mrb[7].mxu0 }
 0x34d   : > { %v15206_v37 = vpack.c.bf16 %v6093_v30, %v6092_v29  ;;  %v5844_v38 = vadd.f32 %v15178_v0, %v5802_v31  ;;  %v5803_v21 = vmul.f32 %v15171_v60, %v5524_v35  ;;  %v14227_v29 = vld [vmem:[%s16689_s2 + $0x48] sm:$0xff]  }
 0x34e   : > { %6147 = vst [vmem:[#allocation3 + $0x18] sm:$0xff] %v15200_v32  ;;  %v5882_v41 = vmax.f32 %v5846_v33, 0.0  ;;  %v5847_v43 = vadd.f32 %v15178_v0, %v5805_v34  ;;  %v6227_v40 = vshrl.u32 %v15200_v32, 16  ;;  %v6230_v42 = vshll.u32 %v15200_v32, 16 }
 0x34f   : > { %6146 = vst [vmem:[#allocation3 + $0x10] sm:$0xff] %v15206_v37  ;;  %v5880_v45 = vmax.f32 %v5844_v38, 0.0  ;;  %v5845_v3 = vadd.f32 %v15178_v0, %v5803_v21  ;;  %v6218_v46 = vshrl.u32 %v15206_v37, 16  ;;  %v6221_v47 = vshll.u32 %v15206_v37, 16 }
 0x350   : > { %v5883_v48 = vmax.f32 %v5847_v43, 0.0  ;;  %v6229_v50 = vrot.slane %v6227_v40, 6  ;;  %v6232_v39 = vrot.slane %v6230_v42, 7  ;;  %v6098_v2 = vmul.f32 %v15158_v57, %v5882_v41  ;;  %v15250_v43 = vpop.permute.xlu0 %6004 }
 0x351   : > { %v5881_v4 = vmax.f32 %v5845_v3, 0.0  ;;  %v12894_v5 = vpop.f32.mrb[8].mxu0  ;;  %v6220_v6 = vrot.slane %v6218_v46, 6  ;;  %v6223_v7 = vrot.slane %v6221_v47, 7  ;;  %v6096_v8 = vmul.f32 %v15154_v55, %v5880_v45  ;;  %16817 = vst [vmem:[#allocation22_spill] sm:$0xff] %v15250_v43 }
 0x352   : > { %v6099_v9 = vmul.f32 %v15160_v61, %v5883_v48  ;;  %v5808_v12 = vmul.f32 %v12894_v5, %v15171_v60  ;;  %v5537_v13 = vpop.f32.mrb[9].mxu0  ;;  %v15224_v14 = vor.u32 %v6232_v39, %v6229_v50  ;;  %v16694_v23 = vrot.slane %v15206_v37, 7  ;;  %v14228_v50 = vld [vmem:[%s16689_s2 + $0x50] sm:$0xff]   ;;  %v15262_v39 = vpop.permute.xlu1 %6009 }
 0x353   : > { %v6097_v18 = vmul.f32 %v15156_v56, %v5881_v4  ;;  %v5806_v19 = vmul.f32 %v15171_v60, %v5537_v13  ;;  %v12895_v20 = vpop.f32.mrb[10].mxu0  ;;  %v6224_v22 = vor.u32 %v6223_v7, %v6220_v6  ;;  %v6710_v30 = vrot.slane %v15200_v32, 7  ;;  %16818 = vst [vmem:[#allocation23_spill] sm:$0xff] %v15262_v39 }
 0x354   : > { %v15231_v25 = vpack.c.bf16 %v6099_v9, %v6098_v2  ;;  %v5850_v26 = vadd.f32 %v15178_v0, %v5808_v12  ;;  %v5809_v27 = vmul.f32 %v12895_v20, %v15171_v60  ;;  %v5540_v28 = vpop.f32.mrb[11].mxu0 }
 0x355   : > { %v15239_v31 = vpack.c.bf16 %v6097_v18, %v6096_v8  ;;  %v5848_v11 = vadd.f32 %v15178_v0, %v5806_v19  ;;  %v5807_v33 = vmul.f32 %v15171_v60, %v5540_v28  ;;  %v6225_v34 = vsel %vm6199_vm6, %v15136_v51, %v6224_v22 }
 0x356   : > { %6149 = vst [vmem:[#allocation3 + $0x28] sm:$0xff] %v15231_v25  ;;  %v5886_v35 = vmax.f32 %v5850_v26, 0.0  ;;  %v5851_v38 = vadd.f32 %v15178_v0, %v5809_v27  ;;  %12937 = vmatmul.mubr.bf16.vlgmr.msra.gmra.mrb[0].mxu1 %v6225_v34  ;;  %v6234_v21 = vsel %vm6199_vm6, %v6224_v22, %v15224_v14  ;;  %v6245_v41 = vshrl.u32 %v15231_v25, 16 }
 0x357   : > { %6148 = vst [vmem:[#allocation3 + $0x20] sm:$0xff] %v15239_v31  ;;  %v5884_v40 = vmax.f32 %v5848_v11, 0.0  ;;  %v5849_v42 = vadd.f32 %v15178_v0, %v5807_v33  ;;  %12940 = vmatprep.mubr.bf16.mxu1 %v6234_v21  ;;  %12973 = vmatpush3.bf16.msra.mxu1 %v15143_v44  ;;  %v6236_v51 = vshrl.u32 %v15239_v31, 16  ;;  %v6239_v45 = vshll.u32 %v15239_v31, 16 }
 0x358   : > { %v6102_v3 = vmul.f32 %v15166_v59, %v5886_v35  ;;  %v5887_v46 = vmax.f32 %v5851_v38, 0.0  ;;  %v6247_v47 = vrot.slane %v6245_v41, 6  ;;  %v6248_v48 = vshll.u32 %v15231_v25, 16  ;;  %12974 = vmatprep.subr.bf16.mxu1 %v14227_v29  ;;  %v14229_v35 = vld [vmem:[%s16689_s2 + $0x58] sm:$0xff]   ;;  %v15284_v38 = vpop.permute.xlu0 %6014 }
 0x359   : > { %v6100_v2 = vmul.f32 %v15162_v63, %v5884_v40  ;;  %v5885_v44 = vmax.f32 %v5849_v42, 0.0  ;;  %v12898_v4 = vpop.f32.mrb[12].mxu0  ;;  %v6238_v5 = vrot.slane %v6236_v51, 6  ;;  %v6241_v6 = vrot.slane %v6239_v45, 7  ;;  %16819 = vst [vmem:[#allocation24_spill] sm:$0xff] %v15284_v38 }
 0x35a   : > { %v6103_v7 = vmul.f32 %v15173_v62, %v5887_v46  ;;  %v5812_v8 = vmul.f32 %v12898_v4, %v15171_v60  ;;  %v5553_v9 = vpop.f32.mrb[13].mxu0  ;;  %v6250_v12 = vrot.slane %v6248_v48, 7  ;;  %v15272_v13 = vsel %vm6704_vm7, %v16694_v23, %v6710_v30  ;;  %v15296_v46 = vpop.permute.xlu1 %6019 }
 0x35b   : > { %v6101_v18 = vmul.f32 %v15164_v58, %v5885_v44  ;;  %v5810_v19 = vmul.f32 %v15171_v60, %v5553_v9  ;;  %v12899_v20 = vpop.f32.mrb[14].mxu0  ;;  %v6242_v22 = vor.u32 %v6241_v6, %v6238_v5  ;;  %12975 = vmatpush3.bf16.msra.mxu1 %v14227_v29  ;;  %v6712_v26 = vrot.slane %v15239_v31, 7  ;;  %16820 = vst [vmem:[#allocation25_spill] sm:$0xff] %v15296_v46 }
 0x35c   : > { %v15277_v27 = vpack.c.bf16 %v6103_v7, %v6102_v3  ;;  %v5854_v28 = vadd.f32 %v15178_v0, %v5812_v8  ;;  %v5813_v11 = vmul.f32 %v12899_v20, %v15171_v60  ;;  %v5556_v33 = vpop.f32.mrb[15].mxu0  ;;  %v6251_v34 = vor.u32 %v6250_v12, %v6247_v47  ;;  %12976 = vmatprep.subr.bf16.mxu1 %v14228_v50  ;;  %v14230_v7 = vld [vmem:[%s16689_s2 + $0x60] sm:$0xff]  }
 0x35d   : > { %v15286_v21 = vpack.c.bf16 %v6101_v18, %v6100_v2  ;;  %v5852_v29 = vadd.f32 %v15178_v0, %v5810_v19  ;;  %v5811_v41 = vmul.f32 %v15171_v60, %v5556_v33  ;;  %v6243_v40 = vsel %vm6199_vm6, %v15224_v14, %v6242_v22  ;;  %v15321_v33 = vpop.permute.xlu0 %6024 }
 0x35e   : > { %6151 = vst [vmem:[#allocation3 + $0x38] sm:$0xff] %v15277_v27  ;;  %v5890_v42 = vmax.f32 %v5854_v28, 0.0  ;;  %v5855_v51 = vadd.f32 %v15178_v0, %v5813_v11  ;;  %12941 = vmatmul.mubr.bf16.gmra.mrb[4].mxu1 %v6243_v40  ;;  %v6252_v45 = vsel %vm6199_vm6, %v6242_v22, %v6251_v34  ;;  %v6263_v3 = vshrl.u32 %v15277_v27, 16  ;;  %16821 = vst [vmem:[#allocation26_spill] sm:$0xff] %v15321_v33 }
 0x35f   : > { %6150 = vst [vmem:[#allocation3 + $0x30] sm:$0xff] %v15286_v21  ;;  %v5888_v47 = vmax.f32 %v5852_v29, 0.0  ;;  %v5853_v48 = vadd.f32 %v15178_v0, %v5811_v41  ;;  %12944 = vmatprep.mubr.bf16.mxu1 %v6252_v45  ;;  %v16701_v14 = vshrl.u32 %v15286_v21, 16  ;;  %v16698_v2 = vshll.u32 %v15286_v21, 16  ;;  %12977 = vmatpush3.bf16.msra.mxu1 %v14228_v50 }
 0x360   : > { %v6106_v44 = vmul.f32 %v15195_v15, %v5890_v42  ;;  %v5891_v4 = vmax.f32 %v5855_v51, 0.0  ;;  %v6265_v5 = vrot.slane %v6263_v3, 6  ;;  %v6266_v6 = vshll.u32 %v15277_v27, 16  ;;  %12978 = vmatprep.subr.bf16.mxu1 %v14229_v35 }
 0x361   : > { %v6104_v8 = vmul.f32 %v15184_v10, %v5888_v47  ;;  %v5889_v9 = vmax.f32 %v5853_v48, 0.0  ;;  %v12902_v12 = vpop.f32.mrb[16].mxu0  ;;  %v6256_v18 = vrot.slane %v16701_v14, 6  ;;  %v6259_v50 = vrot.slane %v16698_v2, 7  ;;  %v14231_v48 = vld [vmem:[%s16689_s2 + $0x68] sm:$0xff]  }
 0x362   : > { %v6107_v19 = vmul.f32 %v15204_v36, %v5891_v4  ;;  %v5816_v20 = vmul.f32 %v12902_v12, %v15171_v60  ;;  %v5569_v22 = vpop.f32.mrb[17].mxu0  ;;  %v6268_v28 = vrot.slane %v6266_v6, 7  ;;  %v15319_v11 = vsel %vm6704_vm7, %v6710_v30, %v6712_v26  ;;  %v15333_v4 = vpop.permute.xlu1 %6029 }
 0x363   : > { %v6105_v29 = vmul.f32 %v15189_v17, %v5889_v9  ;;  %v5814_v41 = vmul.f32 %v15171_v60, %v5569_v22  ;;  %v12903_v40 = vpop.f32.mrb[18].mxu0  ;;  %v6260_v42 = vor.u32 %v6259_v50, %v6256_v18  ;;  %12979 = vmatpush3.bf16.msra.mxu1 %v14229_v35  ;;  %v6714_v51 = vrot.slane %v15231_v25, 7  ;;  %16822 = vst [vmem:[#allocation27_spill] sm:$0xff] %v15333_v4 }
 0x364   : > { %v15326_v45 = vpack.c.bf16 %v6107_v19, %v6106_v44  ;;  %v5858_v3 = vadd.f32 %v15178_v0, %v5816_v20  ;;  %v5817_v32 = vmul.f32 %v12903_v40, %v15171_v60  ;;  %v5572_v47 = vpop.f32.mrb[19].mxu0  ;;  %v6269_v30 = vor.u32 %v6268_v28, %v6265_v5  ;;  %12980 = vmatprep.subr.bf16.mxu1 %v14230_v7  ;;  %v14232_v40 = vld [vmem:[%s16689_s2 + $0x70] sm:$0xff]  }
 0x365   : > { %v15335_v6 = vpack.c.bf16 %v6105_v29, %v6104_v8  ;;  %v5856_v35 = vadd.f32 %v15178_v0, %v5814_v41  ;;  %v5815_v44 = vmul.f32 %v15171_v60, %v5572_v47  ;;  %v6261_v9 = vsel %vm6199_vm6, %v6251_v34, %v6260_v42 }
 0x366   : > { %6153 = vst [vmem:[#allocation3 + $0x48] sm:$0xff] %v15326_v45  ;;  %v5894_v12 = vmax.f32 %v5858_v3, 0.0  ;;  %v5859_v5 = vadd.f32 %v15178_v0, %v5817_v32  ;;  %12945 = vmatmul.mubr.bf16.gmra.mrb[8].mxu1 %v6261_v9  ;;  %v6270_v18 = vsel %vm6199_vm6, %v6260_v42, %v6269_v30  ;;  %v16695_v50 = vshrl.u32 %v15326_v45, 16  ;;  %v15355_v42 = vpop.permute.xlu0 %6034 }
 0x367   : > { %6152 = vst [vmem:[#allocation3 + $0x40] sm:$0xff] %v15335_v6  ;;  %v5892_v8 = vmax.f32 %v5856_v35, 0.0  ;;  %v5857_v19 = vadd.f32 %v15178_v0, %v5815_v44  ;;  %12948 = vmatprep.mubr.bf16.mxu1 %v6270_v18  ;;  %v16699_v20 = vshrl.u32 %v15335_v6, 16  ;;  %v16696_v34 = vshll.u32 %v15335_v6, 16  ;;  %12981 = vmatpush3.bf16.msra.mxu1 %v14230_v7  ;;  %16823 = vst [vmem:[#allocation28_spill] sm:$0xff] %v15355_v42 }
 0x368   : > { %v6110_v22 = vmul.f32 %v15250_v43, %v5894_v12  ;;  %v5895_v28 = vmax.f32 %v5859_v5, 0.0  ;;  %v6283_v29 = vrot.slane %v16695_v50, 6  ;;  %v16697_v41 = vshll.u32 %v15326_v45, 16  ;;  %12982 = vmatprep.subr.bf16.mxu1 %v14231_v48 }
 0x369   : > { %v6108_v3 = vmul.f32 %v15218_v1, %v5892_v8  ;;  %v5893_v32 = vmax.f32 %v5857_v19, 0.0  ;;  %v12906_v47 = vpop.f32.mrb[20].mxu0  ;;  %v6274_v7 = vrot.slane %v16699_v20, 6  ;;  %v6277_v35 = vrot.slane %v16696_v34, 7  ;;  %v15373_v8 = vpop.permute.xlu1 %6039 }
 0x36a   : > { %v6111_v44 = vmul.f32 %v15262_v39, %v5895_v28  ;;  %v5820_v9 = vmul.f32 %v12906_v47, %v15171_v60  ;;  %v5585_v12 = vpop.f32.mrb[21].mxu0  ;;  %v6286_v5 = vrot.slane %v16697_v41, 7  ;;  %v15371_v18 = vsel %vm6704_vm7, %v6712_v26, %v6714_v51  ;;  %16824 = vst [vmem:[#allocation29_spill] sm:$0xff] %v15373_v8 }
 0x36b   : > { %v6109_v19 = vmul.f32 %v15226_v16, %v5893_v32  ;;  %v5818_v23 = vmul.f32 %v15171_v60, %v5585_v12  ;;  %v12907_v28 = vpop.f32.mrb[22].mxu0  ;;  %v6278_v50 = vor.u32 %v6277_v35, %v6274_v7  ;;  %12983 = vmatpush3.bf16.msra.mxu1 %v14231_v48  ;;  %v6716_v47 = vrot.slane %v15286_v21, 7  ;;  %v14233_v32 = vld [vmem:[%s16689_s2 + $0x78] sm:$0xff]   ;;  %v15394_v12 = vpop.permute.xlu0 %6044 }
 0x36c   : > { %v15378_v34 = vpack.c.bf16 %v6111_v44, %v6110_v22  ;;  %v5862_v41 = vadd.f32 %v15178_v0, %v5820_v9  ;;  %v5821_v31 = vmul.f32 %v12907_v28, %v15171_v60  ;;  %v5588_v2 = vpop.f32.mrb[23].mxu0  ;;  %v6287_v26 = vor.u32 %v6286_v5, %v6283_v29  ;;  %12984 = vmatprep.subr.bf16.mxu1 %v14232_v40  ;;  %v15407_v28 = vld [vmem:[%s16689_s2 + $0x80] sm:$0xff]  }
 0x36d   : > { %v15385_v20 = vpack.c.bf16 %v6109_v19, %v6108_v3  ;;  %v5860_v7 = vadd.f32 %v15178_v0, %v5818_v23  ;;  %v5819_v48 = vmul.f32 %v15171_v60, %v5588_v2  ;;  %v6279_v22 = vsel %vm6199_vm6, %v6269_v30, %v6278_v50  ;;  %16825 = vst [vmem:[#allocation30_spill] sm:$0xff] %v15394_v12 }
 0x36e   : > { %6155 = vst [vmem:[#allocation3 + $0x58] sm:$0xff] %v15378_v34  ;;  %v5898_v35 = vmax.f32 %v5862_v41, 0.0  ;;  %v5863_v44 = vadd.f32 %v15178_v0, %v5821_v31  ;;  %12949 = vmatmul.mubr.bf16.gmra.mrb[12].mxu1 %v6279_v22  ;;  %v6288_v29 = vsel %vm6199_vm6, %v6278_v50, %v6287_v26  ;;  %v16700_v9 = vshrl.u32 %v15378_v34, 16  ;;  %v15409_v31 = vpop.permute.xlu1 %6049 }
 0x36f   : > { %6154 = vst [vmem:[#allocation3 + $0x50] sm:$0xff] %v15385_v20  ;;  %v5896_v3 = vmax.f32 %v5860_v7, 0.0  ;;  %v5861_v23 = vadd.f32 %v15178_v0, %v5819_v48  ;;  %12952 = vmatprep.mubr.bf16.mxu1 %v6288_v29  ;;  %v16702_v2 = vshrl.u32 %v15385_v20, 16  ;;  %v16703_v30 = vshll.u32 %v15385_v20, 16  ;;  %12985 = vmatpush3.bf16.msra.mxu1 %v14232_v40  ;;  %16826 = vst [vmem:[#allocation31_spill] sm:$0xff] %v15409_v31 }
 0x370   : > { %v6114_v41 = vmul.f32 %v15321_v33, %v5898_v35  ;;  %v5899_v5 = vmax.f32 %v5863_v44, 0.0  ;;  %v6301_v50 = vrot.slane %v16700_v9, 6  ;;  %v16705_v19 = vshll.u32 %v15378_v34, 16  ;;  %12986 = vmatprep.subr.bf16.mxu1 %v14233_v32 }
 0x371   : > { %v6112_v7 = vmul.f32 %v15284_v38, %v5896_v3  ;;  %v5897_v48 = vmax.f32 %v5861_v23, 0.0  ;;  %v12910_v40 = vpop.f32.mrb[24].mxu0  ;;  %v6292_v22 = vrot.slane %v16702_v2, 6  ;;  %v6295_v35 = vrot.slane %v16703_v30, 7 }
 0x372   : > { %v6115_v44 = vmul.f32 %v15333_v4, %v5899_v5  ;;  %v5824_v29 = vmul.f32 %v12910_v40, %v15171_v60  ;;  %v5601_v9 = vpop.f32.mrb[25].mxu0  ;;  %v6304_v14 = vrot.slane %v16705_v19, 7  ;;  %v15425_v3 = vsel %vm6704_vm7, %v6714_v51, %v6716_v47  ;;  %v15435_v51 = vpop.permute.xlu0 %6054 }
 0x373   : > { %v6113_v23 = vmul.f32 %v15296_v46, %v5897_v48  ;;  %v5822_v2 = vmul.f32 %v15171_v60, %v5601_v9  ;;  %v12911_v30 = vpop.f32.mrb[26].mxu0  ;;  %v6296_v38 = vor.u32 %v6295_v35, %v6292_v22  ;;  %12987 = vmatpush3.bf16.msra.mxu1 %v14233_v32  ;;  %v16717_v5 = vrot.slane %v15277_v27, 7  ;;  %16827 = vst [vmem:[#allocation32_spill] sm:$0xff] %v15435_v51 }
 0x374   : > { %v15430_v40 = vpack.c.bf16 %v6115_v44, %v6114_v41  ;;  %v5866_v19 = vadd.f32 %v15178_v0, %v5824_v29  ;;  %v5825_v4 = vmul.f32 %v12911_v30, %v15171_v60  ;;  %v5604_v33 = vpop.f32.mrb[27].mxu0  ;;  %v6305_v25 = vor.u32 %v6304_v14, %v6301_v50  ;;  %13024 = vmatprep.subr.bf16.mxu1 %v15407_v28  ;;  %v15446_v50 = vpop.permute.xlu1 %6059 }
 0x375   : > { %v15437_v48 = vpack.c.bf16 %v6113_v23, %v6112_v7  ;;  %v5864_v9 = vadd.f32 %v15178_v0, %v5822_v2  ;;  %v5823_v32 = vmul.f32 %v15171_v60, %v5604_v33  ;;  %v6297_v22 = vsel %vm6199_vm6, %v6287_v26, %v6296_v38  ;;  %16828 = vst [vmem:[#allocation33_spill] sm:$0xff] %v15446_v50 }
 0x376   : > { %6157 = vst [vmem:[#allocation3 + $0x68] sm:$0xff] %v15430_v40  ;;  %v5902_v41 = vmax.f32 %v5866_v19, 0.0  ;;  %v5867_v35 = vadd.f32 %v15178_v0, %v5825_v4  ;;  %12953 = vmatmul.mubr.bf16.gmra.mrb[16].mxu1 %v6297_v22  ;;  %v6306_v14 = vsel %vm6199_vm6, %v6296_v38, %v6305_v25  ;;  %v16708_v30 = vshrl.u32 %v15430_v40, 16 }
 0x377   : > { %6156 = vst [vmem:[#allocation3 + $0x60] sm:$0xff] %v15437_v48  ;;  %v5900_v7 = vmax.f32 %v5864_v9, 0.0  ;;  %v5865_v2 = vadd.f32 %v15178_v0, %v5823_v32  ;;  %12956 = vmatprep.mubr.bf16.mxu1 %v6306_v14  ;;  %v16709_v33 = vshrl.u32 %v15437_v48, 16  ;;  %v16710_v26 = vshll.u32 %v15437_v48, 16 }
 0x378   : > { %v6118_v19 = vmul.f32 %v15394_v12, %v5902_v41  ;;  %v5903_v4 = vmax.f32 %v5867_v35, 0.0  ;;  %v6319_v38 = vrot.slane %v16708_v30, 6  ;;  %v16713_v44 = vshll.u32 %v15430_v40, 16 }
 0x379   : > { %v6116_v29 = vmul.f32 %v15355_v42, %v5900_v7  ;;  %v5901_v23 = vmax.f32 %v5865_v2, 0.0  ;;  %v12914_v22 = vpop.f32.mrb[28].mxu0  ;;  %v6310_v9 = vrot.slane %v16709_v33, 6  ;;  %v6313_v32 = vrot.slane %v16710_v26, 7  ;;  %v15472_v2 = vpop.permute.xlu0 %6064 }
 0x37a   : > { %v6119_v14 = vmul.f32 %v15409_v31, %v5903_v4  ;;  %v5828_v41 = vmul.f32 %v12914_v22, %v15171_v60  ;;  %v5617_v35 = vpop.f32.mrb[29].mxu0  ;;  %v6322_v30 = vrot.slane %v16713_v44, 7  ;;  %v15470_v7 = vsel %vm6704_vm7, %v6716_v47, %v16717_v5  ;;  %16829 = vst [vmem:[#allocation34_spill] sm:$0xff] %v15472_v2  ;;  %v15481_v47 = vpop.permute.xlu1 %6069 }
 0x37b   : > { %v6117_v33 = vmul.f32 %v15373_v8, %v5901_v23  ;;  %v5826_v26 = vmul.f32 %v15171_v60, %v5617_v35  ;;  %v12915_v4 = vpop.f32.mrb[30].mxu0  ;;  %v6314_v42 = vor.u32 %v6313_v32, %v6310_v9  ;;  %v16727_v22 = vrot.slane %v15335_v6, 7  ;;  %16830 = vst [vmem:[#allocation35_spill] sm:$0xff] %v15481_v47 }
 0x37c   : > { %v15477_v31 = vpack.c.bf16 %v6119_v14, %v6118_v19  ;;  %v5870_v44 = vadd.f32 %v15178_v0, %v5828_v41  ;;  %v5829_v12 = vmul.f32 %v12915_v4, %v15171_v60  ;;  %v5620_v46 = vpop.f32.mrb[31].mxu0  ;;  %v6323_v16 = vor.u32 %v6322_v30, %v6319_v38 }
 0x37d   : > { %v15483_v5 = vpack.c.bf16 %v6117_v33, %v6116_v29  ;;  %v5868_v23 = vadd.f32 %v15178_v0, %v5826_v26  ;;  %v5827_v35 = vmul.f32 %v15171_v60, %v5620_v46  ;;  %v6315_v9 = vsel %vm6199_vm6, %v6305_v25, %v6314_v42  ;;  %v15500_v29 = vpop.permute.xlu0 %6074 }
 0x37e   : > { %6159 = vst [vmem:[#allocation3 + $0x78] sm:$0xff] %v15477_v31  ;;  %v5906_v19 = vmax.f32 %v5870_v44, 0.0  ;;  %v5871_v32 = vadd.f32 %v15178_v0, %v5829_v12  ;;  %12957 = vmatmul.mubr.bf16.gmra.mrb[20].mxu1 %v6315_v9  ;;  %v6324_v14 = vsel %vm6199_vm6, %v6314_v42, %v6323_v16  ;;  %v16718_v30 = vshrl.u32 %v15477_v31, 16  ;;  %16831 = vst [vmem:[#allocation36_spill] sm:$0xff] %v15500_v29 }
 0x37f   : > { %6158 = vst [vmem:[#allocation3 + $0x70] sm:$0xff] %v15483_v5  ;;  %v5904_v33 = vmax.f32 %v5868_v23, 0.0  ;;  %v5869_v38 = vadd.f32 %v15178_v0, %v5827_v35  ;;  %12960 = vmatprep.mubr.bf16.mxu1 %v6324_v14  ;;  %v16720_v46 = vshrl.u32 %v15483_v5, 16  ;;  %v16721_v25 = vshll.u32 %v15483_v5, 16 }
 0x380   : > { %v6122_v26 = vmul.f32 %v15472_v2, %v5906_v19  ;;  %v5907_v44 = vmax.f32 %v5871_v32, 0.0  ;;  %v6337_v12 = vrot.slane %v16718_v30, 6  ;;  %v16724_v42 = vshll.u32 %v15477_v31, 16 }
 0x381   : > { %v6120_v41 = vmul.f32 %v15435_v51, %v5904_v33  ;;  %v5905_v4 = vmax.f32 %v5869_v38, 0.0  ;;  %v12918_v23 = vpop.f32.mrb[32].mxu0  ;;  %v6328_v35 = vrot.slane %v16720_v46, 6  ;;  %v6331_v9 = vrot.slane %v16721_v25, 7  ;;  %v15518_v51 = vpop.permute.xlu1 %6079 }
 0x382   : > { %v6123_v19 = vmul.f32 %v15481_v47, %v5907_v44  ;;  %v5832_v32 = vmul.f32 %v12918_v23, %v15171_v60  ;;  %v5633_v14 = vpop.f32.mrb[33].mxu0  ;;  %v6340_v30 = vrot.slane %v16724_v42, 7  ;;  %v16832_v33 = vrot.slane %v15277_v27, 7  ;;  %16833 = vst [vmem:[#allocation37_spill] sm:$0xff] %v15518_v51 }
 0x383   : > { %v6121_v46 = vmul.f32 %v15446_v50, %v5905_v4  ;;  %v5830_v25 = vmul.f32 %v15171_v60, %v5633_v14  ;;  %v12919_v44 = vpop.f32.mrb[34].mxu0  ;;  %v6332_v47 = vor.u32 %v6331_v9, %v6328_v35  ;;  %v6722_v23 = vrot.slane %v15326_v45, 7  ;;  %v15612_v50 = vld [vmem:[#allocation3] sm:$0xff] }
 0x384   : > { %v15516_v38 = vsel %vm6704_vm7, %v16832_v33, %v16727_v22  ;;  %v15523_v2 = vpack.c.bf16 %v6123_v19, %v6122_v26  ;;  %v5874_v42 = vadd.f32 %v15178_v0, %v5832_v32  ;;  %v5833_v8 = vmul.f32 %v12919_v44, %v15171_v60  ;;  %v5636_v27 = vpop.f32.mrb[35].mxu0  ;;  %v15536_v32 = vpop.permute.xlu0 %6084 }
 0x385   : > { %v6341_v1 = vor.u32 %v6340_v30, %v6337_v12  ;;  %v15527_v33 = vpack.c.bf16 %v6121_v46, %v6120_v41  ;;  %v5872_v22 = vadd.f32 %v15178_v0, %v5830_v25  ;;  %v5831_v4 = vmul.f32 %v15171_v60, %v5636_v27  ;;  %16834 = vst [vmem:[#allocation38_spill] sm:$0xff] %v15536_v32 }
 0x386   : > { %v6333_v14 = vsel %vm6199_vm6, %v6323_v16, %v6332_v47  ;;  %6161 = vst [vmem:[#allocation3 + $0x88] sm:$0xff] %v15523_v2  ;;  %v5910_v35 = vmax.f32 %v5874_v42, 0.0  ;;  %v5875_v26 = vadd.f32 %v15178_v0, %v5833_v8  ;;  %v16728_v19 = vshrl.u32 %v15523_v2, 16  ;;  %v15546_v42 = vpop.permute.xlu1 %6089 }
 0x387   : > { %12961 = vmatmul.mubr.bf16.gmra.mrb[24].mxu1 %v6333_v14  ;;  %v6342_v9 = vsel %vm6199_vm6, %v6332_v47, %v6341_v1  ;;  %6160 = vst [vmem:[#allocation3 + $0x80] sm:$0xff] %v15527_v33  ;;  %v5908_v30 = vmax.f32 %v5872_v22, 0.0  ;;  %v5873_v46 = vadd.f32 %v15178_v0, %v5831_v4  ;;  %v16730_v60 = vshrl.u32 %v15527_v33, 16  ;;  %16835 = vst [vmem:[#allocation39_spill] sm:$0xff] %v15546_v42 }
 0x388   : > { %12964 = vmatprep.mubr.bf16.mxu1 %v6342_v9  ;;  %v16729_v16 = vshll.u32 %v15527_v33, 16  ;;  %v6126_v25 = vmul.f32 %v15536_v32, %v5910_v35  ;;  %v5911_v8 = vmax.f32 %v5875_v26, 0.0  ;;  %v6355_v47 = vrot.slane %v16728_v19, 6 }
 0x389   : > { %v16731_v12 = vshll.u32 %v15523_v2, 16  ;;  %v6124_v41 = vmul.f32 %v15500_v29, %v5908_v30  ;;  %v5909_v22 = vmax.f32 %v5873_v46, 0.0  ;;  %v6346_v0 = vrot.slane %v16730_v60, 6 }
 0x38a   : > { %v6349_v44 = vrot.slane %v16729_v16, 7  ;;  %v6127_v27 = vmul.f32 %v15546_v42, %v5911_v8  ;;  %v16836_v14 = vrot.slane %v15335_v6, 7  ;;  %v6724_v26 = vrot.slane %v15385_v20, 7 }
 0x38b   : > { %v6358_v4 = vrot.slane %v16731_v12, 7  ;;  %v6125_v9 = vmul.f32 %v15518_v51, %v5909_v22  ;;  %v6726_v46 = vrot.slane %v15378_v34, 7  ;;  %v6728_v19 = vrot.slane %v15437_v48, 7 }
 0x38c   : > { %v15559_v35 = vsel %vm6704_vm7, %v16836_v14, %v6722_v23  ;;  %v6350_v30 = vor.u32 %v6349_v44, %v6346_v0  ;;  %v6145_v16 = vpack.c.bf16 %v6127_v27, %v6126_v25  ;;  %v15566_v8 = vsel %vm6704_vm7, %v6722_v23, %v6724_v26  ;;  %v15587_v44 = vld [vmem:[#allocation3 + $0x10] sm:$0xff] }
 0x38d   : > { %v6359_v60 = vor.u32 %v6358_v4, %v6355_v47  ;;  %v6730_v12 = vrot.slane %v15430_v40, 7  ;;  %v15569_v29 = vpack.c.bf16 %v6125_v9, %v6124_v41  ;;  %v15573_v42 = vsel %vm6704_vm7, %v6724_v26, %v6726_v46  ;;  %v7629_v9 = vld [vmem:[#allocation3 + $0x8] sm:$0x80] }
 0x38e   : > { %v6351_v14 = vsel %vm6199_vm6, %v6341_v1, %v6350_v30  ;;  %v15576_v22 = vsel %vm6704_vm7, %v6726_v46, %v6728_v19  ;;  %6163 = vst [vmem:[#allocation3 + $0x98] sm:$0xff] %v6145_v16  ;;  %v6732_v23 = vrot.slane %v15483_v5, 7  ;;  %v6734_v41 = vrot.slane %v15477_v31, 7 }
 0x38f   : > { %12965 = vmatmul.mubr.bf16.gmra.mrb[28].mxu1 %v6351_v14  ;;  %v6360_v25 = vsel %vm6199_vm6, %v6350_v30, %v6359_v60  ;;  %v15580_v47 = vsel %vm6704_vm7, %v6728_v19, %v6730_v12  ;;  %6162 = vst [vmem:[#allocation3 + $0x90] sm:$0xff] %v15569_v29  ;;  %v6736_v1 = vrot.slane %v15527_v33, 7  ;;  %v16737_v0 = vrot.slane %v15523_v2, 7  ;;  %v6649_v19 = vld [vmem:[#allocation3] sm:$0x80] }
 0x390   : > { %12968 = vmatprep.mubr.bf16.mxu1 %v6360_v25  ;;  %v15590_v16 = vsel %vm6704_vm7, %v6730_v12, %v6732_v23  ;;  %v15593_v27 = vsel %vm6704_vm7, %v6732_v23, %v6734_v41  ;;  %v16742_v30 = vshrl.u32 %v15587_v44, 16  ;;  %v6705_v46 = vrot.slane %v6649_v19, 7  ;;  %v15608_v25 = vld [vmem:[#allocation3 + $0x38] sm:$0xff]  ;;  %v15619_v19 = vld [vmem:[#allocation3 + $0x28] sm:$0xff] }
 0x391   : > { %v15596_v4 = vsel %vm6704_vm7, %v6734_v41, %v6736_v1  ;;  %v15601_v26 = vsel %vm6704_vm7, %v6736_v1, %v16737_v0  ;;  %v16837_v14 = vshrl.u32 %v15286_v21, 16  ;;  %16838 = vst [vmem:[#allocation40_spill] sm:$0xff] %v15608_v25  ;;  %v7666_v23 = vshrl.u32 %v7629_v9, 16 }
 0x392   : > { %v16839_v51 = vshrl.u32 %v15335_v6, 16  ;;  %v16746_v1 = vrot.slane %v15612_v50, 7  ;;  %v15617_v0 = vrot.slane %v16742_v30, 7  ;;  %v16749_v10 = vshll.u32 %v15587_v44, 16 }
 0x393   : > { %v15606_v12 = vrot.slane %v16837_v14, 7  ;;  %v16840_v14 = vshll.u32 %v15286_v21, 16  ;;  %v7668_v30 = vrot.slane %v7666_v23, 7  ;;  %v16841_v21 = vshll.u32 %v15335_v6, 16 }
 0x394   : > { %v7193_v41 = vrot.slane %v16839_v51, 7  ;;  %v6707_v17 = vsel %vm6704_vm7, %v6705_v46, %v16746_v1  ;;  %v16842_v46 = vshrl.u32 %v15326_v45, 16  ;;  %v16843_v23 = vshrl.u32 %v15385_v20, 16 }
 0x395   : > { %v15624_v39 = vor.u32 %v15606_v12, %v16840_v14  ;;  %v16844_v58 = vshrl.u32 %v15608_v25, 16  ;;  %v16845_v6 = vshrl.u32 %v15378_v34, 16  ;;  %v16846_v62 = vshrl.u32 %v15437_v48, 16 }
 0x396   : > { %v6182_v32 = vld [vmem:[#allocation3 + $0x90] sm:$0x7f]  ;;  %v15634_v14 = vor.u32 %v7193_v41, %v16841_v21  ;;  %v7201_v1 = vrot.slane %v16842_v46, 7  ;;  %v16847_v59 = vshll.u32 %v15326_v45, 16  ;;  %v16848_v56 = vshll.u32 %v15385_v20, 16 }
 0x397   : > { %v6362_v9 = vshrl.u32 %v6182_v32, 16  ;;  %v6365_v43 = vshll.u32 %v6182_v32, 16  ;;  %v15639_v32 = vor.u32 %v16749_v10, %v15617_v0  ;;  %v15648_v63 = vrot.slane %v16844_v58, 7 }
 0x398   : > { %v7217_v21 = vrot.slane %v16845_v6, 7  ;;  %v7225_v10 = vrot.slane %v16846_v62, 7  ;;  %v7204_v51 = vor.u32 %v7201_v1, %v16847_v59  ;;  %v16849_v55 = vshrl.u32 %v15430_v40, 16 }
 0x399   : > { %v6364_v36 = vrot.slane %v6362_v9, 6  ;;  %v6367_v15 = vrot.slane %v6365_v43, 7  ;;  %v7209_v9 = vrot.slane %v16843_v23, 7  ;;  %v16851_v61 = vshll.u32 %v15378_v34, 16 }
 0x39a   : > { %v7233_v23 = vrot.slane %v16849_v55, 7  ;;  %v16852_v57 = vshll.u32 %v15437_v48, 16  ;;  %v16853_v45 = vshrl.u32 %v15477_v31, 16  ;;  %v16854_v20 = vshll.u32 %v15430_v40, 16 }
 0x39b   : > { %v6368_v43 = vor.u32 %v6367_v15, %v6364_v36  ;;  %v7212_v46 = vor.u32 %v7209_v9, %v16848_v56  ;;  %v16850_v15 = vshrl.u32 %v15483_v5, 16  ;;  %v7220_v6 = vor.u32 %v7217_v21, %v16851_v61 }
 0x39c   : > { %v7228_v62 = vor.u32 %v7225_v10, %v16852_v57  ;;  %v7249_v59 = vrot.slane %v16853_v45, 7  ;;  %v15670_v56 = vsel %vm7129_vm8, %v7193_v41, %v7204_v51  ;;  %v16856_v48 = vshll.u32 %v15477_v31, 16 }
 0x39d   : > { %v7241_v36 = vrot.slane %v16850_v15, 7  ;;  %v6369_v58 = vsel %vm6199_vm6, %v6359_v60, %v6368_v43  ;;  %v15673_v55 = vsel %vm7129_vm8, %v7201_v1, %v7212_v46  ;;  %v7236_v15 = vor.u32 %v7233_v23, %v16854_v20  ;;  %v15689_v43 = vld [vmem:[#allocation3 + $0x30] sm:$0xff]  ;;  %v15700_v46 = vld [vmem:[#allocation3 + $0x40] sm:$0xff] }
 0x39e   : > { %12969 = vmatmul.mubr.bf16.gmra.mrb[32].mxu1 %v6369_v58  ;;  %v16855_v60 = vshll.u32 %v15483_v5, 16  ;;  %v15680_v61 = vsel %vm7129_vm8, %v7209_v9, %v7220_v6  ;;  %v15683_v57 = vsel %vm7129_vm8, %v7217_v21, %v7228_v62  ;;  %v7252_v41 = vor.u32 %v7249_v59, %v16856_v48  ;;  %16861 = vst [vmem:[#allocation43_spill] sm:$0xff] %v15700_v46 }
 0x39f   : > { %12988 = vmatprep.mubr.bf16.mxu1 %v6707_v17  ;;  %v16857_v51 = vshrl.u32 %v15527_v33, 16  ;;  %v15692_v40 = vsel %vm7129_vm8, %v7225_v10, %v7236_v15  ;;  %v16860_v17 = vshrl.u32 %v15523_v2, 16  ;;  %v7271_v21 = vshrl.u32 %v15569_v29, 16 }
 0x3a0   : > { %v7244_v34 = vor.u32 %v7241_v36, %v16855_v60  ;;  %16858 = vst [vmem:[#allocation41_spill] sm:$0xff] %v15692_v40  ;;  %v16862_v31 = vshll.u32 %v15608_v25, 16  ;;  %v15708_v6 = vsel %vm7129_vm8, %v7241_v36, %v7252_v41  ;;  %v16864_v10 = vshll.u32 %v15527_v33, 16  ;;  %v14235_v33 = vld [vmem:[%s16689_s2 + $0x88] sm:$0xff]  }
 0x3a1   : > { %v7257_v1 = vrot.slane %v16857_v51, 7  ;;  %v7265_v9 = vrot.slane %v16860_v17, 7  ;;  %16863 = vst [vmem:[#allocation44_spill] sm:$0xff] %v15708_v6  ;;  %v16866_v45 = vshll.u32 %v15523_v2, 16  ;;  %v15718_v15 = vrot.slane %v7271_v21, 7 }
 0x3a2   : > { %v15695_v5 = vsel %vm7129_vm8, %v7233_v23, %v7244_v34  ;;  %v15705_v58 = vor.u32 %v16862_v31, %v15648_v63  ;;  %v15714_v23 = vsel %vm7129_vm8, %v7668_v30, %v15639_v32  ;;  %v7274_v60 = vshll.u32 %v15569_v29, 16 }
 0x3a3   : > { %16859 = vst [vmem:[#allocation42_spill] sm:$0xff] %v15695_v5  ;;  %v7260_v62 = vor.u32 %v7257_v1, %v16864_v10  ;;  %16865 = vst [vmem:[#allocation45_spill] sm:$0xff] %v15714_v23  ;;  %v7268_v20 = vor.u32 %v7265_v9, %v16866_v45  ;;  %v16757_v34 = vshrl.u32 %v15689_v43, 16  ;;  %v16755_v36 = vshrl.u32 %v15700_v46, 16 }
 0x3a4   : > { %v15733_v41 = vor.u32 %v7274_v60, %v15718_v15  ;;  %v16758_v51 = vshll.u32 %v15689_v43, 16  ;;  %v16870_v17 = vrot.slane %v15612_v50, 7  ;;  %v16872_v10 = vshrl.u32 %v15619_v19, 16 }
 0x3a5   : > { %v15723_v48 = vsel %vm7129_vm8, %v7249_v59, %v7260_v62  ;;  %v15730_v30 = vsel %vm7129_vm8, %v7257_v1, %v7268_v20  ;;  %v7704_v29 = vrot.slane %v16757_v34, 7  ;;  %v16869_v59 = vrot.slane %v15206_v37, 7  ;;  %v15793_v34 = vld [vmem:[#allocation3 + $0x60] sm:$0xff] }
 0x3a6   : > { %16867 = vst [vmem:[#allocation46_spill] sm:$0xff] %v15723_v48  ;;  %16868 = vst [vmem:[#allocation47_spill] sm:$0xff] %v15730_v30  ;;  %v15745_v31 = vrot.slane %v16755_v36, 7  ;;  %v16756_v1 = vshll.u32 %v15700_v46, 16  ;;  %v15750_v62 = vrot.slane %v16872_v10, 7  ;;  %v15754_v45 = vsel %vm7129_vm8, %v7265_v9, %v15733_v41  ;;  %v14236_v9 = vld [vmem:[%s16689_s2 + $0x90] sm:$0xff]  }
 0x3a7   : > { %v6709_v21 = vsel %vm6704_vm7, %v16870_v17, %v16869_v59  ;;  %16873 = vst [vmem:[#allocation49_spill] sm:$0xff] %v15754_v45  ;;  %v7707_v37 = vor.u32 %v16758_v51, %v7704_v29  ;;  %v15760_v20 = vsel %vm7129_vm8, %v7704_v29, %v15705_v58  ;;  %v15770_v59 = vld [vmem:[#allocation3 + $0x18] sm:$0xff]  ;;  %v15776_v29 = vld [vmem:[#allocation3 + $0x20] sm:$0xff]  ;;  %v15787_v10 = vld [vmem:[#allocation3 + $0x50] sm:$0xff]  ;;  %v16882_v5 = vshll.u32 %v15619_v19, 16 }
 0x3a8   : > { %16871 = vst [vmem:[#allocation48_spill] sm:$0xff] %v15745_v31  ;;  %12989 = vmatmul.mubr.bf16.vlgmr.msra.gmra.mrb[0].mxu1 %v6709_v21  ;;  %16874 = vst [vmem:[#allocation50_spill] sm:$0xff] %v15760_v20  ;;  %v7723_v60 = vor.u32 %v16756_v1, %v15745_v31  ;;  %v14237_v21 = vld [vmem:[%s16689_s2 + $0x98] sm:$0xff]   ;;  %v15795_v51 = vld [vmem:[#allocation3 + $0x68] sm:$0xff]  ;;  %v16877_v31 = vshll.u32 %v15587_v44, 16  ;;  %v16878_v45 = vshll.u32 %v15770_v59, 16 }
 0x3a9   : > { %12992 = vmatprep.mubr.bf16.mxu1 %v15272_v13  ;;  %13025 = vmatpush3.bf16.msra.mxu1 %v15407_v28  ;;  %v15774_v17 = vsel %vm7129_vm8, %v15750_v62, %v7707_v37  ;;  %v15782_v28 = vld [vmem:[#allocation3 + $0x48] sm:$0xff]  ;;  %v15789_v36 = vld [vmem:[#allocation3 + $0x58] sm:$0xff]  ;;  %v15822_v1 = vld [vmem:[#allocation3 + $0x80] sm:$0xff]  ;;  %v8594_v40 = vrot.slane %v16882_v5, 1 }
 0x3aa   : > { %13026 = vmatprep.subr.bf16.mxu1 %v14235_v33  ;;  %16875 = vst [vmem:[#allocation51_spill] sm:$0xff] %v15774_v17  ;;  %v15780_v13 = vsel %vm7129_vm8, %v15648_v63, %v7723_v60  ;;  %v15797_v60 = vld [vmem:[#allocation3 + $0x88] sm:$0xff]  ;;  %v15805_v37 = vld [vmem:[#allocation3 + $0x98] sm:$0xff]  ;;  %v8573_v20 = vrot.slane %v16877_v31, 1  ;;  %v8578_v30 = vrot.slane %v16878_v45, 1  ;;  %v16881_v45 = vshrl.u32 %v15770_v59, 16 }
 0x3ab   : > { %16876 = vst [vmem:[#allocation52_spill] sm:$0xff] %v15780_v13  ;;  %v15811_v17 = vld [vmem:[#allocation3 + $0x78] sm:$0xff]  ;;  %v16764_v24 = vshrl.u32 %v15797_v60, 16  ;;  %v16766_v23 = vshll.u32 %v15805_v37, 16  ;;  %v16880_v13 = vshll.u32 %v15776_v29, 16 }
 0x3ac   : > { %v8582_v54 = vor.u32 %v8578_v30, %v16881_v45 }
 0x3ad   : > { %13027 = vmatpush3.bf16.msra.mxu1 %v14235_v33  ;;  %v15803_v33 = vld [vmem:[#allocation3 + $0x70] sm:$0xff]  ;;  %v8586_v48 = vrot.slane %v16880_v13, 1 }
 0x3ae   : > { %13028 = vmatprep.subr.bf16.mxu1 %v14236_v9 }
 0x3af   : > { %v15877_v45 = vsel %vm3405_vm3, %v8582_v54, %v8586_v48 }
 0x3b0   : > { %12993 = vmatmul.mubr.bf16.gmra.mrb[4].mxu1 %v15319_v11  ;;  %v16765_v11 = vshrl.u32 %v15805_v37, 16  ;;  %16887 = vst [vmem:[#allocation55_spill] sm:$0xff] %v15877_v45 }
 0x3b1   : > { %12996 = vmatprep.mubr.bf16.mxu1 %v15371_v18  ;;  %13029 = vmatpush3.bf16.msra.mxu1 %v14236_v9  ;;  %v15832_v9 = vrot.slane %v16764_v24, 7  ;;  %v16879_v18 = vshrl.u32 %v15587_v44, 16 }
 0x3b2   : > { %13030 = vmatprep.subr.bf16.mxu1 %v14237_v21  ;;  %v7808_v53 = vrot.slane %v16765_v11, 7  ;;  %v16888_v11 = vshrl.u32 %v15619_v19, 16 }
 0x3b3   : > { %v15846_v24 = vsel %vm7129_vm8, %v15832_v9, %v15733_v41  ;;  %v8574_v31 = vor.u32 %v8573_v20, %v16879_v18  ;;  %v14239_v41 = vld [vmem:[%s16689_s2 + $0xa8] sm:$0xff]  }
 0x3b4   : > { %v7811_v6 = vor.u32 %v16766_v23, %v7808_v53  ;;  %v16885_v53 = vshll.u32 %v15689_v43, 16  ;;  %v8598_v20 = vor.u32 %v8594_v40, %v16888_v11 }
 0x3b5   : > { %13031 = vmatpush3.bf16.msra.mxu1 %v14237_v21  ;;  %v15864_v13 = vsel %vm3405_vm3, %v8574_v31, %v8578_v30  ;;  %v16884_v21 = vshrl.u32 %v15776_v29, 16  ;;  %v16889_v30 = vshll.u32 %v15608_v25, 16 }
 0x3b6   : > { %13032 = vmatprep.subr.bf16.mxu1 %v14238_v52  ;;  %16883 = vst [vmem:[#allocation53_spill] sm:$0xff] %v15864_v13  ;;  %v15870_v23 = vrot.slane %v16885_v53, 1  ;;  %v15874_v5 = vsel %vm7129_vm8, %v15718_v15, %v7811_v6  ;;  %v16891_v53 = vshrl.u32 %v15689_v43, 16  ;;  %v16893_v6 = vshll.u32 %v15700_v46, 16 }
 0x3b7   : > { %v8590_v18 = vor.u32 %v8586_v48, %v16884_v21  ;;  %v8610_v31 = vrot.slane %v16889_v30, 1  ;;  %v16895_v15 = vshll.u32 %v15782_v28, 16 }
 0x3b8   : > { %16886 = vst [vmem:[#allocation54_spill] sm:$0xff] %v15870_v23  ;;  %12997 = vmatmul.mubr.bf16.gmra.mrb[8].mxu1 %v15425_v3  ;;  %v15890_v13 = vor.u32 %v15870_v23, %v16891_v53  ;;  %v15894_v54 = vrot.slane %v16893_v6, 1  ;;  %v15901_v3 = vsel %vm3405_vm3, %v8598_v20, %v15870_v23  ;;  %v16899_v53 = vshll.u32 %v15789_v36, 16 }
 0x3b9   : > { %v15885_v21 = vsel %vm3405_vm3, %v8590_v18, %v8594_v40  ;;  %v8626_v48 = vrot.slane %v16895_v15, 1  ;;  %13000 = vmatprep.mubr.bf16.mxu1 %v15470_v7  ;;  %13033 = vmatpush3.bf16.msra.mxu1 %v14238_v52  ;;  %16896 = vst [vmem:[#allocation59_spill] sm:$0xff] %v15901_v3  ;;  %v16897_v40 = vshrl.u32 %v15608_v25, 16  ;;  %v16898_v18 = vshll.u32 %v15787_v10, 16  ;;  %v14240_v15 = vld [vmem:[%s16689_s2 + $0xb0] sm:$0xff]  }
 0x3ba   : > { %16890 = vst [vmem:[#allocation56_spill] sm:$0xff] %v15885_v21  ;;  %16892 = vst [vmem:[#allocation57_spill] sm:$0xff] %v15890_v13  ;;  %v8642_v6 = vrot.slane %v16899_v53, 1  ;;  %13034 = vmatprep.subr.bf16.mxu1 %v14239_v41  ;;  %v15914_v52 = vsel %vm3405_vm3, %v15890_v13, %v8610_v31  ;;  %v16901_v7 = vshrl.u32 %v15700_v46, 16  ;;  %v16904_v21 = vshrl.u32 %v15787_v10, 16 }
 0x3bb   : > { %16894 = vst [vmem:[#allocation58_spill] sm:$0xff] %v15894_v54  ;;  %v8614_v11 = vor.u32 %v8610_v31, %v16897_v40  ;;  %v8634_v30 = vrot.slane %v16898_v18, 1  ;;  %16900 = vst [vmem:[#allocation60_spill] sm:$0xff] %v15914_v52  ;;  %v16902_v40 = vshrl.u32 %v15782_v28, 16  ;;  %v16903_v18 = vshll.u32 %v15793_v34, 16 }
 0x3bc   : > { %v8622_v20 = vor.u32 %v15894_v54, %v16901_v7  ;;  %v16905_v31 = vshrl.u32 %v15789_v36, 16  ;;  %v16906_v52 = vshll.u32 %v15795_v51, 16 }
 0x3bd   : > { %v8630_v23 = vor.u32 %v8626_v48, %v16902_v40  ;;  %v8650_v3 = vrot.slane %v16903_v18, 1  ;;  %v15925_v53 = vsel %vm3405_vm3, %v8614_v11, %v15894_v54  ;;  %v8638_v45 = vor.u32 %v8634_v30, %v16904_v21  ;;  %13035 = vmatpush3.bf16.msra.mxu1 %v14239_v41 }
 0x3be   : > { %v8646_v13 = vor.u32 %v8642_v6, %v16905_v31  ;;  %v8658_v46 = vrot.slane %v16906_v52, 1  ;;  %v15934_v7 = vsel %vm3405_vm3, %v8622_v20, %v8626_v48  ;;  %v16909_v18 = vshrl.u32 %v15793_v34, 16  ;;  %13036 = vmatprep.subr.bf16.mxu1 %v14240_v15 }
 0x3bf   : > { %16907 = vst [vmem:[#allocation61_spill] sm:$0xff] %v15934_v7  ;;  %v15937_v40 = vsel %vm3405_vm3, %v8630_v23, %v8634_v30  ;;  %v16910_v11 = vshll.u32 %v15803_v33, 16  ;;  %v15944_v21 = vsel %vm3405_vm3, %v8638_v45, %v8642_v6  ;;  %v16913_v52 = vshrl.u32 %v15795_v51, 16  ;;  %v14241_v30 = vld [vmem:[%s16689_s2 + $0xb8] sm:$0xff]  }
 0x3c0   : > { %16908 = vst [vmem:[#allocation62_spill] sm:$0xff] %v15937_v40  ;;  %v8654_v25 = vor.u32 %v8650_v3, %v16909_v18  ;;  %16911 = vst [vmem:[#allocation63_spill] sm:$0xff] %v15944_v21  ;;  %v15947_v31 = vsel %vm3405_vm3, %v8646_v13, %v8650_v3  ;;  %v16914_v20 = vshll.u32 %v15811_v17, 16  ;;  %v16916_v41 = vshrl.u32 %v15803_v33, 16  ;;  %13001 = vmatmul.mubr.bf16.gmra.mrb[12].mxu1 %v15516_v38  ;;  %v15971_v21 = vld [vmem:[#allocation3 + $0x90] sm:$0xff]  ;;  %v15989_v38 = vld [vmem:[%s16689_s2 + $0xc0] sm:$0xff]  }
 0x3c1   : > { %v8666_v54 = vrot.slane %v16910_v11, 1  ;;  %16912 = vst [vmem:[#allocation64_spill] sm:$0xff] %v15947_v31  ;;  %v8662_v48 = vor.u32 %v8658_v46, %v16913_v52  ;;  %v16917_v13 = vshll.u32 %v15822_v1, 16  ;;  %v16918_v6 = vshll.u32 %v15797_v60, 16  ;;  %13004 = vmatprep.mubr.bf16.mxu1 %v15559_v35  ;;  %13037 = vmatpush3.bf16.msra.mxu1 %v14240_v15 }
 0x3c2   : > { %v8674_v23 = vrot.slane %v16914_v20, 1  ;;  %v15957_v18 = vsel %vm3405_vm3, %v8654_v25, %v8658_v46  ;;  %v16920_v20 = vshrl.u32 %v15811_v17, 16  ;;  %v16922_v46 = vshrl.u32 %v15822_v1, 16  ;;  %13038 = vmatprep.subr.bf16.mxu1 %v14241_v30 }
 0x3c3   : > { %16915 = vst [vmem:[#allocation65_spill] sm:$0xff] %v15957_v18  ;;  %v8670_v45 = vor.u32 %v8666_v54, %v16916_v41  ;;  %v8682_v3 = vrot.slane %v16917_v13, 1  ;;  %v8690_v11 = vrot.slane %v16918_v6, 1  ;;  %v15966_v52 = vsel %vm3405_vm3, %v8662_v48, %v8666_v54 }
 0x3c4   : > { %16919 = vst [vmem:[#allocation66_spill] sm:$0xff] %v15966_v52  ;;  %v8678_v31 = vor.u32 %v8674_v23, %v16920_v20  ;;  %v16923_v13 = vshrl.u32 %v15797_v60, 16  ;;  %v16924_v6 = vshll.u32 %v15805_v37, 16  ;;  %v8700_v15 = vshrl.u32 %v15971_v21, 16  ;;  %v16071_v52 = vld [vmem:[#allocation3 + $0x50] sm:$0xff] }
 0x3c5   : > { %v15974_v25 = vsel %vm3405_vm3, %v8670_v45, %v8674_v23  ;;  %v8686_v41 = vor.u32 %v8682_v3, %v16922_v46  ;;  %v16927_v45 = vshrl.u32 %v15805_v37, 16  ;;  %v8696_v46 = vshll.u32 %v15971_v21, 16  ;;  %13039 = vmatpush3.bf16.msra.mxu1 %v14241_v30  ;;  %v7093_v30 = vld [vmem:[#allocation3] sm:$0x80]  ;;  %16948 = vst [vmem:[#allocation81_spill] sm:$0xff] %v16071_v52 }
 0x3c6   : > { %16921 = vst [vmem:[#allocation67_spill] sm:$0xff] %v15974_v25  ;;  %v8694_v18 = vor.u32 %v8690_v11, %v16923_v13  ;;  %v8706_v54 = vrot.slane %v16924_v6, 1  ;;  %v15984_v48 = vsel %vm3405_vm3, %v8678_v31, %v8682_v3  ;;  %13076 = vmatprep.subr.bf16.mxu1 %v15989_v38  ;;  %v16003_v3 = vld [vmem:[#allocation3 + $0x20] sm:$0xff]  ;;  %v7131_v6 = vshrl.u32 %v7093_v30, 16 }
 0x3c7   : > { %16925 = vst [vmem:[#allocation68_spill] sm:$0xff] %v15984_v48  ;;  %v15992_v23 = vsel %vm3405_vm3, %v8686_v41, %v8690_v11  ;;  %v8698_v35 = vrot.slane %v8696_v46, 1  ;;  %16929 = vst [vmem:[#allocation71_spill] sm:$0xff] %v16003_v3  ;;  %v16005_v11 = vld [vmem:[#allocation3 + $0x28] sm:$0xff]  ;;  %v6667_v46 = vld [vmem:[#allocation3 + $0x90] sm:$0x7f] }
 0x3c8   : > { %16926 = vst [vmem:[#allocation69_spill] sm:$0xff] %v15992_v23  ;;  %v15996_v20 = vor.u32 %v8706_v54, %v16927_v45  ;;  %13005 = vmatmul.mubr.bf16.gmra.mrb[16].mxu1 %v15566_v8  ;;  %16930 = vst [vmem:[#allocation72_spill] sm:$0xff] %v16005_v11  ;;  %v16775_v8 = vrot.slane %v16005_v11, 1  ;;  %v6740_v45 = vrot.slane %v6667_v46, 7  ;;  %v16942_v46 = vshll.u32 %v15770_v59, 16 }
 0x3c9   : > { %13008 = vmatprep.mubr.bf16.mxu1 %v15573_v42  ;;  %v8702_v31 = vor.u32 %v8700_v15, %v8698_v35  ;;  %v16013_v13 = vsel %vm3405_vm3, %v8694_v18, %v8698_v35  ;;  %v16776_v42 = vrot.slane %v16003_v3, 1  ;;  %v16027_v18 = vld [vmem:[#allocation3 + $0x38] sm:$0xff]  ;;  %v7133_v35 = vrot.slane %v7131_v6, 7 }
 0x3ca   : > { %16928 = vst [vmem:[#allocation70_spill] sm:$0xff] %v15996_v20  ;;  %16932 = vst [vmem:[#allocation74_spill] sm:$0xff] %v16013_v13  ;;  %v16939_v15 = vshll.u32 %v16003_v3, 16  ;;  %v16057_v13 = vld [vmem:[#allocation3 + $0x48] sm:$0xff]  ;;  %v16945_v23 = vshrl.u32 %v16027_v18, 16 }
 0x3cb   : > { %v16009_v41 = vsel %vm3405_vm3, %v8702_v31, %v8706_v54  ;;  %16934 = vst [vmem:[#allocation76_spill] sm:$0xff] %v16027_v18  ;;  %v16935_v31 = vshrl.u32 %v15770_v59, 16  ;;  %v16038_v54 = vld [vmem:[#allocation3 + $0x30] sm:$0xff]  ;;  %16943 = vst [vmem:[#allocation79_spill] sm:$0xff] %v16057_v13 }
 0x3cc   : > { %16931 = vst [vmem:[#allocation73_spill] sm:$0xff] %v16009_v41  ;;  %16936 = vst [vmem:[#allocation77_spill] sm:$0xff] %v16038_v54 }
 0x3cd   : > { %v16034_v30 = vrot.slane %v16935_v31, 7  ;;  %v7141_v31 = vsel %vm7129_vm8, %v7133_v35, %v15133_v49  ;;  %v10119_v35 = vrot.slane %v16945_v23, 1 }
 0x3cf   : > { %v16055_v41 = vor.u32 %v16942_v46, %v16034_v30  ;;  %v16947_v46 = vrot.slane %v15523_v2, 7  ;;  %v10135_v2 = vshrl.u32 %v16057_v13, 16 }
 0x3d0   : > { %13009 = vmatmul.mubr.bf16.gmra.mrb[20].mxu1 %v15576_v22  ;;  %v16022_v22 = vsel %vm4698_vm4, %v16776_v42, %v16775_v8  ;;  %v16941_v8 = vshll.u32 %v16005_v11, 16 }
 0x3d1   : > { %13012 = vmatprep.mubr.bf16.mxu1 %v15580_v47  ;;  %16933 = vst [vmem:[#allocation75_spill] sm:$0xff] %v16022_v22  ;;  %v16040_v47 = vld [vmem:[#allocation3 + $0x40] sm:$0xff]  ;;  %v10095_v22 = vrot.slane %v16939_v15, 2  ;;  %v10108_v15 = vshrl.u32 %v16038_v54, 16  ;;  %v6741_v25 = vsel %vm6704_vm7, %v16947_v46, %v6740_v45 }
 0x3d2   : > { %16937 = vst [vmem:[#allocation78_spill] sm:$0xff] %v16040_v47  ;;  %v10104_v42 = vrot.slane %v16941_v8, 2  ;;  %v10126_v48 = vshrl.u32 %v16040_v47, 16 }
 0x3d8   : > { %13013 = vmatmul.mubr.bf16.gmra.mrb[24].mxu1 %v15590_v16  ;;  %v16938_v16 = vshrl.u32 %v16003_v3, 16  ;;  %v10111_v3 = vshll.u32 %v16038_v54, 16 }
 0x3d9   : > { %13016 = vmatprep.mubr.bf16.mxu1 %v15593_v27  ;;  %v16940_v27 = vshrl.u32 %v16005_v11, 16  ;;  %v16946_v11 = vshll.u32 %v16027_v18, 16 }
 0x3da   : > { %v10092_v6 = vrot.slane %v16938_v16, 1  ;;  %v10113_v40 = vrot.slane %v10111_v3, 2  ;;  %v10138_v3 = vshll.u32 %v16057_v13, 16 }
 0x3db   : > { %v10101_v20 = vrot.slane %v16940_v27, 1  ;;  %v10122_v8 = vrot.slane %v16946_v11, 2 }
 0x3dc   : > { %v16059_v16 = vor.u32 %v10095_v22, %v10092_v6  ;;  %v16073_v22 = vld [vmem:[#allocation3 + $0x58] sm:$0xff]  ;;  %v10110_v6 = vrot.slane %v10108_v15, 1  ;;  %v16085_v15 = vld [vmem:[#allocation3 + $0x60] sm:$0xff] }
 0x3dd   : > { %v10105_v27 = vor.u32 %v10104_v42, %v10101_v20  ;;  %v10129_v20 = vshll.u32 %v16040_v47, 16  ;;  %v10123_v11 = vor.u32 %v10122_v8, %v10119_v35  ;;  %v10128_v42 = vrot.slane %v10126_v48, 1  ;;  %16950 = vst [vmem:[#allocation83_spill] sm:$0xff] %v16085_v15  ;;  %v16090_v48 = vld [vmem:[#allocation3 + $0x68] sm:$0xff] }
 0x3de   : > { %16944 = vst [vmem:[#allocation80_spill] sm:$0xff] %v16059_v16  ;;  %v10114_v46 = vor.u32 %v10113_v40, %v10110_v6  ;;  %v10137_v47 = vrot.slane %v10135_v2, 1  ;;  %v10153_v35 = vshrl.u32 %v16073_v22, 16  ;;  %16951 = vst [vmem:[#allocation84_spill] sm:$0xff] %v16090_v48  ;;  %v10140_v6 = vrot.slane %v10138_v3, 2 }
 0x3df   : > { %v16079_v23 = vsel %vm5234_vm5, %v16059_v16, %v10105_v27  ;;  %v10131_v54 = vrot.slane %v10129_v20, 2  ;;  %v10147_v16 = vshll.u32 %v16071_v52, 16  ;;  %v16098_v20 = vld [vmem:[#allocation3 + $0x70] sm:$0xff]  ;;  %v10156_v13 = vshll.u32 %v16073_v22, 16 }
 0x3e0   : > { %13017 = vmatmul.mubr.bf16.gmra.mrb[28].mxu1 %v15596_v4  ;;  %16949 = vst [vmem:[#allocation82_spill] sm:$0xff] %v16079_v23  ;;  %v10144_v4 = vshrl.u32 %v16071_v52, 16  ;;  %v16093_v8 = vsel %vm5234_vm5, %v10105_v27, %v10114_v46  ;;  %v10155_v23 = vrot.slane %v10153_v35, 1  ;;  %v10141_v18 = vor.u32 %v10140_v6, %v10137_v47 }
 0x3e1   : > { %13020 = vmatprep.mubr.bf16.mxu1 %v15601_v26  ;;  %16952 = vst [vmem:[#allocation85_spill] sm:$0xff] %v16093_v8  ;;  %v16096_v26 = vsel %vm5234_vm5, %v10114_v46, %v10123_v11  ;;  %v10132_v40 = vor.u32 %v10131_v54, %v10128_v42  ;;  %v10149_v2 = vrot.slane %v10147_v16, 2  ;;  %v10162_v7 = vshrl.u32 %v16085_v15, 16  ;;  %v16106_v8 = vld [vmem:[#allocation3 + $0x78] sm:$0xff]  ;;  %v16110_v16 = vld [vmem:[#allocation3 + $0x80] sm:$0xff] }
 0x3e2   : > { %16953 = vst [vmem:[#allocation86_spill] sm:$0xff] %v16096_v26  ;;  %v10146_v45 = vrot.slane %v10144_v4, 1  ;;  %v10165_v27 = vshll.u32 %v16085_v15, 16  ;;  %v10158_v54 = vrot.slane %v10156_v13, 2  ;;  %v10171_v42 = vshrl.u32 %v16090_v48, 16 }
 0x3e3   : > { %v16102_v52 = vsel %vm5234_vm5, %v10123_v11, %v10132_v40  ;;  %v10174_v3 = vshll.u32 %v16090_v48, 16  ;;  %v16113_v4 = vsel %vm5234_vm5, %v10132_v40, %v10141_v18  ;;  %v10164_v11 = vrot.slane %v10162_v7, 1 }
 0x3e4   : > { %16954 = vst [vmem:[#allocation87_spill] sm:$0xff] %v16102_v52  ;;  %v10150_v46 = vor.u32 %v10149_v2, %v10146_v45  ;;  %v10167_v35 = vrot.slane %v10165_v27, 2  ;;  %v10180_v47 = vshrl.u32 %v16098_v20, 16  ;;  %v10159_v52 = vor.u32 %v10158_v54, %v10155_v23  ;;  %v16119_v2 = vld [vmem:[#allocation3 + $0x88] sm:$0xff]  ;;  %v16128_v23 = vld [vmem:[#allocation3 + $0x98] sm:$0xff] }
 0x3e5   : > { %v10173_v45 = vrot.slane %v10171_v42, 1  ;;  %v10176_v13 = vrot.slane %v10174_v3, 2  ;;  %v10183_v15 = vshll.u32 %v16098_v20, 16  ;;  %v10189_v40 = vshrl.u32 %v16106_v8, 16 }
 0x3e6   : > { %v16117_v6 = vsel %vm5234_vm5, %v10141_v18, %v10150_v46  ;;  %v10168_v26 = vor.u32 %v10167_v35, %v10164_v11  ;;  %v10182_v48 = vrot.slane %v10180_v47, 1  ;;  %v16124_v7 = vsel %vm5234_vm5, %v10150_v46, %v10159_v52 }
 0x3e7   : > { %16955 = vst [vmem:[#allocation88_spill] sm:$0xff] %v16117_v6  ;;  %16956 = vst [vmem:[#allocation89_spill] sm:$0xff] %v16124_v7  ;;  %v10177_v27 = vor.u32 %v10176_v13, %v10173_v45  ;;  %v10198_v18 = vshrl.u32 %v16110_v16, 16  ;;  %v10185_v54 = vrot.slane %v10183_v15, 2  ;;  %v10191_v42 = vrot.slane %v10189_v40, 1  ;;  %v14243_v15 = vld [vmem:[%s16689_s2 + $0xc8] sm:$0xff]  }
 0x3e8   : > { %13021 = vmatmul.mubr.bf16.gmra.mrb[32].mxu1 %v6741_v25  ;;  %v10192_v25 = vshll.u32 %v16106_v8, 16  ;;  %v10201_v3 = vshll.u32 %v16110_v16, 16  ;;  %v10207_v47 = vshrl.u32 %v16119_v2, 16  ;;  %v10210_v6 = vshll.u32 %v16119_v2, 16 }
 0x3e9   : > { %13040 = vmatprep.mubr.bf16.mxu1 %v7141_v31  ;;  %v16131_v31 = vsel %vm5234_vm5, %v10159_v52, %v10168_v26  ;;  %v16135_v11 = vsel %vm5234_vm5, %v10168_v26, %v10177_v27  ;;  %v10200_v46 = vrot.slane %v10198_v18, 1  ;;  %v10186_v13 = vor.u32 %v10185_v54, %v10182_v48 }
 0x3ea   : > { %16957 = vst [vmem:[#allocation90_spill] sm:$0xff] %v16131_v31  ;;  %v10194_v35 = vrot.slane %v10192_v25, 2  ;;  %v10203_v7 = vrot.slane %v10201_v3, 2  ;;  %v16958_v52 = vshrl.u32 %v15776_v29, 16  ;;  %v10209_v26 = vrot.slane %v10207_v47, 1 }
 0x3eb   : > { %v10225_v25 = vshrl.u32 %v16128_v23, 16  ;;  %v7149_v18 = vsel %vm7129_vm8, %v15133_v49, %v15639_v32  ;;  %v16150_v48 = vsel %vm5234_vm5, %v10177_v27, %v10186_v13  ;;  %v10212_v3 = vrot.slane %v10210_v6, 2 }
 0x3ec   : > { %v7161_v31 = vrot.slane %v16958_v52, 7  ;;  %v10195_v40 = vor.u32 %v10194_v35, %v10191_v42  ;;  %v10204_v54 = vor.u32 %v10203_v7, %v10200_v46  ;;  %v7157_v52 = vsel %vm7129_vm8, %v15617_v0, %v16055_v41  ;;  %v14244_v41 = vld [vmem:[%s16689_s2 + $0xd0] sm:$0xff]  }
 0x3ed   : > { %v10227_v42 = vrot.slane %v10225_v25, 1  ;;  %v10228_v35 = vshll.u32 %v16128_v23, 16  ;;  %v16163_v32 = vor.u32 %v10212_v3, %v10209_v26  ;;  %v16959_v6 = vshrl.u32 %v15612_v50, 16  ;;  %v14245_v3 = vld [vmem:[%s16689_s2 + $0xd8] sm:$0xff]  }
 0x3ee   : > { %v16156_v45 = vsel %vm5234_vm5, %v10186_v13, %v10195_v40  ;;  %v16161_v49 = vsel %vm5234_vm5, %v10195_v40, %v10204_v54  ;;  %v16960_v27 = vshll.u32 %v15612_v50, 16  ;;  %v16961_v47 = vshll.u32 %v15776_v29, 16 }
 0x3ef   : > { %v10236_v7 = vrot.slane %v16959_v6, 1  ;;  %v10230_v46 = vrot.slane %v10228_v35, 2  ;;  %v16176_v13 = vsel %vm5234_vm5, %v10204_v54, %v16163_v32  ;;  %v16962_v26 = vshll.u32 %v15619_v19, 16 }
 0x3f0   : > { %13041 = vmatmul.mubr.bf16.vlgmr.msra.gmra.mrb[0].mxu1 %v7149_v18  ;;  %v10239_v0 = vrot.slane %v16960_v27, 2  ;;  %v14249_v27 = vld [vmem:[%s16689_s2 + $0xf8] sm:$0xff]  }
 0x3f1   : > { %13044 = vmatprep.mubr.bf16.mxu1 %v7157_v52  ;;  %13077 = vmatpush3.bf16.msra.mxu1 %v15989_v38  ;;  %v7164_v38 = vor.u32 %v16961_v47, %v7161_v31  ;;  %v7172_v25 = vor.u32 %v16962_v26, %v15750_v62  ;;  %v16183_v18 = vor.u32 %v10230_v46, %v10227_v42  ;;  %v14247_v42 = vld [vmem:[%s16689_s2 + $0xe8] sm:$0xff]  }
 0x3f2   : > { %13078 = vmatprep.subr.bf16.mxu1 %v14243_v15  ;;  %v16178_v40 = vor.u32 %v10239_v0, %v10236_v7  ;;  %v14248_v7 = vld [vmem:[%s16689_s2 + $0xf0] sm:$0xff]   ;;  %v16968_v0 = vld [vmem:[#allocation49_spill] sm:$0xff]  ;;  %v16970_v46 = vld [vmem:[#allocation51_spill] sm:$0xff] }
 0x3f3   : > { %v7165_v54 = vsel %vm7129_vm8, %v16034_v30, %v7164_v38  ;;  %v7173_v6 = vsel %vm7129_vm8, %v7161_v31, %v7172_v25  ;;  %v7181_v30 = vsel %vm7129_vm8, %v15750_v62, %v15624_v39  ;;  %v7189_v31 = vsel %vm7129_vm8, %v15606_v12, %v15705_v58  ;;  %v14250_v12 = vld [vmem:[%s16689_s2 + $0x100] sm:$0xff]   ;;  %v16963_v58 = vld [vmem:[#allocation41_spill] sm:$0xff]  ;;  %v16967_v62 = vld [vmem:[#allocation47_spill] sm:$0xff] }
 0x3f4   : > { %v16191_v35 = vsel %vm5234_vm5, %v16183_v18, %v16178_v40  ;;  %v7197_v39 = vsel %vm7129_vm8, %v15648_v63, %v15634_v14  ;;  %v16964_v63 = vld [vmem:[#allocation42_spill] sm:$0xff]  ;;  %v16965_v14 = vld [vmem:[#allocation44_spill] sm:$0xff]  ;;  %v14255_v47 = vld [vmem:[%s16689_s2 + $0x128] sm:$0xff]   ;;  %v16971_v38 = vshrl.u32 %v15782_v28, 16 }
 0x3f5   : > { %13079 = vmatpush3.bf16.msra.mxu1 %v14243_v15  ;;  %v14246_v15 = vld [vmem:[%s16689_s2 + $0xe0] sm:$0xff]  }
 0x3f6   : > { %13080 = vmatprep.subr.bf16.mxu1 %v14244_v41  ;;  %v7728_v26 = vrot.slane %v16971_v38, 7  ;;  %v16972_v25 = vld [vmem:[#allocation50_spill] sm:$0xff] }
 0x3f8   : > { %13045 = vmatmul.mubr.bf16.gmra.mrb[4].mxu1 %v7165_v54 }
 0x3f9   : > { %13048 = vmatprep.mubr.bf16.mxu1 %v7173_v6  ;;  %13081 = vmatpush3.bf16.msra.mxu1 %v14244_v41  ;;  %v16969_v41 = vld [vmem:[#allocation45_spill] sm:$0xff] }
 0x3fa   : > { %13082 = vmatprep.subr.bf16.mxu1 %v14245_v3 }
 0x3fd   : > { %13083 = vmatpush3.bf16.msra.mxu1 %v14245_v3  ;;  %v16973_v3 = vshrl.u32 %v15787_v10, 16 }
 0x3fe   : > { %13084 = vmatprep.subr.bf16.mxu1 %v14246_v15 }
 0x400   : > { %13049 = vmatmul.mubr.bf16.gmra.mrb[8].mxu1 %v7181_v30 }
 0x401   : > { %13052 = vmatprep.mubr.bf16.mxu1 %v7189_v31  ;;  %13085 = vmatpush3.bf16.msra.mxu1 %v14246_v15  ;;  %v14256_v15 = vld [vmem:[%s16689_s2 + $0x130] sm:$0xff]   ;;  %v16976_v31 = vshll.u32 %v15787_v10, 16 }
 0x402   : > { %13086 = vmatprep.subr.bf16.mxu1 %v14247_v42 }
 0x405   : > { %13087 = vmatpush3.bf16.msra.mxu1 %v14247_v42  ;;  %v16975_v42 = vshll.u32 %v15782_v28, 16 }
 0x406   : > { %13088 = vmatprep.subr.bf16.mxu1 %v14248_v7 }
 0x407   : > { %v7731_v30 = vor.u32 %v16975_v42, %v7728_v26 }
 0x408   : > { %13053 = vmatmul.mubr.bf16.gmra.mrb[12].mxu1 %v7197_v39  ;;  %v16977_v39 = vld [vmem:[#allocation48_spill] sm:$0xff] }
 0x409   : > { %13056 = vmatprep.mubr.bf16.mxu1 %v15670_v56  ;;  %13089 = vmatpush3.bf16.msra.mxu1 %v14248_v7  ;;  %v16966_v56 = vld [vmem:[#allocation46_spill] sm:$0xff] }
 0x40a   : > { %13090 = vmatprep.subr.bf16.mxu1 %v14249_v27 }
 0x40d   : > { %13091 = vmatpush3.bf16.msra.mxu1 %v14249_v27  ;;  %v14257_v27 = vld [vmem:[%s16689_s2 + $0x138] sm:$0xff]  }
 0x40e   : > { %13128 = vmatprep.subr.bf16.mxu1 %v14250_v12 }
 0x410   : > { %13057 = vmatmul.mubr.bf16.gmra.mrb[16].mxu1 %v15673_v55  ;;  %v14251_v55 = vld [vmem:[%s16689_s2 + $0x108] sm:$0xff]  }
 0x411   : > { %13060 = vmatprep.mubr.bf16.mxu1 %v15680_v61  ;;  %v14252_v61 = vld [vmem:[%s16689_s2 + $0x110] sm:$0xff]  }
 0x418   : > { %13061 = vmatmul.mubr.bf16.gmra.mrb[20].mxu1 %v15683_v57  ;;  %v14253_v57 = vld [vmem:[%s16689_s2 + $0x118] sm:$0xff]  }
 0x419   : > { %13064 = vmatprep.mubr.bf16.mxu1 %v16963_v58  ;;  %v16978_v58 = vshrl.u32 %v15789_v36, 16 }
 0x420   : > { %13065 = vmatmul.mubr.bf16.gmra.mrb[24].mxu1 %v16964_v63  ;;  %v7744_v63 = vrot.slane %v16978_v58, 7 }
 0x421   : > { %13068 = vmatprep.mubr.bf16.mxu1 %v16965_v14 }
 0x428   : > { %13069 = vmatmul.mubr.bf16.gmra.mrb[28].mxu1 %v16966_v56  ;;  %v16979_v56 = vshrl.u32 %v15793_v34, 16 }
 0x429   : > { %13072 = vmatprep.mubr.bf16.mxu1 %v16967_v62 }
 0x42a   : > { %v7752_v62 = vrot.slane %v16979_v56, 7 }
 0x430   : > { %13073 = vmatmul.mubr.bf16.gmra.mrb[32].mxu1 %v16968_v0  ;;  %v14258_v0 = vld [vmem:[%s16689_s2 + $0x140] sm:$0xff]  }
 0x431   : > { %13092 = vmatprep.mubr.bf16.mxu1 %v16969_v41  ;;  %v16980_v41 = vshll.u32 %v15789_v36, 16 }
 0x438   : > { %13093 = vmatmul.mubr.bf16.vlgmr.msra.gmra.mrb[0].mxu1 %v7157_v52  ;;  %v14254_v52 = vld [vmem:[%s16689_s2 + $0x120] sm:$0xff]  }
 0x439   : > { %13096 = vmatprep.mubr.bf16.mxu1 %v7165_v54  ;;  %13129 = vmatpush3.bf16.msra.mxu1 %v14250_v12  ;;  %v7736_v54 = vrot.slane %v16973_v3, 7  ;;  %v7732_v12 = vsel %vm7129_vm8, %v16977_v39, %v7731_v30  ;;  %v16984_v3 = vshll.u32 %v15795_v51, 16 }
 0x43a   : > { %13130 = vmatprep.subr.bf16.mxu1 %v14251_v55 }
 0x43b   : > { %v7739_v7 = vor.u32 %v16976_v31, %v7736_v54 }
 0x43d   : > { %13131 = vmatpush3.bf16.msra.mxu1 %v14251_v55  ;;  %v7740_v14 = vsel %vm7129_vm8, %v7728_v26, %v7739_v7  ;;  %v7747_v55 = vor.u32 %v16980_v41, %v7744_v63  ;;  %v16983_v26 = vshrl.u32 %v15803_v33, 16  ;;  %v16990_v41 = vshll.u32 %v15797_v60, 16 }
 0x43e   : > { %13132 = vmatprep.subr.bf16.mxu1 %v14252_v61 }
 0x440   : > { %13097 = vmatmul.mubr.bf16.gmra.mrb[4].mxu1 %v7173_v6  ;;  %v16974_v6 = vld [vmem:[#allocation52_spill] sm:$0xff] }
 0x441   : > { %13100 = vmatprep.mubr.bf16.mxu1 %v16970_v46  ;;  %13133 = vmatpush3.bf16.msra.mxu1 %v14252_v61  ;;  %v16981_v61 = vshll.u32 %v15793_v34, 16  ;;  %v7748_v46 = vsel %vm7129_vm8, %v7736_v54, %v7747_v55  ;;  %v16986_v54 = vshrl.u32 %v15811_v17, 16  ;;  %v7795_v55 = vor.u32 %v16990_v41, %v15832_v9  ;;  %v14260_v9 = vld [vmem:[%s16689_s2 + $0x150] sm:$0xff]  }
 0x442   : > { %13134 = vmatprep.subr.bf16.mxu1 %v14253_v57 }
 0x443   : > { %v7776_v31 = vrot.slane %v16986_v54, 7  ;;  %v8550_v54 = vld [vmem:[#allocation3 + $0xa0] sm:$0x1] }
 0x445   : > { %13135 = vmatpush3.bf16.msra.mxu1 %v14253_v57  ;;  %v7755_v57 = vor.u32 %v16981_v61, %v7752_v62 }
 0x446   : > { %13136 = vmatprep.subr.bf16.mxu1 %v14254_v52 }
 0x447   : > { %v7756_v38 = vsel %vm7129_vm8, %v7744_v63, %v7755_v57  ;;  %v16989_v63 = vshll.u32 %v15822_v1, 16  ;;  %v14259_v57 = vld [vmem:[%s16689_s2 + $0x148] sm:$0xff]  }
 0x448   : > { %13101 = vmatmul.mubr.bf16.gmra.mrb[8].mxu1 %v16972_v25  ;;  %v7768_v25 = vrot.slane %v16983_v26, 7  ;;  %v17001_v26 = vld [vmem:[#allocation64_spill] sm:$0xff] }
 0x449   : > { %13104 = vmatprep.mubr.bf16.mxu1 %v16974_v6  ;;  %13137 = vmatpush3.bf16.msra.mxu1 %v14254_v52  ;;  %v16982_v52 = vshrl.u32 %v15795_v51, 16 }
 0x44a   : > { %13138 = vmatprep.subr.bf16.mxu1 %v14255_v47 }
 0x44d   : > { %13139 = vmatpush3.bf16.msra.mxu1 %v14255_v47  ;;  %v7760_v47 = vrot.slane %v16982_v52, 7  ;;  %v14273_v52 = vld [vmem:[%s16689_s2 + $0x1b8] sm:$0xff]  }
 0x44e   : > { %13140 = vmatprep.subr.bf16.mxu1 %v14256_v15 }
 0x44f   : > { %v7763_v6 = vor.u32 %v16984_v3, %v7760_v47  ;;  %v17003_v3 = vld [vmem:[#allocation66_spill] sm:$0xff] }
 0x450   : > { %13105 = vmatmul.mubr.bf16.gmra.mrb[12].mxu1 %v7732_v12  ;;  %v16988_v12 = vshll.u32 %v15811_v17, 16 }
 0x451   : > { %13108 = vmatprep.mubr.bf16.mxu1 %v7740_v14  ;;  %13141 = vmatpush3.bf16.msra.mxu1 %v14256_v15  ;;  %v16985_v15 = vshll.u32 %v15803_v33, 16  ;;  %v7764_v30 = vsel %vm7129_vm8, %v7752_v62, %v7763_v6  ;;  %v17004_v6 = vld [vmem:[#allocation67_spill] sm:$0xff] }
 0x452   : > { %13142 = vmatprep.subr.bf16.mxu1 %v14257_v27  ;;  %v7779_v58 = vor.u32 %v16988_v12, %v7776_v31 }
 0x453   : > { %v7771_v42 = vor.u32 %v16985_v15, %v7768_v25  ;;  %v17005_v15 = vld [vmem:[#allocation68_spill] sm:$0xff] }
 0x454   : > { %v7780_v56 = vsel %vm7129_vm8, %v7768_v25, %v7779_v58  ;;  %v17002_v25 = vld [vmem:[#allocation65_spill] sm:$0xff] }
 0x455   : > { %13143 = vmatpush3.bf16.msra.mxu1 %v14257_v27  ;;  %v7772_v7 = vsel %vm7129_vm8, %v7760_v47, %v7771_v42  ;;  %v16987_v27 = vshrl.u32 %v15822_v1, 16  ;;  %v16999_v47 = vld [vmem:[#allocation62_spill] sm:$0xff]  ;;  %v17006_v42 = vld [vmem:[#allocation69_spill] sm:$0xff] }
 0x456   : > { %13180 = vmatprep.subr.bf16.mxu1 %v14258_v0 }
 0x457   : > { %v7784_v39 = vrot.slane %v16987_v27, 7  ;;  %v17007_v27 = vld [vmem:[#allocation74_spill] sm:$0xff] }
 0x458   : > { %13109 = vmatmul.mubr.bf16.gmra.mrb[16].mxu1 %v7748_v46  ;;  %v14272_v46 = vld [vmem:[%s16689_s2 + $0x1b0] sm:$0xff]  }
 0x459   : > { %13112 = vmatprep.mubr.bf16.mxu1 %v7756_v38  ;;  %v7787_v14 = vor.u32 %v16989_v63, %v7784_v39  ;;  %v7796_v61 = vsel %vm7129_vm8, %v7784_v39, %v7795_v55  ;;  %v17000_v38 = vld [vmem:[#allocation63_spill] sm:$0xff]  ;;  %v17008_v39 = vld [vmem:[#allocation73_spill] sm:$0xff]  ;;  %v17011_v55 = vld [vmem:[#allocation70_spill] sm:$0xff] }
 0x45b   : > { %v7788_v62 = vsel %vm7129_vm8, %v7776_v31, %v7787_v14  ;;  %v17009_v14 = vld [vmem:[#allocation71_spill] sm:$0xff] }
 0x460   : > { %13113 = vmatmul.mubr.bf16.gmra.mrb[20].mxu1 %v7764_v30  ;;  %v9067_v30 = vld [vmem:[#allocation3 + $0x18] sm:$0xff] }
 0x461   : > { %13116 = vmatprep.mubr.bf16.mxu1 %v7772_v7  ;;  %v9106_v31 = vshll.u32 %v9067_v30, 16  ;;  %v8712_v7 = vshll.u32 %v8550_v54, 16  ;;  %v9104_v63 = vshrl.u32 %v9067_v30, 16  ;;  %v14278_v30 = vld [vmem:[%s16689_s2 + $0x1e0] sm:$0xff]   ;;  %v14279_v54 = vld [vmem:[%s16689_s2 + $0x1e8] sm:$0xff]  }
 0x463   : > { %v9108_v12 = vrot.slane %v9106_v31, 1  ;;  %v8714_v58 = vrot.slane %v8712_v7, 1  ;;  %v14280_v31 = vld [vmem:[%s16689_s2 + $0x1f0] sm:$0xff]   ;;  %v14281_v7 = vld [vmem:[%s16689_s2 + $0x1f8] sm:$0xff]  }
 0x465   : > { %v9109_v41 = vor.u32 %v9108_v12, %v9104_v63 }
 0x468   : > { %13117 = vmatmul.mubr.bf16.gmra.mrb[24].mxu1 %v7780_v56  ;;  %v17010_v56 = vshll.u32 %v17009_v14, 16 }
 0x469   : > { %13120 = vmatprep.mubr.bf16.mxu1 %v7788_v62 }
 0x46a   : > { %v9113_v62 = vrot.slane %v17010_v56, 1 }
 0x470   : > { %13121 = vmatmul.mubr.bf16.gmra.mrb[28].mxu1 %v7796_v61  ;;  %v8715_v61 = vsel %vm3405_vm3, %v17011_v55, %v8714_v58 }
 0x471   : > { %13124 = vmatprep.mubr.bf16.mxu1 %v15846_v24  ;;  %v14261_v24 = vld [vmem:[%s16689_s2 + $0x158] sm:$0xff]  }
 0x478   : > { %13125 = vmatmul.mubr.bf16.gmra.mrb[32].mxu1 %v15874_v5  ;;  %v16992_v5 = vld [vmem:[#allocation43_spill] sm:$0xff] }
 0x479   : > { %13144 = vmatprep.mubr.bf16.mxu1 %v15587_v44  ;;  %v14262_v44 = vld [vmem:[%s16689_s2 + $0x160] sm:$0xff]  }
 0x480   : > { %13145 = vmatmul.mubr.bf16.vlgmr.msra.gmra.mrb[0].mxu1 %v15770_v59  ;;  %v14263_v59 = vld [vmem:[%s16689_s2 + $0x168] sm:$0xff]  }
 0x481   : > { %13148 = vmatprep.mubr.bf16.mxu1 %v15776_v29  ;;  %13181 = vmatpush3.bf16.msra.mxu1 %v14258_v0  ;;  %v16991_v29 = vld [vmem:[#allocation40_spill] sm:$0xff]  ;;  %v14266_v0 = vld [vmem:[%s16689_s2 + $0x180] sm:$0xff]  }
 0x482   : > { %13182 = vmatprep.subr.bf16.mxu1 %v14259_v57 }
 0x485   : > { %13183 = vmatpush3.bf16.msra.mxu1 %v14259_v57  ;;  %v9114_v57 = vsel %vm3405_vm3, %v9109_v41, %v9113_v62  ;;  %v14283_v41 = vld [vmem:[%s16689_s2 + $0x208] sm:$0xff]  }
 0x486   : > { %13184 = vmatprep.subr.bf16.mxu1 %v14260_v9 }
 0x488   : > { %13149 = vmatmul.mubr.bf16.gmra.mrb[4].mxu1 %v15619_v19  ;;  %v14264_v19 = vld [vmem:[%s16689_s2 + $0x170] sm:$0xff]  }
 0x489   : > { %13152 = vmatprep.mubr.bf16.mxu1 %v15689_v43  ;;  %13185 = vmatpush3.bf16.msra.mxu1 %v14260_v9  ;;  %v14265_v43 = vld [vmem:[%s16689_s2 + $0x178] sm:$0xff]   ;;  %v17012_v9 = vld [vmem:[#allocation72_spill] sm:$0xff] }
 0x48a   : > { %13186 = vmatprep.subr.bf16.mxu1 %v14261_v24 }
 0x48d   : > { %13187 = vmatpush3.bf16.msra.mxu1 %v14261_v24  ;;  %v17013_v24 = vshll.u32 %v17012_v9, 16 }
 0x48e   : > { %13188 = vmatprep.subr.bf16.mxu1 %v14262_v44 }
 0x490   : > { %13153 = vmatmul.mubr.bf16.gmra.mrb[8].mxu1 %v16991_v29 }
 0x491   : > { %13156 = vmatprep.mubr.bf16.mxu1 %v16992_v5  ;;  %13189 = vmatpush3.bf16.msra.mxu1 %v14262_v44  ;;  %v9121_v44 = vrot.slane %v17013_v24, 1  ;;  %v17015_v5 = vshrl.u32 %v17012_v9, 16  ;;  %v17028_v24 = vld [vmem:[#allocation78_spill] sm:$0xff] }
 0x492   : > { %13190 = vmatprep.subr.bf16.mxu1 %v14263_v59 }
 0x495   : > { %13191 = vmatpush3.bf16.msra.mxu1 %v14263_v59  ;;  %v17014_v59 = vshrl.u32 %v17009_v14, 16 }
 0x496   : > { %13192 = vmatprep.subr.bf16.mxu1 %v14264_v19 }
 0x497   : > { %v9117_v29 = vor.u32 %v17014_v59, %v9113_v62  ;;  %v17025_v62 = vld [vmem:[#allocation77_spill] sm:$0xff] }
 0x498   : > { %13157 = vmatmul.mubr.bf16.gmra.mrb[12].mxu1 %v15782_v28  ;;  %v16993_v28 = vld [vmem:[#allocation53_spill] sm:$0xff] }
 0x499   : > { %13160 = vmatprep.mubr.bf16.mxu1 %v15787_v10  ;;  %13193 = vmatpush3.bf16.msra.mxu1 %v14264_v19  ;;  %v16996_v10 = vld [vmem:[#allocation59_spill] sm:$0xff]  ;;  %v9125_v19 = vor.u32 %v17015_v5, %v9121_v44  ;;  %v14285_v59 = vld [vmem:[%s16689_s2 + $0x218] sm:$0xff]   ;;  %v14286_v5 = vld [vmem:[%s16689_s2 + $0x220] sm:$0xff]  }
 0x49a   : > { %13194 = vmatprep.subr.bf16.mxu1 %v14265_v43 }
 0x49d   : > { %13195 = vmatpush3.bf16.msra.mxu1 %v14265_v43  ;;  %v14275_v43 = vld [vmem:[%s16689_s2 + $0x1c8] sm:$0xff]  }
 0x49e   : > { %13232 = vmatprep.subr.bf16.mxu1 %v14266_v0 }
 0x4a0   : > { %13161 = vmatmul.mubr.bf16.gmra.mrb[16].mxu1 %v15789_v36  ;;  %v16994_v36 = vld [vmem:[#allocation55_spill] sm:$0xff] }
 0x4a1   : > { %13164 = vmatprep.mubr.bf16.mxu1 %v15793_v34  ;;  %v14267_v34 = vld [vmem:[%s16689_s2 + $0x188] sm:$0xff]  }
 0x4a8   : > { %13165 = vmatmul.mubr.bf16.gmra.mrb[20].mxu1 %v15795_v51  ;;  %v16995_v51 = vld [vmem:[#allocation56_spill] sm:$0xff] }
 0x4a9   : > { %13168 = vmatprep.mubr.bf16.mxu1 %v15803_v33  ;;  %v14271_v33 = vld [vmem:[%s16689_s2 + $0x1a8] sm:$0xff]  }
 0x4b0   : > { %13169 = vmatmul.mubr.bf16.gmra.mrb[24].mxu1 %v15811_v17  ;;  %v14269_v17 = vld [vmem:[%s16689_s2 + $0x198] sm:$0xff]  }
 0x4b1   : > { %13172 = vmatprep.mubr.bf16.mxu1 %v15822_v1  ;;  %v14268_v1 = vld [vmem:[%s16689_s2 + $0x190] sm:$0xff]  }
 0x4b8   : > { %13173 = vmatmul.mubr.bf16.gmra.mrb[28].mxu1 %v15797_v60  ;;  %v14270_v60 = vld [vmem:[%s16689_s2 + $0x1a0] sm:$0xff]  }
 0x4b9   : > { %13176 = vmatprep.mubr.bf16.mxu1 %v15971_v21  ;;  %v16998_v21 = vld [vmem:[#allocation61_spill] sm:$0xff] }
 0x4c0   : > { %13177 = vmatmul.mubr.bf16.gmra.mrb[32].mxu1 %v15805_v37  ;;  %v16997_v37 = vld [vmem:[#allocation60_spill] sm:$0xff] }
 0x4c1   : > { %13196 = vmatprep.mubr.bf16.mxu1 %v16993_v28  ;;  %v17016_v28 = vld [vmem:[#allocation54_spill] sm:$0xff] }
 0x4c8   : > { %13197 = vmatmul.mubr.bf16.vlgmr.msra.gmra.mrb[0].mxu1 %v16994_v36  ;;  %v17017_v36 = vld [vmem:[#allocation76_spill] sm:$0xff] }
 0x4c9   : > { %13200 = vmatprep.mubr.bf16.mxu1 %v16995_v51  ;;  %13233 = vmatpush3.bf16.msra.mxu1 %v14266_v0  ;;  %v9122_v0 = vsel %vm3405_vm3, %v9117_v29, %v9121_v44  ;;  %v17018_v51 = vshll.u32 %v17017_v36, 16  ;;  %v9666_v44 = vrot.slane %v17028_v24, 1  ;;  %v17038_v24 = vld [vmem:[#allocation88_spill] sm:$0xff] }
 0x4ca   : > { %13234 = vmatprep.subr.bf16.mxu1 %v14267_v34 }
 0x4cd   : > { %13235 = vmatpush3.bf16.msra.mxu1 %v14267_v34  ;;  %v9130_v34 = vsel %vm3405_vm3, %v9125_v19, %v17016_v28  ;;  %v17029_v19 = vld [vmem:[#allocation79_spill] sm:$0xff] }
 0x4ce   : > { %13236 = vmatprep.subr.bf16.mxu1 %v14268_v1 }
 0x4d0   : > { %13201 = vmatmul.mubr.bf16.gmra.mrb[4].mxu1 %v16996_v10  ;;  %v17019_v10 = vshrl.u32 %v17017_v36, 16 }
 0x4d1   : > { %13204 = vmatprep.mubr.bf16.mxu1 %v16997_v37  ;;  %13237 = vmatpush3.bf16.msra.mxu1 %v14268_v1  ;;  %v9137_v1 = vrot.slane %v17018_v51, 1 }
 0x4d2   : > { %13238 = vmatprep.subr.bf16.mxu1 %v14269_v17 }
 0x4d3   : > { %v9141_v37 = vor.u32 %v17019_v10, %v9137_v1  ;;  %v17031_v10 = vld [vmem:[#allocation83_spill] sm:$0xff] }
 0x4d5   : > { %13239 = vmatpush3.bf16.msra.mxu1 %v14269_v17  ;;  %v14276_v17 = vld [vmem:[%s16689_s2 + $0x1d0] sm:$0xff]  }
 0x4d6   : > { %13240 = vmatprep.subr.bf16.mxu1 %v14270_v60 }
 0x4d8   : > { %13205 = vmatmul.mubr.bf16.gmra.mrb[8].mxu1 %v15925_v53  ;;  %v14274_v53 = vld [vmem:[%s16689_s2 + $0x1c0] sm:$0xff]  }
 0x4d9   : > { %13208 = vmatprep.mubr.bf16.mxu1 %v16998_v21  ;;  %13241 = vmatpush3.bf16.msra.mxu1 %v14270_v60  ;;  %v14277_v60 = vld [vmem:[%s16689_s2 + $0x1d8] sm:$0xff]  }
 0x4da   : > { %13242 = vmatprep.subr.bf16.mxu1 %v14271_v33 }
 0x4dd   : > { %13243 = vmatpush3.bf16.msra.mxu1 %v14271_v33  ;;  %v17020_v33 = vld [vmem:[#allocation57_spill] sm:$0xff] }
 0x4de   : > { %13244 = vmatprep.subr.bf16.mxu1 %v14272_v46 }
 0x4e0   : > { %13209 = vmatmul.mubr.bf16.gmra.mrb[12].mxu1 %v16999_v47 }
 0x4e1   : > { %13212 = vmatprep.mubr.bf16.mxu1 %v17000_v38  ;;  %13245 = vmatpush3.bf16.msra.mxu1 %v14272_v46  ;;  %v9138_v46 = vsel %vm3405_vm3, %v17020_v33, %v9137_v1  ;;  %v14288_v1 = vld [vmem:[%s16689_s2 + $0x230] sm:$0xff]  }
 0x4e2   : > { %13246 = vmatprep.subr.bf16.mxu1 %v14273_v52 }
 0x4e5   : > { %13247 = vmatpush3.bf16.msra.mxu1 %v14273_v52  ;;  %v17021_v52 = vld [vmem:[#allocation58_spill] sm:$0xff] }
 0x4e6   : > { %13284 = vmatprep.subr.bf16.mxu1 %v14274_v53 }
 0x4e8   : > { %13213 = vmatmul.mubr.bf16.gmra.mrb[16].mxu1 %v17001_v26 }
 0x4e9   : > { %13216 = vmatprep.mubr.bf16.mxu1 %v17002_v25 }
 0x4f0   : > { %13217 = vmatmul.mubr.bf16.gmra.mrb[20].mxu1 %v17003_v3 }
 0x4f1   : > { %13220 = vmatprep.mubr.bf16.mxu1 %v17004_v6 }
 0x4f8   : > { %13221 = vmatmul.mubr.bf16.gmra.mrb[24].mxu1 %v17005_v15 }
 0x4f9   : > { %13224 = vmatprep.mubr.bf16.mxu1 %v17006_v42 }
 0x500   : > { %13225 = vmatmul.mubr.bf16.gmra.mrb[28].mxu1 %v17007_v27 }
 0x501   : > { %13228 = vmatprep.mubr.bf16.mxu1 %v17008_v39 }
 0x508   : > { %13229 = vmatmul.mubr.bf16.gmra.mrb[32].mxu1 %v8715_v61 }
 0x509   : > { %13248 = vmatprep.mubr.bf16.mxu1 %v9114_v57  ;;  %v9664_v57 = vrot.slane %v17017_v36, 1 }
 0x50b   : > { %v9667_v29 = vsel %vm4698_vm4, %v9664_v57, %v9666_v44 }
 0x510   : > { %13249 = vmatmul.mubr.bf16.vlgmr.msra.gmra.mrb[0].mxu1 %v9122_v0  ;;  %v17030_v0 = vld [vmem:[#allocation81_spill] sm:$0xff] }
 0x511   : > { %13252 = vmatprep.mubr.bf16.mxu1 %v9130_v34  ;;  %13285 = vmatpush3.bf16.msra.mxu1 %v14274_v53  ;;  %v9146_v53 = vsel %vm3405_vm3, %v9141_v37, %v17021_v52  ;;  %v9670_v28 = vrot.slane %v17030_v0, 1  ;;  %v14287_v34 = vld [vmem:[%s16689_s2 + $0x228] sm:$0xff]   ;;  %v9674_v37 = vrot.slane %v17031_v10, 1  ;;  %v17032_v52 = vld [vmem:[#allocation84_spill] sm:$0xff] }
 0x512   : > { %13286 = vmatprep.subr.bf16.mxu1 %v14275_v43  ;;  %v10063_v0 = vld [vmem:[#allocation3 + $0xa8] sm:$0x3] }
 0x515   : > { %13287 = vmatpush3.bf16.msra.mxu1 %v14275_v43  ;;  %v9668_v43 = vrot.slane %v17029_v19, 1 }
 0x516   : > { %13288 = vmatprep.subr.bf16.mxu1 %v14276_v17 }
 0x517   : > { %v9669_v36 = vsel %vm4698_vm4, %v9666_v44, %v9668_v43  ;;  %v9671_v51 = vsel %vm4698_vm4, %v9668_v43, %v9670_v28  ;;  %v17039_v44 = vld [vmem:[#allocation89_spill] sm:$0xff] }
 0x518   : > { %13253 = vmatmul.mubr.bf16.gmra.mrb[4].mxu1 %v9138_v46 }
 0x519   : > { %13256 = vmatprep.mubr.bf16.mxu1 %v9146_v53  ;;  %13289 = vmatpush3.bf16.msra.mxu1 %v14276_v17  ;;  %v9672_v17 = vrot.slane %v16073_v22, 1  ;;  %v9676_v53 = vrot.slane %v17032_v52, 1  ;;  %v9678_v22 = vrot.slane %v16098_v20, 1  ;;  %v14291_v20 = vld [vmem:[#allocation3 + $0x90] sm:$0xff] }
 0x51a   : > { %13290 = vmatprep.subr.bf16.mxu1 %v14277_v60 }
 0x51b   : > { %v9673_v33 = vsel %vm4698_vm4, %v9670_v28, %v9672_v17  ;;  %v9675_v46 = vsel %vm4698_vm4, %v9672_v17, %v9674_v37  ;;  %v10246_v28 = vshll.u32 %v10063_v0, 16 }
 0x51d   : > { %13291 = vmatpush3.bf16.msra.mxu1 %v14277_v60  ;;  %v14289_v60 = vld [vmem:[%s16689_s2 + $0x238] sm:$0xff]  }
 0x51e   : > { %13292 = vmatprep.subr.bf16.mxu1 %v14278_v30 }
 0x520   : > { %13257 = vmatmul.mubr.bf16.gmra.mrb[8].mxu1 %v16998_v21  ;;  %v14282_v21 = vld [vmem:[%s16689_s2 + $0x200] sm:$0xff]  }
 0x521   : > { %13260 = vmatprep.mubr.bf16.mxu1 %v16999_v47  ;;  %13293 = vmatpush3.bf16.msra.mxu1 %v14278_v30  ;;  %v9085_v47 = vld [vmem:[#allocation3 + $0xa8] sm:$0x1]  ;;  %v9677_v30 = vsel %vm4698_vm4, %v9674_v37, %v9676_v53 }
 0x522   : > { %13294 = vmatprep.subr.bf16.mxu1 %v14279_v54  ;;  %v9247_v12 = vshll.u32 %v9085_v47, 16 }
 0x524   : > { %v9249_v58 = vrot.slane %v9247_v12, 1 }
 0x525   : > { %13295 = vmatpush3.bf16.msra.mxu1 %v14279_v54  ;;  %v9679_v54 = vsel %vm4698_vm4, %v9676_v53, %v9678_v22 }
 0x526   : > { %13296 = vmatprep.subr.bf16.mxu1 %v14280_v31 }
 0x528   : > { %13261 = vmatmul.mubr.bf16.gmra.mrb[12].mxu1 %v17000_v38  ;;  %v17022_v38 = vshll.u32 %v15612_v50, 16 }
 0x529   : > { %13264 = vmatprep.mubr.bf16.mxu1 %v17001_v26  ;;  %13297 = vmatpush3.bf16.msra.mxu1 %v14280_v31  ;;  %v9680_v31 = vrot.slane %v16106_v8, 1  ;;  %v9688_v8 = vrot.slane %v16128_v23, 1  ;;  %v17033_v23 = vld [vmem:[#allocation80_spill] sm:$0xff] }
 0x52a   : > { %13298 = vmatprep.subr.bf16.mxu1 %v14281_v7  ;;  %v9241_v26 = vrot.slane %v17022_v38, 1  ;;  %v9684_v38 = vrot.slane %v16119_v2, 1 }
 0x52d   : > { %13299 = vmatpush3.bf16.msra.mxu1 %v14281_v7  ;;  %v9682_v7 = vrot.slane %v16110_v16, 1  ;;  %v14292_v16 = vld [vmem:[#allocation3] sm:$0xff] }
 0x52e   : > { %13336 = vmatprep.subr.bf16.mxu1 %v14282_v21 }
 0x52f   : > { %v9683_v47 = vsel %vm4698_vm4, %v9680_v31, %v9682_v7  ;;  %v9685_v12 = vsel %vm4698_vm4, %v9682_v7, %v9684_v38 }
 0x530   : > { %13265 = vmatmul.mubr.bf16.gmra.mrb[16].mxu1 %v17002_v25  ;;  %v9242_v25 = vsel %vm3405_vm3, %v17011_v55, %v9241_v26  ;;  %v17026_v55 = vld [vmem:[#allocation75_spill] sm:$0xff] }
 0x531   : > { %13268 = vmatprep.mubr.bf16.mxu1 %v17003_v3  ;;  %v17023_v3 = vshrl.u32 %v15612_v50, 16  ;;  %v17027_v50 = vrot.slane %v17012_v9, 1 }
 0x538   : > { %13269 = vmatmul.mubr.bf16.gmra.mrb[20].mxu1 %v17004_v6  ;;  %v9245_v6 = vor.u32 %v17023_v3, %v9241_v26  ;;  %v9686_v26 = vrot.slane %v14291_v20, 1  ;;  %v10045_v3 = vld [vmem:[#allocation3 + $0x18] sm:$0xfe]  ;;  %v11951_v20 = vld [vmem:[%s14364_s8 + $0x28] sm:$0xff]  }
 0x539   : > { %13272 = vmatprep.mubr.bf16.mxu1 %v17005_v15  ;;  %v9602_v15 = vld [vmem:[#allocation3 + $0x18] sm:$0xfe] }
 0x53a   : > { %v9657_v63 = vrot.slane %v9602_v15, 1  ;;  %v10082_v15 = vshrl.u32 %v10045_v3, 16 }
 0x540   : > { %13273 = vmatmul.mubr.bf16.gmra.mrb[24].mxu1 %v17006_v42  ;;  %v9250_v42 = vsel %vm3405_vm3, %v9245_v6, %v9249_v58  ;;  %v9690_v6 = vrot.slane %v14292_v16, 1  ;;  %v9620_v58 = vld [vmem:[#allocation3 + $0xa8] sm:$0x1] }
 0x541   : > { %13276 = vmatprep.mubr.bf16.mxu1 %v17007_v27  ;;  %v17024_v27 = vrot.slane %v17009_v14, 1  ;;  %v14284_v14 = vld [vmem:[%s16689_s2 + $0x210] sm:$0xff]  }
 0x542   : > { %v9691_v2 = vsel %vm4698_vm4, %v9688_v8, %v9690_v6 }
 0x543   : > { %v9659_v56 = vsel %vm4698_vm4, %v9657_v63, %v17024_v27  ;;  %v9689_v63 = vsel %vm4698_vm4, %v9686_v26, %v9688_v8  ;;  %v9692_v27 = vrot.slane %v9620_v58, 1 }
 0x548   : > { %13277 = vmatmul.mubr.bf16.gmra.mrb[28].mxu1 %v17008_v39  ;;  %v9662_v39 = vrot.slane %v17025_v62, 1 }
 0x549   : > { %13280 = vmatprep.mubr.bf16.mxu1 %v9242_v25  ;;  %v9687_v25 = vsel %vm4698_vm4, %v9684_v38, %v9686_v26  ;;  %v11950_v26 = vld [vmem:[%s14364_s8 + $0x20] sm:$0xff]  }
 0x54a   : > { %v9663_v61 = vsel %vm4698_vm4, %v17027_v50, %v9662_v39  ;;  %v9665_v9 = vsel %vm4698_vm4, %v9662_v39, %v9664_v57  ;;  %v9693_v39 = vsel %vm4698_vm4, %v9690_v6, %v9692_v27  ;;  %v17034_v50 = vld [vmem:[#allocation82_spill] sm:$0xff]  ;;  %v17037_v57 = vld [vmem:[#allocation87_spill] sm:$0xff] }
 0x550   : > { %13281 = vmatmul.mubr.bf16.gmra.mrb[32].mxu1 %v9250_v42  ;;  %v10085_v42 = vshll.u32 %v10045_v3, 16 }
 0x551   : > { %13300 = vmatprep.mubr.bf16.mxu1 %v9659_v56  ;;  %v10084_v56 = vrot.slane %v10082_v15, 1  ;;  %v11800_v15 = vunpack.c.l.bf16 %v11951_v20 }
 0x552   : > { %v10087_v62 = vrot.slane %v10085_v42, 2 }
 0x558   : > { %13301 = vmatmul.mubr.bf16.vlgmr.msra.gmra.mrb[0].mxu1 %v17026_v55 }
 0x559   : > { %13304 = vmatprep.mubr.bf16.mxu1 %v9663_v61  ;;  %13337 = vmatpush3.bf16.msra.mxu1 %v14282_v21  ;;  %v9681_v21 = vsel %vm4698_vm4, %v9678_v22, %v9680_v31  ;;  %v17035_v61 = vld [vmem:[#allocation85_spill] sm:$0xff] }
 0x55a   : > { %13338 = vmatprep.subr.bf16.mxu1 %v14283_v41 }
 0x55d   : > { %13339 = vmatpush3.bf16.msra.mxu1 %v14283_v41  ;;  %v10088_v41 = vor.u32 %v10087_v62, %v10084_v56  ;;  %v11801_v62 = vunpack.c.h.bf16 %v11951_v20  ;;  %v17048_v20 = vld [vmem:[#allocation9_spill] sm:$0xff] }
 0x55e   : > { %13340 = vmatprep.subr.bf16.mxu1 %v14284_v14 }
 0x55f   : > { %v10097_v55 = vsel %vm5234_vm5, %v10088_v41, %v17033_v23  ;;  %v17041_v41 = vld [vmem:[#allocation5_spill] sm:$0xff] }
 0x560   : > { %13305 = vmatmul.mubr.bf16.gmra.mrb[4].mxu1 %v9665_v9  ;;  %v10060_v9 = vld [vmem:[#allocation3 + $0x90] sm:$0xff] }
 0x561   : > { %13308 = vmatprep.mubr.bf16.mxu1 %v9667_v29  ;;  %13341 = vmatpush3.bf16.msra.mxu1 %v14284_v14  ;;  %v17036_v14 = vld [vmem:[#allocation86_spill] sm:$0xff]  ;;  %v10216_v29 = vshrl.u32 %v10060_v9, 16 }
 0x562   : > { %13342 = vmatprep.subr.bf16.mxu1 %v14285_v59 }
 0x563   : > { %v10218_v19 = vrot.slane %v10216_v29, 1 }
 0x565   : > { %13343 = vmatpush3.bf16.msra.mxu1 %v14285_v59  ;;  %v17040_v59 = vld [vmem:[#allocation90_spill] sm:$0xff] }
 0x566   : > { %13344 = vmatprep.subr.bf16.mxu1 %v14286_v5 }
 0x568   : > { %13309 = vmatmul.mubr.bf16.gmra.mrb[8].mxu1 %v9669_v36  ;;  %v10248_v36 = vrot.slane %v10246_v28, 2  ;;  %v11953_v28 = vld [vmem:[%s14364_s8 + $0x38] sm:$0xff]  }
 0x569   : > { %13312 = vmatprep.mubr.bf16.mxu1 %v9671_v51  ;;  %13345 = vmatpush3.bf16.msra.mxu1 %v14286_v5  ;;  %v10219_v5 = vshll.u32 %v10060_v9, 16 }
 0x56a   : > { %13346 = vmatprep.subr.bf16.mxu1 %v14287_v34 }
 0x56b   : > { %v10221_v43 = vrot.slane %v10219_v5, 2 }
 0x56d   : > { %13347 = vmatpush3.bf16.msra.mxu1 %v14287_v34 }
 0x56e   : > { %13348 = vmatprep.subr.bf16.mxu1 %v14288_v1 }
 0x570   : > { %13313 = vmatmul.mubr.bf16.gmra.mrb[12].mxu1 %v9673_v33 }
 0x571   : > { %13316 = vmatprep.mubr.bf16.mxu1 %v9675_v46  ;;  %13349 = vmatpush3.bf16.msra.mxu1 %v14288_v1  ;;  %v11948_v1 = vld [vmem:[%s14364_s8 + $0x10] sm:$0xff]  }
 0x572   : > { %13350 = vmatprep.subr.bf16.mxu1 %v14289_v60  ;;  %v11789_v31 = vunpack.c.h.bf16 %v11948_v1 }
 0x575   : > { %13351 = vmatpush3.bf16.msra.mxu1 %v14289_v60  ;;  %v11788_v60 = vunpack.c.l.bf16 %v11948_v1 }
 0x578   : > { %13317 = vmatmul.mubr.bf16.gmra.mrb[16].mxu1 %v9677_v30 }
 0x579   : > { %13320 = vmatprep.mubr.bf16.mxu1 %v9679_v54 }
 0x580   : > { %13321 = vmatmul.mubr.bf16.gmra.mrb[20].mxu1 %v9681_v21 }
 0x581   : > { %13324 = vmatprep.mubr.bf16.mxu1 %v9683_v47 }
 0x588   : > { %13325 = vmatmul.mubr.bf16.gmra.mrb[24].mxu1 %v9685_v12 }
 0x589   : > { %13328 = vmatprep.mubr.bf16.mxu1 %v9687_v25 }
 0x590   : > { %13329 = vmatmul.mubr.bf16.gmra.mrb[28].mxu1 %v9689_v63  ;;  %v11796_v63 = vunpack.c.l.bf16 %v11950_v26 }
 0x591   : > { %13332 = vmatprep.mubr.bf16.mxu1 %v9691_v2 }
 0x598   : > { %13333 = vmatmul.mubr.bf16.gmra.mrb[32].mxu1 %v9693_v39  ;;  %v11797_v39 = vunpack.c.h.bf16 %v11950_v26 }
 0x599   : > { %13352 = vmatprep.mubr.bf16.mxu1 %v10097_v55  ;;  %v17042_v55 = vld [vmem:[#allocation7_spill] sm:$0xff] }
 0x5a0   : > { %13353 = vmatmul.mubr.bf16.vlgmr.msra.gmra.mrb[0].mxu1 %v17034_v50 }
 0x5a1   : > { %13356 = vmatprep.mubr.bf16.mxu1 %v17035_v61 }
 0x5a8   : > { %13357 = vmatmul.mubr.bf16.gmra.mrb[4].mxu1 %v17036_v14 }
 0x5a9   : > { %13360 = vmatprep.mubr.bf16.mxu1 %v17037_v57 }
 0x5b0   : > { %13361 = vmatmul.mubr.bf16.gmra.mrb[8].mxu1 %v16113_v4  ;;  %v10222_v4 = vor.u32 %v10221_v43, %v10218_v19 }
 0x5b1   : > { %13364 = vmatprep.mubr.bf16.mxu1 %v17038_v24  ;;  %v17043_v24 = vld [vmem:[#allocation4_spill] sm:$0xff] }
 0x5b8   : > { %13365 = vmatmul.mubr.bf16.gmra.mrb[12].mxu1 %v17039_v44 }
 0x5b9   : > { %13368 = vmatprep.mubr.bf16.mxu1 %v17040_v59  ;;  %v17044_v59 = vld [vmem:[#allocation6_spill] sm:$0xff] }
 0x5c0   : > { %13369 = vmatmul.mubr.bf16.gmra.mrb[16].mxu1 %v16135_v11  ;;  %v10223_v11 = vsel %vm5234_vm5, %v16163_v32, %v10222_v4  ;;  %v16535_v32 = vld [vmem:[%s16690_s3] ss:$0 sm:$0xff] }
 0x5c1   : > { %13372 = vmatprep.mubr.bf16.mxu1 %v16150_v48  ;;  %v10243_v48 = vshrl.u32 %v10063_v0, 16 }
 0x5c3   : > { %v10245_v34 = vrot.slane %v10243_v48, 1 }
 0x5c8   : > { %13373 = vmatmul.mubr.bf16.gmra.mrb[20].mxu1 %v16156_v45  ;;  %v10232_v45 = vsel %vm5234_vm5, %v10222_v4, %v16183_v18 }
 0x5c9   : > { %13376 = vmatprep.mubr.bf16.mxu1 %v16161_v49  ;;  %v10249_v49 = vor.u32 %v10248_v36, %v10245_v34  ;;  %v11952_v34 = vld [vmem:[%s14364_s8 + $0x30] sm:$0xff]  }
 0x5cb   : > { %v10250_v51 = vsel %vm5234_vm5, %v16178_v40, %v10249_v49  ;;  %v16542_v40 = vld [vmem:[%s16691_s4] ss:$0 sm:$0xff] }
 0x5d0   : > { %13377 = vmatmul.mubr.bf16.gmra.mrb[24].mxu1 %v16176_v13  ;;  %v11949_v13 = vld [vmem:[%s14364_s8 + $0x18] sm:$0xff]  }
 0x5d1   : > { %13380 = vmatprep.mubr.bf16.mxu1 %v10223_v11  ;;  %v11792_v37 = vunpack.c.l.bf16 %v11949_v13  ;;  %v11793_v53 = vunpack.c.h.bf16 %v11949_v13 }
 0x5d8   : > { %13381 = vmatmul.mubr.bf16.gmra.mrb[28].mxu1 %v10232_v45 }
 0x5d9   : > { %13384 = vmatprep.mubr.bf16.mxu1 %v16191_v35 }
 0x5e0   : > { %13385 = vmatmul.mubr.bf16.gmra.mrb[32].mxu1 %v10250_v51 }
 0x673   : > { %v13354_v17 = vpop.f32.mrb[0].mxu1 }
 0x674   : > { %v10640_v10 = vmul.f32 %v16535_v32, %v13354_v17  ;;  %v10351_v18 = vpop.f32.mrb[1].mxu1 }
 0x675   : > { %v10638_v35 = vmul.f32 %v16535_v32, %v10351_v18  ;;  %v13355_v33 = vpop.f32.mrb[2].mxu1  ;;  %v11804_v18 = vunpack.c.l.bf16 %v11952_v34 }
 0x676   : > { %v10676_v46 = vadd.f32 %v16542_v40, %v10640_v10  ;;  %v10641_v52 = vmul.f32 %v16535_v32, %v13355_v33  ;;  %v10354_v22 = vpop.f32.mrb[3].mxu1  ;;  %v11808_v10 = vunpack.c.l.bf16 %v11953_v28 }
 0x677   : > { %v10674_v30 = vadd.f32 %v16542_v40, %v10638_v35  ;;  %v10639_v54 = vmul.f32 %v16535_v32, %v10354_v22 }
 0x678   : > { %v10784_v7 = vadd.f32 %v11792_v37, %v10676_v46  ;;  %v10677_v21 = vadd.f32 %v16542_v40, %v10641_v52  ;;  %v11809_v46 = vunpack.c.h.bf16 %v11953_v28  ;;  %v11805_v52 = vunpack.c.h.bf16 %v11952_v34  ;;  %v17052_v28 = vld [vmem:[#allocation13_spill] sm:$0xff] }
 0x679   : > { %v10782_v47 = vadd.f32 %v11788_v60, %v10674_v30  ;;  %v10675_v38 = vadd.f32 %v16542_v40, %v10639_v54  ;;  %v17046_v30 = vld [vmem:[#allocation11_spill] sm:$0xff] }
 0x67a   : > { %v10820_v12 = vmax.f32 %v10784_v7, 0.0  ;;  %v10785_v25 = vadd.f32 %v11793_v53, %v10677_v21  ;;  %v17045_v53 = vld [vmem:[#allocation10_spill] sm:$0xff] }
 0x67b   : > { %v10818_v8 = vmax.f32 %v10782_v47, 0.0  ;;  %v10783_v3 = vadd.f32 %v11789_v31, %v10675_v38  ;;  %v13358_v16 = vpop.f32.mrb[4].mxu1  ;;  %v17047_v47 = vld [vmem:[#allocation8_spill] sm:$0xff] }
 0x67c   : > { %v10821_v6 = vmax.f32 %v10785_v25, 0.0  ;;  %v10644_v58 = vmul.f32 %v16535_v32, %v13358_v16  ;;  %v10367_v42 = vpop.f32.mrb[5].mxu1  ;;  %v10856_v23 = vmul.f32 %v10820_v12, %v17041_v41 }
 0x67d   : > { %v10819_v2 = vmax.f32 %v10783_v3, 0.0  ;;  %v10642_v27 = vmul.f32 %v16535_v32, %v10367_v42  ;;  %v13359_v56 = vpop.f32.mrb[6].mxu1  ;;  %v10854_v44 = vmul.f32 %v10818_v8, %v17043_v24  ;;  %v11955_v42 = vld [vmem:[%s14364_s8 + $0x48] sm:$0xff]  }
 0x67e   : > { %v10857_v50 = vmul.f32 %v10821_v6, %v17042_v55  ;;  %v10680_v61 = vadd.f32 %v16542_v40, %v10644_v58  ;;  %v10645_v14 = vmul.f32 %v16535_v32, %v13359_v56  ;;  %v10370_v57 = vpop.f32.mrb[7].mxu1  ;;  %v11816_v55 = vunpack.c.l.bf16 %v11955_v42 }
 0x67f   : > { %v10855_v9 = vmul.f32 %v10819_v2, %v17044_v59  ;;  %v10678_v29 = vadd.f32 %v16542_v40, %v10642_v27  ;;  %v10643_v5 = vmul.f32 %v16535_v32, %v10370_v57 }
 0x680   : > { %v11866_v19 = vpack.c.bf16 %v10857_v50, %v10856_v23  ;;  %v10788_v43 = vadd.f32 %v11800_v15, %v10680_v61  ;;  %v10681_v4 = vadd.f32 %v16542_v40, %v10645_v14 }
 0x681   : > { %v11861_v0 = vpack.c.bf16 %v10855_v9, %v10854_v44  ;;  %v10786_v11 = vadd.f32 %v11796_v63, %v10678_v29  ;;  %v10679_v48 = vadd.f32 %v16542_v40, %v10643_v5  ;;  %v11954_v63 = vld [vmem:[%s14364_s8 + $0x40] sm:$0xff]   ;;  %v11817_v44 = vunpack.c.h.bf16 %v11955_v42  ;;  %v17050_v5 = vld [vmem:[#allocation15_spill] sm:$0xff]  ;;  %v17056_v42 = vld [vmem:[#allocation17_spill] sm:$0xff] }
 0x682   : > { %11967 = vst [vmem:[%s14868_s15 + $0x18] sm:$0xff] %v11866_v19   ;;  %v10824_v36 = vmax.f32 %v10788_v43, 0.0  ;;  %v10789_v45 = vadd.f32 %v11801_v62, %v10681_v4  ;;  %v11812_v61 = vunpack.c.l.bf16 %v11954_v63  ;;  %v11813_v59 = vunpack.c.h.bf16 %v11954_v63  ;;  %v17049_v9 = vld [vmem:[#allocation14_spill] sm:$0xff] }
 0x683   : > { %11966 = vst [vmem:[%s14868_s15 + $0x10] sm:$0xff] %v11861_v0   ;;  %v10822_v49 = vmax.f32 %v10786_v11, 0.0  ;;  %v10787_v51 = vadd.f32 %v11797_v39, %v10679_v48  ;;  %v13362_v13 = vpop.f32.mrb[8].mxu1  ;;  %v17051_v11 = vld [vmem:[#allocation12_spill] sm:$0xff] }
 0x684   : > { %v10825_v1 = vmax.f32 %v10789_v45, 0.0  ;;  %v10648_v17 = vmul.f32 %v16535_v32, %v13362_v13  ;;  %v10383_v37 = vpop.f32.mrb[9].mxu1  ;;  %v10860_v22 = vmul.f32 %v10824_v36, %v17045_v53 }
 0x685   : > { %v10823_v35 = vmax.f32 %v10787_v51, 0.0  ;;  %v10646_v60 = vmul.f32 %v16535_v32, %v10383_v37  ;;  %v13363_v33 = vpop.f32.mrb[10].mxu1  ;;  %v10858_v38 = vmul.f32 %v10822_v49, %v17047_v47  ;;  %v11957_v37 = vld [vmem:[%s14364_s8 + $0x58] sm:$0xff]  }
 0x686   : > { %v10861_v54 = vmul.f32 %v10825_v1, %v17046_v30  ;;  %v10684_v31 = vadd.f32 %v16542_v40, %v10648_v17  ;;  %v10649_v7 = vmul.f32 %v16535_v32, %v13363_v33  ;;  %v10386_v21 = vpop.f32.mrb[11].mxu1  ;;  %v11824_v30 = vunpack.c.l.bf16 %v11957_v37 }
 0x687   : > { %v10859_v26 = vmul.f32 %v10823_v35, %v17048_v20  ;;  %v10682_v12 = vadd.f32 %v16542_v40, %v10646_v60  ;;  %v10647_v25 = vmul.f32 %v16535_v32, %v10386_v21 }
 0x688   : > { %v11876_v8 = vpack.c.bf16 %v10861_v54, %v10860_v22  ;;  %v10792_v3 = vadd.f32 %v11808_v10, %v10684_v31  ;;  %v10685_v16 = vadd.f32 %v16542_v40, %v10649_v7 }
 0x689   : > { %v11871_v6 = vpack.c.bf16 %v10859_v26, %v10858_v38  ;;  %v10790_v58 = vadd.f32 %v11804_v18, %v10682_v12  ;;  %v10683_v15 = vadd.f32 %v16542_v40, %v10647_v25  ;;  %v11956_v18 = vld [vmem:[%s14364_s8 + $0x50] sm:$0xff]   ;;  %v11825_v38 = vunpack.c.h.bf16 %v11957_v37  ;;  %v17053_v26 = vld [vmem:[#allocation18_spill] sm:$0xff]  ;;  %v17054_v25 = vld [vmem:[#allocation19_spill] sm:$0xff] }
 0x68a   : > { %11969 = vst [vmem:[%s14868_s15 + $0x28] sm:$0xff] %v11876_v8   ;;  %v10828_v2 = vmax.f32 %v10792_v3, 0.0  ;;  %v10793_v27 = vadd.f32 %v11809_v46, %v10685_v16  ;;  %v11820_v31 = vunpack.c.l.bf16 %v11956_v18  ;;  %v11821_v20 = vunpack.c.h.bf16 %v11956_v18  ;;  %v17060_v37 = vld [vmem:[#allocation21_spill] sm:$0xff] }
 0x68b   : > { %11968 = vst [vmem:[%s14868_s15 + $0x20] sm:$0xff] %v11871_v6   ;;  %v10826_v56 = vmax.f32 %v10790_v58, 0.0  ;;  %v10791_v62 = vadd.f32 %v11805_v52, %v10683_v15  ;;  %v13366_v39 = vpop.f32.mrb[12].mxu1  ;;  %v17055_v58 = vld [vmem:[#allocation16_spill] sm:$0xff] }
 0x68c   : > { %v10829_v41 = vmax.f32 %v10793_v27, 0.0  ;;  %v10652_v23 = vmul.f32 %v16535_v32, %v13366_v39  ;;  %v10399_v50 = vpop.f32.mrb[13].mxu1  ;;  %v10864_v29 = vmul.f32 %v10828_v2, %v17049_v9 }
 0x68d   : > { %v10827_v14 = vmax.f32 %v10791_v62, 0.0  ;;  %v10650_v57 = vmul.f32 %v16535_v32, %v10399_v50  ;;  %v13367_v24 = vpop.f32.mrb[14].mxu1  ;;  %v10862_v48 = vmul.f32 %v10826_v56, %v17051_v11  ;;  %v11959_v50 = vld [vmem:[%s14364_s8 + $0x68] sm:$0xff]  }
 0x68e   : > { %v10865_v19 = vmul.f32 %v10829_v41, %v17050_v5  ;;  %v10688_v43 = vadd.f32 %v16542_v40, %v10652_v23  ;;  %v10653_v4 = vmul.f32 %v16535_v32, %v13367_v24  ;;  %v10402_v0 = vpop.f32.mrb[15].mxu1  ;;  %v11832_v5 = vunpack.c.l.bf16 %v11959_v50 }
 0x68f   : > { %v10863_v34 = vmul.f32 %v10827_v14, %v17052_v28  ;;  %v10686_v36 = vadd.f32 %v16542_v40, %v10650_v57  ;;  %v10651_v45 = vmul.f32 %v16535_v32, %v10402_v0 }
 0x690   : > { %v11886_v49 = vpack.c.bf16 %v10865_v19, %v10864_v29  ;;  %v10796_v51 = vadd.f32 %v11816_v55, %v10688_v43  ;;  %v10689_v13 = vadd.f32 %v16542_v40, %v10653_v4 }
 0x691   : > { %v11881_v1 = vpack.c.bf16 %v10863_v34, %v10862_v48  ;;  %v10794_v17 = vadd.f32 %v11812_v61, %v10686_v36  ;;  %v10687_v10 = vadd.f32 %v16542_v40, %v10651_v45  ;;  %v11958_v61 = vld [vmem:[%s14364_s8 + $0x60] sm:$0xff]   ;;  %v11833_v48 = vunpack.c.h.bf16 %v11959_v50  ;;  %v17058_v45 = vld [vmem:[#allocation23_spill] sm:$0xff]  ;;  %v17064_v50 = vld [vmem:[#allocation25_spill] sm:$0xff] }
 0x692   : > { %11971 = vst [vmem:[%s14868_s15 + $0x38] sm:$0xff] %v11886_v49   ;;  %v10832_v35 = vmax.f32 %v10796_v51, 0.0  ;;  %v10797_v60 = vadd.f32 %v11817_v44, %v10689_v13  ;;  %v11828_v43 = vunpack.c.l.bf16 %v11958_v61  ;;  %v11829_v28 = vunpack.c.h.bf16 %v11958_v61  ;;  %v17057_v34 = vld [vmem:[#allocation22_spill] sm:$0xff] }
 0x693   : > { %11970 = vst [vmem:[%s14868_s15 + $0x30] sm:$0xff] %v11881_v1   ;;  %v10830_v33 = vmax.f32 %v10794_v17, 0.0  ;;  %v10795_v46 = vadd.f32 %v11813_v59, %v10687_v10  ;;  %v13370_v52 = vpop.f32.mrb[16].mxu1  ;;  %v17059_v17 = vld [vmem:[#allocation20_spill] sm:$0xff] }
 0x694   : > { %v10833_v53 = vmax.f32 %v10797_v60, 0.0  ;;  %v10656_v22 = vmul.f32 %v16535_v32, %v13370_v52  ;;  %v10415_v54 = vpop.f32.mrb[17].mxu1  ;;  %v10868_v12 = vmul.f32 %v10832_v35, %v17053_v26 }
 0x695   : > { %v10831_v7 = vmax.f32 %v10795_v46, 0.0  ;;  %v10654_v21 = vmul.f32 %v16535_v32, %v10415_v54  ;;  %v13371_v47 = vpop.f32.mrb[18].mxu1  ;;  %v10866_v15 = vmul.f32 %v10830_v33, %v17055_v58  ;;  %v11961_v54 = vld [vmem:[%s14364_s8 + $0x78] sm:$0xff]  }
 0x696   : > { %v10869_v8 = vmul.f32 %v10833_v53, %v17054_v25  ;;  %v10692_v3 = vadd.f32 %v16542_v40, %v10656_v22  ;;  %v10657_v16 = vmul.f32 %v16535_v32, %v13371_v47  ;;  %v10418_v6 = vpop.f32.mrb[19].mxu1  ;;  %v11840_v25 = vunpack.c.l.bf16 %v11961_v54 }
 0x697   : > { %v10867_v63 = vmul.f32 %v10831_v7, %v17056_v42  ;;  %v10690_v2 = vadd.f32 %v16542_v40, %v10654_v21  ;;  %v10655_v27 = vmul.f32 %v16535_v32, %v10418_v6 }
 0x698   : > { %v11896_v56 = vpack.c.bf16 %v10869_v8, %v10868_v12  ;;  %v10800_v62 = vadd.f32 %v11824_v30, %v10692_v3  ;;  %v10693_v39 = vadd.f32 %v16542_v40, %v10657_v16 }
 0x699   : > { %v11891_v41 = vpack.c.bf16 %v10867_v63, %v10866_v15  ;;  %v10798_v23 = vadd.f32 %v11820_v31, %v10690_v2  ;;  %v10691_v55 = vadd.f32 %v16542_v40, %v10655_v27  ;;  %v11960_v31 = vld [vmem:[%s14364_s8 + $0x70] sm:$0xff]   ;;  %v11841_v15 = vunpack.c.h.bf16 %v11961_v54  ;;  %v17061_v63 = vld [vmem:[#allocation26_spill] sm:$0xff]  ;;  %v17062_v27 = vld [vmem:[#allocation27_spill] sm:$0xff] }
 0x69a   : > { %11973 = vst [vmem:[%s14868_s15 + $0x48] sm:$0xff] %v11896_v56   ;;  %v10836_v14 = vmax.f32 %v10800_v62, 0.0  ;;  %v10801_v57 = vadd.f32 %v11825_v38, %v10693_v39  ;;  %v11836_v3 = vunpack.c.l.bf16 %v11960_v31  ;;  %v11837_v42 = vunpack.c.h.bf16 %v11960_v31  ;;  %v17068_v54 = vld [vmem:[#allocation29_spill] sm:$0xff] }
 0x69b   : > { %11972 = vst [vmem:[%s14868_s15 + $0x40] sm:$0xff] %v11891_v41   ;;  %v10834_v24 = vmax.f32 %v10798_v23, 0.0  ;;  %v10799_v44 = vadd.f32 %v11821_v20, %v10691_v55  ;;  %v13374_v59 = vpop.f32.mrb[20].mxu1  ;;  %v17063_v23 = vld [vmem:[#allocation24_spill] sm:$0xff] }
 0x69c   : > { %v10837_v9 = vmax.f32 %v10801_v57, 0.0  ;;  %v10660_v29 = vmul.f32 %v16535_v32, %v13374_v59  ;;  %v10431_v19 = vpop.f32.mrb[21].mxu1  ;;  %v10872_v36 = vmul.f32 %v10836_v14, %v17057_v34 }
 0x69d   : > { %v10835_v4 = vmax.f32 %v10799_v44, 0.0  ;;  %v10658_v0 = vmul.f32 %v16535_v32, %v10431_v19  ;;  %v13375_v11 = vpop.f32.mrb[22].mxu1  ;;  %v10870_v10 = vmul.f32 %v10834_v24, %v17059_v17  ;;  %v11963_v19 = vld [vmem:[%s14364_s8 + $0x88] sm:$0xff]  }
 0x69e   : > { %v10873_v49 = vmul.f32 %v10837_v9, %v17058_v45  ;;  %v10696_v51 = vadd.f32 %v16542_v40, %v10660_v29  ;;  %v10661_v13 = vmul.f32 %v16535_v32, %v13375_v11  ;;  %v10434_v1 = vpop.f32.mrb[23].mxu1  ;;  %v11848_v45 = vunpack.c.l.bf16 %v11963_v19 }
 0x69f   : > { %v10871_v18 = vmul.f32 %v10835_v4, %v17060_v37  ;;  %v10694_v35 = vadd.f32 %v16542_v40, %v10658_v0  ;;  %v10659_v60 = vmul.f32 %v16535_v32, %v10434_v1 }
 0x6a0   : > { %v11906_v33 = vpack.c.bf16 %v10873_v49, %v10872_v36  ;;  %v10804_v46 = vadd.f32 %v11832_v5, %v10696_v51  ;;  %v10697_v52 = vadd.f32 %v16542_v40, %v10661_v13 }
 0x6a1   : > { %v11901_v53 = vpack.c.bf16 %v10871_v18, %v10870_v10  ;;  %v10802_v22 = vadd.f32 %v11828_v43, %v10694_v35  ;;  %v10695_v30 = vadd.f32 %v16542_v40, %v10659_v60  ;;  %v11962_v43 = vld [vmem:[%s14364_s8 + $0x80] sm:$0xff]   ;;  %v11849_v10 = vunpack.c.h.bf16 %v11963_v19  ;;  %v17066_v60 = vld [vmem:[#allocation31_spill] sm:$0xff]  ;;  %v17072_v19 = vld [vmem:[#allocation33_spill] sm:$0xff] }
 0x6a2   : > { %11975 = vst [vmem:[%s14868_s15 + $0x58] sm:$0xff] %v11906_v33   ;;  %v10840_v7 = vmax.f32 %v10804_v46, 0.0  ;;  %v10805_v21 = vadd.f32 %v11833_v48, %v10697_v52  ;;  %v11844_v51 = vunpack.c.l.bf16 %v11962_v43  ;;  %v11845_v37 = vunpack.c.h.bf16 %v11962_v43  ;;  %v17065_v18 = vld [vmem:[#allocation30_spill] sm:$0xff] }
 0x6a3   : > { %11974 = vst [vmem:[%s14868_s15 + $0x50] sm:$0xff] %v11901_v53   ;;  %v10838_v47 = vmax.f32 %v10802_v22, 0.0  ;;  %v10803_v38 = vadd.f32 %v11829_v28, %v10695_v30  ;;  %v13378_v20 = vpop.f32.mrb[24].mxu1  ;;  %v17067_v22 = vld [vmem:[#allocation28_spill] sm:$0xff] }
 0x6a4   : > { %v10841_v26 = vmax.f32 %v10805_v21, 0.0  ;;  %v10664_v12 = vmul.f32 %v16535_v32, %v13378_v20  ;;  %v10447_v8 = vpop.f32.mrb[25].mxu1  ;;  %v10876_v2 = vmul.f32 %v10840_v7, %v17061_v63 }
 0x6a5   : > { %v10839_v16 = vmax.f32 %v10803_v38, 0.0  ;;  %v10662_v6 = vmul.f32 %v16535_v32, %v10447_v8  ;;  %v13379_v58 = vpop.f32.mrb[26].mxu1  ;;  %v10874_v55 = vmul.f32 %v10838_v47, %v17063_v23  ;;  %v11965_v8 = vld [vmem:[%s14364_s8 + $0x98] sm:$0xff]  }
 0x6a6   : > { %v10877_v56 = vmul.f32 %v10841_v26, %v17062_v27  ;;  %v10700_v62 = vadd.f32 %v16542_v40, %v10664_v12  ;;  %v10665_v39 = vmul.f32 %v16535_v32, %v13379_v58  ;;  %v10450_v41 = vpop.f32.mrb[27].mxu1  ;;  %v11856_v27 = vunpack.c.l.bf16 %v11965_v8 }
 0x6a7   : > { %v10875_v61 = vmul.f32 %v10839_v16, %v17064_v50  ;;  %v10698_v14 = vadd.f32 %v16542_v40, %v10662_v6  ;;  %v10663_v57 = vmul.f32 %v16535_v32, %v10450_v41 }
 0x6a8   : > { %v11916_v24 = vpack.c.bf16 %v10877_v56, %v10876_v2  ;;  %v10808_v44 = vadd.f32 %v11840_v25, %v10700_v62  ;;  %v10701_v59 = vadd.f32 %v16542_v40, %v10665_v39 }
 0x6a9   : > { %v11911_v9 = vpack.c.bf16 %v10875_v61, %v10874_v55  ;;  %v10806_v29 = vadd.f32 %v11836_v3, %v10698_v14  ;;  %v10699_v5 = vadd.f32 %v16542_v40, %v10663_v57  ;;  %v11964_v3 = vld [vmem:[%s14364_s8 + $0x90] sm:$0xff]   ;;  %v11857_v55 = vunpack.c.h.bf16 %v11965_v8  ;;  %v17069_v61 = vld [vmem:[#allocation34_spill] sm:$0xff]  ;;  %v17070_v57 = vld [vmem:[#allocation35_spill] sm:$0xff] }
 0x6aa   : > { %11977 = vst [vmem:[%s14868_s15 + $0x68] sm:$0xff] %v11916_v24   ;;  %v10844_v4 = vmax.f32 %v10808_v44, 0.0  ;;  %v10809_v0 = vadd.f32 %v11841_v15, %v10701_v59  ;;  %v11852_v62 = vunpack.c.l.bf16 %v11964_v3  ;;  %v11853_v50 = vunpack.c.h.bf16 %v11964_v3 }
 0x6ab   : > { %11976 = vst [vmem:[%s14868_s15 + $0x60] sm:$0xff] %v11911_v9   ;;  %v10842_v11 = vmax.f32 %v10806_v29, 0.0  ;;  %v10807_v48 = vadd.f32 %v11837_v42, %v10699_v5  ;;  %v13382_v28 = vpop.f32.mrb[28].mxu1  ;;  %v17071_v29 = vld [vmem:[#allocation32_spill] sm:$0xff] }
 0x6ac   : > { %v10845_v34 = vmax.f32 %v10809_v0, 0.0  ;;  %v10668_v36 = vmul.f32 %v16535_v32, %v13382_v28  ;;  %v10463_v49 = vpop.f32.mrb[29].mxu1  ;;  %v10880_v35 = vmul.f32 %v10844_v4, %v17065_v18  ;;  %v17074_v18 = vld [vmem:[#allocation39_spill] sm:$0xff] }
 0x6ad   : > { %v10843_v13 = vmax.f32 %v10807_v48, 0.0  ;;  %v10666_v1 = vmul.f32 %v16535_v32, %v10463_v49  ;;  %v13383_v17 = vpop.f32.mrb[30].mxu1  ;;  %v10878_v30 = vmul.f32 %v10842_v11, %v17067_v22 }
 0x6ae   : > { %v10881_v33 = vmul.f32 %v10845_v34, %v17066_v60  ;;  %v10704_v46 = vadd.f32 %v16542_v40, %v10668_v36  ;;  %v10669_v52 = vmul.f32 %v16535_v32, %v13383_v17  ;;  %v10466_v53 = vpop.f32.mrb[31].mxu1  ;;  %v17075_v60 = vld [vmem:[#allocation36_spill] sm:$0xff] }
 0x6af   : > { %v10879_v31 = vmul.f32 %v10843_v13, %v17068_v54  ;;  %v10702_v7 = vadd.f32 %v16542_v40, %v10666_v1  ;;  %v10667_v21 = vmul.f32 %v16535_v32, %v10466_v53 }
 0x6b0   : > { %v11926_v47 = vpack.c.bf16 %v10881_v33, %v10880_v35  ;;  %v10812_v38 = vadd.f32 %v11848_v45, %v10704_v46  ;;  %v10705_v20 = vadd.f32 %v16542_v40, %v10669_v52  ;;  %v17076_v46 = vld [vmem:[#allocation37_spill] sm:$0xff] }
 0x6b1   : > { %v11921_v26 = vpack.c.bf16 %v10879_v31, %v10878_v30  ;;  %v10810_v12 = vadd.f32 %v11844_v51, %v10702_v7  ;;  %v10703_v25 = vadd.f32 %v16542_v40, %v10667_v21 }
 0x6b2   : > { %11979 = vst [vmem:[%s14868_s15 + $0x78] sm:$0xff] %v11926_v47   ;;  %v10848_v16 = vmax.f32 %v10812_v38, 0.0  ;;  %v10813_v6 = vadd.f32 %v11849_v10, %v10705_v20 }
 0x6b3   : > { %11978 = vst [vmem:[%s14868_s15 + $0x70] sm:$0xff] %v11921_v26   ;;  %v10846_v58 = vmax.f32 %v10810_v12, 0.0  ;;  %v10811_v15 = vadd.f32 %v11845_v37, %v10703_v25  ;;  %v13386_v42 = vpop.f32.mrb[32].mxu1  ;;  %v17073_v37 = vld [vmem:[#allocation38_spill] sm:$0xff] }
 0x6b4   : > { %v10849_v63 = vmax.f32 %v10813_v6, 0.0  ;;  %v10672_v2 = vmul.f32 %v16535_v32, %v13386_v42  ;;  %v10479_v56 = vpop.f32.mrb[33].mxu1  ;;  %v10884_v14 = vmul.f32 %v10848_v16, %v17069_v61 }
 0x6b5   : > { %v10847_v39 = vmax.f32 %v10811_v15, 0.0  ;;  %v10670_v41 = vmul.f32 %v16535_v32, %v10479_v56  ;;  %v13387_v23 = vpop.f32.mrb[34].mxu1  ;;  %v10882_v5 = vmul.f32 %v10846_v58, %v17071_v29 }
 0x6b6   : > { %v10885_v24 = vmul.f32 %v10849_v63, %v17070_v57  ;;  %v10708_v44 = vadd.f32 %v16542_v40, %v10672_v2  ;;  %v10673_v59 = vmul.f32 %v16535_v32, %v13387_v23  ;;  %v10482_v9 = vpop.f32.mrb[35].mxu1 }
 0x6b7   : > { %v10883_v43 = vmul.f32 %v10847_v39, %v17072_v19  ;;  %v10706_v4 = vadd.f32 %v16542_v40, %v10670_v41  ;;  %v10671_v0 = vmul.f32 %v16535_v32, %v10482_v9 }
 0x6b8   : > { %v11936_v11 = vpack.c.bf16 %v10885_v24, %v10884_v14  ;;  %v10816_v48 = vadd.f32 %v11856_v27, %v10708_v44  ;;  %v10709_v28 = vadd.f32 %v16542_v40, %v10673_v59 }
 0x6b9   : > { %v11931_v34 = vpack.c.bf16 %v10883_v43, %v10882_v5  ;;  %v10814_v36 = vadd.f32 %v11852_v62, %v10706_v4  ;;  %v10707_v45 = vadd.f32 %v16542_v40, %v10671_v0 }
 0x6ba   : > { %11981 = vst [vmem:[%s14868_s15 + $0x88] sm:$0xff] %v11936_v11   ;;  %v10852_v49 = vmax.f32 %v10816_v48, 0.0  ;;  %v10817_v51 = vadd.f32 %v11857_v55, %v10709_v28 }
 0x6bb   : > { %11980 = vst [vmem:[%s14868_s15 + $0x80] sm:$0xff] %v11931_v34   ;;  %v10850_v13 = vmax.f32 %v10814_v36, 0.0  ;;  %v10815_v1 = vadd.f32 %v11853_v50, %v10707_v45 }
 0x6bc   : > { %v10853_v17 = vmax.f32 %v10817_v51, 0.0  ;;  %v10888_v32 = vmul.f32 %v10852_v49, %v17073_v37 }
 0x6bd   : > { %v10851_v10 = vmax.f32 %v10815_v1, 0.0  ;;  %v10886_v33 = vmul.f32 %v10850_v13, %v17075_v60 }
 0x6be   : > { %v10889_v35 = vmul.f32 %v10853_v17, %v17074_v18 }
 0x6bf   : > { %v10887_v52 = vmul.f32 %v10851_v10, %v17076_v46 }
 0x6c0   : > { %v11946_v53 = vpack.c.bf16 %v10889_v35, %v10888_v32 }
 0x6c1   : > { %v11941_v22 = vpack.c.bf16 %v10887_v52, %v10886_v33 }
 0x6c2   : > { %11983 = vst [vmem:[%s14868_s15 + $0x98] sm:$0xff] %v11946_v53  }
 0x6c3   : > { %11982 = vst [vmem:[%s14868_s15 + $0x90] sm:$0xff] %v11941_v22  }
 0x6c4 PF: > { %s16_s21 = sadd.s32 1, %s14301_s21  }
 0x6c5   : > { %p13_p4 = scmp.ge.s32.totalorder %s16_s21, 4  }
 0x6c7   :  { %15 = sbr.rel (!%p13_p4) target bundleno = 1 (0x1), region = 90 }

// kernel: run_chain.3
= control target key start
LH: loop header
LB: loop body
LE: loop exit
PB: predicated region body
PF: predicated region fallthrough
CT: control target
= control target key end

     0   :  { %s14892_s30 = smov 0   ;;  %s17450_s0 = inlined_call_operand.vmem [shape: bf16[2,352,128], index: 0, kind: input, shape index: {}]   ;;  %s17451_s1 = inlined_call_operand.vmem [shape: bf16[9,128,128], index: 1, kind: input, shape index: {}]   ;;  %s17452_s2 = inlined_call_operand.vmem [shape: bf16[9,128,128], index: 2, kind: input, shape index: {}]   ;;  %s17453_s3 = inlined_call_operand.vmem [shape: f32[1,128], index: 3, kind: input, shape index: {}]   ;;  %s17454_s4 = inlined_call_operand.vmem [shape: f32[1,128], index: 4, kind: input, shape index: {}]   ;;  %s17455_s5 = inlined_call_operand.vmem [shape: f32[288,1], index: 5, kind: input, shape index: {}]   ;;  %s17456_s6 = inlined_call_operand.vmem [shape: bf16[128,128], index: 6, kind: input, shape index: {}]   ;;  %s17457_s7 = inlined_call_operand.vmem [shape: f32[1,128], index: 7, kind: input, shape index: {}]   ;;  %s17458_s8 = inlined_call_operand.vmem [shape: f32[1,128], index: 8, kind: input, shape index: {}]   ;;  %s17459_s9 = inlined_call_operand.vmem [shape: bf16[2,352,128], index: 9, kind: output, shape index: {}]  }
   0x1 LB: > { %s11613_s10 = sadd.s32 4294967295, %s14839_s30   ;;  %p11617_p0 = scmp.ge.s32.totalorder %s14839_s30, 1  ;;  %s14839_s30 = sphi %s14892_s30, %s19_s30  }
   0x2   : > { %p287_p1 = scmp.lt.s32.totalorder %s14839_s30, 3 }
   0x4   : > { %p288_p2 = pnand %p11617_p0, %p287_p1 }
   0x6   : > { %291 = sbr.rel (%p288_p2) target bundleno = 1693 (0x69d), region = 56 }
   0xd   : > { %v14488_v0 = vld [vmem:[%s17451_s1] sm:$0xff]   ;;  %p323_p3 = scmp.lt.s32.totalorder %s11613_s10, 1  ;;  %v14489_v1 = vld [vmem:[%s17451_s1 + $0x8] sm:$0xff]   ;;  %v14490_v2 = vld [vmem:[%s17451_s1 + $0x10] sm:$0xff]   ;;  %vm522_vm0 = vsmask.f32 5376 }
   0xe   : > { %12896 = vmatprep.subr.bf16.mxu0 %v14488_v0  ;;  %13884 = vmatprep.subr.bf16.mxu1 %v14488_v0  ;;  %v14491_v3 = vld [vmem:[%s17451_s1 + $0x18] sm:$0xff]   ;;  %v14492_v6 = vld [vmem:[%s17451_s1 + $0x20] sm:$0xff]   ;;  %v14493_v19 = vld [vmem:[%s17451_s1 + $0x28] sm:$0xff]   ;;  %vm1119_vm1 = vcmask 1044480   ;;  %vm1655_vm2 = vsmask.f32 4352 }
   0xf   : > { %s17830_s10 = smov (!%p323_p3, %s11613_s10), 1  ;;  %12897 = vmatpush3.bf16.msra.mxu0 %v14488_v0  ;;  %13892 = vmatpush3.bf16.msra.mxu1 %v14488_v0  ;;  %v14494_v24 = vld [vmem:[%s17451_s1 + $0x30] sm:$0xff]   ;;  %v14495_v27 = vld [vmem:[%s17451_s1 + $0x38] sm:$0xff]   ;;  %v14499_v36 = vld [vmem:[%s17451_s1 + $0x40] sm:$0xff]   ;;  %vm3486_vm3 = vsmask.f32 7424 }
  0x10   : > { %12898 = vmatprep.subr.bf16.mxu0 %v14489_v1  ;;  %s14476_s17 = smul.u32 176, %s17830_s10  ;;  %13885 = vmatprep.subr.bf16.mxu1 %v14489_v1  ;;  %v14500_v44 = vld [vmem:[%s17451_s1 + $0x48] sm:$0xff]   ;;  %v14503_v49 = vld [vmem:[%s17451_s1 + $0x50] sm:$0xff]   ;;  %v14504_v56 = vld [vmem:[%s17451_s1 + $0x58] sm:$0xff]   ;;  %vm4779_vm4 = vcmask 1046528   ;;  %vm6785_vm7 = vcmask 1040384  }
  0x11   : > { %vm5315_vm5 = vsmask.f32 6400  ;;  %vm6280_vm6 = vsmask.f32 1280  ;;  %vm7210_vm8 = vsmask.f32 256 }
  0x12   : > { %s14917_s20 = scalar_lea.vmem %s17450_s0, %s14476_s17  ;;  %s15379_s28 = scalar_lea.vmem %s17459_s9, %s14476_s17 }
  0x13   : > { %12899 = vmatpush3.bf16.msra.mxu0 %v14489_v1  ;;  %13893 = vmatpush3.bf16.msra.mxu1 %v14489_v1  ;;  %v14496_v4 = vld [vmem:[%s14917_s20 + $0x4] sm:$0xfc]   ;;  %v14497_v5 = vld [vmem:[%s14917_s20 + $0xc] sm:$0xff]   ;;  %v14498_v15 = vld [vmem:[%s14917_s20 + $0x14] sm:$0xff]  }
  0x14   : > { %12900 = vmatprep.subr.bf16.mxu0 %v14490_v2  ;;  %13886 = vmatprep.subr.bf16.mxu1 %v14490_v2  ;;  %v524_v7 = vshrl.u32 %v14496_v4, 16  ;;  %v527_v8 = vshll.u32 %v14496_v4, 16  ;;  %v532_v9 = vshrl.u32 %v14497_v5, 16  ;;  %v535_v10 = vshll.u32 %v14497_v5, 16  ;;  %v14501_v16 = vld [vmem:[%s14917_s20 + $0x1c] sm:$0xff]   ;;  %v14502_v26 = vld [vmem:[%s14917_s20 + $0x24] sm:$0xff]  }
  0x15   : > { %v541_v21 = vshrl.u32 %v14498_v15, 16  ;;  %v544_v22 = vshll.u32 %v14498_v15, 16  ;;  %v550_v23 = vshrl.u32 %v14501_v16, 16  ;;  %v553_v25 = vshll.u32 %v14501_v16, 16  ;;  %v14505_v32 = vld [vmem:[%s14917_s20 + $0x2c] sm:$0xff]   ;;  %v14506_v42 = vld [vmem:[%s14917_s20 + $0x34] sm:$0xff]  }
  0x16   : > { %v526_v11 = vrot.slane %v524_v7, 2  ;;  %v529_v12 = vrot.slane %v527_v8, 3  ;;  %v534_v13 = vrot.slane %v532_v9, 2  ;;  %v537_v14 = vrot.slane %v535_v10, 3  ;;  %v14509_v48 = vld [vmem:[%s14917_s20 + $0x3c] sm:$0xff]   ;;  %v14510_v57 = vld [vmem:[%s14917_s20 + $0x44] sm:$0xff]  }
  0x17   : > { %12901 = vmatpush3.bf16.msra.mxu0 %v14490_v2  ;;  %13894 = vmatpush3.bf16.msra.mxu1 %v14490_v2  ;;  %v543_v28 = vrot.slane %v541_v21, 2  ;;  %v546_v29 = vrot.slane %v544_v22, 3  ;;  %v552_v30 = vrot.slane %v550_v23, 2  ;;  %v555_v31 = vrot.slane %v553_v25, 3  ;;  %v14508_v5 = vld [vmem:[%s17451_s1 + $0x68] sm:$0xff]   ;;  %v14512_v16 = vld [vmem:[%s17451_s1 + $0x78] sm:$0xff]  }
  0x18   : > { %12902 = vmatprep.subr.bf16.mxu0 %v14491_v3  ;;  %13887 = vmatprep.subr.bf16.mxu1 %v14491_v3  ;;  %v530_v17 = vor.u32 %v529_v12, %v526_v11  ;;  %v538_v18 = vor.u32 %v537_v14, %v534_v13  ;;  %v559_v33 = vshrl.u32 %v14502_v26, 16  ;;  %v562_v34 = vshll.u32 %v14502_v26, 16  ;;  %v14513_v9 = vld [vmem:[%s14917_s20 + $0x4] sm:$0xf8]   ;;  %v14514_v11 = vld [vmem:[%s14917_s20 + $0xc] sm:$0xff]  }
  0x19   : > { %v547_v35 = vor.u32 %v546_v29, %v543_v28  ;;  %v556_v37 = vor.u32 %v555_v31, %v552_v30  ;;  %v568_v38 = vshrl.u32 %v14505_v32, 16  ;;  %v571_v39 = vshll.u32 %v14505_v32, 16  ;;  %v14511_v13 = vld [vmem:[%s17451_s1 + $0x70] sm:$0xff]   ;;  %v14516_v22 = vld [vmem:[%s17451_s1 + $0x80] sm:$0xff]   ;;  %v14519_v28 = vld [vmem:[%s17451_s1 + $0x88] sm:$0xff]  }
  0x1a   : > { %v539_v20 = vsel %vm522_vm0, %v530_v17, %v538_v18  ;;  %v561_v40 = vrot.slane %v559_v33, 2  ;;  %v564_v41 = vrot.slane %v562_v34, 3  ;;  %v577_v51 = vshrl.u32 %v14506_v42, 16  ;;  %v14520_v26 = vld [vmem:[%s14917_s20 + $0x2c] sm:$0xff]   ;;  %v14521_v32 = vld [vmem:[%s14917_s20 + $0x34] sm:$0xff]   ;;  %v14523_v34 = vld [vmem:[%s14917_s20 + $0x3c] sm:$0xff]  }
  0x1b   : > { %12903 = vmatpush3.bf16.msra.mxu0 %v14491_v3  ;;  %13895 = vmatpush3.bf16.msra.mxu1 %v14491_v3  ;;  %v548_v43 = vsel %vm522_vm0, %v538_v18, %v547_v35  ;;  %v557_v45 = vsel %vm522_vm0, %v547_v35, %v556_v37  ;;  %v570_v46 = vrot.slane %v568_v38, 2  ;;  %v573_v47 = vrot.slane %v571_v39, 3  ;;  %v14507_v3 = vld [vmem:[%s17451_s1 + $0x60] sm:$0xff]   ;;  %v14515_v18 = vld [vmem:[%s14917_s20 + $0x14] sm:$0xff]  }
  0x1c   : > { %12904 = vmatprep.subr.bf16.mxu0 %v14492_v6  ;;  %13888 = vmatprep.subr.bf16.mxu1 %v14492_v6  ;;  %v565_v50 = vor.u32 %v564_v41, %v561_v40  ;;  %v580_v52 = vshll.u32 %v14506_v42, 16  ;;  %v586_v54 = vshrl.u32 %v14509_v48, 16  ;;  %v589_v55 = vshll.u32 %v14509_v48, 16  ;;  %v14522_v31 = vld [vmem:[%s17451_s1 + $0x90] sm:$0xff]   ;;  %v14528_v39 = vld [vmem:[%s17451_s1 + $0xa0] sm:$0xff]  }
  0x1d   : > { %12912 = vmatprep.mubr.bf16.mxu0 %v539_v20  ;;  %v574_v53 = vor.u32 %v573_v47, %v570_v46  ;;  %v579_v59 = vrot.slane %v577_v51, 2  ;;  %v595_v0 = vshrl.u32 %v14510_v57, 16  ;;  %v598_v1 = vshll.u32 %v14510_v57, 16  ;;  %v14524_v41 = vld [vmem:[%s14917_s20 + $0x44] sm:$0xff]   ;;  %v14534_v47 = vld [vmem:[%s17451_s1 + $0xb0] sm:$0xff]  }
  0x1e   : > { %v566_v58 = vsel %vm522_vm0, %v556_v37, %v565_v50  ;;  %v582_v60 = vrot.slane %v580_v52, 3  ;;  %v588_v62 = vrot.slane %v586_v54, 2  ;;  %v591_v63 = vrot.slane %v589_v55, 3  ;;  %v14538_v52 = vld [vmem:[%s17451_s1 + $0xb8] sm:$0xff]   ;;  %v15026_v55 = vld [vmem:[%s17451_s1 + $0xc0] sm:$0xff]  }
  0x1f   : > { %12905 = vmatpush3.bf16.msra.mxu0 %v14492_v6  ;;  %13896 = vmatpush3.bf16.msra.mxu1 %v14492_v6  ;;  %v575_v61 = vsel %vm522_vm0, %v565_v50, %v574_v53  ;;  %v597_v6 = vrot.slane %v595_v0, 2  ;;  %v600_v7 = vrot.slane %v598_v1, 3  ;;  %v1120_v14 = vrot.slane %v14513_v9, 3  ;;  %v14529_v50 = vld [vmem:[%s14917_s20 + $0x5c] sm:$0xff]   ;;  %v14530_v57 = vld [vmem:[%s14917_s20 + $0x64] sm:$0xff]  }
  0x20   : > { %12906 = vmatprep.subr.bf16.mxu0 %v14493_v19  ;;  %13889 = vmatprep.subr.bf16.mxu1 %v14493_v19  ;;  %v583_v2 = vor.u32 %v582_v60, %v579_v59  ;;  %v592_v4 = vor.u32 %v591_v63, %v588_v62  ;;  %v1121_v15 = vrot.slane %v14514_v11, 3  ;;  %v1123_v21 = vrot.slane %v14515_v18, 3  ;;  %v14532_v59 = vld [vmem:[%s14917_s20 + $0x6c] sm:$0xff]   ;;  %v14533_v62 = vld [vmem:[%s14917_s20 + $0x74] sm:$0xff]   ;;  %v14535_v63 = vld [vmem:[%s14917_s20 + $0x7c] sm:$0xff]  }
  0x21   : > { %v14970_v12 = vor.u32 %v600_v7, %v597_v6  ;;  %v1129_v30 = vrot.slane %v14520_v26, 3  ;;  %v1131_v37 = vrot.slane %v14521_v32, 3  ;;  %v1133_v38 = vrot.slane %v14523_v34, 3  ;;  %v14536_v1 = vld [vmem:[%s14917_s20 + $0x84] sm:$0xff]   ;;  %v15041_v6 = vld [vmem:[%s14917_s20 + $0x8c] sm:$0xff]   ;;  %v14544_v9 = vld [vmem:[%s14917_s20 + $0x1c] sm:$0xff]  }
  0x22   : > { %v584_v8 = vsel %vm522_vm0, %v574_v53, %v583_v2  ;;  %v593_v10 = vsel %vm522_vm0, %v583_v2, %v592_v4  ;;  %v1122_v20 = vsel %vm1119_vm1, %v1120_v14, %v1121_v15  ;;  %v1124_v25 = vsel %vm1119_vm1, %v1121_v15, %v1123_v21  ;;  %v14540_v2 = vld [vmem:[%s14917_s20 + $0x4] sm:$0xf8]   ;;  %v15044_v7 = vld [vmem:[%s14917_s20 + $0x94] ss:$0 sps:$4 sm:$0x77]  }
  0x23   : > { %12907 = vmatpush3.bf16.msra.mxu0 %v14493_v19  ;;  %13897 = vmatpush3.bf16.msra.mxu1 %v14493_v19  ;;  %v602_v17 = vsel %vm522_vm0, %v592_v4, %v14970_v12  ;;  %v14517_v19 = vld [vmem:[%s14917_s20 + $0x1c] sm:$0xff]   ;;  %v1132_v40 = vsel %vm1119_vm1, %v1129_v30, %v1131_v37  ;;  %v1134_v42 = vsel %vm1119_vm1, %v1131_v37, %v1133_v38  ;;  %v1141_v54 = vrot.slane %v14529_v50, 3  ;;  %v14541_v4 = vld [vmem:[%s14917_s20 + $0xc] sm:$0xff]   ;;  %v14545_v11 = vld [vmem:[%s14917_s20 + $0x24] sm:$0xff]  }
  0x24   : > { %12908 = vmatprep.subr.bf16.mxu0 %v14494_v24  ;;  %13890 = vmatprep.subr.bf16.mxu1 %v14494_v24  ;;  %v1125_v23 = vrot.slane %v14517_v19, 3  ;;  %v1143_v60 = vrot.slane %v14530_v57, 3  ;;  %v1657_v14 = vshrl.u32 %v14540_v2, 16  ;;  %v1660_v15 = vshll.u32 %v14540_v2, 16  ;;  %v14553_v50 = vld [vmem:[%s14917_s20 + $0x4c] sm:$0xff]  }
  0x26   : > { %v1144_v0 = vsel %vm1119_vm1, %v1141_v54, %v1143_v60  ;;  %v1659_v26 = vrot.slane %v1657_v14, 3 }
  0x27   : > { %12909 = vmatpush3.bf16.msra.mxu0 %v14494_v24  ;;  %13898 = vmatpush3.bf16.msra.mxu1 %v14494_v24  ;;  %v14518_v24 = vld [vmem:[%s14917_s20 + $0x24] sm:$0xff]  }
  0x28   : > { %12910 = vmatprep.subr.bf16.mxu0 %v14495_v27  ;;  %13891 = vmatprep.subr.bf16.mxu1 %v14495_v27  ;;  %v1127_v29 = vrot.slane %v14518_v24, 3  ;;  %v1153_v24 = vrot.slane %v15041_v6, 3 }
  0x2a   : > { %v1128_v33 = vsel %vm1119_vm1, %v1125_v23, %v1127_v29  ;;  %v1130_v35 = vsel %vm1119_vm1, %v1127_v29, %v1129_v30  ;;  %v1662_v29 = vrot.slane %v1660_v15, 4  ;;  %v14548_v30 = vld [vmem:[%s14917_s20 + $0x34] sm:$0xff]  }
  0x2b   : > { %12911 = vmatpush3.bf16.msra.mxu0 %v14495_v27  ;;  %13899 = vmatpush3.bf16.msra.mxu1 %v14495_v27  ;;  %v1126_v27 = vsel %vm1119_vm1, %v1123_v21, %v1125_v23  ;;  %v1686_v21 = vshll.u32 %v14544_v9, 16 }
  0x2c   : > { %12948 = vmatprep.subr.bf16.mxu0 %v14499_v36 }
  0x2e   : > { %12913 = vmatmul.mubr.bf16.vlgmr.msra.gmra.mrb[0].mxu0 %v548_v43  ;;  %v14526_v43 = vld [vmem:[%s14917_s20 + $0x4c] sm:$0xff]  }
  0x2f   : > { %12949 = vmatpush3.bf16.msra.mxu0 %v14499_v36  ;;  %12916 = vmatprep.mubr.bf16.mxu0 %v557_v45  ;;  %v14525_v36 = vld [vmem:[%s17451_s1 + $0x98] sm:$0xff]   ;;  %v1135_v45 = vrot.slane %v14524_v41, 3  ;;  %v1137_v46 = vrot.slane %v14526_v43, 3  ;;  %v1710_v41 = vshrl.u32 %v14548_v30, 16  ;;  %v1713_v43 = vshll.u32 %v14548_v30, 16 }
  0x30   : > { %12950 = vmatprep.subr.bf16.mxu0 %v14500_v44 }
  0x31   : > { %v1136_v48 = vsel %vm1119_vm1, %v1133_v38, %v1135_v45  ;;  %v1138_v51 = vsel %vm1119_vm1, %v1135_v45, %v1137_v46  ;;  %v1695_v38 = vshll.u32 %v14545_v11, 16 }
  0x33   : > { %12951 = vmatpush3.bf16.msra.mxu0 %v14500_v44  ;;  %v14531_v44 = vld [vmem:[%s17451_s1 + $0xa8] sm:$0xff]  }
  0x34   : > { %12952 = vmatprep.subr.bf16.mxu0 %v14503_v49 }
  0x36   : > { %12917 = vmatmul.mubr.bf16.gmra.mrb[4].mxu0 %v566_v58 }
  0x37   : > { %12953 = vmatpush3.bf16.msra.mxu0 %v14503_v49  ;;  %12920 = vmatprep.mubr.bf16.mxu0 %v575_v61  ;;  %v14527_v49 = vld [vmem:[%s14917_s20 + $0x54] sm:$0xff]   ;;  %v1145_v61 = vrot.slane %v14532_v59, 3 }
  0x38   : > { %12954 = vmatprep.subr.bf16.mxu0 %v14504_v56  ;;  %v1139_v53 = vrot.slane %v14527_v49, 3 }
  0x3a   : > { %v1142_v58 = vsel %vm1119_vm1, %v1139_v53, %v1141_v54 }
  0x3b   : > { %12955 = vmatpush3.bf16.msra.mxu0 %v14504_v56  ;;  %v1140_v56 = vsel %vm1119_vm1, %v1137_v46, %v1139_v53  ;;  %v15062_v53 = vrot.slane %v1713_v43, 4 }
  0x3c   : > { %12956 = vmatprep.subr.bf16.mxu0 %v14507_v3 }
  0x3e   : > { %12921 = vmatmul.mubr.bf16.gmra.mrb[8].mxu0 %v584_v8  ;;  %v14542_v8 = vld [vmem:[%s14917_s20 + $0x14] sm:$0xff]  }
  0x3f   : > { %12957 = vmatpush3.bf16.msra.mxu0 %v14507_v3  ;;  %12924 = vmatprep.mubr.bf16.mxu0 %v593_v10  ;;  %v1146_v3 = vsel %vm1119_vm1, %v1143_v60, %v1145_v61  ;;  %v1149_v10 = vrot.slane %v14535_v63, 3  ;;  %v1674_v18 = vshrl.u32 %v14542_v8, 16  ;;  %v1677_v19 = vshll.u32 %v14542_v8, 16  ;;  %v14556_v63 = vld [vmem:[%s14917_s20 + $0x5c] sm:$0xff]  }
  0x40   : > { %12958 = vmatprep.subr.bf16.mxu0 %v14508_v5  ;;  %v1758_v15 = vshll.u32 %v14556_v63, 16 }
  0x41   : > { %v1679_v34 = vrot.slane %v1677_v19, 4  ;;  %v14546_v19 = vld [vmem:[%s17451_s1 + $0xc8] sm:$0xff]  }
  0x42   : > { %v1760_v30 = vrot.slane %v1758_v15, 4 }
  0x43   : > { %12959 = vmatpush3.bf16.msra.mxu0 %v14508_v5  ;;  %v1147_v5 = vrot.slane %v14533_v62, 3  ;;  %v1737_v62 = vshrl.u32 %v14553_v50, 16 }
  0x44   : > { %12960 = vmatprep.subr.bf16.mxu0 %v14511_v13 }
  0x45   : > { %v1148_v23 = vsel %vm1119_vm1, %v1145_v61, %v1147_v5  ;;  %v14554_v61 = vld [vmem:[%s14917_s20 + $0x54] sm:$0xff]  }
  0x46   : > { %12925 = vmatmul.mubr.bf16.gmra.mrb[12].mxu0 %v602_v17  ;;  %v1668_v17 = vshll.u32 %v14541_v4, 16  ;;  %v1746_v8 = vshrl.u32 %v14554_v61, 16 }
  0x47   : > { %12961 = vmatpush3.bf16.msra.mxu0 %v14511_v13  ;;  %12964 = vmatprep.mubr.bf16.mxu0 %v1122_v20  ;;  %v1151_v13 = vrot.slane %v14536_v1, 3  ;;  %v1683_v20 = vshrl.u32 %v14544_v9, 16  ;;  %v1749_v9 = vshll.u32 %v14554_v61, 16 }
  0x48   : > { %12962 = vmatprep.subr.bf16.mxu0 %v14512_v16  ;;  %v1670_v32 = vrot.slane %v1668_v17, 4 }
  0x49   : > { %v1152_v45 = vsel %vm1119_vm1, %v1149_v10, %v1151_v13  ;;  %v1154_v46 = vsel %vm1119_vm1, %v1151_v13, %v1153_v24  ;;  %v1755_v13 = vshrl.u32 %v14556_v63, 16  ;;  %v14566_v63 = vld [vmem:[%s14917_s20 + $0x94] ss:$0 sps:$4 sm:$0xff]  }
  0x4b   : > { %12963 = vmatpush3.bf16.msra.mxu0 %v14512_v16  ;;  %v1665_v16 = vshrl.u32 %v14541_v4, 16 }
  0x4c   : > { %13000 = vmatprep.subr.bf16.mxu0 %v14516_v22 }
  0x4e   : > { %12965 = vmatmul.mubr.bf16.vlgmr.msra.gmra.mrb[0].mxu0 %v1124_v25  ;;  %v1155_v25 = vrot.slane %v15044_v7, 3  ;;  %v1740_v7 = vshll.u32 %v14553_v50, 16  ;;  %v14558_v50 = vld [vmem:[%s17451_s1 + $0xe8] sm:$0xff]  }
  0x4f   : > { %13001 = vmatpush3.bf16.msra.mxu0 %v14516_v22  ;;  %12968 = vmatprep.mubr.bf16.mxu0 %v1126_v27  ;;  %v1692_v22 = vshrl.u32 %v14545_v11, 16  ;;  %v14547_v27 = vld [vmem:[%s14917_s20 + $0x2c] sm:$0xff]   ;;  %v15072_v11 = vrot.slane %v1737_v62, 3 }
  0x50   : > { %13002 = vmatprep.subr.bf16.mxu0 %v14519_v28 }
  0x51   : > { %v1694_v37 = vrot.slane %v1692_v22, 3 }
  0x53   : > { %13003 = vmatpush3.bf16.msra.mxu0 %v14519_v28  ;;  %v1150_v28 = vsel %vm1119_vm1, %v1147_v5, %v1149_v10  ;;  %v14559_v5 = vld [vmem:[%s14917_s20 + $0x6c] sm:$0xff]  }
  0x54   : > { %13004 = vmatprep.subr.bf16.mxu0 %v14522_v31  ;;  %v1776_v22 = vshll.u32 %v14559_v5, 16 }
  0x56   : > { %12969 = vmatmul.mubr.bf16.gmra.mrb[4].mxu0 %v1128_v33  ;;  %v1676_v33 = vrot.slane %v1674_v18, 3  ;;  %v1773_v18 = vshrl.u32 %v14559_v5, 16 }
  0x57   : > { %12972 = vmatprep.mubr.bf16.mxu0 %v1130_v35  ;;  %13005 = vmatpush3.bf16.msra.mxu0 %v14522_v31  ;;  %v1667_v31 = vrot.slane %v1665_v16, 3  ;;  %v1685_v35 = vrot.slane %v1683_v20, 3 }
  0x58   : > { %13006 = vmatprep.subr.bf16.mxu0 %v14525_v36  ;;  %v1680_v10 = vor.u32 %v1679_v34, %v1676_v33  ;;  %v15092_v33 = vrot.slane %v1773_v18, 3 }
  0x59   : > { %v1671_v59 = vor.u32 %v1670_v32, %v1667_v31 }
  0x5b   : > { %13007 = vmatpush3.bf16.msra.mxu0 %v14525_v36  ;;  %v1688_v36 = vrot.slane %v1686_v21, 4  ;;  %v1681_v20 = vsel %vm1655_vm2, %v1671_v59, %v1680_v10 }
  0x5c   : > { %13008 = vmatprep.subr.bf16.mxu0 %v14528_v39 }
  0x5d   : > { %v1689_v14 = vor.u32 %v1688_v36, %v1685_v35  ;;  %v15094_v35 = vrot.slane %v1776_v22, 4 }
  0x5e   : > { %12973 = vmatmul.mubr.bf16.gmra.mrb[8].mxu0 %v1132_v40  ;;  %v1704_v40 = vshll.u32 %v14547_v27, 16 }
  0x5f   : > { %12976 = vmatprep.mubr.bf16.mxu0 %v1134_v42  ;;  %13009 = vmatpush3.bf16.msra.mxu0 %v14528_v39  ;;  %v1701_v39 = vshrl.u32 %v14547_v27, 16  ;;  %v14550_v42 = vld [vmem:[%s14917_s20 + $0x3c] sm:$0xff]   ;;  %v1690_v21 = vsel %vm1655_vm2, %v1680_v10, %v1689_v14  ;;  %v14549_v27 = vld [vmem:[%s17451_s1 + $0xd0] sm:$0xff]  }
  0x60   : > { %13010 = vmatprep.subr.bf16.mxu0 %v14531_v44  ;;  %v1722_v54 = vshll.u32 %v14550_v42, 16 }
  0x61   : > { %v1703_v49 = vrot.slane %v1701_v39, 3  ;;  %v14552_v39 = vld [vmem:[%s17451_s1 + $0xd8] sm:$0xff]  }
  0x62   : > { %v1724_v2 = vrot.slane %v1722_v54, 4 }
  0x63   : > { %13011 = vmatpush3.bf16.msra.mxu0 %v14531_v44  ;;  %v14551_v44 = vld [vmem:[%s14917_s20 + $0x44] sm:$0xff]  }
  0x64   : > { %13012 = vmatprep.subr.bf16.mxu0 %v14534_v47  ;;  %v1731_v57 = vshll.u32 %v14551_v44, 16 }
  0x66   : > { %12977 = vmatmul.mubr.bf16.gmra.mrb[12].mxu0 %v1136_v48  ;;  %v1719_v48 = vshrl.u32 %v14550_v42, 16  ;;  %v1733_v6 = vrot.slane %v1731_v57, 4 }
  0x67   : > { %12980 = vmatprep.mubr.bf16.mxu0 %v1138_v51  ;;  %13013 = vmatpush3.bf16.msra.mxu0 %v14534_v47  ;;  %v1697_v47 = vrot.slane %v1695_v38, 4  ;;  %v1706_v51 = vrot.slane %v1704_v40, 4  ;;  %v14562_v38 = vld [vmem:[%s14917_s20 + $0x7c] sm:$0xff]  }
  0x68   : > { %13014 = vmatprep.subr.bf16.mxu0 %v14538_v52  ;;  %v1721_v60 = vrot.slane %v1719_v48, 3  ;;  %v14563_v48 = vld [vmem:[%s14917_s20 + $0x84] sm:$0xff]  }
  0x69   : > { %v1707_v34 = vor.u32 %v1706_v51, %v1703_v49  ;;  %v14564_v49 = vld [vmem:[%s14917_s20 + $0x8c] sm:$0xff]   ;;  %v1803_v57 = vshll.u32 %v14563_v48, 16 }
  0x6a   : > { %v1812_v61 = vshll.u32 %v14564_v49, 16 }
  0x6b   : > { %13015 = vmatpush3.bf16.msra.mxu0 %v14538_v52  ;;  %v15060_v52 = vrot.slane %v1710_v41, 3  ;;  %v14555_v41 = vld [vmem:[%s17451_s1 + $0xe0] sm:$0xff]  }
  0x6c   : > { %13052 = vmatprep.subr.bf16.mxu0 %v15026_v55 }
  0x6e   : > { %12981 = vmatmul.mubr.bf16.gmra.mrb[16].mxu0 %v1140_v56  ;;  %v1728_v56 = vshrl.u32 %v14551_v44, 16  ;;  %v1716_v44 = vor.u32 %v15062_v53, %v15060_v52  ;;  %v14561_v53 = vld [vmem:[%s17451_s1 + $0xf0] sm:$0xff]  }
  0x6f   : > { %12984 = vmatprep.mubr.bf16.mxu0 %v1142_v58  ;;  %v1663_v58 = vor.u32 %v1662_v29, %v1659_v26  ;;  %v1698_v26 = vor.u32 %v1697_v47, %v1694_v37  ;;  %v15085_v29 = vrot.slane %v1755_v13, 3  ;;  %v1725_v47 = vor.u32 %v1724_v2, %v1721_v60  ;;  %v14569_v13 = vld [vmem:[%s14917_s20 + $0x1c] sm:$0xff]  }
  0x70   : > { %v15069_v4 = vrot.slane %v1728_v56, 3  ;;  %v1717_v51 = vsel %vm1655_vm2, %v1707_v34, %v1716_v44  ;;  %v1800_v56 = vshrl.u32 %v14563_v48, 16  ;;  %v1809_v60 = vshrl.u32 %v14564_v49, 16 }
  0x71   : > { %v1672_v1 = vsel %vm1655_vm2, %v1663_v58, %v1671_v59  ;;  %v1708_v40 = vsel %vm1655_vm2, %v1698_v26, %v1707_v34  ;;  %v1726_v54 = vsel %vm1655_vm2, %v1716_v44, %v1725_v47  ;;  %v1761_v10 = vor.u32 %v1760_v30, %v15085_v29 }
  0x72   : > { %v1734_v52 = vor.u32 %v1733_v6, %v15069_v4  ;;  %v1805_v4 = vrot.slane %v1803_v57, 4  ;;  %v1811_v5 = vrot.slane %v1809_v60, 3  ;;  %v1818_v6 = vshrl.u32 %v14566_v63, 16 }
  0x76   : > { %12985 = vmatmul.mubr.bf16.gmra.mrb[20].mxu0 %v1144_v0  ;;  %v1156_v0 = vsel %vm1119_vm1, %v1153_v24, %v1155_v25  ;;  %v1742_v24 = vrot.slane %v1740_v7, 4  ;;  %v15080_v25 = vrot.slane %v1746_v8, 3  ;;  %v1821_v8 = vshll.u32 %v14566_v63, 16 }
  0x77   : > { %12988 = vmatprep.mubr.bf16.mxu0 %v1146_v3  ;;  %v14557_v3 = vld [vmem:[%s14917_s20 + $0x64] sm:$0xff]  }
  0x78   : > { %v1764_v16 = vshrl.u32 %v14557_v3, 16  ;;  %v1767_v17 = vshll.u32 %v14557_v3, 16  ;;  %v1743_v62 = vor.u32 %v1742_v24, %v15072_v11  ;;  %v1802_v3 = vrot.slane %v1800_v56, 3  ;;  %v14568_v11 = vld [vmem:[%s14917_s20 + $0x14] sm:$0xff]   ;;  %v14567_v24 = vld [vmem:[%s14917_s20 + $0xc] sm:$0xf8]  }
  0x79   : > { %v2336_v18 = vshll.u32 %v14568_v11, 16  ;;  %v1823_v22 = vrot.slane %v1821_v8, 4  ;;  %v2328_v29 = vshll.u32 %v14567_v24, 16  ;;  %v14573_v8 = vld [vmem:[%s17451_s1 + $0x108] sm:$0xff]  }
  0x7a   : > { %v15088_v31 = vrot.slane %v1764_v16, 3  ;;  %v15090_v32 = vrot.slane %v1767_v17, 4  ;;  %v1744_v2 = vsel %vm1655_vm2, %v1734_v52, %v1743_v62  ;;  %v1814_v16 = vrot.slane %v1812_v61, 4 }
  0x7b   : > { %v2333_v17 = vshrl.u32 %v14568_v11, 16  ;;  %v2338_v34 = vrot.slane %v2336_v18, 4 }
  0x7d   : > { %v2335_v30 = vrot.slane %v2333_v17, 3 }
  0x7e   : > { %12989 = vmatmul.mubr.bf16.gmra.mrb[24].mxu0 %v1148_v23  ;;  %v14560_v23 = vld [vmem:[%s14917_s20 + $0x74] sm:$0xff]  }
  0x7f   : > { %12992 = vmatprep.mubr.bf16.mxu0 %v1150_v28  ;;  %v1751_v28 = vrot.slane %v1749_v9, 4  ;;  %v1782_v36 = vshrl.u32 %v14560_v23, 16  ;;  %v1785_v37 = vshll.u32 %v14560_v23, 16  ;;  %v15133_v9 = vld [vmem:[%s17451_s1 + $0x100] sm:$0xff]   ;;  %v1779_v23 = vor.u32 %v15094_v35, %v15092_v33 }
  0x81   : > { %v15105_v42 = vrot.slane %v1782_v36, 3  ;;  %v15107_v43 = vrot.slane %v1785_v37, 4  ;;  %v1752_v7 = vor.u32 %v1751_v28, %v15080_v25  ;;  %v14571_v25 = vld [vmem:[%s14917_s20 + $0x24] sm:$0xff]   ;;  %v2325_v28 = vshrl.u32 %v14567_v24, 16 }
  0x82   : > { %v2351_v36 = vshrl.u32 %v14571_v25, 16 }
  0x83   : > { %v1762_v15 = vsel %vm1655_vm2, %v1752_v7, %v1761_v10 }
  0x86   : > { %12993 = vmatmul.mubr.bf16.gmra.mrb[28].mxu0 %v1152_v45  ;;  %v1791_v45 = vshrl.u32 %v14562_v38, 16 }
  0x87   : > { %12996 = vmatprep.mubr.bf16.mxu0 %v1154_v46  ;;  %v1794_v46 = vshll.u32 %v14562_v38, 16  ;;  %v2327_v38 = vrot.slane %v2325_v28, 3 }
  0x88   : > { %v1793_v58 = vrot.slane %v1791_v45, 3  ;;  %v2353_v45 = vrot.slane %v2351_v36, 3 }
  0x89   : > { %v1796_v59 = vrot.slane %v1794_v46, 4  ;;  %v14574_v46 = vld [vmem:[%s14917_s20 + $0x34] sm:$0xff]  }
  0x8a   : > { %v2372_v56 = vshll.u32 %v14574_v46, 16 }
  0x8b   : > { %v1797_v33 = vor.u32 %v1796_v59, %v1793_v58  ;;  %v2339_v59 = vor.u32 %v2338_v34, %v2335_v30 }
  0x8e   : > { %12997 = vmatmul.mubr.bf16.gmra.mrb[32].mxu0 %v1156_v0  ;;  %v14565_v0 = vld [vmem:[%s17451_s1 + $0xf8] sm:$0xff]  }
  0x8f   : > { %13016 = vmatprep.mubr.bf16.mxu0 %v1672_v1  ;;  %v1735_v1 = vsel %vm1655_vm2, %v1725_v47, %v1734_v52  ;;  %v14575_v47 = vld [vmem:[%s14917_s20 + $0x3c] sm:$0xff]   ;;  %v2369_v52 = vshrl.u32 %v14574_v46, 16 }
  0x90   : > { %v2378_v57 = vshrl.u32 %v14575_v47, 16 }
  0x96   : > { %13017 = vmatmul.mubr.bf16.vlgmr.msra.gmra.mrb[0].mxu0 %v1681_v20  ;;  %v1770_v20 = vor.u32 %v15090_v32, %v15088_v31  ;;  %v1788_v31 = vor.u32 %v15107_v43, %v15105_v42  ;;  %v2345_v32 = vshll.u32 %v14569_v13, 16  ;;  %v1815_v42 = vor.u32 %v1814_v16, %v1811_v5  ;;  %v14572_v43 = vld [vmem:[%s14917_s20 + $0x2c] sm:$0xff]  }
  0x97   : > { %13053 = vmatpush3.bf16.msra.mxu0 %v15026_v55  ;;  %13020 = vmatprep.mubr.bf16.mxu0 %v1690_v21  ;;  %v1699_v55 = vsel %vm1655_vm2, %v1689_v14, %v1698_v26  ;;  %v1753_v14 = vsel %vm1655_vm2, %v1743_v62, %v1752_v7  ;;  %v1820_v21 = vrot.slane %v1818_v6, 3  ;;  %v14577_v6 = vld [vmem:[%s14917_s20 + $0x44] sm:$0xff]   ;;  %v14578_v7 = vld [vmem:[%s14917_s20 + $0x4c] sm:$0xff]  }
  0x98   : > { %13054 = vmatprep.subr.bf16.mxu0 %v14546_v19  ;;  %v1771_v26 = vsel %vm1655_vm2, %v1761_v10, %v1770_v20  ;;  %v1789_v35 = vsel %vm1655_vm2, %v1779_v23, %v1788_v31  ;;  %v1798_v37 = vsel %vm1655_vm2, %v1788_v31, %v1797_v33  ;;  %v2347_v44 = vrot.slane %v2345_v32, 4  ;;  %v14583_v32 = vld [vmem:[%s14917_s20 + $0x64] sm:$0xff]  }
  0x99   : > { %v2390_v17 = vshll.u32 %v14577_v6, 16  ;;  %v2396_v18 = vshrl.u32 %v14578_v7, 16 }
  0x9b   : > { %13055 = vmatpush3.bf16.msra.mxu0 %v14546_v19  ;;  %v2342_v19 = vshrl.u32 %v14569_v13, 16  ;;  %v2398_v28 = vrot.slane %v2396_v18, 3 }
  0x9c   : > { %13056 = vmatprep.subr.bf16.mxu0 %v14549_v27 }
  0x9e   : > { %13021 = vmatmul.mubr.bf16.gmra.mrb[4].mxu0 %v1699_v55  ;;  %v2344_v55 = vrot.slane %v2342_v19, 3  ;;  %v2399_v19 = vshll.u32 %v14578_v7, 16 }
  0x9f   : > { %13024 = vmatprep.mubr.bf16.mxu0 %v1708_v40  ;;  %13057 = vmatpush3.bf16.msra.mxu0 %v14549_v27  ;;  %v1780_v27 = vsel %vm1655_vm2, %v1770_v20, %v1779_v23  ;;  %v2354_v40 = vshll.u32 %v14571_v25, 16  ;;  %v14580_v20 = vld [vmem:[%s14917_s20 + $0x54] sm:$0xff]  }
  0xa0   : > { %13058 = vmatprep.subr.bf16.mxu0 %v14552_v39  ;;  %v14579_v23 = vld [vmem:[%s17451_s1 + $0x118] sm:$0xff]   ;;  %v2401_v30 = vrot.slane %v2399_v19, 4  ;;  %v2408_v34 = vshll.u32 %v14580_v20, 16 }
  0xa2   : > { %v2402_v46 = vor.u32 %v2401_v30, %v2398_v28  ;;  %v14593_v30 = vld [vmem:[%s14917_s20 + $0x9c] ss:$0 sps:$4 sm:$0xff]  }
  0xa3   : > { %13059 = vmatpush3.bf16.msra.mxu0 %v14552_v39  ;;  %v2330_v39 = vrot.slane %v2328_v29, 4 }
  0xa4   : > { %13060 = vmatprep.subr.bf16.mxu0 %v14555_v41 }
  0xa5   : > { %v2331_v58 = vor.u32 %v2330_v39, %v2327_v38  ;;  %v14584_v38 = vld [vmem:[%s14917_s20 + $0x6c] sm:$0xff]  }
  0xa6   : > { %13025 = vmatmul.mubr.bf16.gmra.mrb[8].mxu0 %v1717_v51  ;;  %v2360_v51 = vshrl.u32 %v14572_v43, 16 }
  0xa7   : > { %13028 = vmatprep.mubr.bf16.mxu0 %v1726_v54  ;;  %13061 = vmatpush3.bf16.msra.mxu0 %v14555_v41  ;;  %v1806_v41 = vor.u32 %v1805_v4, %v1802_v3  ;;  %v2363_v54 = vshll.u32 %v14572_v43, 16  ;;  %v2340_v61 = vsel %vm1655_vm2, %v2331_v58, %v2339_v59  ;;  %v2374_v3 = vrot.slane %v2372_v56, 4 }
  0xa8   : > { %13062 = vmatprep.subr.bf16.mxu0 %v14558_v50  ;;  %v2362_v62 = vrot.slane %v2360_v51, 3  ;;  %v2380_v4 = vrot.slane %v2378_v57, 3  ;;  %v2426_v43 = vshll.u32 %v14583_v32, 16  ;;  %v14592_v57 = vld [vmem:[%s17451_s1 + $0x138] sm:$0xff]  }
  0xa9   : > { %v1807_v48 = vsel %vm1655_vm2, %v1797_v33, %v1806_v41  ;;  %v1816_v49 = vsel %vm1655_vm2, %v1806_v41, %v1815_v42  ;;  %v2365_v63 = vrot.slane %v2363_v54, 4 }
  0xaa   : > { %v2428_v56 = vrot.slane %v2426_v43, 4  ;;  %v14595_v43 = vld [vmem:[%s14917_s20 + $0x18] sm:$0xff]  }
  0xab   : > { %13063 = vmatpush3.bf16.msra.mxu0 %v14558_v50  ;;  %v2356_v50 = vrot.slane %v2354_v40, 4  ;;  %v2366_v16 = vor.u32 %v2365_v63, %v2362_v62  ;;  %v14585_v40 = vld [vmem:[%s17451_s1 + $0x128] sm:$0xff]  }
  0xac   : > { %13064 = vmatprep.subr.bf16.mxu0 %v14561_v53 }
  0xad   : > { %v2357_v5 = vor.u32 %v2356_v50, %v2353_v45  ;;  %v2423_v45 = vshrl.u32 %v14583_v32, 16  ;;  %v14588_v50 = vld [vmem:[%s17451_s1 + $0x130] sm:$0xff]  }
  0xae   : > { %13029 = vmatmul.mubr.bf16.gmra.mrb[12].mxu0 %v1735_v1  ;;  %v2381_v1 = vshll.u32 %v14575_v47, 16  ;;  %v2432_v47 = vshrl.u32 %v14584_v38, 16 }
  0xaf   : > { %13032 = vmatprep.mubr.bf16.mxu0 %v1744_v2  ;;  %13065 = vmatpush3.bf16.msra.mxu0 %v14561_v53  ;;  %v1824_v53 = vor.u32 %v1823_v22, %v1820_v21  ;;  %v2348_v2 = vor.u32 %v2347_v44, %v2344_v55  ;;  %v14581_v22 = vld [vmem:[%s14917_s20 + $0x5c] sm:$0xff]   ;;  %v2367_v24 = vsel %vm1655_vm2, %v2357_v5, %v2366_v16  ;;  %v2410_v55 = vrot.slane %v2408_v34, 4 }
  0xb0   : > { %13066 = vmatprep.subr.bf16.mxu0 %v14565_v0  ;;  %v2383_v13 = vrot.slane %v2381_v1, 4  ;;  %v2414_v31 = vshrl.u32 %v14581_v22, 16  ;;  %v2417_v33 = vshll.u32 %v14581_v22, 16  ;;  %v2425_v54 = vrot.slane %v2423_v45, 3 }
  0xb1   : > { %v1825_v60 = vsel %vm1655_vm2, %v1815_v42, %v1824_v53  ;;  %v2349_v10 = vsel %vm1655_vm2, %v2339_v59, %v2348_v2  ;;  %v2358_v11 = vsel %vm1655_vm2, %v2348_v2, %v2357_v5  ;;  %v14596_v2 = vld [vmem:[%s17451_s1 + $0x140] sm:$0xff]  }
  0xb2   : > { %v2384_v29 = vor.u32 %v2383_v13, %v2380_v4  ;;  %v2416_v44 = vrot.slane %v2414_v31, 3  ;;  %v2419_v42 = vrot.slane %v2417_v33, 4  ;;  %v14589_v5 = vld [vmem:[%s14917_s20 + $0x84] sm:$0xff]  }
  0xb3   : > { %13067 = vmatpush3.bf16.msra.mxu0 %v14565_v0  ;;  %v2371_v0 = vrot.slane %v2369_v52, 3  ;;  %v14587_v52 = vld [vmem:[%s14917_s20 + $0x7c] sm:$0xff]  }
  0xb4   : > { %13104 = vmatprep.subr.bf16.mxu0 %v15133_v9  ;;  %v2420_v62 = vor.u32 %v2419_v42, %v2416_v44  ;;  %v2453_v1 = vshll.u32 %v14587_v52, 16  ;;  %v14594_v42 = vld [vmem:[%s14917_s20 + $0x10] sm:$0xff]  }
  0xb5   : > { %v2375_v21 = vor.u32 %v2374_v3, %v2371_v0  ;;  %v2450_v0 = vshrl.u32 %v14587_v52, 16  ;;  %v2429_v3 = vor.u32 %v2428_v56, %v2425_v54  ;;  %v14601_v54 = vld [vmem:[%s14917_s20 + $0x38] sm:$0xff]   ;;  %v14608_v52 = vld [vmem:[%s17451_s1 + $0x160] sm:$0xff]   ;;  %v14611_v56 = vld [vmem:[%s17451_s1 + $0x168] sm:$0xff]  }
  0xb6   : > { %13033 = vmatmul.mubr.bf16.gmra.mrb[16].mxu0 %v1753_v14  ;;  %v14576_v14 = vld [vmem:[%s17451_s1 + $0x110] sm:$0xff]  }
  0xb7   : > { %13036 = vmatprep.mubr.bf16.mxu0 %v1762_v15  ;;  %v2387_v15 = vshrl.u32 %v14577_v6, 16  ;;  %v2376_v25 = vsel %vm1655_vm2, %v2366_v16, %v2375_v21  ;;  %v2385_v39 = vsel %vm1655_vm2, %v2375_v21, %v2384_v29  ;;  %v2462_v16 = vshll.u32 %v14589_v5, 16 }
  0xb9   : > { %v2464_v22 = vrot.slane %v2462_v16, 4 }
  0xbe   : > { %13037 = vmatmul.mubr.bf16.gmra.mrb[20].mxu0 %v1771_v26  ;;  %v2392_v26 = vrot.slane %v2390_v17, 4 }
  0xbf   : > { %13040 = vmatprep.mubr.bf16.mxu0 %v1780_v27  ;;  %v2405_v27 = vshrl.u32 %v14580_v20, 16 }
  0xc6   : > { %13041 = vmatmul.mubr.bf16.gmra.mrb[24].mxu0 %v1789_v35  ;;  %v14582_v35 = vld [vmem:[%s17451_s1 + $0x120] sm:$0xff]  }
  0xc7   : > { %13044 = vmatprep.mubr.bf16.mxu0 %v1798_v37  ;;  %v2407_v37 = vrot.slane %v2405_v27, 3 }
  0xc9   : > { %v2411_v51 = vor.u32 %v2410_v55, %v2407_v37  ;;  %v2489_v37 = vshll.u32 %v14593_v30, 16 }
  0xcb   : > { %v2412_v58 = vsel %vm1655_vm2, %v2402_v46, %v2411_v51  ;;  %v2421_v6 = vsel %vm1655_vm2, %v2411_v51, %v2420_v62  ;;  %v14605_v51 = vld [vmem:[%s17451_s1 + $0x158] sm:$0xff]  }
  0xce   : > { %13045 = vmatmul.mubr.bf16.gmra.mrb[28].mxu0 %v1807_v48  ;;  %v2435_v48 = vshll.u32 %v14584_v38, 16 }
  0xcf   : > { %13048 = vmatprep.mubr.bf16.mxu0 %v1816_v49  ;;  %v14586_v49 = vld [vmem:[%s14917_s20 + $0x74] sm:$0xff]  }
  0xd0   : > { %v2441_v59 = vshrl.u32 %v14586_v49, 16  ;;  %v2444_v63 = vshll.u32 %v14586_v49, 16  ;;  %v14598_v49 = vld [vmem:[%s14917_s20 + $0x28] sm:$0xff]  }
  0xd2   : > { %v2443_v4 = vrot.slane %v2441_v59, 3  ;;  %v2446_v7 = vrot.slane %v2444_v63, 4  ;;  %v14606_v59 = vld [vmem:[%s14917_s20 + $0x50] sm:$0xff]   ;;  %v14609_v63 = vld [vmem:[%s14917_s20 + $0x60] sm:$0xff]  }
  0xd4   : > { %v2447_v18 = vor.u32 %v2446_v7, %v2443_v4  ;;  %v14620_v4 = vld [vmem:[%s14917_s20 + $0x10] sm:$0xff]   ;;  %v14616_v7 = vld [vmem:[%s14917_s20 + $0x88] sm:$0xff]  }
  0xd6   : > { %13049 = vmatmul.mubr.bf16.gmra.mrb[32].mxu0 %v1825_v60  ;;  %v2434_v60 = vrot.slane %v2432_v47, 3  ;;  %v14599_v47 = vld [vmem:[%s17451_s1 + $0x148] sm:$0xff]  }
  0xd7   : > { %13068 = vmatprep.mubr.bf16.mxu0 %v2340_v61  ;;  %v2437_v61 = vrot.slane %v2435_v48, 4  ;;  %v14602_v48 = vld [vmem:[%s17451_s1 + $0x150] sm:$0xff]  }
  0xd9   : > { %v2438_v13 = vor.u32 %v2437_v61, %v2434_v60  ;;  %v14618_v60 = vld [vmem:[%s17451_s1 + $0x178] sm:$0xff]   ;;  %v14623_v61 = vld [vmem:[%s17451_s1 + $0x180] sm:$0xff]  }
  0xdb   : > { %v2439_v21 = vsel %vm1655_vm2, %v2429_v3, %v2438_v13 }
  0xde   : > { %13069 = vmatmul.mubr.bf16.vlgmr.msra.gmra.mrb[0].mxu0 %v2349_v10  ;;  %v2430_v10 = vsel %vm1655_vm2, %v2420_v62, %v2429_v3  ;;  %v14607_v62 = vld [vmem:[%s14917_s20 + $0x58] sm:$0xff]   ;;  %v14615_v3 = vld [vmem:[%s14917_s20 + $0x80] sm:$0xff]  }
  0xdf   : > { %13105 = vmatpush3.bf16.msra.mxu0 %v15133_v9  ;;  %13072 = vmatprep.mubr.bf16.mxu0 %v2358_v11  ;;  %v2389_v9 = vrot.slane %v2387_v15, 3  ;;  %v2459_v11 = vshrl.u32 %v14589_v5, 16  ;;  %v2455_v15 = vrot.slane %v2453_v1, 4  ;;  %v14612_v1 = vld [vmem:[%s14917_s20 + $0x70] sm:$0xff]   ;;  %v14621_v5 = vld [vmem:[%s14917_s20 + $0x18] sm:$0xff]  }
  0xe0   : > { %13106 = vmatprep.subr.bf16.mxu0 %v14573_v8 }
  0xe1   : > { %v2393_v36 = vor.u32 %v2392_v26, %v2389_v9  ;;  %v2461_v19 = vrot.slane %v2459_v11, 3 }
  0xe3   : > { %13107 = vmatpush3.bf16.msra.mxu0 %v14573_v8  ;;  %v2394_v41 = vsel %vm1655_vm2, %v2384_v29, %v2393_v36  ;;  %v2403_v53 = vsel %vm1655_vm2, %v2393_v36, %v2402_v46  ;;  %v14590_v8 = vld [vmem:[%s14917_s20 + $0x8c] sm:$0xff]   ;;  %v2465_v29 = vor.u32 %v2464_v22, %v2461_v19  ;;  %v14597_v46 = vld [vmem:[%s14917_s20 + $0x20] sm:$0xff]  }
  0xe4   : > { %13108 = vmatprep.subr.bf16.mxu0 %v14576_v14  ;;  %v2468_v17 = vshrl.u32 %v14590_v8, 16  ;;  %v2471_v20 = vshll.u32 %v14590_v8, 16  ;;  %v14617_v8 = vld [vmem:[%s14917_s20 + $0x90] sm:$0xff]  }
  0xe6   : > { %13073 = vmatmul.mubr.bf16.gmra.mrb[4].mxu0 %v2367_v24  ;;  %v2448_v24 = vsel %vm1655_vm2, %v2438_v13, %v2447_v18  ;;  %v2470_v9 = vrot.slane %v2468_v17, 3  ;;  %v2473_v26 = vrot.slane %v2471_v20, 4  ;;  %v3495_v13 = vshll.u32 %v14621_v5, 16  ;;  %v14624_v17 = vld [vmem:[%s14917_s20 + $0x28] sm:$0xff]  }
  0xe7   : > { %13076 = vmatprep.mubr.bf16.mxu0 %v2376_v25  ;;  %13109 = vmatpush3.bf16.msra.mxu0 %v14576_v14  ;;  %v2452_v14 = vrot.slane %v2450_v0, 3  ;;  %v14610_v0 = vld [vmem:[%s14917_s20 + $0x68] sm:$0xff]   ;;  %v3499_v20 = vshrl.u32 %v14621_v5, 16 }
  0xe8   : > { %13110 = vmatprep.subr.bf16.mxu0 %v14579_v23  ;;  %v2474_v33 = vor.u32 %v2473_v26, %v2470_v9  ;;  %v3497_v16 = vrot.slane %v3495_v13, 1  ;;  %v14636_v5 = vld [vmem:[%s14917_s20 + $0x68] sm:$0xff]  }
  0xe9   : > { %v2456_v25 = vor.u32 %v2455_v15, %v2452_v14  ;;  %v14622_v14 = vld [vmem:[%s14917_s20 + $0x20] sm:$0xff]  }
  0xea   : > { %v3503_v19 = vshll.u32 %v14622_v14, 16  ;;  %v3507_v22 = vshrl.u32 %v14622_v14, 16  ;;  %v3501_v9 = vor.u32 %v3499_v20, %v3497_v16  ;;  %v3575_v14 = vshll.u32 %v14636_v5, 16 }
  0xeb   : > { %13111 = vmatpush3.bf16.msra.mxu0 %v14579_v23  ;;  %v14591_v23 = vld [vmem:[%s14917_s20 + $0x94] sm:$0xff]   ;;  %v2457_v34 = vsel %vm1655_vm2, %v2447_v18, %v2456_v25  ;;  %v2466_v36 = vsel %vm1655_vm2, %v2456_v25, %v2465_v29 }
  0xec   : > { %13112 = vmatprep.subr.bf16.mxu0 %v14582_v35  ;;  %v2477_v27 = vshrl.u32 %v14591_v23, 16  ;;  %v2480_v28 = vshll.u32 %v14591_v23, 16  ;;  %v14619_v18 = vld [vmem:[%s14917_s20 + $0x98] sm:$0xff]   ;;  %v3511_v23 = vshll.u32 %v14624_v17, 16  ;;  %v14625_v25 = vld [vmem:[%s14917_s20 + $0x30] sm:$0xff]   ;;  %v3577_v20 = vrot.slane %v3575_v14, 1 }
  0xee   : > { %13077 = vmatmul.mubr.bf16.gmra.mrb[8].mxu0 %v2385_v39  ;;  %v2479_v31 = vrot.slane %v2477_v27, 3  ;;  %v2482_v32 = vrot.slane %v2480_v28, 4  ;;  %v2475_v39 = vsel %vm1655_vm2, %v2465_v29, %v2474_v33  ;;  %v3513_v27 = vrot.slane %v3511_v23, 1  ;;  %v14627_v28 = vld [vmem:[%s14917_s20 + $0x38] sm:$0xff]  }
  0xef   : > { %13080 = vmatprep.mubr.bf16.mxu0 %v2394_v41  ;;  %13113 = vmatpush3.bf16.msra.mxu0 %v14582_v35  ;;  %v2486_v35 = vshrl.u32 %v14593_v30, 16  ;;  %v3519_v29 = vshll.u32 %v14625_v25, 16 }
  0xf0   : > { %13114 = vmatprep.subr.bf16.mxu0 %v14585_v40  ;;  %v2483_v38 = vor.u32 %v2482_v32, %v2479_v31  ;;  %v14626_v32 = vld [vmem:[%s17451_s1 + $0x188] sm:$0xff]  }
  0xf1   : > { %v2488_v55 = vrot.slane %v2486_v35, 3  ;;  %v3521_v35 = vrot.slane %v3519_v29, 1  ;;  %v14640_v29 = vld [vmem:[%s14917_s20 + $0x80] sm:$0xff]  }
  0xf2   : > { %v2484_v41 = vsel %vm1655_vm2, %v2474_v33, %v2483_v38  ;;  %v3527_v33 = vshll.u32 %v14627_v28, 16 }
  0xf3   : > { %13115 = vmatpush3.bf16.msra.mxu0 %v14585_v40  ;;  %v2491_v40 = vrot.slane %v2489_v37, 4  ;;  %v14628_v37 = vld [vmem:[%s14917_s20 + $0x40] sm:$0xff]  }
  0xf4   : > { %13116 = vmatprep.subr.bf16.mxu0 %v14588_v50 }
  0xf5   : > { %v2492_v44 = vor.u32 %v2491_v40, %v2488_v55  ;;  %v3529_v55 = vrot.slane %v3527_v33, 1  ;;  %v14629_v40 = vld [vmem:[%s17451_s1 + $0x190] sm:$0xff]  }
  0xf6   : > { %13081 = vmatmul.mubr.bf16.gmra.mrb[12].mxu0 %v2403_v53  ;;  %v14603_v53 = vld [vmem:[%s14917_s20 + $0x40] sm:$0xff]  }
  0xf7   : > { %13084 = vmatprep.mubr.bf16.mxu0 %v2412_v58  ;;  %13117 = vmatpush3.bf16.msra.mxu0 %v14588_v50  ;;  %v2493_v45 = vsel %vm1655_vm2, %v2483_v38, %v2492_v44  ;;  %v14600_v50 = vld [vmem:[%s14917_s20 + $0x30] sm:$0xff]   ;;  %v14604_v58 = vld [vmem:[%s14917_s20 + $0x48] sm:$0xff]   ;;  %v3535_v44 = vshll.u32 %v14628_v37, 16 }
  0xf8   : > { %13118 = vmatprep.subr.bf16.mxu0 %v14592_v57 }
  0xfb   : > { %13119 = vmatpush3.bf16.msra.mxu0 %v14592_v57  ;;  %v14614_v57 = vld [vmem:[%s17451_s1 + $0x170] sm:$0xff]  }
  0xfc   : > { %13156 = vmatprep.subr.bf16.mxu0 %v14596_v2 }
  0xfe   : > { %13085 = vmatmul.mubr.bf16.gmra.mrb[16].mxu0 %v2421_v6  ;;  %v3490_v6 = vshll.u32 %v14620_v4, 16 }
  0xff   : > { %13088 = vmatprep.mubr.bf16.mxu0 %v2430_v10  ;;  %v3488_v10 = vshrl.u32 %v14620_v4, 16 }
 0x100   : > { %v3492_v11 = vrot.slane %v3490_v6, 1  ;;  %v14641_v6 = vld [vmem:[%s17451_s1 + $0x1b0] sm:$0xff]  }
 0x102   : > { %v3493_v15 = vor.u32 %v3492_v11, %v3488_v10 }
 0x106   : > { %13089 = vmatmul.mubr.bf16.gmra.mrb[20].mxu0 %v2439_v21  ;;  %v3498_v21 = vsel %vm3486_vm3, %v3493_v15, %v3497_v16  ;;  %v14645_v15 = vld [vmem:[%s17451_s1 + $0x1b8] sm:$0xff]  }
 0x107   : > { %13092 = vmatprep.mubr.bf16.mxu0 %v2448_v24  ;;  %v3505_v24 = vrot.slane %v3503_v19, 1 }
 0x109   : > { %v3509_v26 = vor.u32 %v3507_v22, %v3505_v24  ;;  %v3506_v30 = vsel %vm3486_vm3, %v3501_v9, %v3505_v24  ;;  %v15303_v22 = vld [vmem:[%s17451_s1 + $0x1c0] sm:$0xff]  }
 0x10b   : > { %v3514_v31 = vsel %vm3486_vm3, %v3509_v26, %v3513_v27 }
 0x10e   : > { %13093 = vmatmul.mubr.bf16.gmra.mrb[24].mxu0 %v2457_v34  ;;  %v3515_v34 = vshrl.u32 %v14624_v17, 16  ;;  %v14637_v17 = vld [vmem:[%s14917_s20 + $0x70] sm:$0xff]  }
 0x10f   : > { %13096 = vmatprep.mubr.bf16.mxu0 %v2466_v36  ;;  %v3523_v36 = vshrl.u32 %v14625_v25, 16  ;;  %v3583_v23 = vshll.u32 %v14637_v17, 16  ;;  %v3579_v25 = vshrl.u32 %v14636_v5, 16  ;;  %v3587_v26 = vshrl.u32 %v14637_v17, 16 }
 0x110   : > { %v3517_v38 = vor.u32 %v3515_v34, %v3513_v27 }
 0x116   : > { %13097 = vmatmul.mubr.bf16.gmra.mrb[28].mxu0 %v2475_v39  ;;  %v3525_v39 = vor.u32 %v3523_v36, %v3521_v35  ;;  %v3599_v36 = vshll.u32 %v14640_v29, 16 }
 0x117   : > { %13100 = vmatprep.mubr.bf16.mxu0 %v2484_v41  ;;  %v14630_v41 = vld [vmem:[%s14917_s20 + $0x48] sm:$0xff]  }
 0x11e   : > { %13101 = vmatmul.mubr.bf16.gmra.mrb[32].mxu0 %v2493_v45  ;;  %v3522_v45 = vsel %vm3486_vm3, %v3517_v38, %v3521_v35  ;;  %v3603_v38 = vshrl.u32 %v14640_v29, 16 }
 0x11f   : > { %13120 = vmatprep.mubr.bf16.mxu0 %v14594_v42  ;;  %v3531_v42 = vshrl.u32 %v14627_v28, 16  ;;  %v3585_v28 = vrot.slane %v3583_v23, 1  ;;  %v14654_v23 = vld [vmem:[%s14917_s20 + $0x40] sm:$0xff]  }
 0x120   : > { %v4173_v29 = vshll.u32 %v14654_v23, 16 }
 0x121   : > { %v3589_v34 = vor.u32 %v3587_v26, %v3585_v28 }
 0x126   : > { %13121 = vmatmul.mubr.bf16.vlgmr.msra.gmra.mrb[0].mxu0 %v14595_v43  ;;  %v3530_v43 = vsel %vm3486_vm3, %v3525_v39, %v3529_v55 }
 0x127   : > { %13157 = vmatpush3.bf16.msra.mxu0 %v14596_v2  ;;  %13124 = vmatprep.mubr.bf16.mxu0 %v14597_v46  ;;  %v14613_v2 = vld [vmem:[%s14917_s20 + $0x78] sm:$0xff]   ;;  %v3539_v46 = vshrl.u32 %v14628_v37, 16 }
 0x128   : > { %13158 = vmatprep.subr.bf16.mxu0 %v14599_v47 }
 0x12b   : > { %13159 = vmatpush3.bf16.msra.mxu0 %v14599_v47  ;;  %v3543_v47 = vshll.u32 %v14630_v41, 16 }
 0x12c   : > { %13160 = vmatprep.subr.bf16.mxu0 %v14602_v48 }
 0x12e   : > { %13125 = vmatmul.mubr.bf16.gmra.mrb[4].mxu0 %v14598_v49  ;;  %v3537_v49 = vrot.slane %v3535_v44, 1 }
 0x12f   : > { %13128 = vmatprep.mubr.bf16.mxu0 %v14600_v50  ;;  %13161 = vmatpush3.bf16.msra.mxu0 %v14602_v48  ;;  %v14632_v48 = vld [vmem:[%s17451_s1 + $0x198] sm:$0xff]   ;;  %v14631_v50 = vld [vmem:[%s14917_s20 + $0x50] sm:$0xff]  }
 0x130   : > { %13162 = vmatprep.subr.bf16.mxu0 %v14605_v51 }
 0x133   : > { %13163 = vmatpush3.bf16.msra.mxu0 %v14605_v51  ;;  %v3533_v51 = vor.u32 %v3531_v42, %v3529_v55  ;;  %v3601_v55 = vrot.slane %v3599_v36, 1  ;;  %v14644_v42 = vld [vmem:[%s14917_s20 + $0x98] sm:$0xff]   ;;  %v4175_v36 = vrot.slane %v4173_v29, 1 }
 0x134   : > { %13164 = vmatprep.subr.bf16.mxu0 %v14608_v52 }
 0x135   : > { %v3605_v44 = vor.u32 %v3603_v38, %v3601_v55 }
 0x136   : > { %13129 = vmatmul.mubr.bf16.gmra.mrb[8].mxu0 %v14601_v54  ;;  %v3541_v54 = vor.u32 %v3539_v46, %v3537_v49 }
 0x137   : > { %13132 = vmatprep.mubr.bf16.mxu0 %v14603_v53  ;;  %13165 = vmatpush3.bf16.msra.mxu0 %v14608_v52  ;;  %v3545_v52 = vrot.slane %v3543_v47, 1  ;;  %v14633_v53 = vld [vmem:[%s14917_s20 + $0x58] sm:$0xff]  }
 0x138   : > { %13166 = vmatprep.subr.bf16.mxu0 %v14611_v56  ;;  %v3563_v10 = vshrl.u32 %v14633_v53, 16 }
 0x13b   : > { %13167 = vmatpush3.bf16.msra.mxu0 %v14611_v56  ;;  %v14635_v56 = vld [vmem:[%s17451_s1 + $0x1a0] sm:$0xff]  }
 0x13c   : > { %13168 = vmatprep.subr.bf16.mxu0 %v14614_v57 }
 0x13e   : > { %13133 = vmatmul.mubr.bf16.gmra.mrb[12].mxu0 %v14604_v58  ;;  %v3538_v58 = vsel %vm3486_vm3, %v3533_v51, %v3537_v49  ;;  %v14647_v51 = vld [vmem:[%s14917_s20 + $0x18] sm:$0xff]  }
 0x13f   : > { %13136 = vmatprep.mubr.bf16.mxu0 %v14606_v59  ;;  %13169 = vmatpush3.bf16.msra.mxu0 %v14614_v57  ;;  %v3551_v57 = vshll.u32 %v14631_v50, 16  ;;  %v3547_v59 = vshrl.u32 %v14630_v41, 16 }
 0x140   : > { %13170 = vmatprep.subr.bf16.mxu0 %v14618_v60 }
 0x143   : > { %13171 = vmatpush3.bf16.msra.mxu0 %v14618_v60  ;;  %v3546_v60 = vsel %vm3486_vm3, %v3541_v54, %v3545_v52 }
 0x144   : > { %13208 = vmatprep.subr.bf16.mxu0 %v14623_v61 }
 0x146   : > { %13137 = vmatmul.mubr.bf16.gmra.mrb[16].mxu0 %v14607_v62  ;;  %v3559_v62 = vshll.u32 %v14633_v53, 16  ;;  %v14646_v53 = vld [vmem:[%s14917_s20 + $0xa0] ss:$0 sps:$4 sm:$0x11]  }
 0x147   : > { %13140 = vmatprep.mubr.bf16.mxu0 %v14609_v63  ;;  %v14638_v63 = vld [vmem:[%s17451_s1 + $0x1a8] sm:$0xff]  }
 0x148   : > { %v3561_v4 = vrot.slane %v3559_v62, 1  ;;  %v3631_v62 = vshll.u32 %v14646_v53, 16 }
 0x14a   : > { %v3633_v5 = vrot.slane %v3631_v62, 1  ;;  %v14663_v62 = vld [vmem:[%s14917_s20 + $0x70] sm:$0xff]  }
 0x14e   : > { %13141 = vmatmul.mubr.bf16.gmra.mrb[20].mxu0 %v14610_v0  ;;  %v3553_v0 = vrot.slane %v3551_v57, 1 }
 0x14f   : > { %13144 = vmatprep.mubr.bf16.mxu0 %v14612_v1  ;;  %v14634_v1 = vld [vmem:[%s14917_s20 + $0x60] sm:$0xff]  }
 0x150   : > { %v3571_v13 = vshrl.u32 %v14634_v1, 16 }
 0x156   : > { %13145 = vmatmul.mubr.bf16.gmra.mrb[24].mxu0 %v14613_v2  ;;  %v3549_v2 = vor.u32 %v3547_v59, %v3545_v52  ;;  %v4136_v59 = vshll.u32 %v14647_v51, 16 }
 0x157   : > { %13148 = vmatprep.mubr.bf16.mxu0 %v14615_v3 }
 0x15e   : > { %13149 = vmatmul.mubr.bf16.gmra.mrb[28].mxu0 %v14616_v7  ;;  %v3567_v7 = vshll.u32 %v14634_v1, 16  ;;  %v4138_v1 = vrot.slane %v4136_v59, 1 }
 0x15f   : > { %13152 = vmatprep.mubr.bf16.mxu0 %v14617_v8  ;;  %v3554_v8 = vsel %vm3486_vm3, %v3549_v2, %v3553_v0 }
 0x160   : > { %v3569_v16 = vrot.slane %v3567_v7, 1 }
 0x162   : > { %v3573_v19 = vor.u32 %v3571_v13, %v3569_v16 }
 0x164   : > { %v3578_v9 = vsel %vm3486_vm3, %v3573_v19, %v3577_v20 }
 0x166   : > { %13153 = vmatmul.mubr.bf16.gmra.mrb[32].mxu0 %v14619_v18  ;;  %v3565_v18 = vor.u32 %v3563_v10, %v3561_v4 }
 0x167   : > { %13172 = vmatprep.mubr.bf16.mxu0 %v3498_v21  ;;  %v14639_v21 = vld [vmem:[%s14917_s20 + $0x78] sm:$0xff]  }
 0x168   : > { %v3570_v24 = vsel %vm3486_vm3, %v3565_v18, %v3569_v16  ;;  %v3591_v27 = vshll.u32 %v14639_v21, 16  ;;  %v3595_v35 = vshrl.u32 %v14639_v21, 16  ;;  %v14652_v18 = vld [vmem:[%s14917_s20 + $0x38] sm:$0xff]  }
 0x16e   : > { %13173 = vmatmul.mubr.bf16.vlgmr.msra.gmra.mrb[0].mxu0 %v3506_v30  ;;  %v3581_v30 = vor.u32 %v3579_v25, %v3577_v20 }
 0x16f   : > { %13209 = vmatpush3.bf16.msra.mxu0 %v14623_v61  ;;  %13176 = vmatprep.mubr.bf16.mxu0 %v3514_v31  ;;  %v3555_v61 = vshrl.u32 %v14631_v50, 16  ;;  %v3593_v31 = vrot.slane %v3591_v27, 1  ;;  %v3623_v50 = vshll.u32 %v14644_v42, 16  ;;  %v14653_v27 = vld [vmem:[%s17451_s1 + $0x1c8] sm:$0xff]  }
 0x170   : > { %13210 = vmatprep.subr.bf16.mxu0 %v14626_v32  ;;  %v3586_v33 = vsel %vm3486_vm3, %v3581_v30, %v3585_v28  ;;  %v4169_v28 = vshrl.u32 %v14652_v18, 16 }
 0x171   : > { %v3557_v3 = vor.u32 %v3555_v61, %v3553_v0  ;;  %v3594_v37 = vsel %vm3486_vm3, %v3589_v34, %v3593_v31  ;;  %v3597_v41 = vor.u32 %v3595_v35, %v3593_v31  ;;  %v3625_v57 = vrot.slane %v3623_v50, 1  ;;  %v14655_v34 = vld [vmem:[%s14917_s20 + $0x48] sm:$0xff]   ;;  %v14657_v35 = vld [vmem:[%s14917_s20 + $0x50] sm:$0xff]  }
 0x172   : > { %v3627_v61 = vshrl.u32 %v14644_v42, 16  ;;  %v4134_v0 = vshrl.u32 %v14647_v51, 16  ;;  %v4193_v51 = vshrl.u32 %v14657_v35, 16 }
 0x173   : > { %13211 = vmatpush3.bf16.msra.mxu0 %v14626_v32  ;;  %v3562_v11 = vsel %vm3486_vm3, %v3557_v3, %v3561_v4  ;;  %v14642_v32 = vld [vmem:[%s14917_s20 + $0x88] sm:$0xff]   ;;  %v3602_v46 = vsel %vm3486_vm3, %v3597_v41, %v3601_v55  ;;  %v14659_v41 = vld [vmem:[%s17451_s1 + $0x1d8] sm:$0xff]  }
 0x174   : > { %13212 = vmatprep.subr.bf16.mxu0 %v14629_v40  ;;  %v3607_v39 = vshll.u32 %v14642_v32, 16  ;;  %v3611_v47 = vshrl.u32 %v14642_v32, 16  ;;  %v14649_v3 = vld [vmem:[%s14917_s20 + $0x28] sm:$0xff]   ;;  %v3629_v4 = vor.u32 %v3627_v61, %v3625_v57 }
 0x175   : > { %v4149_v10 = vshll.u32 %v14649_v3, 16 }
 0x176   : > { %13177 = vmatmul.mubr.bf16.gmra.mrb[4].mxu0 %v3522_v45  ;;  %v3609_v45 = vrot.slane %v3607_v39, 1  ;;  %v4177_v39 = vshrl.u32 %v14654_v23, 16  ;;  %v14667_v23 = vld [vmem:[%s14917_s20 + $0x88] sm:$0xff]  }
 0x177   : > { %13180 = vmatprep.mubr.bf16.mxu0 %v3530_v43  ;;  %13213 = vmatpush3.bf16.msra.mxu0 %v14629_v40  ;;  %v14643_v40 = vld [vmem:[%s14917_s20 + $0x90] sm:$0xff]   ;;  %v4151_v17 = vrot.slane %v4149_v10, 1 }
 0x178   : > { %13214 = vmatprep.subr.bf16.mxu0 %v14632_v48  ;;  %v3615_v43 = vshll.u32 %v14643_v40, 16  ;;  %v3619_v49 = vshrl.u32 %v14643_v40, 16  ;;  %v3613_v52 = vor.u32 %v3611_v47, %v3609_v45  ;;  %v4189_v40 = vshll.u32 %v14657_v35, 16  ;;  %v14660_v47 = vld [vmem:[%s14917_s20 + $0x60] sm:$0xff]  }
 0x179   : > { %v4179_v42 = vor.u32 %v4177_v39, %v4175_v36  ;;  %v4205_v53 = vshll.u32 %v14660_v47, 16 }
 0x17a   : > { %v3617_v54 = vrot.slane %v3615_v43, 1 }
 0x17b   : > { %13215 = vmatpush3.bf16.msra.mxu0 %v14632_v48  ;;  %v3610_v48 = vsel %vm3486_vm3, %v3605_v44, %v3609_v45  ;;  %v14658_v45 = vld [vmem:[%s14917_s20 + $0x58] sm:$0xff]   ;;  %v4207_v61 = vrot.slane %v4205_v53, 1 }
 0x17c   : > { %13216 = vmatprep.subr.bf16.mxu0 %v14635_v56  ;;  %v339_v53 = vld [vmem:[%s17455_s5 + $0x18] sm:$0xff] }
 0x17e   : > { %13181 = vmatmul.mubr.bf16.gmra.mrb[8].mxu0 %v3538_v58  ;;  %v14648_v58 = vld [vmem:[%s14917_s20 + $0x20] sm:$0xff]  }
 0x17f   : > { %13184 = vmatprep.mubr.bf16.mxu0 %v3546_v60  ;;  %13217 = vmatpush3.bf16.msra.mxu0 %v14635_v56  ;;  %v3621_v56 = vor.u32 %v3619_v49, %v3617_v54  ;;  %v3618_v60 = vsel %vm3486_vm3, %v3613_v52, %v3617_v54  ;;  %v4141_v2 = vshll.u32 %v14648_v58, 16  ;;  %v4145_v13 = vshrl.u32 %v14648_v58, 16  ;;  %v14661_v58 = vld [vmem:[%s14917_s20 + $0x68] sm:$0xff]  }
 0x180   : > { %13218 = vmatprep.subr.bf16.mxu0 %v14638_v63  ;;  %v4197_v49 = vshll.u32 %v14658_v45, 16  ;;  %v4201_v52 = vshrl.u32 %v14658_v45, 16  ;;  %v14670_v45 = vld [vmem:[%s14917_s20 + $0x98] sm:$0xff]  }
 0x181   : > { %v4143_v7 = vrot.slane %v4141_v2, 1  ;;  %v4209_v2 = vshrl.u32 %v14660_v47, 16 }
 0x183   : > { %13219 = vmatpush3.bf16.msra.mxu0 %v14638_v63  ;;  %v3626_v63 = vsel %vm3486_vm3, %v3621_v56, %v3625_v57  ;;  %v4147_v19 = vor.u32 %v4145_v13, %v4143_v7  ;;  %v14665_v56 = vld [vmem:[%s17451_s1 + $0x1e8] sm:$0xff]   ;;  %v4199_v57 = vrot.slane %v4197_v49, 1  ;;  %v4211_v10 = vor.u32 %v4209_v2, %v4207_v61 }
 0x184   : > { %13220 = vmatprep.subr.bf16.mxu0 %v14641_v6  ;;  %v4265_v2 = vshrl.u32 %v14670_v45, 16 }
 0x185   : > { %v4152_v25 = vsel %vm3486_vm3, %v4147_v19, %v4151_v17 }
 0x186   : > { %13185 = vmatmul.mubr.bf16.gmra.mrb[12].mxu0 %v3554_v8  ;;  %v14651_v8 = vld [vmem:[%s14917_s20 + $0x30] sm:$0xff]  }
 0x187   : > { %13188 = vmatprep.mubr.bf16.mxu0 %v3562_v11  ;;  %13221 = vmatpush3.bf16.msra.mxu0 %v14641_v6  ;;  %v4139_v6 = vor.u32 %v4138_v1, %v4134_v0  ;;  %v3634_v11 = vsel %vm3486_vm3, %v3629_v4, %v3633_v5  ;;  %v4157_v16 = vshll.u32 %v14651_v8, 16  ;;  %v4213_v0 = vshll.u32 %v14661_v58, 16 }
 0x188   : > { %13222 = vmatprep.subr.bf16.mxu0 %v14645_v15  ;;  %v4217_v4 = vshrl.u32 %v14661_v58, 16  ;;  %v4221_v5 = vshll.u32 %v14663_v62, 16  ;;  %v14714_v58 = vld [vmem:[%s14917_s20 + $0x5c] sm:$0xff]  }
 0x189   : > { %v4144_v14 = vsel %vm3486_vm3, %v4139_v6, %v4143_v7  ;;  %v4159_v21 = vrot.slane %v4157_v16, 1  ;;  %v14672_v6 = vld [vmem:[%s17451_s1 + $0x1f8] sm:$0xff]   ;;  %v4215_v7 = vrot.slane %v4213_v0, 1  ;;  %v4225_v16 = vshrl.u32 %v14663_v62, 16  ;;  %v14715_v62 = vld [vmem:[%s14917_s20 + $0x64] sm:$0xff]  }
 0x18a   : > { %v4223_v13 = vrot.slane %v4221_v5, 1  ;;  %v634_v5 = vshll.u32 %v14715_v62, 16 }
 0x18b   : > { %13223 = vmatpush3.bf16.msra.mxu0 %v14645_v15  ;;  %v4153_v15 = vshrl.u32 %v14649_v3, 16 }
 0x18c   : > { %13260 = vmatprep.subr.bf16.mxu0 %v15303_v22 }
 0x18d   : > { %v4155_v20 = vor.u32 %v4153_v15, %v4151_v17  ;;  %v15368_v15 = vld [vmem:[%s17451_s1 + $0x200] sm:$0xff]  }
 0x18e   : > { %13189 = vmatmul.mubr.bf16.gmra.mrb[16].mxu0 %v3570_v24  ;;  %v4165_v24 = vshll.u32 %v14652_v18, 16  ;;  %v4216_v18 = vsel %vm3486_vm3, %v4211_v10, %v4215_v7 }
 0x18f   : > { %13192 = vmatprep.mubr.bf16.mxu0 %v3578_v9  ;;  %v4161_v9 = vshrl.u32 %v14651_v8, 16  ;;  %v4160_v26 = vsel %vm3486_vm3, %v4155_v20, %v4159_v21  ;;  %v14664_v8 = vld [vmem:[%s14917_s20 + $0x78] sm:$0xff]  }
 0x190   : > { %v4167_v30 = vrot.slane %v4165_v24, 1  ;;  %v4229_v17 = vshll.u32 %v14664_v8, 16  ;;  %v4233_v20 = vshrl.u32 %v14664_v8, 16  ;;  %v4227_v24 = vor.u32 %v4225_v16, %v4223_v13 }
 0x191   : > { %v4163_v31 = vor.u32 %v4161_v9, %v4159_v21  ;;  %v15382_v9 = vld [vmem:[%s14917_s20 + $0x90] sm:$0xff]   ;;  %v636_v16 = vrot.slane %v634_v5, 3 }
 0x192   : > { %v4171_v32 = vor.u32 %v4169_v28, %v4167_v30  ;;  %v4253_v35 = vshll.u32 %v15382_v9, 16 }
 0x193   : > { %v4168_v38 = vsel %vm3486_vm3, %v4163_v31, %v4167_v30  ;;  %v4245_v30 = vshll.u32 %v14667_v23, 16 }
 0x194   : > { %v4176_v55 = vsel %vm3486_vm3, %v4171_v32, %v4175_v36  ;;  %v14711_v36 = vld [vmem:[%s14917_s20 + $0x54] sm:$0xff]  }
 0x196   : > { %13193 = vmatmul.mubr.bf16.gmra.mrb[20].mxu0 %v3586_v33  ;;  %v14656_v33 = vld [vmem:[%s17451_s1 + $0x1d0] sm:$0xff]  }
 0x197   : > { %13196 = vmatprep.mubr.bf16.mxu0 %v3594_v37  ;;  %v4181_v37 = vshll.u32 %v14655_v34, 16 }
 0x199   : > { %v4183_v44 = vrot.slane %v4181_v37, 1 }
 0x19b   : > { %v4184_v50 = vsel %vm3486_vm3, %v4179_v42, %v4183_v44  ;;  %v338_v42 = vld [vmem:[%s17455_s5 + $0x10] sm:$0xff] }
 0x19e   : > { %13197 = vmatmul.mubr.bf16.gmra.mrb[24].mxu0 %v3602_v46  ;;  %v4191_v46 = vrot.slane %v4189_v40, 1  ;;  %v4247_v40 = vrot.slane %v4245_v30, 1 }
 0x19f   : > { %13200 = vmatprep.mubr.bf16.mxu0 %v3610_v48  ;;  %v14662_v48 = vld [vmem:[%s17451_s1 + $0x1e0] sm:$0xff]  }
 0x1a0   : > { %v4195_v59 = vor.u32 %v4193_v51, %v4191_v46 }
 0x1a2   : > { %v4200_v1 = vsel %vm3486_vm3, %v4195_v59, %v4199_v57  ;;  %v4257_v59 = vshrl.u32 %v15382_v9, 16  ;;  %v14718_v9 = vld [vmem:[%s14917_s20 + $0x6c] sm:$0xff]  }
 0x1a6   : > { %13201 = vmatmul.mubr.bf16.gmra.mrb[28].mxu0 %v3618_v60  ;;  %v4203_v60 = vor.u32 %v4201_v52, %v4199_v57  ;;  %v340_v57 = vld [vmem:[%s17455_s5 + $0x20] sm:$0xff] }
 0x1a7   : > { %13204 = vmatprep.mubr.bf16.mxu0 %v3626_v63  ;;  %v14668_v63 = vld [vmem:[%s17451_s1 + $0x1f0] sm:$0xff]  }
 0x1a8   : > { %v4208_v3 = vsel %vm3486_vm3, %v4203_v60, %v4207_v61  ;;  %v4261_v60 = vshll.u32 %v14670_v45, 16 }
 0x1aa   : > { %v4263_v10 = vrot.slane %v4261_v60, 1 }
 0x1ae   : > { %13205 = vmatmul.mubr.bf16.gmra.mrb[32].mxu0 %v3634_v11  ;;  %v4219_v11 = vor.u32 %v4217_v4, %v4215_v7  ;;  %v631_v4 = vshrl.u32 %v14715_v62, 16 }
 0x1af   : > { %13224 = vmatprep.mubr.bf16.mxu0 %v4144_v14  ;;  %v14666_v14 = vld [vmem:[%s14917_s20 + $0x80] sm:$0xff]  }
 0x1b0   : > { %v4224_v19 = vsel %vm3486_vm3, %v4219_v11, %v4223_v13  ;;  %v4237_v21 = vshll.u32 %v14666_v14, 16  ;;  %v4241_v32 = vshrl.u32 %v14666_v14, 16  ;;  %v341_v11 = vld [vmem:[%s17455_s5 + $0x28] sm:$0xff]  ;;  %v342_v13 = vld [vmem:[%s17455_s5 + $0x30] sm:$0xff]  ;;  %v633_v14 = vrot.slane %v631_v4, 2 }
 0x1b2   : > { %v4239_v29 = vrot.slane %v4237_v21, 1  ;;  %v637_v21 = vor.u32 %v636_v16, %v633_v14  ;;  %v14726_v14 = vld [vmem:[%s14917_s20 + $0x8c] sm:$0xff]  }
 0x1b6   : > { %13225 = vmatmul.mubr.bf16.vlgmr.msra.gmra.mrb[0].mxu0 %v4152_v25  ;;  %v4231_v25 = vrot.slane %v4229_v17, 1  ;;  %v14673_v17 = vld [vmem:[%s14917_s20 + $0xa8] ss:$0 sps:$4 sm:$0x11]  }
 0x1b7   : > { %13261 = vmatpush3.bf16.msra.mxu0 %v15303_v22  ;;  %13228 = vmatprep.mubr.bf16.mxu0 %v4160_v26  ;;  %v4185_v22 = vshrl.u32 %v14655_v34, 16  ;;  %v14841_v26 = vmov 0   ;;  %v14710_v34 = vld [vmem:[%s14917_s20 + $0x4c] sm:$0xff]  }
 0x1b8   : > { %13262 = vmatprep.subr.bf16.mxu0 %v14653_v27  ;;  %14486 = vset.pattern.permute.xlu0 %v14841_v26  ;;  %11550 = vst [vmem:[%s15379_s28] sm:$0xf] %v14841_v26  ;;  %11551 = vst [vmem:[%s15379_s28 + $0x4] sm:$0xf] %v14841_v26  ;;  %v4235_v28 = vor.u32 %v4233_v20, %v4231_v25  ;;  %v4232_v31 = vsel %vm3486_vm3, %v4227_v24, %v4231_v25  ;;  %v604_v37 = vshrl.u32 %v14710_v34, 16  ;;  %v344_v25 = vld [vmem:[%s17455_s5 + $0x40] sm:$0xff] }
 0x1b9   : > { %v4187_v43 = vor.u32 %v4185_v22, %v4183_v44  ;;  %11552 = vst [vmem:[%s15379_s28 + $0x8] sm:$0xf] %v14841_v26  ;;  %11553 = vst [vmem:[%s15379_s28 + $0xc] sm:$0xf] %v14841_v26  ;;  %14487 = vset.pattern.permute.xlu1 %v14841_v26  ;;  %v616_v22 = vshll.u32 %v14711_v36, 16 }
 0x1ba   : > { %11554 = vst [vmem:[%s15379_s28 + $0xa0] sm:$0xf] %v14841_v26  ;;  %11555 = vst [vmem:[%s15379_s28 + $0xa4] sm:$0xf] %v14841_v26  ;;  %v4240_v39 = vsel %vm3486_vm3, %v4235_v28, %v4239_v29  ;;  %6005 = vperm.xlu1 %14487, %v338_v42  }
 0x1bb   : > { %13263 = vmatpush3.bf16.msra.mxu0 %v14653_v27  ;;  %v4192_v54 = vsel %vm3486_vm3, %v4187_v43, %v4191_v46  ;;  %11556 = vst [vmem:[%s15379_s28 + $0xa8] sm:$0xf] %v14841_v26  ;;  %11557 = vst [vmem:[%s15379_s28 + $0xac] sm:$0xf] %v14841_v26  ;;  %v336_v27 = vld [vmem:[%s17455_s5] sm:$0xff]  ;;  %v337_v43 = vld [vmem:[%s17455_s5 + $0x8] sm:$0xff] }
 0x1bc   : > { %13264 = vmatprep.subr.bf16.mxu0 %v14656_v33  ;;  %372 = vst [vmem:[#allocation3] sm:$0xff] %v14841_v26  ;;  %373 = vst [vmem:[#allocation3 + $0x8] sm:$0xff] %v14841_v26  ;;  %5995 = vperm.xlu0 %14486, %v336_v27   ;;  %v618_v47 = vrot.slane %v616_v22, 3  ;;  %v345_v22 = vld [vmem:[%s17455_s5 + $0x48] sm:$0xff] }
 0x1bd   : > { %374 = vst [vmem:[#allocation3 + $0xa0] sm:$0xff] %v14841_v26  ;;  %375 = vst [vmem:[#allocation3 + $0xa8] sm:$0xff] %v14841_v26 }
 0x1be   : > { %13229 = vmatmul.mubr.bf16.gmra.mrb[4].mxu0 %v4168_v38  ;;  %v607_v38 = vshll.u32 %v14710_v34, 16  ;;  %6010 = vperm.xlu1 %14487, %v339_v53   ;;  %v4277_v34 = vshll.u32 %v14673_v17, 16  ;;  %v14723_v53 = vld [vmem:[%s14917_s20 + $0x84] sm:$0xff]   ;;  %v14727_v17 = vld [vmem:[%s14917_s20 + $0x94] ss:$0 sps:$4 sm:$0x77]  }
 0x1bf   : > { %13232 = vmatprep.mubr.bf16.mxu0 %v4176_v55  ;;  %13265 = vmatpush3.bf16.msra.mxu0 %v14656_v33  ;;  %v4249_v33 = vshrl.u32 %v14667_v23, 16  ;;  %v613_v55 = vshrl.u32 %v14711_v36, 16  ;;  %v343_v23 = vld [vmem:[%s17455_s5 + $0x38] sm:$0xff]  ;;  %v667_v62 = vshrl.u32 %v14723_v53, 16 }
 0x1c0   : > { %13266 = vmatprep.subr.bf16.mxu0 %v14659_v41  ;;  %v609_v44 = vrot.slane %v607_v38, 3  ;;  %6000 = vperm.xlu0 %14486, %v337_v43   ;;  %v4279_v42 = vrot.slane %v4277_v34, 1  ;;  %v354_v34 = vld [vmem:[%s17455_s5 + $0x90] sm:$0xff] }
 0x1c1   : > { %v615_v46 = vrot.slane %v613_v55, 2  ;;  %v4251_v49 = vor.u32 %v4249_v33, %v4247_v40  ;;  %v14674_v33 = vld [vmem:[%s14917_s20 + $0x18] sm:$0xfe]  }
 0x1c2   : > { %6020 = vperm.xlu1 %14487, %v341_v11  }
 0x1c3   : > { %13267 = vmatpush3.bf16.msra.mxu0 %v14659_v41  ;;  %v606_v41 = vrot.slane %v604_v37, 2  ;;  %v619_v52 = vor.u32 %v618_v47, %v615_v46  ;;  %v4780_v46 = vrot.slane %v14674_v33, 1 }
 0x1c4   : > { %13268 = vmatprep.subr.bf16.mxu0 %v14662_v48  ;;  %6015 = vperm.xlu0 %14486, %v340_v57   ;;  %v14676_v57 = vld [vmem:[%s14917_s20 + $0x28] sm:$0xff]  }
 0x1c5   : > { %v610_v51 = vor.u32 %v609_v44, %v606_v41  ;;  %v4783_v5 = vrot.slane %v14676_v57, 1  ;;  %v14692_v57 = vld [vmem:[%s17451_s1 + $0x228] sm:$0xff]  }
 0x1c6   : > { %13233 = vmatmul.mubr.bf16.gmra.mrb[8].mxu0 %v4184_v50  ;;  %v4255_v50 = vrot.slane %v4253_v35, 1  ;;  %6030 = vperm.xlu1 %14487, %v343_v23   ;;  %v14675_v35 = vld [vmem:[%s14917_s20 + $0x20] sm:$0xff]  }
 0x1c7   : > { %13236 = vmatprep.mubr.bf16.mxu0 %v4192_v54  ;;  %13269 = vmatpush3.bf16.msra.mxu0 %v14662_v48  ;;  %v4243_v48 = vor.u32 %v4241_v32, %v4239_v29  ;;  %v15422_v54 = vld [vmem:[%s14917_s20 + $0xa0] sm:$0xff]   ;;  %v620_v61 = vsel %vm522_vm0, %v610_v51, %v619_v52  ;;  %v14719_v29 = vld [vmem:[%s14917_s20 + $0x74] sm:$0xff]   ;;  %v643_v32 = vshll.u32 %v14718_v9, 16  ;;  %v4781_v47 = vrot.slane %v14675_v35, 1 }
 0x1c8   : > { %13270 = vmatprep.subr.bf16.mxu0 %v14665_v56  ;;  %v4256_v0 = vsel %vm3486_vm3, %v4251_v49, %v4255_v50  ;;  %v4259_v8 = vor.u32 %v4257_v59, %v4255_v50  ;;  %6025 = vperm.xlu0 %14486, %v342_v13   ;;  %v4273_v30 = vshrl.u32 %v15422_v54, 16  ;;  %v649_v37 = vshrl.u32 %v14719_v29, 16  ;;  %v347_v49 = vld [vmem:[%s17455_s5 + $0x58] sm:$0xff]  ;;  %v352_v13 = vld [vmem:[%s17455_s5 + $0x80] sm:$0xff] }
 0x1c9   : > { %v652_v38 = vshll.u32 %v14719_v29, 16  ;;  %v645_v55 = vrot.slane %v643_v32, 3  ;;  %v4782_v60 = vsel %vm4779_vm4, %v4780_v46, %v4781_v47  ;;  %v358_v46 = vld [vmem:[%s17455_s5 + $0xb0] sm:$0xff] }
 0x1ca   : > { %v4264_v27 = vsel %vm3486_vm3, %v4259_v8, %v4263_v10  ;;  %v651_v41 = vrot.slane %v649_v37, 2  ;;  %6040 = vperm.xlu1 %14487, %v345_v22   ;;  %v14683_v37 = vld [vmem:[%s17451_s1 + $0x210] sm:$0xff]   ;;  %v356_v22 = vld [vmem:[%s17455_s5 + $0xa0] sm:$0xff] }
 0x1cb   : > { %13271 = vmatpush3.bf16.msra.mxu0 %v14665_v56  ;;  %v611_v56 = vsel %vm522_vm0, %v14970_v12, %v610_v51  ;;  %v625_v12 = vshll.u32 %v14714_v58, 16  ;;  %v654_v44 = vrot.slane %v652_v38, 3  ;;  %v348_v51 = vld [vmem:[%s17455_s5 + $0x60] sm:$0xff] }
 0x1cc   : > { %13272 = vmatprep.subr.bf16.mxu0 %v14668_v63  ;;  %12928 = vmatprep.mubr.bf16.mxu1 %v611_v56 }
 0x1cd   : > { %12929 = vmatmul.mubr.bf16.vlgmr.msra.gmra.mrb[0].mxu1 %v620_v61  ;;  %v627_v7 = vrot.slane %v625_v12, 3  ;;  %6035 = vperm.xlu0 %14486, %v344_v25   ;;  %v14678_v61 = vld [vmem:[%s14917_s20 + $0x30] sm:$0xff]   ;;  %v349_v12 = vld [vmem:[%s17455_s5 + $0x68] sm:$0xff]  ;;  %v14681_v25 = vld [vmem:[%s14917_s20 + $0x40] sm:$0xff]  }
 0x1ce   : > { %13237 = vmatmul.mubr.bf16.gmra.mrb[12].mxu0 %v4200_v1  ;;  %v622_v1 = vshrl.u32 %v14714_v58, 16  ;;  %6050 = vperm.xlu1 %14487, %v347_v49   ;;  %v4789_v35 = vrot.slane %v14681_v25, 1  ;;  %v14689_v49 = vld [vmem:[%s17451_s1 + $0x220] sm:$0xff]   ;;  %v371_v25 = vld [vmem:[%s17455_s5 + $0x118] sm:$0xff] }
 0x1cf   : > { %13240 = vmatprep.mubr.bf16.mxu0 %v4208_v3  ;;  %13273 = vmatpush3.bf16.msra.mxu0 %v14668_v63  ;;  %v4248_v63 = vsel %vm3486_vm3, %v4243_v48, %v4247_v40  ;;  %v4269_v3 = vshll.u32 %v15422_v54, 16  ;;  %v346_v40 = vld [vmem:[%s17455_s5 + $0x50] sm:$0xff]  ;;  %v655_v48 = vor.u32 %v654_v44, %v651_v41  ;;  %v14722_v54 = vld [vmem:[%s14917_s20 + $0x7c] sm:$0xff]   ;;  %v14682_v41 = vld [vmem:[%s14917_s20 + $0x48] sm:$0xff]  }
 0x1d0   : > { %13274 = vmatprep.subr.bf16.mxu0 %v14672_v6  ;;  %v658_v58 = vshrl.u32 %v14722_v54, 16  ;;  %v661_v59 = vshll.u32 %v14722_v54, 16 }
 0x1d1   : > { %v4271_v20 = vrot.slane %v4269_v3, 1  ;;  %6045 = vperm.xlu0 %14486, %v346_v40   ;;  %v669_v3 = vrot.slane %v667_v62, 2 }
 0x1d2   : > { %6060 = vperm.xlu1 %14487, %v349_v12  }
 0x1d3   : > { %13275 = vmatpush3.bf16.msra.mxu0 %v14672_v6  ;;  %v624_v6 = vrot.slane %v622_v1, 2  ;;  %v4275_v45 = vor.u32 %v4273_v30, %v4271_v20  ;;  %v663_v1 = vrot.slane %v661_v59, 3  ;;  %v353_v30 = vld [vmem:[%s17455_s5 + $0x88] sm:$0xff] }
 0x1d4   : > { %13312 = vmatprep.subr.bf16.mxu0 %v15368_v15  ;;  %v361_v59 = vld [vmem:[%s17455_s5 + $0xc8] sm:$0xff] }
 0x1d5   : > { %v4280_v56 = vsel %vm3486_vm3, %v4275_v45, %v4279_v42  ;;  %6055 = vperm.xlu0 %14486, %v348_v51   ;;  %v14684_v45 = vld [vmem:[%s14917_s20 + $0x50] sm:$0xff]   ;;  %v14686_v42 = vld [vmem:[%s17451_s1 + $0x218] sm:$0xff]   ;;  %v360_v51 = vld [vmem:[%s17455_s5 + $0xc0] sm:$0xff] }
 0x1d6   : > { %13241 = vmatmul.mubr.bf16.gmra.mrb[16].mxu0 %v4216_v18  ;;  %v628_v18 = vor.u32 %v627_v7, %v624_v6  ;;  %v4785_v7 = vrot.slane %v14678_v61, 1 }
 0x1d7   : > { %13244 = vmatprep.mubr.bf16.mxu0 %v4224_v19  ;;  %v4267_v19 = vor.u32 %v4265_v2, %v4263_v10  ;;  %v350_v2 = vld [vmem:[%s17455_s5 + $0x70] sm:$0xff]  ;;  %v351_v10 = vld [vmem:[%s17455_s5 + $0x78] sm:$0xff] }
 0x1d8   : > { %v629_v24 = vsel %vm522_vm0, %v619_v52, %v628_v18  ;;  %v638_v28 = vsel %vm522_vm0, %v628_v18, %v637_v21  ;;  %v4784_v18 = vsel %vm4779_vm4, %v4781_v47, %v4783_v5  ;;  %6070 = vperm.xlu1 %14487, %v351_v10   ;;  %v4786_v23 = vsel %vm4779_vm4, %v4783_v5, %v4785_v7  ;;  %v14699_v5 = vld [vmem:[%s17451_s1 + $0x238] sm:$0xff]  }
 0x1d9   : > { %12932 = vmatprep.mubr.bf16.mxu1 %v629_v24  ;;  %v4272_v36 = vsel %vm3486_vm3, %v4267_v19, %v4271_v20  ;;  %6065 = vperm.xlu0 %14486, %v350_v2   ;;  %v14679_v19 = vld [vmem:[%s14917_s20 + $0x38] sm:$0xff]   ;;  %v676_v20 = vshrl.u32 %v14726_v14, 16  ;;  %v14680_v24 = vld [vmem:[%s17451_s1 + $0x208] sm:$0xff]   ;;  %v4791_v47 = vrot.slane %v14682_v41, 1 }
 0x1da   : > { %12933 = vmatmul.mubr.bf16.gmra.mrb[4].mxu1 %v638_v28  ;;  %v14688_v2 = vld [vmem:[%s14917_s20 + $0x68] sm:$0xff]  }
 0x1db   : > { %v678_v28 = vrot.slane %v676_v20, 2  ;;  %v4792_v54 = vsel %vm4779_vm4, %v4789_v35, %v4791_v47  ;;  %v4799_v10 = vrot.slane %v14688_v2, 1  ;;  %v369_v20 = vld [vmem:[%s17455_s5 + $0x108] sm:$0xff] }
 0x1dc   : > { %6080 = vperm.xlu1 %14487, %v353_v30  }
 0x1dd   : > { %6075 = vperm.xlu0 %14486, %v352_v13   ;;  %v367_v13 = vld [vmem:[%s17455_s5 + $0xf8] sm:$0xff] }
 0x1de   : > { %13245 = vmatmul.mubr.bf16.gmra.mrb[20].mxu0 %v4232_v31  ;;  %v640_v31 = vshrl.u32 %v14718_v9, 16  ;;  %v685_v9 = vshrl.u32 %v14727_v17, 16 }
 0x1df   : > { %13248 = vmatprep.mubr.bf16.mxu0 %v4240_v39 }
 0x1e0   : > { %v642_v39 = vrot.slane %v640_v31, 2  ;;  %v687_v31 = vrot.slane %v685_v9, 2 }
 0x1e1   : > { %6085 = vperm.xlu0 %14486, %v354_v34  }
 0x1e2   : > { %v646_v43 = vor.u32 %v645_v55, %v642_v39 }
 0x1e4   : > { %v647_v50 = vsel %vm522_vm0, %v637_v21, %v646_v43  ;;  %v656_v52 = vsel %vm522_vm0, %v646_v43, %v655_v48  ;;  %v679_v21 = vshll.u32 %v14726_v14, 16  ;;  %v357_v43 = vld [vmem:[%s17455_s5 + $0xa8] sm:$0xff]  ;;  %v368_v14 = vld [vmem:[%s17455_s5 + $0x100] sm:$0xff] }
 0x1e5   : > { %12936 = vmatprep.mubr.bf16.mxu1 %v647_v50  ;;  %6095 = vperm.xlu0 %14486, %v356_v22   ;;  %v359_v50 = vld [vmem:[%s17455_s5 + $0xb8] sm:$0xff] }
 0x1e6   : > { %13249 = vmatmul.mubr.bf16.gmra.mrb[24].mxu0 %v4248_v63  ;;  %12937 = vmatmul.mubr.bf16.gmra.mrb[8].mxu1 %v656_v52  ;;  %v670_v63 = vshll.u32 %v14723_v53, 16  ;;  %v681_v29 = vrot.slane %v679_v21, 3  ;;  %v14685_v52 = vld [vmem:[%s14917_s20 + $0x58] sm:$0xff]   ;;  %v370_v21 = vld [vmem:[%s17455_s5 + $0x110] sm:$0xff] }
 0x1e7   : > { %13252 = vmatprep.mubr.bf16.mxu0 %v4256_v0  ;;  %v660_v0 = vrot.slane %v658_v58, 2  ;;  %v14730_v58 = vld [vmem:[%s17452_s2] sm:$0xff]   ;;  %v4795_v61 = vrot.slane %v14685_v52, 1 }
 0x1e8   : > { %v672_v4 = vrot.slane %v670_v63, 3  ;;  %v682_v33 = vor.u32 %v681_v29, %v678_v28  ;;  %13364 = vmatprep.subr.bf16.mxu1 %v14730_v58  ;;  %v14695_v63 = vld [vmem:[%s17451_s1 + $0x230] sm:$0xff]  }
 0x1e9   : > { %v664_v6 = vor.u32 %v663_v1, %v660_v0  ;;  %6105 = vperm.xlu0 %14486, %v358_v46   ;;  %v363_v0 = vld [vmem:[%s17455_s5 + $0xd8] sm:$0xff]  ;;  %13365 = vmatpush3.bf16.msra.mxu1 %v14730_v58  ;;  %v364_v1 = vld [vmem:[%s17455_s5 + $0xe0] sm:$0xff]  ;;  %v14696_v29 = vld [vmem:[%s14917_s20 + $0x90] sm:$0xff]  }
 0x1ea   : > { %v673_v8 = vor.u32 %v672_v4, %v669_v3  ;;  %v14690_v4 = vld [vmem:[%s14917_s20 + $0x70] sm:$0xff]   ;;  %v4809_v34 = vrot.slane %v14696_v29, 1 }
 0x1eb   : > { %v665_v11 = vsel %vm522_vm0, %v655_v48, %v664_v6  ;;  %v4793_v48 = vrot.slane %v14684_v45, 1  ;;  %v14700_v45 = vld [vmem:[%s14917_s20 + $0xa8] ss:$0 sps:$4 sm:$0x11]  }
 0x1ec   : > { %12940 = vmatprep.mubr.bf16.mxu1 %v665_v11  ;;  %v674_v16 = vsel %vm522_vm0, %v664_v6, %v673_v8  ;;  %v683_v39 = vsel %vm522_vm0, %v673_v8, %v682_v33  ;;  %v14731_v6 = vld [vmem:[%s17452_s2 + $0x8] sm:$0xff]   ;;  %v366_v8 = vld [vmem:[%s17455_s5 + $0xf0] sm:$0xff]  ;;  %v4801_v11 = vrot.slane %v14690_v4, 1 }
 0x1ed   : > { %v4794_v53 = vsel %vm4779_vm4, %v4791_v47, %v4793_v48  ;;  %6115 = vperm.xlu0 %14486, %v360_v51   ;;  %v4796_v12 = vsel %vm4779_vm4, %v4793_v48, %v4795_v61  ;;  %13366 = vmatprep.subr.bf16.mxu1 %v14731_v6 }
 0x1ee   : > { %13253 = vmatmul.mubr.bf16.gmra.mrb[28].mxu0 %v4264_v27  ;;  %12941 = vmatmul.mubr.bf16.gmra.mrb[12].mxu1 %v674_v16  ;;  %v688_v27 = vshll.u32 %v14727_v17, 16  ;;  %v14691_v17 = vld [vmem:[%s14917_s20 + $0x78] sm:$0xff]  }
 0x1ef   : > { %13256 = vmatprep.mubr.bf16.mxu0 %v4272_v36  ;;  %v4787_v36 = vrot.slane %v14679_v19, 1  ;;  %12944 = vmatprep.mubr.bf16.mxu1 %v683_v39  ;;  %v14693_v19 = vld [vmem:[%s14917_s20 + $0x80] sm:$0xff]  }
 0x1f0   : > { %v690_v32 = vrot.slane %v688_v27, 3  ;;  %13367 = vmatpush3.bf16.msra.mxu1 %v14731_v6  ;;  %v14694_v27 = vld [vmem:[%s14917_s20 + $0x88] sm:$0xff]  }
 0x1f1   : > { %v4788_v40 = vsel %vm4779_vm4, %v4785_v7, %v4787_v36  ;;  %v4790_v44 = vsel %vm4779_vm4, %v4787_v36, %v4789_v35  ;;  %v365_v7 = vld [vmem:[%s17455_s5 + $0xe8] sm:$0xff]  ;;  %v4807_v30 = vrot.slane %v14694_v27, 1  ;;  %v14698_v36 = vld [vmem:[%s14917_s20 + $0xa0] sm:$0xff]   ;;  %v14701_v35 = vld [vmem:[%s14917_s20 + $0x18] sm:$0xfe]  }
 0x1f2   : > { %v691_v38 = vor.u32 %v690_v32, %v687_v31  ;;  %v14697_v32 = vld [vmem:[%s14917_s20 + $0x98] sm:$0xff]   ;;  %v4813_v39 = vrot.slane %v14698_v36, 1 }
 0x1f4   : > { %v692_v55 = vsel %vm522_vm0, %v682_v33, %v691_v38  ;;  %v4810_v33 = vsel %vm4779_vm4, %v4807_v30, %v4809_v34  ;;  %v4811_v38 = vrot.slane %v14697_v32, 1 }
 0x1f6   : > { %13257 = vmatmul.mubr.bf16.gmra.mrb[32].mxu0 %v4280_v56  ;;  %12945 = vmatmul.mubr.bf16.gmra.mrb[16].mxu1 %v692_v55  ;;  %v14687_v56 = vld [vmem:[%s14917_s20 + $0x60] sm:$0xff]   ;;  %v5320_v55 = vshll.u32 %v14701_v35, 16  ;;  %v4812_v41 = vsel %vm4779_vm4, %v4809_v34, %v4811_v38 }
 0x1f7   : > { %13276 = vmatprep.mubr.bf16.mxu0 %v4782_v60  ;;  %v362_v60 = vld [vmem:[%s17455_s5 + $0xd0] sm:$0xff]  ;;  %v4797_v62 = vrot.slane %v14687_v56, 1 }
 0x1f8   : > { %6125 = vperm.xlu0 %14486, %v362_v60   ;;  %v5322_v46 = vrot.slane %v5320_v55, 2 }
 0x1f9   : > { %v4798_v3 = vsel %vm4779_vm4, %v4795_v61, %v4797_v62  ;;  %v4800_v16 = vsel %vm4779_vm4, %v4797_v62, %v4799_v10  ;;  %v14705_v61 = vld [vmem:[%s14917_s20 + $0x38] sm:$0xff]  }
 0x1fa   : > { %v5352_v2 = vshrl.u32 %v14705_v61, 16 }
 0x1fc   : > { %6135 = vperm.xlu0 %14486, %v364_v1   ;;  %v14706_v1 = vld [vmem:[%s14917_s20 + $0x40] sm:$0xff]  }
 0x1fd   : > { %v5364_v6 = vshll.u32 %v14706_v1, 16 }
 0x1fe   : > { %13277 = vmatmul.mubr.bf16.vlgmr.msra.gmra.mrb[0].mxu0 %v4784_v18  ;;  %v4802_v18 = vsel %vm4779_vm4, %v4799_v10, %v4801_v11 }
 0x1ff   : > { %13313 = vmatpush3.bf16.msra.mxu0 %v15368_v15  ;;  %13280 = vmatprep.mubr.bf16.mxu0 %v4786_v23  ;;  %v355_v15 = vld [vmem:[%s17455_s5 + $0x98] sm:$0xff]  ;;  %v4803_v23 = vrot.slane %v14691_v17, 1  ;;  %v14708_v17 = vld [vmem:[%s14917_s20 + $0x50] sm:$0xff]  }
 0x200   : > { %13314 = vmatprep.subr.bf16.mxu0 %v14680_v24  ;;  %6090 = vperm.xlu1 %14487, %v355_v15   ;;  %v5317_v15 = vshrl.u32 %v14701_v35, 16 }
 0x201   : > { %6145 = vperm.xlu0 %14486, %v366_v8   ;;  %v4804_v9 = vsel %vm4779_vm4, %v4801_v11, %v4803_v23  ;;  %v5354_v8 = vrot.slane %v5352_v2, 1  ;;  %v14707_v11 = vld [vmem:[%s14917_s20 + $0x48] sm:$0xff]  }
 0x203   : > { %13315 = vmatpush3.bf16.msra.mxu0 %v14680_v24  ;;  %v4805_v24 = vrot.slane %v14693_v19, 1  ;;  %v5370_v19 = vshrl.u32 %v14707_v11, 16 }
 0x204   : > { %13316 = vmatprep.subr.bf16.mxu0 %v14683_v37  ;;  %6100 = vperm.xlu1 %14487, %v357_v43   ;;  %v5319_v43 = vrot.slane %v5317_v15, 1 }
 0x205   : > { %6155 = vperm.xlu0 %14486, %v368_v14   ;;  %v4806_v28 = vsel %vm4779_vm4, %v4803_v23, %v4805_v24  ;;  %v4808_v31 = vsel %vm4779_vm4, %v4805_v24, %v4807_v30  ;;  %v5379_v23 = vshrl.u32 %v14708_v17, 16  ;;  %v5382_v24 = vshll.u32 %v14708_v17, 16 }
 0x206   : > { %13281 = vmatmul.mubr.bf16.gmra.mrb[4].mxu0 %v4788_v40  ;;  %v5323_v52 = vor.u32 %v5322_v46, %v5319_v43 }
 0x207   : > { %13284 = vmatprep.mubr.bf16.mxu0 %v4790_v44  ;;  %13317 = vmatpush3.bf16.msra.mxu0 %v14683_v37  ;;  %v14702_v37 = vld [vmem:[%s14917_s20 + $0x20] sm:$0xff]   ;;  %v4814_v44 = vsel %vm4779_vm4, %v4811_v38, %v4813_v39  ;;  %v5381_v30 = vrot.slane %v5379_v23, 1  ;;  %v5384_v34 = vrot.slane %v5382_v24, 2 }
 0x208   : > { %13318 = vmatprep.subr.bf16.mxu0 %v14686_v42  ;;  %6110 = vperm.xlu1 %14487, %v359_v50   ;;  %v5325_v22 = vshrl.u32 %v14702_v37, 16  ;;  %v5328_v40 = vshll.u32 %v14702_v37, 16  ;;  %v4815_v50 = vrot.slane %v14700_v45, 1  ;;  %v14716_v45 = vld [vmem:[%s14917_s20 + $0x70] sm:$0xff]  }
 0x209   : > { %6165 = vperm.xlu0 %14486, %v370_v21   ;;  %v5385_v35 = vor.u32 %v5384_v34, %v5381_v30 }
 0x20a   : > { %v5327_v47 = vrot.slane %v5325_v22, 1  ;;  %v5330_v48 = vrot.slane %v5328_v40, 2  ;;  %v4816_v58 = vsel %vm4779_vm4, %v4813_v39, %v4815_v50  ;;  %v14713_v22 = vld [vmem:[%s14917_s20 + $0x68] sm:$0xff]  }
 0x20b   : > { %13319 = vmatpush3.bf16.msra.mxu0 %v14686_v42  ;;  %v14703_v42 = vld [vmem:[%s14917_s20 + $0x28] sm:$0xff]   ;;  %v5406_v43 = vshrl.u32 %v14713_v22, 16  ;;  %v5409_v46 = vshll.u32 %v14713_v22, 16 }
 0x20c   : > { %13320 = vmatprep.subr.bf16.mxu0 %v14689_v49  ;;  %6120 = vperm.xlu1 %14487, %v361_v59   ;;  %v5334_v51 = vshrl.u32 %v14703_v42, 16 }
 0x20e   : > { %13285 = vmatmul.mubr.bf16.gmra.mrb[8].mxu0 %v4792_v54  ;;  %v5337_v54 = vshll.u32 %v14703_v42, 16  ;;  %v5336_v59 = vrot.slane %v5334_v51, 1  ;;  %v5408_v51 = vrot.slane %v5406_v43, 1 }
 0x20f   : > { %13288 = vmatprep.mubr.bf16.mxu0 %v4794_v53  ;;  %13321 = vmatpush3.bf16.msra.mxu0 %v14689_v49  ;;  %v14704_v49 = vld [vmem:[%s14917_s20 + $0x30] sm:$0xff]   ;;  %v5331_v53 = vor.u32 %v5330_v48, %v5327_v47  ;;  %v5415_v48 = vshrl.u32 %v14716_v45, 16 }
 0x210   : > { %13322 = vmatprep.subr.bf16.mxu0 %v14692_v57  ;;  %6130 = vperm.xlu1 %14487, %v363_v0   ;;  %v5343_v56 = vshrl.u32 %v14704_v49, 16  ;;  %v5339_v60 = vrot.slane %v5337_v54, 2  ;;  %v5411_v54 = vrot.slane %v5409_v46, 2  ;;  %v14732_v46 = vld [vmem:[%s17452_s2 + $0x10] sm:$0xff]  }
 0x211   : > { %v5332_v62 = vsel %vm5315_vm5, %v5323_v52, %v5331_v53  ;;  %v14717_v52 = vld [vmem:[%s14917_s20 + $0x78] sm:$0xff]   ;;  %13368 = vmatprep.subr.bf16.mxu1 %v14732_v46 }
 0x212   : > { %13369 = vmatpush3.bf16.msra.mxu1 %v14732_v46 }
 0x213   : > { %13323 = vmatpush3.bf16.msra.mxu0 %v14692_v57  ;;  %v5346_v57 = vshll.u32 %v14704_v49, 16  ;;  %v5418_v49 = vshll.u32 %v14716_v45, 16 }
 0x214   : > { %13324 = vmatprep.subr.bf16.mxu0 %v14695_v63  ;;  %6140 = vperm.xlu1 %14487, %v365_v7  }
 0x215   : > { %v5348_v0 = vrot.slane %v5346_v57, 2  ;;  %v5420_v57 = vrot.slane %v5418_v49, 2  ;;  %v14735_v49 = vld [vmem:[%s17452_s2 + $0x28] sm:$0xff]  }
 0x216   : > { %13289 = vmatmul.mubr.bf16.gmra.mrb[12].mxu0 %v4796_v12  ;;  %v5340_v12 = vor.u32 %v5339_v60, %v5336_v59  ;;  %v5412_v59 = vor.u32 %v5411_v54, %v5408_v51  ;;  %v5424_v60 = vshrl.u32 %v14717_v52, 16  ;;  %v6245_v51 = vld [vmem:[#allocation3] sm:$0xc0] }
 0x217   : > { %13292 = vmatprep.mubr.bf16.mxu0 %v4798_v3  ;;  %13325 = vmatpush3.bf16.msra.mxu0 %v14695_v63  ;;  %v5345_v63 = vrot.slane %v5343_v56, 1  ;;  %v5355_v3 = vshll.u32 %v14705_v61, 16  ;;  %v5417_v56 = vrot.slane %v5415_v48, 1  ;;  %v5427_v61 = vshll.u32 %v14717_v52, 16  ;;  %v14734_v48 = vld [vmem:[%s17452_s2 + $0x20] sm:$0xff]  }
 0x218   : > { %13326 = vmatprep.subr.bf16.mxu0 %v14699_v5  ;;  %6150 = vperm.xlu1 %14487, %v367_v13   ;;  %v5341_v7 = vsel %vm5315_vm5, %v5331_v53, %v5340_v12  ;;  %v6282_v54 = vshrl.u32 %v6245_v51, 16  ;;  %v6285_v52 = vshll.u32 %v6245_v51, 16 }
 0x219   : > { %v5349_v4 = vor.u32 %v5348_v0, %v5345_v63  ;;  %v5357_v10 = vrot.slane %v5355_v3, 2  ;;  %v5429_v2 = vrot.slane %v5427_v61, 2  ;;  %v14721_v3 = vld [vmem:[%s14917_s20 + $0x88] sm:$0xff]  }
 0x21b   : > { %13327 = vmatpush3.bf16.msra.mxu0 %v14699_v5  ;;  %v5361_v5 = vshrl.u32 %v14706_v1, 16  ;;  %v5350_v13 = vsel %vm5315_vm5, %v5340_v12, %v5349_v4  ;;  %v5426_v12 = vrot.slane %v5424_v60, 1 }
 0x21c   : > { %6160 = vperm.xlu1 %14487, %v369_v20   ;;  %v5373_v20 = vshll.u32 %v14707_v11, 16  ;;  %v5445_v11 = vshll.u32 %v14721_v3, 16 }
 0x21d   : > { %v5363_v14 = vrot.slane %v5361_v5, 1 }
 0x21e   : > { %13293 = vmatmul.mubr.bf16.gmra.mrb[16].mxu0 %v4800_v16  ;;  %v5366_v16 = vrot.slane %v5364_v6, 2  ;;  %v5375_v27 = vrot.slane %v5373_v20, 2  ;;  %v14725_v20 = vld [vmem:[%s14917_s20 + $0x98] sm:$0xff]  }
 0x21f   : > { %13296 = vmatprep.mubr.bf16.mxu0 %v4802_v18  ;;  %v5358_v18 = vor.u32 %v5357_v10, %v5354_v8  ;;  %v5430_v8 = vor.u32 %v5429_v2, %v5426_v12  ;;  %v5442_v10 = vshrl.u32 %v14721_v3, 16 }
 0x220   : > { %6170 = vperm.xlu1 %14487, %v371_v25   ;;  %v5367_v21 = vor.u32 %v5366_v16, %v5363_v14 }
 0x221   : > { %v5359_v25 = vsel %vm5315_vm5, %v5349_v4, %v5358_v18 }
 0x222   : > { %v5368_v29 = vsel %vm5315_vm5, %v5358_v18, %v5367_v21  ;;  %v5444_v18 = vrot.slane %v5442_v10, 1 }
 0x226   : > { %13297 = vmatmul.mubr.bf16.gmra.mrb[20].mxu0 %v4804_v9  ;;  %v5372_v9 = vrot.slane %v5370_v19, 1  ;;  %v5447_v19 = vrot.slane %v5445_v11, 2 }
 0x227   : > { %13300 = vmatprep.mubr.bf16.mxu0 %v4806_v28  ;;  %v14709_v28 = vld [vmem:[%s14917_s20 + $0x58] sm:$0xff]  }
 0x228   : > { %v5376_v32 = vor.u32 %v5375_v27, %v5372_v9  ;;  %v5388_v36 = vshrl.u32 %v14709_v28, 16  ;;  %v5448_v9 = vor.u32 %v5447_v19, %v5444_v18  ;;  %v5460_v27 = vshrl.u32 %v14725_v20, 16 }
 0x22a   : > { %v5377_v39 = vsel %vm5315_vm5, %v5367_v21, %v5376_v32  ;;  %v5390_v15 = vrot.slane %v5388_v36, 1  ;;  %v5386_v40 = vsel %vm5315_vm5, %v5376_v32, %v5385_v35  ;;  %v5462_v32 = vrot.slane %v5460_v27, 1 }
 0x22e   : > { %13301 = vmatmul.mubr.bf16.gmra.mrb[24].mxu0 %v4808_v31  ;;  %v14712_v31 = vld [vmem:[%s14917_s20 + $0x60] sm:$0xff]  }
 0x22f   : > { %13304 = vmatprep.mubr.bf16.mxu0 %v4810_v33  ;;  %v5391_v33 = vshll.u32 %v14709_v28, 16  ;;  %v5397_v37 = vshrl.u32 %v14712_v31, 16  ;;  %v5400_v38 = vshll.u32 %v14712_v31, 16  ;;  %v5463_v28 = vshll.u32 %v14725_v20, 16 }
 0x231   : > { %v5393_v55 = vrot.slane %v5391_v33, 2  ;;  %v5465_v36 = vrot.slane %v5463_v28, 2  ;;  %v14729_v33 = vld [vmem:[%s14917_s20 + $0xa8] ss:$0 sps:$4 sm:$0x33]  }
 0x233   : > { %v5394_v42 = vor.u32 %v5393_v55, %v5390_v15  ;;  %v5478_v15 = vshrl.u32 %v14729_v33, 16  ;;  %v5481_v55 = vshll.u32 %v14729_v33, 16 }
 0x235   : > { %v5395_v50 = vsel %vm5315_vm5, %v5385_v35, %v5394_v42 }
 0x236   : > { %13305 = vmatmul.mubr.bf16.gmra.mrb[28].mxu0 %v4812_v41  ;;  %v5399_v41 = vrot.slane %v5397_v37, 1 }
 0x237   : > { %13308 = vmatprep.mubr.bf16.mxu0 %v4814_v44  ;;  %v5402_v44 = vrot.slane %v5400_v38, 2 }
 0x239   : > { %v5403_v47 = vor.u32 %v5402_v44, %v5399_v41  ;;  %v5480_v41 = vrot.slane %v5478_v15, 1  ;;  %v5483_v44 = vrot.slane %v5481_v55, 2 }
 0x23b   : > { %v5404_v53 = vsel %vm5315_vm5, %v5394_v42, %v5403_v47  ;;  %v5413_v1 = vsel %vm5315_vm5, %v5403_v47, %v5412_v59  ;;  %v5484_v42 = vor.u32 %v5483_v44, %v5480_v41  ;;  %v14733_v47 = vld [vmem:[%s17452_s2 + $0x18] sm:$0xff]  }
 0x23c   : > { %13370 = vmatprep.subr.bf16.mxu1 %v14733_v47 }
 0x23d   : > { %13371 = vmatpush3.bf16.msra.mxu1 %v14733_v47 }
 0x23e   : > { %13309 = vmatmul.mubr.bf16.gmra.mrb[32].mxu0 %v4816_v58  ;;  %v14720_v58 = vld [vmem:[%s14917_s20 + $0x80] sm:$0xff]   ;;  %13372 = vmatprep.subr.bf16.mxu1 %v14734_v48 }
 0x23f   : > { %13328 = vmatprep.mubr.bf16.mxu0 %v5332_v62  ;;  %v5421_v62 = vor.u32 %v5420_v57, %v5417_v56  ;;  %v5433_v63 = vshrl.u32 %v14720_v58, 16  ;;  %v5436_v0 = vshll.u32 %v14720_v58, 16  ;;  %v6284_v56 = vrot.slane %v6282_v54, 6 }
 0x240   : > { %v6287_v57 = vrot.slane %v6285_v52, 7  ;;  %v6292_v58 = vrot.slane %v14841_v26, 6 }
 0x241   : > { %v5422_v4 = vsel %vm5315_vm5, %v5412_v59, %v5421_v62  ;;  %v5435_v5 = vrot.slane %v5433_v63, 1  ;;  %v5438_v6 = vrot.slane %v5436_v0, 2  ;;  %v5431_v17 = vsel %vm5315_vm5, %v5421_v62, %v5430_v8  ;;  %13373 = vmatpush3.bf16.msra.mxu1 %v14734_v48 }
 0x242   : > { %13374 = vmatprep.subr.bf16.mxu1 %v14735_v49  ;;  %v15673_v59 = vrot.slane %v14841_v26, 7  ;;  %v6288_v60 = vor.u32 %v6287_v57, %v6284_v56  ;;  %v15691_v26 = vld [vmem:[%s17452_s2 + $0x40] sm:$0xff]  }
 0x244   : > { %v15676_v61 = vor.u32 %v15673_v59, %v6292_v58 }
 0x245   : > { %13375 = vmatpush3.bf16.msra.mxu1 %v14735_v49 }
 0x246   : > { %13329 = vmatmul.mubr.bf16.vlgmr.msra.gmra.mrb[0].mxu0 %v5341_v7  ;;  %v14724_v7 = vld [vmem:[%s14917_s20 + $0x90] sm:$0xff]   ;;  %v6297_v62 = vsel %vm6280_vm6, %v6288_v60, %v15676_v61 }
 0x247   : > { %13332 = vmatprep.mubr.bf16.mxu0 %v5350_v13  ;;  %v5439_v13 = vor.u32 %v5438_v6, %v5435_v5  ;;  %v5451_v14 = vshrl.u32 %v14724_v7, 16  ;;  %v5454_v16 = vshll.u32 %v14724_v7, 16  ;;  %13380 = vmatprep.mubr.bf16.mxu1 %v6297_v62 }
 0x249   : > { %v5440_v21 = vsel %vm5315_vm5, %v5430_v8, %v5439_v13  ;;  %v5453_v23 = vrot.slane %v5451_v14, 1  ;;  %v5456_v24 = vrot.slane %v5454_v16, 2  ;;  %v5449_v31 = vsel %vm5315_vm5, %v5439_v13, %v5448_v9 }
 0x24e   : > { %13333 = vmatmul.mubr.bf16.gmra.mrb[4].mxu0 %v5359_v25  ;;  %v14728_v25 = vld [vmem:[%s14917_s20 + $0xa0] sm:$0xff]  }
 0x24f   : > { %13336 = vmatprep.mubr.bf16.mxu0 %v5368_v29  ;;  %v5457_v29 = vor.u32 %v5456_v24, %v5453_v23  ;;  %v5469_v30 = vshrl.u32 %v14728_v25, 16  ;;  %v5472_v34 = vshll.u32 %v14728_v25, 16  ;;  %v15728_v23 = vpop.permute.xlu1 %6005 }
 0x250   : > { %17549 = vst [vmem:[#allocation5_spill] sm:$0xff] %v15728_v23 }
 0x251   : > { %v5458_v35 = vsel %vm5315_vm5, %v5448_v9, %v5457_v29  ;;  %v5471_v37 = vrot.slane %v5469_v30, 1  ;;  %v5474_v38 = vrot.slane %v5472_v34, 2 }
 0x253   : > { %v5475_v22 = vor.u32 %v5474_v38, %v5471_v37  ;;  %v15732_v25 = vpop.permute.xlu1 %6010 }
 0x254   : > { %17551 = vst [vmem:[#allocation7_spill] sm:$0xff] %v15732_v25 }
 0x255   : > { %v5485_v43 = vsel %vm5315_vm5, %v5475_v22, %v5484_v42 }
 0x256   : > { %13337 = vmatmul.mubr.bf16.gmra.mrb[8].mxu0 %v5377_v39  ;;  %v5466_v39 = vor.u32 %v5465_v36, %v5462_v32  ;;  %v15756_v36 = vld [vmem:[%s17454_s4] ss:$0 sm:$0xff] }
 0x257   : > { %13340 = vmatprep.mubr.bf16.mxu0 %v5386_v40  ;;  %v15736_v27 = vpop.permute.xlu1 %6020 }
 0x258   : > { %v5467_v40 = vsel %vm5315_vm5, %v5457_v29, %v5466_v39  ;;  %v5476_v45 = vsel %vm5315_vm5, %v5466_v39, %v5475_v22  ;;  %17553 = vst [vmem:[#allocation9_spill] sm:$0xff] %v15736_v27 }
 0x25b   : > { %v15740_v29 = vpop.permute.xlu1 %6030 }
 0x25c   : > { %17555 = vst [vmem:[#allocation11_spill] sm:$0xff] %v15740_v29 }
 0x25e   : > { %13341 = vmatmul.mubr.bf16.gmra.mrb[12].mxu0 %v5395_v50  ;;  %v14736_v50 = vld [vmem:[%s17452_s2 + $0x30] sm:$0xff]  }
 0x25f   : > { %13344 = vmatprep.mubr.bf16.mxu0 %v5404_v53  ;;  %13376 = vmatprep.subr.bf16.mxu1 %v14736_v50  ;;  %v14737_v53 = vld [vmem:[%s17452_s2 + $0x38] sm:$0xff]   ;;  %v15744_v34 = vpop.permute.xlu1 %6040 }
 0x260   : > { %13377 = vmatpush3.bf16.msra.mxu1 %v14736_v50  ;;  %17557 = vst [vmem:[#allocation13_spill] sm:$0xff] %v15744_v34 }
 0x261   : > { %13378 = vmatprep.subr.bf16.mxu1 %v14737_v53 }
 0x263   : > { %v15759_v38 = vpop.permute.xlu1 %6050 }
 0x264   : > { %13379 = vmatpush3.bf16.msra.mxu1 %v14737_v53  ;;  %17559 = vst [vmem:[#allocation15_spill] sm:$0xff] %v15759_v38 }
 0x265   : > { %13416 = vmatprep.subr.bf16.mxu1 %v15691_v26 }
 0x266   : > { %13345 = vmatmul.mubr.bf16.gmra.mrb[16].mxu0 %v5413_v1 }
 0x267   : > { %13348 = vmatprep.mubr.bf16.mxu0 %v5422_v4  ;;  %v15770_v49 = vpop.permute.xlu1 %6060 }
 0x268   : > { %17561 = vst [vmem:[#allocation17_spill] sm:$0xff] %v15770_v49 }
 0x26e   : > { %13349 = vmatmul.mubr.bf16.gmra.mrb[20].mxu0 %v5431_v17 }
 0x26f   : > { %13352 = vmatprep.mubr.bf16.mxu0 %v5440_v21  ;;  %v15726_v21 = vpop.permute.xlu0 %5995 }
 0x270   : > { %17548 = vst [vmem:[#allocation4_spill] sm:$0xff] %v15726_v21 }
 0x273   : > { %v15730_v24 = vpop.permute.xlu0 %6000 }
 0x274   : > { %17550 = vst [vmem:[#allocation6_spill] sm:$0xff] %v15730_v24 }
 0x276   : > { %13353 = vmatmul.mubr.bf16.gmra.mrb[24].mxu0 %v5449_v31  ;;  %v15749_v31 = vld [vmem:[%s17453_s3] ss:$0 sm:$0xff] }
 0x277   : > { %13356 = vmatprep.mubr.bf16.mxu0 %v5458_v35  ;;  %v15734_v9 = vpop.permute.xlu0 %6015 }
 0x278   : > { %17552 = vst [vmem:[#allocation8_spill] sm:$0xff] %v15734_v9 }
 0x27b   : > { %v15738_v28 = vpop.permute.xlu0 %6025 }
 0x27c   : > { %17554 = vst [vmem:[#allocation10_spill] sm:$0xff] %v15738_v28 }
 0x27e   : > { %13357 = vmatmul.mubr.bf16.gmra.mrb[28].mxu0 %v5467_v40 }
 0x27f   : > { %13360 = vmatprep.mubr.bf16.mxu0 %v5476_v45  ;;  %v15742_v30 = vpop.permute.xlu0 %6035 }
 0x280   : > { %17556 = vst [vmem:[#allocation12_spill] sm:$0xff] %v15742_v30 }
 0x283   : > { %v15751_v32 = vpop.permute.xlu0 %6045 }
 0x284   : > { %17558 = vst [vmem:[#allocation14_spill] sm:$0xff] %v15751_v32 }
 0x286   : > { %13361 = vmatmul.mubr.bf16.gmra.mrb[32].mxu0 %v5485_v43 }
 0x287   : > { %v15767_v43 = vpop.permute.xlu0 %6055 }
 0x288   : > { %17560 = vst [vmem:[#allocation16_spill] sm:$0xff] %v15767_v43 }
 0x2a0   : > { %v15680_v63 = vpop.f32.mrb[0].mxu1 }
 0x2a1   : > { %v15682_v0 = vpop.f32.mrb[1].mxu1 }
 0x2a2   : > { %v15684_v1 = vpop.f32.mrb[2].mxu1 }
 0x2a3   : > { %v15686_v12 = vpop.f32.mrb[3].mxu1 }
 0x2ad   : > { %v15693_v2 = vpop.f32.mrb[4].mxu1 }
 0x2ae   : > { %v15696_v3 = vpop.f32.mrb[5].mxu1 }
 0x2af   : > { %v15698_v4 = vpop.f32.mrb[6].mxu1 }
 0x2b0   : > { %v15700_v5 = vpop.f32.mrb[7].mxu1 }
 0x2b9   : > { %v15702_v6 = vpop.f32.mrb[8].mxu1 }
 0x2ba   : > { %v15704_v7 = vpop.f32.mrb[9].mxu1 }
 0x2bb   : > { %v15706_v8 = vpop.f32.mrb[10].mxu1 }
 0x2bc   : > { %v15708_v10 = vpop.f32.mrb[11].mxu1 }
 0x2c1   : > { %v15710_v11 = vpop.f32.mrb[12].mxu1 }
 0x2c2   : > { %v15712_v13 = vpop.f32.mrb[13].mxu1 }
 0x2c3   : > { %v15714_v14 = vpop.f32.mrb[14].mxu1 }
 0x2c4   : > { %v15716_v16 = vpop.f32.mrb[15].mxu1 }
 0x2c9   : > { %v15718_v17 = vpop.f32.mrb[16].mxu1 }
 0x2ca   : > { %v15720_v18 = vpop.f32.mrb[17].mxu1 }
 0x2cb   : > { %v15722_v19 = vpop.f32.mrb[18].mxu1 }
 0x2cc   : > { %v15724_v20 = vpop.f32.mrb[19].mxu1 }
 0x319   : > { %v13330_v33 = vpop.f32.mrb[0].mxu0 }
 0x31a   : > { %v5881_v35 = vmul.f32 %v13330_v33, %v15749_v31  ;;  %v5586_v37 = vpop.f32.mrb[1].mxu0 }
 0x31b   : > { %v5879_v39 = vmul.f32 %v15749_v31, %v5586_v37  ;;  %v13331_v15 = vpop.f32.mrb[2].mxu0 }
 0x31c   : > { %v5923_v55 = vadd.f32 %v15756_v36, %v5881_v35  ;;  %v5882_v22 = vmul.f32 %v13331_v15, %v15749_v31  ;;  %v5589_v40 = vpop.f32.mrb[3].mxu0  ;;  %v15782_v15 = vpop.permute.xlu0 %6065 }
 0x31d   : > { %v5921_v41 = vadd.f32 %v15756_v36, %v5879_v39  ;;  %v5880_v44 = vmul.f32 %v15749_v31, %v5589_v40  ;;  %17562 = vst [vmem:[#allocation18_spill] sm:$0xff] %v15782_v15 }
 0x31e   : > { %v5959_v45 = vmax.f32 %v5923_v55, 0.0  ;;  %v5924_v42 = vadd.f32 %v15756_v36, %v5882_v22 }
 0x31f   : > { %v5957_v46 = vmax.f32 %v5921_v41, 0.0  ;;  %v5922_v47 = vadd.f32 %v15756_v36, %v5880_v44 }
 0x320   : > { %v5960_v48 = vmax.f32 %v5924_v42, 0.0  ;;  %v6175_v54 = vmul.f32 %v15728_v23, %v5959_v45 }
 0x321   : > { %v5958_v50 = vmax.f32 %v5922_v47, 0.0  ;;  %v13334_v51 = vpop.f32.mrb[4].mxu0  ;;  %v6173_v57 = vmul.f32 %v15726_v21, %v5957_v46  ;;  %v15792_v46 = vpop.permute.xlu1 %6070 }
 0x322   : > { %v6176_v52 = vmul.f32 %v15732_v25, %v5960_v48  ;;  %v5885_v53 = vmul.f32 %v13334_v51, %v15749_v31  ;;  %v5602_v56 = vpop.f32.mrb[5].mxu0  ;;  %17563 = vst [vmem:[#allocation19_spill] sm:$0xff] %v15792_v46 }
 0x323   : > { %v6174_v58 = vmul.f32 %v15730_v24, %v5958_v50  ;;  %v5883_v60 = vmul.f32 %v15749_v31, %v5602_v56  ;;  %v13335_v62 = vpop.f32.mrb[6].mxu0  ;;  %v15804_v24 = vpop.permute.xlu0 %6075 }
 0x324   : > { %v15778_v33 = vpack.c.bf16 %v6176_v52, %v6175_v54  ;;  %v5927_v35 = vadd.f32 %v15756_v36, %v5885_v53  ;;  %v5886_v37 = vmul.f32 %v13335_v62, %v15749_v31  ;;  %v5605_v39 = vpop.f32.mrb[7].mxu0  ;;  %17564 = vst [vmem:[#allocation20_spill] sm:$0xff] %v15804_v24 }
 0x325   : > { %v15784_v55 = vpack.c.bf16 %v6174_v58, %v6173_v57  ;;  %v5925_v22 = vadd.f32 %v15756_v36, %v5883_v60  ;;  %v5884_v40 = vmul.f32 %v15749_v31, %v5605_v39 }
 0x326   : > { %6228 = vst [vmem:[#allocation3 + $0x18] sm:$0xff] %v15778_v33  ;;  %v5963_v41 = vmax.f32 %v5927_v35, 0.0  ;;  %v5928_v44 = vadd.f32 %v15756_v36, %v5886_v37  ;;  %v6308_v45 = vshrl.u32 %v15778_v33, 16  ;;  %v6311_v42 = vshll.u32 %v15778_v33, 16 }
 0x327   : > { %6227 = vst [vmem:[#allocation3 + $0x10] sm:$0xff] %v15784_v55  ;;  %v5961_v47 = vmax.f32 %v5925_v22, 0.0  ;;  %v5926_v48 = vadd.f32 %v15756_v36, %v5884_v40  ;;  %v6299_v50 = vshrl.u32 %v15784_v55, 16  ;;  %v6302_v51 = vshll.u32 %v15784_v55, 16 }
 0x328   : > { %v5964_v54 = vmax.f32 %v5928_v44, 0.0  ;;  %v6310_v52 = vrot.slane %v6308_v45, 6  ;;  %v6313_v53 = vrot.slane %v6311_v42, 7  ;;  %v6179_v56 = vmul.f32 %v15738_v28, %v5963_v41 }
 0x329   : > { %v5962_v57 = vmax.f32 %v5926_v48, 0.0  ;;  %v13338_v58 = vpop.f32.mrb[8].mxu0  ;;  %v6301_v60 = vrot.slane %v6299_v50, 6  ;;  %v6304_v62 = vrot.slane %v6302_v51, 7  ;;  %v6177_v35 = vmul.f32 %v15734_v9, %v5961_v47 }
 0x32a   : > { %v6180_v37 = vmul.f32 %v15740_v29, %v5964_v54  ;;  %v5889_v39 = vmul.f32 %v13338_v58, %v15749_v31  ;;  %v5618_v22 = vpop.f32.mrb[9].mxu0  ;;  %v15802_v40 = vor.u32 %v6313_v53, %v6310_v52  ;;  %v14739_v52 = vld [vmem:[%s17452_s2 + $0x48] sm:$0xff]   ;;  %v17568_v9 = vrot.slane %v15784_v55, 7 }
 0x32b   : > { %v6178_v44 = vmul.f32 %v15736_v27, %v5962_v57  ;;  %v5887_v45 = vmul.f32 %v15749_v31, %v5618_v22  ;;  %v13339_v41 = vpop.f32.mrb[10].mxu0  ;;  %v6305_v42 = vor.u32 %v6304_v62, %v6301_v60  ;;  %v15817_v57 = vpop.permute.xlu1 %6080 }
 0x32c   : > { %v15809_v50 = vpack.c.bf16 %v6180_v37, %v6179_v56  ;;  %v5931_v47 = vadd.f32 %v15756_v36, %v5889_v39  ;;  %v5890_v51 = vmul.f32 %v13339_v41, %v15749_v31  ;;  %v5621_v54 = vpop.f32.mrb[11].mxu0  ;;  %17565 = vst [vmem:[#allocation21_spill] sm:$0xff] %v15817_v57 }
 0x32d   : > { %v15819_v58 = vpack.c.bf16 %v6178_v44, %v6177_v35  ;;  %v5929_v60 = vadd.f32 %v15756_v36, %v5887_v45  ;;  %v5888_v56 = vmul.f32 %v15749_v31, %v5621_v54  ;;  %v6306_v62 = vsel %vm6280_vm6, %v15676_v61, %v6305_v42 }
 0x32e   : > { %6230 = vst [vmem:[#allocation3 + $0x28] sm:$0xff] %v15809_v50  ;;  %v5967_v37 = vmax.f32 %v5931_v47, 0.0  ;;  %v5932_v39 = vadd.f32 %v15756_v36, %v5890_v51  ;;  %13381 = vmatmul.mubr.bf16.vlgmr.msra.gmra.mrb[20].mxu1 %v6306_v62  ;;  %v6315_v22 = vsel %vm6280_vm6, %v6305_v42, %v15802_v40  ;;  %v6326_v41 = vshrl.u32 %v15809_v50, 16  ;;  %v15840_v62 = vpop.permute.xlu0 %6085 }
 0x32f   : > { %6229 = vst [vmem:[#allocation3 + $0x20] sm:$0xff] %v15819_v58  ;;  %v5965_v35 = vmax.f32 %v5929_v60, 0.0  ;;  %v5930_v44 = vadd.f32 %v15756_v36, %v5888_v56  ;;  %13384 = vmatprep.mubr.bf16.mxu1 %v6315_v22  ;;  %13417 = vmatpush3.bf16.msra.mxu1 %v15691_v26  ;;  %v6317_v61 = vshrl.u32 %v15819_v58, 16  ;;  %v6320_v45 = vshll.u32 %v15819_v58, 16  ;;  %v14740_v60 = vld [vmem:[%s17452_s2 + $0x50] sm:$0xff]   ;;  %17566 = vst [vmem:[#allocation22_spill] sm:$0xff] %v15840_v62  ;;  %v15852_v28 = vpop.permute.xlu1 %6090 }
 0x330   : > { %v6183_v47 = vmul.f32 %v15751_v32, %v5967_v37  ;;  %v5968_v51 = vmax.f32 %v5932_v39, 0.0  ;;  %v6328_v54 = vrot.slane %v6326_v41, 6  ;;  %v6329_v42 = vshll.u32 %v15809_v50, 16  ;;  %13418 = vmatprep.subr.bf16.mxu1 %v14739_v52  ;;  %17569 = vst [vmem:[#allocation23_spill] sm:$0xff] %v15852_v28 }
 0x331   : > { %v6181_v56 = vmul.f32 %v15742_v30, %v5965_v35  ;;  %v5966_v26 = vmax.f32 %v5930_v44, 0.0  ;;  %v13342_v22 = vpop.f32.mrb[12].mxu0  ;;  %v6319_v48 = vrot.slane %v6317_v61, 6  ;;  %v6322_v53 = vrot.slane %v6320_v45, 7 }
 0x332   : > { %v6184_v27 = vmul.f32 %v15759_v38, %v5968_v51  ;;  %v5893_v37 = vmul.f32 %v13342_v22, %v15749_v31  ;;  %v5634_v39 = vpop.f32.mrb[13].mxu0  ;;  %v6331_v41 = vrot.slane %v6329_v42, 7  ;;  %v17567_v32 = vrot.slane %v15778_v33, 7 }
 0x333   : > { %v6182_v35 = vmul.f32 %v15744_v34, %v5966_v26  ;;  %v5891_v44 = vmul.f32 %v15749_v31, %v5634_v39  ;;  %v13343_v61 = vpop.f32.mrb[14].mxu0  ;;  %v6323_v45 = vor.u32 %v6322_v53, %v6319_v48  ;;  %13419 = vmatpush3.bf16.msra.mxu1 %v14739_v52  ;;  %v15874_v39 = vpop.permute.xlu0 %6095  ;;  %v17573_v34 = vrot.slane %v15778_v33, 7 }
 0x334   : > { %v15850_v29 = vsel %vm6785_vm7, %v17568_v9, %v17567_v32  ;;  %v15857_v22 = vpack.c.bf16 %v6184_v27, %v6183_v47  ;;  %v5935_v42 = vadd.f32 %v15756_v36, %v5893_v37  ;;  %v5894_v30 = vmul.f32 %v13343_v61, %v15749_v31  ;;  %v5637_v38 = vpop.f32.mrb[15].mxu0  ;;  %13420 = vmatprep.subr.bf16.mxu1 %v14740_v60  ;;  %v14741_v32 = vld [vmem:[%s17452_s2 + $0x58] sm:$0xff]  }
 0x335   : > { %v6332_v9 = vor.u32 %v6331_v41, %v6328_v54  ;;  %v15864_v26 = vpack.c.bf16 %v6182_v35, %v6181_v56  ;;  %v5933_v48 = vadd.f32 %v15756_v36, %v5891_v44  ;;  %v5892_v52 = vmul.f32 %v15749_v31, %v5637_v38  ;;  %17570 = vst [vmem:[#allocation24_spill] sm:$0xff] %v15874_v39 }
 0x336   : > { %v6324_v27 = vsel %vm6280_vm6, %v15802_v40, %v6323_v45  ;;  %6232 = vst [vmem:[#allocation3 + $0x38] sm:$0xff] %v15857_v22  ;;  %v5971_v53 = vmax.f32 %v5935_v42, 0.0  ;;  %v5936_v47 = vadd.f32 %v15756_v36, %v5894_v30  ;;  %v6344_v37 = vshrl.u32 %v15857_v22, 16  ;;  %v15885_v42 = vpop.permute.xlu1 %6100 }
 0x337   : > { %13385 = vmatmul.mubr.bf16.gmra.mrb[24].mxu1 %v6324_v27  ;;  %v6333_v54 = vsel %vm6280_vm6, %v6323_v45, %v6332_v9  ;;  %6231 = vst [vmem:[#allocation3 + $0x30] sm:$0xff] %v15864_v26  ;;  %v5969_v56 = vmax.f32 %v5933_v48, 0.0  ;;  %v5934_v38 = vadd.f32 %v15756_v36, %v5892_v52  ;;  %v6335_v40 = vshrl.u32 %v15864_v26, 16  ;;  %v14742_v45 = vld [vmem:[%s17452_s2 + $0x60] sm:$0xff]   ;;  %17571 = vst [vmem:[#allocation25_spill] sm:$0xff] %v15885_v42 }
 0x338   : > { %13388 = vmatprep.mubr.bf16.mxu1 %v6333_v54  ;;  %v6338_v41 = vshll.u32 %v15864_v26, 16  ;;  %13421 = vmatpush3.bf16.msra.mxu1 %v14740_v60  ;;  %v6187_v30 = vmul.f32 %v15782_v15, %v5971_v53  ;;  %v5972_v35 = vmax.f32 %v5936_v47, 0.0  ;;  %v6346_v44 = vrot.slane %v6344_v37, 6 }
 0x339   : > { %v6347_v61 = vshll.u32 %v15857_v22, 16  ;;  %13422 = vmatprep.subr.bf16.mxu1 %v14741_v32  ;;  %v6185_v48 = vmul.f32 %v15767_v43, %v5969_v56  ;;  %v5970_v52 = vmax.f32 %v5934_v38, 0.0  ;;  %v13346_v27 = vpop.f32.mrb[16].mxu0  ;;  %v6337_v54 = vrot.slane %v6335_v40, 6 }
 0x33a   : > { %v6340_v51 = vrot.slane %v6338_v41, 7  ;;  %v6188_v60 = vmul.f32 %v15792_v46, %v5972_v35  ;;  %v13900_v53 = vadd.f32 %v13346_v27, %v15680_v63  ;;  %v5650_v47 = vpop.f32.mrb[17].mxu0  ;;  %v17572_v15 = vrot.slane %v15819_v58, 7 }
 0x33b   : > { %v6349_v37 = vrot.slane %v6347_v61, 7  ;;  %v6186_v25 = vmul.f32 %v15770_v49, %v5970_v52  ;;  %v13901_v56 = vadd.f32 %v5650_v47, %v15682_v0  ;;  %v13347_v38 = vpop.f32.mrb[18].mxu0 }
 0x33c   : > { %v15895_v21 = vsel %vm6785_vm7, %v17573_v34, %v17572_v15  ;;  %v6341_v40 = vor.u32 %v6340_v51, %v6337_v54  ;;  %13423 = vmatpush3.bf16.msra.mxu1 %v14741_v32  ;;  %v15900_v35 = vpack.c.bf16 %v6188_v60, %v6187_v30  ;;  %v5897_v63 = vmul.f32 %v13900_v53, %v15749_v31  ;;  %v5653_v27 = vpop.f32.mrb[19].mxu0  ;;  %v14743_v34 = vld [vmem:[%s17452_s2 + $0x68] sm:$0xff]   ;;  %v15907_v15 = vpop.permute.xlu0 %6105 }
 0x33d   : > { %v13902_v61 = vadd.f32 %v13347_v38, %v15684_v1  ;;  %v6350_v33 = vor.u32 %v6349_v37, %v6346_v44  ;;  %13424 = vmatprep.subr.bf16.mxu1 %v14742_v45  ;;  %17574 = vst [vmem:[#allocation26_spill] sm:$0xff] %v15907_v15  ;;  %v15909_v0 = vpack.c.bf16 %v6186_v25, %v6185_v48  ;;  %v15919_v60 = vpop.permute.xlu1 %6110  ;;  %v14744_v38 = vld [vmem:[%s17452_s2 + $0x70] sm:$0xff]  }
 0x33e   : > { %v5895_v51 = vmul.f32 %v13901_v56, %v15749_v31  ;;  %v13903_v32 = vadd.f32 %v5653_v27, %v15686_v12  ;;  %v6342_v30 = vsel %vm6280_vm6, %v6332_v9, %v6341_v40  ;;  %6234 = vst [vmem:[#allocation3 + $0x48] sm:$0xff] %v15900_v35  ;;  %v5939_v1 = vadd.f32 %v15756_v36, %v5897_v63 }
 0x33f   : > { %v5898_v44 = vmul.f32 %v13902_v61, %v15749_v31  ;;  %13389 = vmatmul.mubr.bf16.gmra.mrb[28].mxu1 %v6342_v30  ;;  %v6351_v52 = vsel %vm6280_vm6, %v6341_v40, %v6350_v33  ;;  %v6362_v54 = vshrl.u32 %v15900_v35, 16  ;;  %17575 = vst [vmem:[#allocation27_spill] sm:$0xff] %v15919_v60  ;;  %6233 = vst [vmem:[#allocation3 + $0x40] sm:$0xff] %v15909_v0  ;;  %v6353_v9 = vshrl.u32 %v15909_v0, 16 }
 0x340   : > { %v5937_v25 = vadd.f32 %v15756_v36, %v5895_v51  ;;  %v5896_v12 = vmul.f32 %v13903_v32, %v15749_v31  ;;  %13392 = vmatprep.mubr.bf16.mxu1 %v6351_v52  ;;  %v6356_v48 = vshll.u32 %v15909_v0, 16  ;;  %13425 = vmatpush3.bf16.msra.mxu1 %v14742_v45  ;;  %v5975_v53 = vmax.f32 %v5939_v1, 0.0  ;;  %v15934_v52 = vpop.permute.xlu0 %6115 }
 0x341   : > { %v5940_v47 = vadd.f32 %v15756_v36, %v5898_v44  ;;  %v6364_v37 = vrot.slane %v6362_v54, 6  ;;  %v6365_v56 = vshll.u32 %v15900_v35, 16  ;;  %13426 = vmatprep.subr.bf16.mxu1 %v14743_v34  ;;  %v13350_v61 = vpop.f32.mrb[20].mxu0  ;;  %v6355_v27 = vrot.slane %v6353_v9, 6  ;;  %17576 = vst [vmem:[#allocation28_spill] sm:$0xff] %v15934_v52 }
 0x342   : > { %v5973_v40 = vmax.f32 %v5937_v25, 0.0  ;;  %v5938_v63 = vadd.f32 %v15756_v36, %v5896_v12  ;;  %v6358_v51 = vrot.slane %v6356_v48, 7  ;;  %v6191_v32 = vmul.f32 %v15840_v62, %v5975_v53  ;;  %v5666_v1 = vpop.f32.mrb[21].mxu0 }
 0x343   : > { %v5976_v45 = vmax.f32 %v5940_v47, 0.0  ;;  %v13904_v30 = vadd.f32 %v13350_v61, %v15693_v2  ;;  %v6367_v44 = vrot.slane %v6365_v56, 7  ;;  %v13905_v49 = vadd.f32 %v5666_v1, %v15696_v3  ;;  %v13351_v25 = vpop.f32.mrb[22].mxu0  ;;  %v14745_v47 = vld [vmem:[%s17452_s2 + $0x78] sm:$0xff]   ;;  %v15946_v56 = vpop.permute.xlu1 %6120 }
 0x344   : > { %v6189_v54 = vmul.f32 %v15804_v24, %v5973_v40  ;;  %v5974_v41 = vmax.f32 %v5938_v63, 0.0  ;;  %v6359_v43 = vor.u32 %v6358_v51, %v6355_v27  ;;  %13427 = vmatpush3.bf16.msra.mxu1 %v14743_v34  ;;  %v13906_v48 = vadd.f32 %v13351_v25, %v15698_v4  ;;  %v5669_v53 = vpop.f32.mrb[23].mxu0  ;;  %17577 = vst [vmem:[#allocation29_spill] sm:$0xff] %v15946_v56  ;;  %v15972_v1 = vpop.permute.xlu0 %6125 }
 0x345   : > { %v6192_v12 = vmul.f32 %v15852_v28, %v5976_v45  ;;  %v5901_v9 = vmul.f32 %v13904_v30, %v15749_v31  ;;  %v15941_v2 = vor.u32 %v6367_v44, %v6364_v37  ;;  %13428 = vmatprep.subr.bf16.mxu1 %v14744_v38  ;;  %v5899_v34 = vmul.f32 %v13905_v49, %v15749_v31 }
 0x346   : > { %v6190_v3 = vmul.f32 %v15817_v57, %v5974_v41  ;;  %v13907_v40 = vadd.f32 %v5669_v53, %v15700_v5  ;;  %v6360_v63 = vsel %vm6280_vm6, %v6350_v33, %v6359_v43  ;;  %v5902_v37 = vmul.f32 %v13906_v48, %v15749_v31  ;;  %17578 = vst [vmem:[#allocation30_spill] sm:$0xff] %v15972_v1 }
 0x347   : > { %v15952_v61 = vpack.c.bf16 %v6192_v12, %v6191_v32  ;;  %v5943_v4 = vadd.f32 %v15756_v36, %v5901_v9  ;;  %13393 = vmatmul.mubr.bf16.gmra.mrb[32].mxu1 %v6360_v63  ;;  %v6369_v27 = vsel %vm6280_vm6, %v6359_v43, %v15941_v2  ;;  %v5941_v41 = vadd.f32 %v15756_v36, %v5899_v34  ;;  %v15970_v43 = vld [vmem:[%s17452_s2 + $0x80] sm:$0xff]  }
 0x348   : > { %v15958_v51 = vpack.c.bf16 %v6190_v3, %v6189_v54  ;;  %v5900_v49 = vmul.f32 %v13907_v40, %v15749_v31  ;;  %13396 = vmatprep.mubr.bf16.mxu1 %v6369_v27  ;;  %13429 = vmatpush3.bf16.msra.mxu1 %v14744_v38  ;;  %v5944_v32 = vadd.f32 %v15756_v36, %v5902_v37  ;;  %v15982_v40 = vpop.permute.xlu1 %6130 }
 0x349   : > { %6236 = vst [vmem:[#allocation3 + $0x58] sm:$0xff] %v15952_v61  ;;  %v5979_v33 = vmax.f32 %v5943_v4, 0.0  ;;  %v17475_v45 = vshrl.u32 %v15952_v61, 16  ;;  %v17476_v30 = vshll.u32 %v15952_v61, 16  ;;  %13430 = vmatprep.subr.bf16.mxu1 %v14745_v47  ;;  %v5977_v38 = vmax.f32 %v5941_v41, 0.0  ;;  %v13354_v54 = vpop.f32.mrb[24].mxu0 }
 0x34a   : > { %6235 = vst [vmem:[#allocation3 + $0x50] sm:$0xff] %v15958_v51  ;;  %v5942_v44 = vadd.f32 %v15756_v36, %v5900_v49  ;;  %v17480_v25 = vshrl.u32 %v15958_v51, 16  ;;  %v17474_v12 = vshll.u32 %v15958_v51, 16  ;;  %v5980_v48 = vmax.f32 %v5944_v32, 0.0  ;;  %v5682_v3 = vpop.f32.mrb[25].mxu0  ;;  %17579 = vst [vmem:[#allocation31_spill] sm:$0xff] %v15982_v40 }
 0x34b   : > { %v6195_v9 = vmul.f32 %v15907_v15, %v5979_v33  ;;  %v13908_v53 = vadd.f32 %v13354_v54, %v15702_v6  ;;  %v6382_v34 = vrot.slane %v17475_v45, 6  ;;  %v6193_v63 = vmul.f32 %v15874_v39, %v5977_v38  ;;  %v13355_v27 = vpop.f32.mrb[26].mxu0  ;;  %v14750_v15 = vld [vmem:[%s17452_s2 + $0xa0] sm:$0xff]  }
 0x34c   : > { %v5978_v4 = vmax.f32 %v5942_v44, 0.0  ;;  %v13909_v37 = vadd.f32 %v5682_v3, %v15704_v7  ;;  %v6373_v41 = vrot.slane %v17480_v25, 6  ;;  %13431 = vmatpush3.bf16.msra.mxu1 %v14745_v47  ;;  %v6196_v49 = vmul.f32 %v15919_v60, %v5980_v48  ;;  %v5685_v32 = vpop.f32.mrb[27].mxu0 }
 0x34d   : > { %v5905_v6 = vmul.f32 %v13908_v53, %v15749_v31  ;;  %v13910_v33 = vadd.f32 %v13355_v27, %v15706_v8  ;;  %v6376_v54 = vrot.slane %v17474_v12, 7  ;;  %13468 = vmatprep.subr.bf16.mxu1 %v15970_v43  ;;  %v13911_v44 = vadd.f32 %v5685_v32, %v15708_v10  ;;  %v16003_v27 = vpop.permute.xlu0 %6135 }
 0x34e   : > { %v6194_v38 = vmul.f32 %v15885_v42, %v5978_v4  ;;  %v5903_v7 = vmul.f32 %v13909_v37, %v15749_v31  ;;  %v6385_v47 = vrot.slane %v17476_v30, 7  ;;  %v15999_v48 = vpack.c.bf16 %v6196_v49, %v6195_v9  ;;  %17580 = vst [vmem:[#allocation32_spill] sm:$0xff] %v16003_v27 }
 0x34f   : > { %v5947_v53 = vadd.f32 %v15756_v36, %v5905_v6  ;;  %v5906_v8 = vmul.f32 %v13910_v33, %v15749_v31  ;;  %v6377_v3 = vor.u32 %v6376_v54, %v6373_v41  ;;  %v5904_v37 = vmul.f32 %v13911_v44, %v15749_v31  ;;  %v16014_v41 = vpop.permute.xlu1 %6140 }
 0x350   : > { %v16005_v12 = vpack.c.bf16 %v6194_v38, %v6193_v63  ;;  %v5945_v4 = vadd.f32 %v15756_v36, %v5903_v7  ;;  %v6386_v45 = vor.u32 %v6385_v47, %v6382_v34  ;;  %6238 = vst [vmem:[#allocation3 + $0x68] sm:$0xff] %v15999_v48  ;;  %v17478_v6 = vshrl.u32 %v15999_v48, 16  ;;  %17581 = vst [vmem:[#allocation33_spill] sm:$0xff] %v16014_v41 }
 0x351   : > { %v5983_v10 = vmax.f32 %v5947_v53, 0.0  ;;  %v5948_v9 = vadd.f32 %v15756_v36, %v5906_v8  ;;  %v6378_v49 = vsel %vm6280_vm6, %v15941_v2, %v6377_v3  ;;  %v5946_v33 = vadd.f32 %v15756_v36, %v5904_v37  ;;  %v13358_v32 = vpop.f32.mrb[28].mxu0 }
 0x352   : > { %6237 = vst [vmem:[#allocation3 + $0x60] sm:$0xff] %v16005_v12  ;;  %v5981_v63 = vmax.f32 %v5945_v4, 0.0  ;;  %13397 = vmatmul.mubr.bf16.gmra.mrb[36].mxu1 %v6378_v49  ;;  %v6387_v34 = vsel %vm6280_vm6, %v6377_v3, %v6386_v45  ;;  %v17479_v54 = vshrl.u32 %v16005_v12, 16  ;;  %v13912_v2 = vadd.f32 %v13358_v32, %v15710_v11  ;;  %v5698_v44 = vpop.f32.mrb[29].mxu0 }
 0x353   : > { %v6199_v38 = vmul.f32 %v15972_v1, %v5983_v10  ;;  %v5984_v7 = vmax.f32 %v5948_v9, 0.0  ;;  %13400 = vmatprep.mubr.bf16.mxu1 %v6387_v34  ;;  %v17477_v47 = vshll.u32 %v16005_v12, 16  ;;  %v5982_v8 = vmax.f32 %v5946_v33, 0.0  ;;  %v13359_v37 = vpop.f32.mrb[30].mxu0  ;;  %v16032_v34 = vpop.permute.xlu0 %6145 }
 0x354   : > { %v6197_v53 = vmul.f32 %v15934_v52, %v5981_v63  ;;  %v13913_v4 = vadd.f32 %v5698_v44, %v15712_v13  ;;  %v6391_v3 = vrot.slane %v17479_v54, 6  ;;  %v5909_v10 = vmul.f32 %v13912_v2, %v15749_v31  ;;  %v5701_v11 = vpop.f32.mrb[31].mxu0  ;;  %17582 = vst [vmem:[#allocation34_spill] sm:$0xff] %v16032_v34  ;;  %v16043_v30 = vpop.permute.xlu1 %6150 }
 0x355   : > { %v6200_v49 = vmul.f32 %v15982_v40, %v5984_v7  ;;  %v13914_v9 = vadd.f32 %v13359_v37, %v15714_v14  ;;  %v6394_v32 = vrot.slane %v17477_v47, 7  ;;  %v6198_v63 = vmul.f32 %v15946_v56, %v5982_v8  ;;  %17583 = vst [vmem:[#allocation35_spill] sm:$0xff] %v16043_v30 }
 0x356   : > { %v5907_v13 = vmul.f32 %v13913_v4, %v15749_v31  ;;  %v13915_v33 = vadd.f32 %v5701_v11, %v15716_v16  ;;  %v6400_v44 = vrot.slane %v17478_v6, 6  ;;  %v5951_v2 = vadd.f32 %v15756_v36, %v5909_v10 }
 0x357   : > { %v16039_v7 = vpack.c.bf16 %v6200_v49, %v6199_v38  ;;  %v5910_v14 = vmul.f32 %v13914_v9, %v15749_v31  ;;  %v6395_v37 = vor.u32 %v6394_v32, %v6391_v3  ;;  %v16045_v47 = vpack.c.bf16 %v6198_v63, %v6197_v53  ;;  %v16062_v6 = vpop.permute.xlu0 %6155 }
 0x358   : > { %v5949_v8 = vadd.f32 %v15756_v36, %v5907_v13  ;;  %v5908_v4 = vmul.f32 %v13915_v33, %v15749_v31  ;;  %v17481_v16 = vshll.u32 %v15999_v48, 16  ;;  %v5987_v11 = vmax.f32 %v5951_v2, 0.0  ;;  %17584 = vst [vmem:[#allocation36_spill] sm:$0xff] %v16062_v6 }
 0x359   : > { %6240 = vst [vmem:[#allocation3 + $0x78] sm:$0xff] %v16039_v7  ;;  %v5952_v38 = vadd.f32 %v15756_v36, %v5910_v14  ;;  %v6396_v49 = vsel %vm6280_vm6, %v6386_v45, %v6395_v37  ;;  %6239 = vst [vmem:[#allocation3 + $0x70] sm:$0xff] %v16045_v47  ;;  %v13362_v9 = vpop.f32.mrb[32].mxu0  ;;  %v17488_v63 = vshrl.u32 %v16045_v47, 16  ;;  %v17487_v14 = vshll.u32 %v16045_v47, 16 }
 0x35a   : > { %v5985_v3 = vmax.f32 %v5949_v8, 0.0  ;;  %v5950_v53 = vadd.f32 %v15756_v36, %v5908_v4  ;;  %13401 = vmatmul.mubr.bf16.gmra.mrb[40].mxu1 %v6396_v49  ;;  %v6403_v32 = vrot.slane %v17481_v16, 7  ;;  %v6203_v13 = vmul.f32 %v16032_v34, %v5987_v11  ;;  %v5714_v45 = vpop.f32.mrb[33].mxu0 }
 0x35b   : > { %v5988_v33 = vmax.f32 %v5952_v38, 0.0  ;;  %v13916_v2 = vadd.f32 %v13362_v9, %v15718_v17  ;;  %v13917_v49 = vadd.f32 %v5714_v45, %v15720_v18  ;;  %v13363_v54 = vpop.f32.mrb[34].mxu0  ;;  %v6409_v17 = vrot.slane %v17488_v63, 6  ;;  %v16071_v9 = vpop.permute.xlu1 %6160  ;;  %v7710_v63 = vld [vmem:[#allocation3 + $0x8] sm:$0x80] }
 0x35c   : > { %v6201_v8 = vmul.f32 %v16003_v27, %v5985_v3  ;;  %v5986_v4 = vmax.f32 %v5950_v53, 0.0  ;;  %v6404_v25 = vor.u32 %v6403_v32, %v6400_v44  ;;  %v13918_v11 = vadd.f32 %v13363_v54, %v15722_v19  ;;  %v5717_v38 = vpop.f32.mrb[35].mxu0  ;;  %17585 = vst [vmem:[#allocation37_spill] sm:$0xff] %v16071_v9 }
 0x35d   : > { %v6204_v16 = vmul.f32 %v16043_v30, %v5988_v33  ;;  %v5913_v5 = vmul.f32 %v13916_v2, %v15749_v31  ;;  %v5911_v3 = vmul.f32 %v13917_v49, %v15749_v31  ;;  %v13919_v18 = vadd.f32 %v5717_v38, %v15724_v20  ;;  %v16092_v49 = vpop.permute.xlu0 %6165 }
 0x35e   : > { %v6202_v10 = vmul.f32 %v16014_v41, %v5986_v4  ;;  %v6405_v44 = vsel %vm6280_vm6, %v6395_v37, %v6404_v25  ;;  %v5914_v19 = vmul.f32 %v13918_v11, %v15749_v31  ;;  %v6412_v54 = vrot.slane %v17487_v14, 7  ;;  %17587 = vst [vmem:[#allocation38_spill] sm:$0xff] %v16092_v49  ;;  %v16188_v14 = vld [vmem:[#allocation3] sm:$0xff] }
 0x35f   : > { %v16077_v53 = vpack.c.bf16 %v6204_v16, %v6203_v13  ;;  %v5955_v32 = vadd.f32 %v15756_v36, %v5913_v5  ;;  %13404 = vmatprep.mubr.bf16.mxu1 %v6405_v44  ;;  %v5953_v2 = vadd.f32 %v15756_v36, %v5911_v3  ;;  %v5912_v45 = vmul.f32 %v13919_v18, %v15749_v31  ;;  %v16102_v44 = vpop.permute.xlu1 %6170 }
 0x360   : > { %v16083_v33 = vpack.c.bf16 %v6202_v10, %v6201_v8  ;;  %v17586_v20 = vshrl.u32 %v16039_v7, 16  ;;  %v5956_v5 = vadd.f32 %v15756_v36, %v5914_v19  ;;  %v6413_v16 = vor.u32 %v6412_v54, %v6409_v17  ;;  %17588 = vst [vmem:[#allocation39_spill] sm:$0xff] %v16102_v44  ;;  %v16337_v39 = vld [vmem:[#allocation3 + $0x70] sm:$0xff]  ;;  %v16346_v57 = vld [vmem:[#allocation3 + $0x78] sm:$0xff] }
 0x361   : > { %6242 = vst [vmem:[#allocation3 + $0x88] sm:$0xff] %v16077_v53  ;;  %v5991_v37 = vmax.f32 %v5955_v32, 0.0  ;;  %v17482_v13 = vshll.u32 %v16039_v7, 16  ;;  %v5989_v10 = vmax.f32 %v5953_v2, 0.0  ;;  %v5954_v8 = vadd.f32 %v15756_v36, %v5912_v45 }
 0x362   : > { %v6418_v4 = vrot.slane %v17586_v20, 6  ;;  %6241 = vst [vmem:[#allocation3 + $0x80] sm:$0xff] %v16083_v33  ;;  %v17486_v31 = vshrl.u32 %v16083_v33, 16  ;;  %v17483_v11 = vshll.u32 %v16083_v33, 16  ;;  %v5992_v3 = vmax.f32 %v5956_v5, 0.0 }
 0x363   : > { %v6207_v38 = vmul.f32 %v16092_v49, %v5991_v37  ;;  %v6414_v18 = vsel %vm6280_vm6, %v6404_v25, %v6413_v16  ;;  %v6421_v17 = vrot.slane %v17482_v13, 7  ;;  %v6205_v32 = vmul.f32 %v16062_v6, %v5989_v10 }
 0x364   : > { %v5990_v19 = vmax.f32 %v5954_v8, 0.0  ;;  %13405 = vmatmul.mubr.bf16.gmra.mrb[44].mxu1 %v6414_v18  ;;  %v6427_v36 = vrot.slane %v17486_v31, 6  ;;  %v6430_v54 = vrot.slane %v17483_v11, 7  ;;  %v6208_v2 = vmul.f32 %v16102_v44, %v5992_v3 }
 0x365   : > { %v6422_v45 = vor.u32 %v6421_v17, %v6418_v4  ;;  %v17485_v25 = vshrl.u32 %v16077_v53, 16  ;;  %v17484_v20 = vshll.u32 %v16077_v53, 16  ;;  %v17589_v10 = vrot.slane %v15809_v50, 7 }
 0x366   : > { %v6206_v37 = vmul.f32 %v16071_v9, %v5990_v19  ;;  %v6431_v5 = vor.u32 %v6430_v54, %v6427_v36  ;;  %v17590_v8 = vrot.slane %v15819_v58, 7  ;;  %v17591_v13 = vrot.slane %v15864_v26, 7 }
 0x367   : > { %v17592_v11 = vmov %v17589_v10  ;;  %v6226_v3 = vpack.c.bf16 %v6208_v2, %v6207_v38  ;;  %v6423_v17 = vsel %vm6280_vm6, %v6413_v16, %v6422_v45  ;;  %v6436_v19 = vrot.slane %v17485_v25, 6 }
 0x368   : > { %v16118_v18 = vsel %vm6785_vm7, %v17590_v8, %v17589_v10  ;;  %v16125_v4 = vsel %vm6785_vm7, %v17592_v11, %v17591_v13  ;;  %v6439_v36 = vrot.slane %v17484_v20, 7  ;;  %v16132_v58 = vpack.c.bf16 %v6206_v37, %v6205_v32  ;;  %13408 = vmatprep.mubr.bf16.mxu1 %v6423_v17  ;;  %v16331_v56 = vld [vmem:[#allocation3 + $0x88] sm:$0xff] }
 0x369   : > { %v6432_v54 = vsel %vm6280_vm6, %v6422_v45, %v6431_v5  ;;  %v6799_v10 = vrot.slane %v15857_v22, 7  ;;  %v6801_v50 = vrot.slane %v15909_v0, 7  ;;  %6244 = vst [vmem:[#allocation3 + $0x98] sm:$0xff] %v6226_v3  ;;  %v6803_v11 = vrot.slane %v15900_v35, 7 }
 0x36a   : > { %v6440_v13 = vor.u32 %v6439_v36, %v6436_v19  ;;  %v6805_v16 = vrot.slane %v15958_v51, 7  ;;  %v6807_v38 = vrot.slane %v15952_v61, 7  ;;  %6243 = vst [vmem:[#allocation3 + $0x90] sm:$0xff] %v16132_v58  ;;  %v17593_v32 = vrot.slane %v15864_v26, 7 }
 0x36b   : > { %v16147_v45 = vsel %vm6785_vm7, %v6799_v10, %v6801_v50  ;;  %v6809_v22 = vrot.slane %v16005_v12, 7  ;;  %v6811_v0 = vrot.slane %v15999_v48, 7  ;;  %v16153_v37 = vsel %vm6785_vm7, %v6801_v50, %v6803_v11 }
 0x36c   : > { %v16144_v2 = vsel %vm6785_vm7, %v17593_v32, %v6799_v10  ;;  %v6441_v35 = vsel %vm6280_vm6, %v6431_v5, %v6440_v13  ;;  %v16156_v8 = vsel %vm6785_vm7, %v6803_v11, %v6805_v16  ;;  %v16159_v26 = vsel %vm6785_vm7, %v6805_v16, %v6807_v38  ;;  %13409 = vmatmul.mubr.bf16.gmra.mrb[48].mxu1 %v6432_v54 }
 0x36d   : > { %v16162_v3 = vsel %vm6785_vm7, %v6807_v38, %v6809_v22  ;;  %v16165_v17 = vsel %vm6785_vm7, %v6809_v22, %v6811_v0  ;;  %v6813_v19 = vrot.slane %v16045_v47, 7  ;;  %v6815_v5 = vrot.slane %v16039_v7, 7  ;;  %13412 = vmatprep.mubr.bf16.mxu1 %v6441_v35  ;;  %v6730_v38 = vld [vmem:[#allocation3] sm:$0x80]  ;;  %v16185_v22 = vld [vmem:[#allocation3 + $0x10] sm:$0xff] }
 0x36e   : > { %v6817_v36 = vrot.slane %v16083_v33, 7  ;;  %v17490_v10 = vrot.slane %v16077_v53, 7  ;;  %17594 = vst [vmem:[#allocation40_spill] sm:$0xff] %v16185_v22  ;;  %v6786_v25 = vrot.slane %v6730_v38, 7  ;;  %v17596_v44 = vshrl.u32 %v15952_v61, 16 }
 0x36f   : > { %v16172_v50 = vsel %vm6785_vm7, %v6811_v0, %v6813_v19  ;;  %v16175_v54 = vsel %vm6785_vm7, %v6813_v19, %v6815_v5  ;;  %v17494_v19 = vshrl.u32 %v16185_v22, 16  ;;  %v17604_v30 = vrot.slane %v15784_v55, 7 }
 0x370   : > { %v16178_v11 = vsel %vm6785_vm7, %v6815_v5, %v6817_v36  ;;  %v16183_v16 = vsel %vm6785_vm7, %v6817_v36, %v17490_v10  ;;  %v6787_v5 = vrot.slane %v16188_v14, 7  ;;  %v7298_v49 = vrot.slane %v17596_v44, 7 }
 0x371   : > { %v6263_v32 = vld [vmem:[#allocation3 + $0x90] sm:$0x7f]  ;;  %v16195_v6 = vrot.slane %v17494_v19, 7  ;;  %v17601_v44 = vshll.u32 %v16005_v12, 16  ;;  %v17606_v55 = vshll.u32 %v16045_v47, 16  ;;  %v7352_v34 = vshrl.u32 %v16132_v58, 16 }
 0x372   : > { %v6443_v35 = vshrl.u32 %v6263_v32, 16  ;;  %v6446_v20 = vshll.u32 %v6263_v32, 16  ;;  %v6788_v36 = vsel %vm6785_vm7, %v6786_v25, %v6787_v5  ;;  %v7747_v32 = vshrl.u32 %v7710_v63, 16 }
 0x373   : > { %v17617_v24 = vshll.u32 %v16185_v22, 16 }
 0x374   : > { %v6445_v0 = vrot.slane %v6443_v35, 6  ;;  %v6448_v31 = vrot.slane %v6446_v20, 7  ;;  %v17595_v20 = vshrl.u32 %v15958_v51, 16  ;;  %v17498_v35 = vshll.u32 %v16185_v22, 16 }
 0x375   : > { %v7749_v41 = vrot.slane %v7747_v32, 7  ;;  %v17605_v32 = vshrl.u32 %v16039_v7, 16  ;;  %v8654_v28 = vrot.slane %v17617_v24, 1  ;;  %v17621_v24 = vshrl.u32 %v16185_v22, 16 }
 0x376   : > { %v6449_v9 = vor.u32 %v6448_v31, %v6445_v0  ;;  %v7290_v38 = vrot.slane %v17595_v20, 7  ;;  %v17597_v31 = vshrl.u32 %v16005_v12, 16  ;;  %v17599_v0 = vshrl.u32 %v15999_v48, 16 }
 0x378   : > { %v6450_v10 = vsel %vm6280_vm6, %v6440_v13, %v6449_v9  ;;  %v7306_v25 = vrot.slane %v17597_v31, 7  ;;  %v17598_v9 = vshll.u32 %v15958_v51, 16  ;;  %v7314_v63 = vrot.slane %v17599_v0, 7  ;;  %v16219_v31 = vld [vmem:[#allocation3 + $0x48] sm:$0xff] }
 0x379   : > { %13413 = vmatmul.mubr.bf16.gmra.mrb[52].mxu1 %v6450_v10  ;;  %v16213_v10 = vor.u32 %v17498_v35, %v16195_v6  ;;  %v17602_v51 = vshll.u32 %v15999_v48, 16  ;;  %v17603_v0 = vshrl.u32 %v16045_v47, 16  ;;  %v6790_v35 = vsel %vm6785_vm7, %v6787_v5, %v17604_v30  ;;  %v14747_v48 = vld [vmem:[%s17452_s2 + $0x88] sm:$0xff]  }
 0x37a   : > { %13432 = vmatprep.mubr.bf16.mxu1 %v6788_v36  ;;  %v16206_v13 = vor.u32 %v7290_v38, %v17598_v9  ;;  %v17600_v36 = vshll.u32 %v15952_v61, 16  ;;  %v7309_v19 = vor.u32 %v7306_v25, %v17601_v44  ;;  %v16236_v44 = vld [vmem:[#allocation3 + $0x50] sm:$0xff]  ;;  %v17607_v5 = vshrl.u32 %v16083_v33, 16 }
 0x37b   : > { %v7317_v9 = vor.u32 %v7314_v63, %v17602_v51  ;;  %v7322_v27 = vrot.slane %v17603_v0, 7  ;;  %v17609_v0 = vshll.u32 %v16039_v7, 16  ;;  %v16268_v7 = vld [vmem:[#allocation3 + $0x18] sm:$0xff] }
 0x37c   : > { %v7301_v20 = vor.u32 %v7298_v49, %v17600_v36  ;;  %v16232_v12 = vsel %vm7210_vm8, %v7298_v49, %v7309_v19  ;;  %v7330_v36 = vrot.slane %v17605_v32, 7  ;;  %v17608_v49 = vshrl.u32 %v16077_v53, 16 }
 0x37d   : > { %v16242_v51 = vsel %vm7210_vm8, %v7306_v25, %v7317_v9  ;;  %v7325_v30 = vor.u32 %v7322_v27, %v17606_v55  ;;  %v16256_v25 = vsel %vm7210_vm8, %v7749_v41, %v16213_v10  ;;  %v17611_v9 = vshll.u32 %v16083_v33, 16  ;;  %v14748_v33 = vld [vmem:[%s17452_s2 + $0x90] sm:$0xff]  }
 0x37e   : > { %v16229_v61 = vsel %vm7210_vm8, %v7290_v38, %v7301_v20  ;;  %v7338_v38 = vrot.slane %v17607_v5, 7  ;;  %v7346_v19 = vrot.slane %v17608_v49, 7  ;;  %v7333_v32 = vor.u32 %v7330_v36, %v17609_v0  ;;  %17610 = vst [vmem:[#allocation41_spill] sm:$0xff] %v16256_v25  ;;  %v16294_v0 = vld [vmem:[#allocation3 + $0x30] sm:$0xff] }
 0x37f   : > { %v16259_v47 = vsel %vm7210_vm8, %v7314_v63, %v7325_v30  ;;  %v17612_v5 = vshll.u32 %v16077_v53, 16  ;;  %v17500_v20 = vshrl.u32 %v16236_v44, 16  ;;  %v7355_v63 = vshll.u32 %v16132_v58, 16  ;;  %v16279_v30 = vld [vmem:[#allocation3 + $0x20] sm:$0xff]  ;;  %v16292_v58 = vld [vmem:[#allocation3 + $0x28] sm:$0xff] }
 0x380   : > { %v7341_v55 = vor.u32 %v7338_v38, %v17611_v9  ;;  %v16271_v41 = vsel %vm7210_vm8, %v7322_v27, %v7333_v32  ;;  %v16329_v9 = vld [vmem:[#allocation3 + $0x68] sm:$0xff]  ;;  %v17619_v46 = vshll.u32 %v16279_v30, 16  ;;  %v17623_v40 = vshrl.u32 %v16279_v30, 16 }
 0x381   : > { %13433 = vmatmul.mubr.bf16.vlgmr.msra.gmra.mrb[20].mxu1 %v6790_v35  ;;  %v7349_v49 = vor.u32 %v7346_v19, %v17612_v5  ;;  %v16273_v35 = vrot.slane %v7352_v34, 7  ;;  %v16289_v27 = vrot.slane %v17500_v20, 7  ;;  %v17504_v34 = vshll.u32 %v16236_v44, 16  ;;  %v16298_v5 = vld [vmem:[#allocation3 + $0x38] sm:$0xff] }
 0x382   : > { %13436 = vmatprep.mubr.bf16.mxu1 %v15850_v29  ;;  %13469 = vmatpush3.bf16.msra.mxu1 %v15970_v43  ;;  %v16282_v29 = vsel %vm7210_vm8, %v7330_v36, %v7341_v55  ;;  %v16300_v36 = vld [vmem:[#allocation3 + $0x40] sm:$0xff]  ;;  %v14749_v20 = vld [vmem:[%s17452_s2 + $0x98] sm:$0xff]   ;;  %v8667_v42 = vrot.slane %v17619_v46, 1  ;;  %v17622_v46 = vshrl.u32 %v16268_v7, 16 }
 0x383   : > { %13470 = vmatprep.subr.bf16.mxu1 %v14747_v48  ;;  %v16285_v43 = vsel %vm7210_vm8, %v7338_v38, %v7349_v49  ;;  %17613 = vst [vmem:[#allocation42_spill] sm:$0xff] %v16289_v27  ;;  %v7357_v32 = vor.u32 %v7355_v63, %v16273_v35  ;;  %v17614_v38 = vshrl.u32 %v16219_v31, 16  ;;  %v7820_v49 = vor.u32 %v17504_v34, %v16289_v27  ;;  %v16327_v63 = vld [vmem:[#allocation3 + $0x60] sm:$0xff]  ;;  %v16339_v34 = vld [vmem:[#allocation3 + $0x98] sm:$0xff] }
 0x384   : > { %17616 = vst [vmem:[#allocation44_spill] sm:$0xff] %v16339_v34 }
 0x385   : > { %v16304_v55 = vrot.slane %v17614_v38, 7  ;;  %v16316_v52 = vsel %vm7210_vm8, %v7346_v19, %v7357_v32  ;;  %v16318_v38 = vld [vmem:[#allocation3 + $0x58] sm:$0xff]  ;;  %v17618_v19 = vshll.u32 %v16268_v7, 16 }
 0x386   : > { %13471 = vmatpush3.bf16.msra.mxu1 %v14747_v48  ;;  %v17517_v48 = vshrl.u32 %v16339_v34, 16 }
 0x387   : > { %13472 = vmatprep.subr.bf16.mxu1 %v14748_v33  ;;  %v16325_v1 = vsel %vm7210_vm8, %v16304_v55, %v7820_v49  ;;  %v8659_v62 = vrot.slane %v17618_v19, 1  ;;  %v14751_v19 = vld [vmem:[%s17452_s2 + $0xa8] sm:$0xff]  }
 0x388   : > { %17615 = vst [vmem:[#allocation43_spill] sm:$0xff] %v16325_v1  ;;  %v7889_v60 = vrot.slane %v17517_v48, 7  ;;  %v8655_v48 = vor.u32 %v8654_v28, %v17621_v24  ;;  %v8671_v1 = vor.u32 %v8667_v42, %v17623_v40  ;;  %v17626_v28 = vshll.u32 %v16294_v0, 16 }
 0x389   : > { %13437 = vmatmul.mubr.bf16.gmra.mrb[24].mxu1 %v15895_v21  ;;  %v17515_v21 = vshrl.u32 %v16331_v56, 16 }
 0x38a   : > { %13440 = vmatprep.mubr.bf16.mxu1 %v16118_v18  ;;  %13473 = vmatpush3.bf16.msra.mxu1 %v14748_v33  ;;  %v16359_v33 = vld [vmem:[#allocation3 + $0x80] sm:$0xff]  ;;  %v7890_v18 = vshll.u32 %v16339_v34, 16  ;;  %v16396_v22 = vsel %vm3486_vm3, %v8655_v48, %v8659_v62  ;;  %v8683_v24 = vrot.slane %v17626_v28, 1 }
 0x38b   : > { %13474 = vmatprep.subr.bf16.mxu1 %v14749_v20  ;;  %v16366_v49 = vrot.slane %v17515_v21, 7  ;;  %v17624_v21 = vshll.u32 %v16292_v58, 16  ;;  %17625 = vst [vmem:[#allocation46_spill] sm:$0xff] %v16396_v22 }
 0x38c   : > { %v7892_v27 = vor.u32 %v7890_v18, %v7889_v60 }
 0x38d   : > { %v16381_v23 = vsel %vm7210_vm8, %v16366_v49, %v7357_v32  ;;  %v8675_v25 = vrot.slane %v17624_v21, 1 }
 0x38e   : > { %13475 = vmatpush3.bf16.msra.mxu1 %v14749_v20  ;;  %17620 = vst [vmem:[#allocation45_spill] sm:$0xff] %v16381_v23  ;;  %v8663_v20 = vor.u32 %v8659_v62, %v17622_v46  ;;  %v17627_v23 = vshll.u32 %v16298_v5, 16  ;;  %v16405_v46 = vsel %vm7210_vm8, %v16273_v35, %v7892_v27  ;;  %v17631_v62 = vshrl.u32 %v16292_v58, 16 }
 0x38f   : > { %13476 = vmatprep.subr.bf16.mxu1 %v14750_v15  ;;  %17628 = vst [vmem:[#allocation47_spill] sm:$0xff] %v16405_v46  ;;  %v16411_v21 = vsel %vm3486_vm3, %v8671_v1, %v8675_v25  ;;  %v17634_v35 = vshll.u32 %v16300_v36, 16  ;;  %v14752_v1 = vld [vmem:[%s17452_s2 + $0xb0] sm:$0xff]  }
 0x390   : > { %v8691_v60 = vrot.slane %v17627_v23, 1  ;;  %v16408_v40 = vsel %vm3486_vm3, %v8663_v20, %v8667_v42  ;;  %17630 = vst [vmem:[#allocation49_spill] sm:$0xff] %v16411_v21  ;;  %v8679_v48 = vor.u32 %v8675_v25, %v17631_v62  ;;  %v17632_v23 = vshrl.u32 %v16294_v0, 16 }
 0x391   : > { %13441 = vmatmul.mubr.bf16.gmra.mrb[28].mxu1 %v16125_v4  ;;  %17629 = vst [vmem:[#allocation48_spill] sm:$0xff] %v16408_v40  ;;  %v17633_v4 = vshrl.u32 %v16298_v5, 16  ;;  %v8699_v27 = vrot.slane %v17634_v35, 1  ;;  %v17635_v42 = vshll.u32 %v16219_v31, 16  ;;  %v17639_v62 = vshll.u32 %v16318_v38, 16 }
 0x392   : > { %13444 = vmatprep.mubr.bf16.mxu1 %v16144_v2  ;;  %13477 = vmatpush3.bf16.msra.mxu1 %v14750_v15  ;;  %v8687_v28 = vor.u32 %v8683_v24, %v17632_v23  ;;  %v16428_v2 = vsel %vm3486_vm3, %v8679_v48, %v8683_v24  ;;  %v17637_v15 = vshll.u32 %v16236_v44, 16  ;;  %v17643_v40 = vshrl.u32 %v16300_v36, 16 }
 0x393   : > { %v8695_v32 = vor.u32 %v8691_v60, %v17633_v4  ;;  %v8707_v20 = vrot.slane %v17635_v42, 1  ;;  %13478 = vmatprep.subr.bf16.mxu1 %v14751_v19  ;;  %17636 = vst [vmem:[#allocation50_spill] sm:$0xff] %v16428_v2  ;;  %v8723_v23 = vrot.slane %v17639_v62, 1  ;;  %v17640_v4 = vshll.u32 %v16327_v63, 16 }
 0x394   : > { %v16432_v25 = vrot.slane %v17637_v15, 1  ;;  %v16439_v42 = vsel %vm3486_vm3, %v8687_v28, %v8691_v60  ;;  %v8703_v24 = vor.u32 %v8699_v27, %v17643_v40  ;;  %v17644_v48 = vshrl.u32 %v16219_v31, 16 }
 0x395   : > { %v8731_v35 = vrot.slane %v17640_v4, 1  ;;  %17641 = vst [vmem:[#allocation52_spill] sm:$0xff] %v16439_v42  ;;  %v16442_v21 = vsel %vm3486_vm3, %v8695_v32, %v8699_v27  ;;  %v17645_v15 = vshrl.u32 %v16236_v44, 16  ;;  %v17646_v62 = vshrl.u32 %v16318_v38, 16 }
 0x396   : > { %17638 = vst [vmem:[#allocation51_spill] sm:$0xff] %v16432_v25  ;;  %17642 = vst [vmem:[#allocation53_spill] sm:$0xff] %v16442_v21  ;;  %v8711_v2 = vor.u32 %v8707_v20, %v17644_v48  ;;  %v17647_v4 = vshrl.u32 %v16327_v63, 16  ;;  %v17648_v28 = vshll.u32 %v16329_v9, 16  ;;  %13479 = vmatpush3.bf16.msra.mxu1 %v14751_v19  ;;  %v16458_v21 = vsel %vm3486_vm3, %v8703_v24, %v8707_v20 }
 0x397   : > { %v8719_v22 = vor.u32 %v16432_v25, %v17645_v15  ;;  %v8727_v46 = vor.u32 %v8723_v23, %v17646_v62  ;;  %17649 = vst [vmem:[#allocation54_spill] sm:$0xff] %v16458_v21  ;;  %v17651_v27 = vshll.u32 %v16337_v39, 16  ;;  %v17652_v15 = vshll.u32 %v16346_v57, 16  ;;  %13480 = vmatprep.subr.bf16.mxu1 %v14752_v1 }
 0x398   : > { %v8735_v60 = vor.u32 %v8731_v35, %v17647_v4  ;;  %v8739_v32 = vrot.slane %v17648_v28, 1  ;;  %v16462_v40 = vsel %vm3486_vm3, %v8711_v2, %v16432_v25  ;;  %v14753_v4 = vld [vmem:[%s17452_s2 + $0xb8] sm:$0xff]   ;;  %v17656_v24 = vshrl.u32 %v16329_v9, 16 }
 0x399   : > { %17650 = vst [vmem:[#allocation55_spill] sm:$0xff] %v16462_v40  ;;  %v8747_v48 = vrot.slane %v17651_v27, 1  ;;  %v8755_v62 = vrot.slane %v17652_v15, 1  ;;  %v16472_v19 = vsel %vm3486_vm3, %v8719_v22, %v8723_v23  ;;  %v16475_v20 = vsel %vm3486_vm3, %v8727_v46, %v8731_v35  ;;  %13445 = vmatmul.mubr.bf16.gmra.mrb[32].mxu1 %v16147_v45  ;;  %v16506_v45 = vld [vmem:[%s17452_s2 + $0xc0] sm:$0xff]  }
 0x39a   : > { %17653 = vst [vmem:[#allocation56_spill] sm:$0xff] %v16472_v19  ;;  %17654 = vst [vmem:[#allocation57_spill] sm:$0xff] %v16475_v20  ;;  %v16478_v2 = vsel %vm3486_vm3, %v8735_v60, %v8739_v32  ;;  %v8743_v28 = vor.u32 %v8739_v32, %v17656_v24  ;;  %v17657_v27 = vshrl.u32 %v16337_v39, 16  ;;  %v17658_v25 = vshrl.u32 %v16346_v57, 16  ;;  %13448 = vmatprep.mubr.bf16.mxu1 %v16153_v37 }
 0x39b   : > { %17655 = vst [vmem:[#allocation58_spill] sm:$0xff] %v16478_v2  ;;  %v17659_v21 = vshll.u32 %v16359_v33, 16  ;;  %v17660_v22 = vshll.u32 %v16331_v56, 16  ;;  %v8787_v35 = vrot.slane %v7890_v18, 1  ;;  %13481 = vmatpush3.bf16.msra.mxu1 %v14752_v1  ;;  %v17665_v18 = vshrl.u32 %v16331_v56, 16 }
 0x39c   : > { %v8751_v15 = vor.u32 %v8747_v48, %v17657_v27  ;;  %v8759_v40 = vor.u32 %v8755_v62, %v17658_v25  ;;  %v16492_v46 = vsel %vm3486_vm3, %v8743_v28, %v8747_v48  ;;  %13482 = vmatprep.subr.bf16.mxu1 %v14753_v4  ;;  %v17666_v37 = vshrl.u32 %v16339_v34, 16  ;;  %v7174_v27 = vld [vmem:[#allocation3] sm:$0x80] }
 0x39d   : > { %v8763_v42 = vrot.slane %v17659_v21, 1  ;;  %v8771_v23 = vrot.slane %v17660_v22, 1  ;;  %17661 = vst [vmem:[#allocation59_spill] sm:$0xff] %v16492_v46  ;;  %v17664_v21 = vshrl.u32 %v16359_v33, 16  ;;  %v16526_v22 = vld [vmem:[#allocation3 + $0x20] sm:$0xff] }
 0x39e   : > { %v16496_v60 = vsel %vm3486_vm3, %v8751_v15, %v8755_v62  ;;  %v16512_v1 = vor.u32 %v8787_v35, %v17666_v37  ;;  %17669 = vst [vmem:[#allocation64_spill] sm:$0xff] %v16526_v22  ;;  %v16641_v34 = vld [vmem:[#allocation3 + $0x60] sm:$0xff] }
 0x39f   : > { %17662 = vst [vmem:[#allocation60_spill] sm:$0xff] %v16496_v60  ;;  %v16499_v25 = vsel %vm3486_vm3, %v8759_v40, %v8763_v42  ;;  %v8767_v32 = vor.u32 %v8763_v42, %v17664_v21  ;;  %v8775_v48 = vor.u32 %v8771_v23, %v17665_v18  ;;  %v16517_v40 = vld [vmem:[#allocation3 + $0x90] sm:$0xff]  ;;  %13483 = vmatpush3.bf16.msra.mxu1 %v14753_v4  ;;  %v16528_v4 = vld [vmem:[#allocation3 + $0x28] sm:$0xff]  ;;  %17699 = vst [vmem:[#allocation77_spill] sm:$0xff] %v16641_v34 }
 0x3a0   : > { %17663 = vst [vmem:[#allocation61_spill] sm:$0xff] %v16499_v25  ;;  %17667 = vst [vmem:[#allocation62_spill] sm:$0xff] %v16512_v1  ;;  %13520 = vmatprep.subr.bf16.mxu1 %v16506_v45  ;;  %v8777_v42 = vshll.u32 %v16517_v40, 16  ;;  %v8781_v28 = vshrl.u32 %v16517_v40, 16  ;;  %v16530_v21 = vld [vmem:[#allocation3 + $0x30] sm:$0xff] }
 0x3a1   : > { %v16515_v62 = vsel %vm3486_vm3, %v8767_v32, %v8771_v23  ;;  %13449 = vmatmul.mubr.bf16.gmra.mrb[36].mxu1 %v16156_v8  ;;  %17670 = vst [vmem:[#allocation65_spill] sm:$0xff] %v16528_v4  ;;  %v7212_v23 = vshrl.u32 %v7174_v27, 16  ;;  %17671 = vst [vmem:[#allocation66_spill] sm:$0xff] %v16530_v21  ;;  %v16532_v32 = vld [vmem:[#allocation3 + $0x38] sm:$0xff]  ;;  %v16534_v8 = vld [vmem:[#allocation3 + $0x40] sm:$0xff]  ;;  %v17689_v25 = vshrl.u32 %v16530_v21, 16 }
 0x3a2   : > { %17668 = vst [vmem:[#allocation63_spill] sm:$0xff] %v16515_v62  ;;  %13452 = vmatprep.mubr.bf16.mxu1 %v16159_v26  ;;  %v8779_v24 = vrot.slane %v8777_v42, 1  ;;  %17672 = vst [vmem:[#allocation67_spill] sm:$0xff] %v16532_v32  ;;  %v16536_v26 = vld [vmem:[#allocation3 + $0x48] sm:$0xff]  ;;  %v9743_v42 = vrot.slane %v16530_v21, 1  ;;  %v9747_v27 = vrot.slane %v16534_v8, 1 }
 0x3a3   : > { %v17698_v19 = vshll.u32 %v16536_v26, 16 }
 0x3a4   : > { %v8783_v15 = vor.u32 %v8781_v28, %v8779_v24  ;;  %v16544_v37 = vsel %vm3486_vm3, %v8775_v48, %v8779_v24  ;;  %v9745_v28 = vrot.slane %v16532_v32, 1 }
 0x3a5   : > { %17674 = vst [vmem:[#allocation69_spill] sm:$0xff] %v16544_v37  ;;  %v6748_v37 = vld [vmem:[#allocation3 + $0x90] sm:$0x7f] }
 0x3a6   : > { %v16539_v18 = vsel %vm3486_vm3, %v8783_v15, %v8787_v35  ;;  %v17525_v35 = vrot.slane %v16536_v26, 1  ;;  %v7214_v15 = vrot.slane %v7212_v23, 7  ;;  %v16559_v48 = vsel %vm4779_vm4, %v9743_v42, %v9745_v28 }
 0x3a7   : > { %17673 = vst [vmem:[#allocation68_spill] sm:$0xff] %v16539_v18  ;;  %17677 = vst [vmem:[#allocation72_spill] sm:$0xff] %v16559_v48  ;;  %v16562_v24 = vsel %vm4779_vm4, %v9745_v28, %v9747_v27  ;;  %v17681_v28 = vshrl.u32 %v16526_v22, 16  ;;  %v17684_v23 = vshrl.u32 %v16279_v30, 16 }
 0x3a8   : > { %17678 = vst [vmem:[#allocation73_spill] sm:$0xff] %v16562_v24  ;;  %v6821_v24 = vrot.slane %v6748_v37, 7 }
 0x3a9   : > { %13453 = vmatmul.mubr.bf16.gmra.mrb[40].mxu1 %v16162_v3  ;;  %v17524_v3 = vrot.slane %v16526_v22, 1 }
 0x3aa   : > { %13456 = vmatprep.mubr.bf16.mxu1 %v16165_v17  ;;  %v9741_v17 = vrot.slane %v16528_v4, 1 }
 0x3ac   : > { %v16552_v1 = vsel %vm4779_vm4, %v17524_v3, %v9741_v17  ;;  %v16556_v18 = vsel %vm4779_vm4, %v9741_v17, %v9743_v42  ;;  %v16568_v3 = vsel %vm4779_vm4, %v9747_v27, %v17525_v35  ;;  %v17680_v42 = vshrl.u32 %v16268_v7, 16 }
 0x3ad   : > { %17675 = vst [vmem:[#allocation70_spill] sm:$0xff] %v16552_v1  ;;  %17676 = vst [vmem:[#allocation71_spill] sm:$0xff] %v16556_v18  ;;  %v17682_v18 = vshll.u32 %v16526_v22, 16  ;;  %v17683_v35 = vshll.u32 %v16268_v7, 16  ;;  %v16601_v17 = vrot.slane %v17684_v23, 7  ;;  %v17686_v1 = vshrl.u32 %v16292_v58, 16 }
 0x3ae   : > { %17679 = vst [vmem:[#allocation74_spill] sm:$0xff] %v16568_v3  ;;  %v16575_v48 = vrot.slane %v17680_v42, 7  ;;  %v17685_v3 = vshrl.u32 %v16528_v4, 16  ;;  %v16610_v22 = vld [vmem:[#allocation3 + $0x50] sm:$0xff]  ;;  %v10191_v23 = vrot.slane %v17689_v25, 1  ;;  %v17690_v42 = vshll.u32 %v16530_v21, 16 }
 0x3af   : > { %v10176_v27 = vrot.slane %v17682_v18, 2 }
 0x3b0   : > { %v10182_v37 = vrot.slane %v17685_v3, 1  ;;  %v10194_v60 = vrot.slane %v17690_v42, 2  ;;  %v17691_v3 = vshrl.u32 %v16532_v32, 16  ;;  %v17696_v42 = vshrl.u32 %v16536_v26, 16 }
 0x3b1   : > { %13457 = vmatmul.mubr.bf16.gmra.mrb[44].mxu1 %v16172_v50  ;;  %v16580_v50 = vsel %vm7210_vm8, %v7214_v15, %v15673_v59  ;;  %v10173_v15 = vrot.slane %v17681_v28, 1  ;;  %v16608_v28 = vrot.slane %v17686_v1, 7  ;;  %v17692_v1 = vshll.u32 %v16532_v32, 16 }
 0x3b2   : > { %13460 = vmatprep.mubr.bf16.mxu1 %v16175_v54  ;;  %v16597_v54 = vor.u32 %v17683_v35, %v16575_v48  ;;  %v17688_v35 = vshll.u32 %v16528_v4, 16  ;;  %v10200_v46 = vrot.slane %v17691_v3, 1  ;;  %v10218_v20 = vrot.slane %v17696_v42, 1  ;;  %v16635_v3 = vld [vmem:[#allocation3 + $0x58] sm:$0xff] }
 0x3b3   : > { %v16612_v18 = vor.u32 %v10176_v27, %v10173_v15  ;;  %v10203_v2 = vrot.slane %v17692_v1, 2  ;;  %v17693_v27 = vshrl.u32 %v16534_v8, 16  ;;  %17697 = vst [vmem:[#allocation76_spill] sm:$0xff] %v16635_v3  ;;  %v10195_v32 = vor.u32 %v10194_v60, %v10191_v23  ;;  %v16656_v23 = vld [vmem:[#allocation3 + $0x70] sm:$0xff] }
 0x3b4   : > { %v10185_v62 = vrot.slane %v17688_v35, 2  ;;  %v17694_v35 = vrot.slane %v16077_v53, 7  ;;  %v10234_v53 = vshrl.u32 %v16635_v3, 16 }
 0x3b5   : > { %17687 = vst [vmem:[#allocation75_spill] sm:$0xff] %v16612_v18  ;;  %v10209_v15 = vrot.slane %v17693_v27, 1  ;;  %v10204_v1 = vor.u32 %v10203_v2, %v10200_v46  ;;  %v10221_v27 = vrot.slane %v17698_v19, 2 }
 0x3b6   : > { %v6822_v25 = vsel %vm6785_vm7, %v17694_v35, %v6821_v24  ;;  %v10186_v4 = vor.u32 %v10185_v62, %v10182_v37  ;;  %v16643_v62 = vld [vmem:[#allocation3 + $0x68] sm:$0xff]  ;;  %v10228_v35 = vshll.u32 %v16610_v22, 16 }
 0x3b7   : > { %v16654_v19 = vsel %vm5315_vm5, %v10195_v32, %v10204_v1  ;;  %v10222_v46 = vor.u32 %v10221_v27, %v10218_v20  ;;  %v10252_v20 = vshrl.u32 %v16643_v62, 16  ;;  %v16669_v27 = vld [vmem:[#allocation3 + $0x78] sm:$0xff] }
 0x3b8   : > { %v16647_v24 = vsel %vm5315_vm5, %v16612_v18, %v10186_v4  ;;  %v16651_v2 = vsel %vm5315_vm5, %v10186_v4, %v10195_v32  ;;  %17702 = vst [vmem:[#allocation80_spill] sm:$0xff] %v16654_v19  ;;  %v10230_v42 = vrot.slane %v10228_v35, 2  ;;  %v10243_v4 = vshrl.u32 %v16641_v34, 16  ;;  %17705 = vst [vmem:[#allocation83_spill] sm:$0xff] %v16669_v27 }
 0x3b9   : > { %13461 = vmatmul.mubr.bf16.gmra.mrb[48].mxu1 %v16178_v11  ;;  %v17695_v11 = vshll.u32 %v16534_v8, 16  ;;  %17700 = vst [vmem:[#allocation78_spill] sm:$0xff] %v16647_v24  ;;  %17701 = vst [vmem:[#allocation79_spill] sm:$0xff] %v16651_v2  ;;  %v10246_v32 = vshll.u32 %v16641_v34, 16  ;;  %v10236_v19 = vrot.slane %v10234_v53, 1  ;;  %v10255_v35 = vshll.u32 %v16643_v62, 16 }
 0x3ba   : > { %13464 = vmatprep.mubr.bf16.mxu1 %v16183_v16  ;;  %v10225_v16 = vshrl.u32 %v16610_v22, 16  ;;  %v10245_v2 = vrot.slane %v10243_v4, 1  ;;  %v10264_v53 = vshll.u32 %v16656_v23, 16  ;;  %v10273_v4 = vshll.u32 %v16669_v27, 16 }
 0x3bb   : > { %v10212_v21 = vrot.slane %v17695_v11, 2  ;;  %v10248_v24 = vrot.slane %v10246_v32, 2 }
 0x3bc   : > { %v10227_v60 = vrot.slane %v10225_v16, 1 }
 0x3bd   : > { %v10213_v37 = vor.u32 %v10212_v21, %v10209_v15  ;;  %v10237_v21 = vshll.u32 %v16635_v3, 16  ;;  %v10257_v3 = vrot.slane %v10255_v35, 2  ;;  %v10275_v35 = vrot.slane %v10273_v4, 2 }
 0x3be   : > { %v10231_v16 = vor.u32 %v10230_v42, %v10227_v60  ;;  %v16680_v60 = vld [vmem:[#allocation3 + $0x88] sm:$0xff]  ;;  %v10249_v42 = vor.u32 %v10248_v24, %v10245_v2  ;;  %v7230_v4 = vsel %vm7210_vm8, %v15673_v59, %v16213_v10 }
 0x3bf   : > { %v16659_v11 = vsel %vm5315_vm5, %v10204_v1, %v10213_v37  ;;  %v16664_v15 = vsel %vm5315_vm5, %v10213_v37, %v10222_v46  ;;  %v10239_v1 = vrot.slane %v10237_v21, 2  ;;  %v10254_v37 = vrot.slane %v10252_v20, 1 }
 0x3c0   : > { %17703 = vst [vmem:[#allocation81_spill] sm:$0xff] %v16659_v11  ;;  %17704 = vst [vmem:[#allocation82_spill] sm:$0xff] %v16664_v15  ;;  %v16672_v11 = vld [vmem:[#allocation3 + $0x80] sm:$0xff]  ;;  %v10261_v15 = vshrl.u32 %v16656_v23, 16  ;;  %v16677_v18 = vsel %vm5315_vm5, %v10222_v46, %v10231_v16  ;;  %v10270_v21 = vshrl.u32 %v16669_v27, 16 }
 0x3c1   : > { %13465 = vmatmul.mubr.bf16.gmra.mrb[52].mxu1 %v6822_v25  ;;  %17706 = vst [vmem:[#allocation84_spill] sm:$0xff] %v16677_v18  ;;  %v10240_v34 = vor.u32 %v10239_v1, %v10236_v19  ;;  %v10258_v20 = vor.u32 %v10257_v3, %v10254_v37  ;;  %v10279_v46 = vshrl.u32 %v16672_v11, 16  ;;  %v16688_v18 = vld [vmem:[#allocation3 + $0x98] sm:$0xff]  ;;  %v10282_v24 = vshll.u32 %v16672_v11, 16  ;;  %v14755_v3 = vld [vmem:[%s17452_s2 + $0xc8] sm:$0xff]  }
 0x3c2   : > { %13484 = vmatprep.mubr.bf16.mxu1 %v16580_v50  ;;  %v10263_v25 = vrot.slane %v10261_v15, 1  ;;  %v10266_v50 = vrot.slane %v10264_v53, 2  ;;  %v10272_v1 = vrot.slane %v10270_v21, 1  ;;  %v17546_v37 = vshll.u32 %v16188_v14, 16 }
 0x3c3   : > { %v16685_v32 = vsel %vm5315_vm5, %v10231_v16, %v10240_v34  ;;  %v16691_v19 = vsel %vm5315_vm5, %v10240_v34, %v10249_v42  ;;  %v16695_v2 = vsel %vm5315_vm5, %v10249_v42, %v10258_v20  ;;  %v10281_v27 = vrot.slane %v10279_v46, 1 }
 0x3c4   : > { %v10267_v15 = vor.u32 %v10266_v50, %v10263_v25  ;;  %v10288_v16 = vshrl.u32 %v16680_v60, 16  ;;  %v10276_v53 = vor.u32 %v10275_v35, %v10272_v1  ;;  %v10284_v34 = vrot.slane %v10282_v24, 2 }
 0x3c5   : > { %v10291_v21 = vshll.u32 %v16680_v60, 16  ;;  %v10306_v50 = vshrl.u32 %v16688_v18, 16  ;;  %v16713_v46 = vsel %vm7210_vm8, %v16195_v6, %v16597_v54  ;;  %v10309_v10 = vshll.u32 %v16688_v18, 16  ;;  %v14756_v6 = vld [vmem:[%s17452_s2 + $0xd0] sm:$0xff]  }
 0x3c6   : > { %v16707_v42 = vsel %vm5315_vm5, %v10258_v20, %v10267_v15  ;;  %v10290_v25 = vrot.slane %v10288_v16, 1  ;;  %v16716_v1 = vsel %vm5315_vm5, %v10267_v15, %v10276_v53  ;;  %v10285_v35 = vor.u32 %v10284_v34, %v10281_v27 }
 0x3c7   : > { %v10293_v24 = vrot.slane %v10291_v21, 2  ;;  %v10308_v59 = vrot.slane %v10306_v50, 1  ;;  %v17707_v20 = vshrl.u32 %v16188_v14, 16  ;;  %v10320_v15 = vrot.slane %v17546_v37, 2 }
 0x3c8   : > { %v16727_v54 = vsel %vm5315_vm5, %v10276_v53, %v10285_v35  ;;  %v10311_v21 = vrot.slane %v10309_v10, 2 }
 0x3c9   : > { %13485 = vmatmul.mubr.bf16.vlgmr.msra.gmra.mrb[20].mxu1 %v7230_v4  ;;  %v10317_v16 = vrot.slane %v17707_v20, 1  ;;  %v16729_v27 = vor.u32 %v10293_v24, %v10290_v25  ;;  %v17709_v4 = vshll.u32 %v16292_v58, 16  ;;  %v14757_v24 = vld [vmem:[%s17452_s2 + $0xd8] sm:$0xff]  }
 0x3ca   : > { %13488 = vmatprep.mubr.bf16.mxu1 %v16713_v46  ;;  %13521 = vmatpush3.bf16.msra.mxu1 %v16506_v45  ;;  %v17708_v45 = vshll.u32 %v16279_v30, 16  ;;  %v16745_v25 = vor.u32 %v10311_v21, %v10308_v59  ;;  %v17712_v59 = vshrl.u32 %v16298_v5, 16  ;;  %v17714_v21 = vshll.u32 %v16298_v5, 16 }
 0x3cb   : > { %13522 = vmatprep.subr.bf16.mxu1 %v14755_v3  ;;  %v7253_v50 = vor.u32 %v17709_v4, %v16608_v28  ;;  %v16741_v20 = vsel %vm5315_vm5, %v10285_v35, %v16729_v27  ;;  %v16743_v53 = vor.u32 %v10320_v15, %v10317_v16  ;;  %v17713_v15 = vshll.u32 %v16294_v0, 16 }
 0x3cc   : > { %v7245_v34 = vor.u32 %v17708_v45, %v16601_v17  ;;  %v17711_v45 = vshrl.u32 %v16294_v0, 16  ;;  %v7266_v16 = vrot.slane %v17712_v59, 7 }
 0x3cd   : > { %17710 = vst [vmem:[#allocation85_spill] sm:$0xff] %v16743_v53  ;;  %v16757_v35 = vsel %vm5315_vm5, %v16745_v25, %v16743_v53  ;;  %v17717_v53 = vshll.u32 %v16219_v31, 16 }
 0x3ce   : > { %13523 = vmatpush3.bf16.msra.mxu1 %v14755_v3  ;;  %v7246_v10 = vsel %vm7210_vm8, %v16575_v48, %v7245_v34  ;;  %v7258_v4 = vrot.slane %v17711_v45, 7  ;;  %v7254_v3 = vsel %vm7210_vm8, %v16601_v17, %v7253_v50  ;;  %v14758_v48 = vld [vmem:[%s17452_s2 + $0xe0] sm:$0xff]   ;;  %v7269_v45 = vor.u32 %v17714_v21, %v7266_v16  ;;  %v14759_v17 = vld [vmem:[%s17452_s2 + $0xe8] sm:$0xff]  }
 0x3cf   : > { %13524 = vmatprep.subr.bf16.mxu1 %v14756_v6  ;;  %v17715_v50 = vshrl.u32 %v16300_v36, 16 }
 0x3d0   : > { %v7261_v34 = vor.u32 %v17713_v15, %v7258_v4  ;;  %v7270_v37 = vsel %vm7210_vm8, %v7258_v4, %v7269_v45  ;;  %v17716_v15 = vshll.u32 %v16300_v36, 16  ;;  %v14761_v4 = vld [vmem:[%s17452_s2 + $0xf8] sm:$0xff]   ;;  %v14762_v45 = vld [vmem:[%s17452_s2 + $0x100] sm:$0xff]  }
 0x3d1   : > { %13489 = vmatmul.mubr.bf16.gmra.mrb[24].mxu1 %v7246_v10  ;;  %v7274_v59 = vrot.slane %v17715_v50, 7 }
 0x3d2   : > { %13492 = vmatprep.mubr.bf16.mxu1 %v7254_v3  ;;  %13525 = vmatpush3.bf16.msra.mxu1 %v14756_v6  ;;  %v7262_v6 = vsel %vm7210_vm8, %v16608_v28, %v7261_v34  ;;  %v7285_v28 = vor.u32 %v17717_v53, %v16304_v55  ;;  %v7294_v53 = vsel %vm7210_vm8, %v16304_v55, %v16206_v13  ;;  %v14763_v13 = vld [vmem:[%s17452_s2 + $0x108] sm:$0xff]   ;;  %v17720_v55 = vshrl.u32 %v16327_v63, 16 }
 0x3d3   : > { %13526 = vmatprep.subr.bf16.mxu1 %v14757_v24  ;;  %v7277_v21 = vor.u32 %v17716_v15, %v7274_v59  ;;  %v17725_v15 = vshrl.u32 %v16329_v9, 16 }
 0x3d4   : > { %v7286_v34 = vsel %vm7210_vm8, %v7274_v59, %v7285_v28  ;;  %v17724_v59 = vld [vmem:[#allocation42_spill] sm:$0xff] }
 0x3d6   : > { %13527 = vmatpush3.bf16.msra.mxu1 %v14757_v24  ;;  %v14760_v24 = vld [vmem:[%s17452_s2 + $0xf0] sm:$0xff]  }
 0x3d7   : > { %13528 = vmatprep.subr.bf16.mxu1 %v14758_v48 }
 0x3d9   : > { %13493 = vmatmul.mubr.bf16.gmra.mrb[28].mxu1 %v7262_v6 }
 0x3da   : > { %13496 = vmatprep.mubr.bf16.mxu1 %v7270_v37  ;;  %13529 = vmatpush3.bf16.msra.mxu1 %v14758_v48  ;;  %v7278_v48 = vsel %vm7210_vm8, %v7266_v16, %v7277_v21  ;;  %v17718_v16 = vld [vmem:[#allocation41_spill] sm:$0xff]  ;;  %v7841_v21 = vrot.slane %v17725_v15, 7  ;;  %v14771_v15 = vld [vmem:[%s17452_s2 + $0x148] sm:$0xff]  }
 0x3db   : > { %13530 = vmatprep.subr.bf16.mxu1 %v14759_v17 }
 0x3de   : > { %13531 = vmatpush3.bf16.msra.mxu1 %v14759_v17 }
 0x3df   : > { %13532 = vmatprep.subr.bf16.mxu1 %v14760_v24 }
 0x3e1   : > { %13497 = vmatmul.mubr.bf16.gmra.mrb[32].mxu1 %v7278_v48 }
 0x3e2   : > { %13500 = vmatprep.mubr.bf16.mxu1 %v7286_v34  ;;  %13533 = vmatpush3.bf16.msra.mxu1 %v14760_v24 }
 0x3e3   : > { %13534 = vmatprep.subr.bf16.mxu1 %v14761_v4 }
 0x3e6   : > { %13535 = vmatpush3.bf16.msra.mxu1 %v14761_v4  ;;  %v17726_v4 = vshrl.u32 %v16337_v39, 16 }
 0x3e7   : > { %13572 = vmatprep.subr.bf16.mxu1 %v14762_v45 }
 0x3e9   : > { %13501 = vmatmul.mubr.bf16.gmra.mrb[36].mxu1 %v7294_v53  ;;  %v17728_v53 = vshll.u32 %v16337_v39, 16 }
 0x3ea   : > { %13504 = vmatprep.mubr.bf16.mxu1 %v16229_v61  ;;  %v14764_v61 = vld [vmem:[%s17452_s2 + $0x110] sm:$0xff]  }
 0x3f1   : > { %13505 = vmatmul.mubr.bf16.gmra.mrb[40].mxu1 %v16232_v12  ;;  %v14766_v12 = vld [vmem:[%s17452_s2 + $0x120] sm:$0xff]  }
 0x3f2   : > { %13508 = vmatprep.mubr.bf16.mxu1 %v16242_v51  ;;  %v14767_v51 = vld [vmem:[%s17452_s2 + $0x128] sm:$0xff]  }
 0x3f9   : > { %13509 = vmatmul.mubr.bf16.gmra.mrb[44].mxu1 %v16259_v47  ;;  %v14768_v47 = vld [vmem:[%s17452_s2 + $0x130] sm:$0xff]  }
 0x3fa   : > { %13512 = vmatprep.mubr.bf16.mxu1 %v16271_v41  ;;  %v14769_v41 = vld [vmem:[%s17452_s2 + $0x138] sm:$0xff]  }
 0x401   : > { %13513 = vmatmul.mubr.bf16.gmra.mrb[48].mxu1 %v16282_v29  ;;  %v17719_v29 = vshrl.u32 %v16318_v38, 16 }
 0x402   : > { %13516 = vmatprep.mubr.bf16.mxu1 %v16285_v43 }
 0x403   : > { %v7825_v43 = vrot.slane %v17719_v29, 7 }
 0x409   : > { %13517 = vmatmul.mubr.bf16.gmra.mrb[52].mxu1 %v16316_v52  ;;  %v14765_v52 = vld [vmem:[%s17452_s2 + $0x118] sm:$0xff]  }
 0x40a   : > { %13536 = vmatprep.mubr.bf16.mxu1 %v17718_v16 }
 0x411   : > { %13537 = vmatmul.mubr.bf16.vlgmr.msra.gmra.mrb[20].mxu1 %v16713_v46  ;;  %v17721_v46 = vld [vmem:[#allocation43_spill] sm:$0xff] }
 0x412   : > { %13540 = vmatprep.mubr.bf16.mxu1 %v7246_v10  ;;  %13573 = vmatpush3.bf16.msra.mxu1 %v14762_v45  ;;  %v14770_v10 = vld [vmem:[%s17452_s2 + $0x140] sm:$0xff]  }
 0x413   : > { %13574 = vmatprep.subr.bf16.mxu1 %v14763_v13 }
 0x416   : > { %13575 = vmatpush3.bf16.msra.mxu1 %v14763_v13 }
 0x417   : > { %13576 = vmatprep.subr.bf16.mxu1 %v14764_v61 }
 0x419   : > { %13541 = vmatmul.mubr.bf16.gmra.mrb[24].mxu1 %v7254_v3  ;;  %v17722_v3 = vshll.u32 %v16318_v38, 16 }
 0x41a   : > { %13544 = vmatprep.mubr.bf16.mxu1 %v7262_v6  ;;  %13577 = vmatpush3.bf16.msra.mxu1 %v14764_v61  ;;  %v17723_v6 = vshll.u32 %v16327_v63, 16  ;;  %v17729_v61 = vshrl.u32 %v16346_v57, 16 }
 0x41b   : > { %13578 = vmatprep.subr.bf16.mxu1 %v14765_v52  ;;  %v7828_v17 = vor.u32 %v17722_v3, %v7825_v43  ;;  %v17733_v3 = vshll.u32 %v16331_v56, 16 }
 0x41d   : > { %v7829_v24 = vsel %vm7210_vm8, %v17724_v59, %v7828_v17  ;;  %v7876_v17 = vor.u32 %v17733_v3, %v16366_v49  ;;  %v17735_v59 = vld [vmem:[#allocation47_spill] sm:$0xff]  ;;  %v14772_v49 = vld [vmem:[%s17452_s2 + $0x150] sm:$0xff]  }
 0x41e   : > { %13579 = vmatpush3.bf16.msra.mxu1 %v14765_v52  ;;  %v7857_v52 = vrot.slane %v17729_v61, 7  ;;  %v17747_v61 = vld [vmem:[#allocation57_spill] sm:$0xff] }
 0x41f   : > { %13580 = vmatprep.subr.bf16.mxu1 %v14766_v12 }
 0x421   : > { %13545 = vmatmul.mubr.bf16.gmra.mrb[28].mxu1 %v7270_v37  ;;  %v7833_v37 = vrot.slane %v17720_v55, 7 }
 0x422   : > { %13548 = vmatprep.mubr.bf16.mxu1 %v7278_v48  ;;  %13581 = vmatpush3.bf16.msra.mxu1 %v14766_v12  ;;  %v7849_v48 = vrot.slane %v17726_v4, 7  ;;  %v17744_v4 = vld [vmem:[#allocation54_spill] sm:$0xff] }
 0x423   : > { %13582 = vmatprep.subr.bf16.mxu1 %v14767_v51  ;;  %v7836_v50 = vor.u32 %v17723_v6, %v7833_v37 }
 0x424   : > { %v7852_v16 = vor.u32 %v17728_v53, %v7849_v48  ;;  %v17746_v53 = vld [vmem:[#allocation56_spill] sm:$0xff] }
 0x425   : > { %v7837_v28 = vsel %vm7210_vm8, %v7825_v43, %v7836_v50  ;;  %v17732_v43 = vshll.u32 %v16359_v33, 16  ;;  %v17734_v50 = vld [vmem:[#allocation45_spill] sm:$0xff] }
 0x426   : > { %13583 = vmatpush3.bf16.msra.mxu1 %v14767_v51  ;;  %v7853_v12 = vsel %vm7210_vm8, %v7841_v21, %v7852_v16  ;;  %v17730_v51 = vshrl.u32 %v16359_v33, 16  ;;  %v14797_v16 = vld [vmem:[%s17456_s6 + $0x8] sm:$0xff]  }
 0x427   : > { %13584 = vmatprep.subr.bf16.mxu1 %v14768_v47 }
 0x429   : > { %13549 = vmatmul.mubr.bf16.gmra.mrb[32].mxu1 %v7286_v34  ;;  %v17727_v34 = vshll.u32 %v16329_v9, 16 }
 0x42a   : > { %13552 = vmatprep.mubr.bf16.mxu1 %v17721_v46  ;;  %13585 = vmatpush3.bf16.msra.mxu1 %v14768_v47  ;;  %v7865_v47 = vrot.slane %v17730_v51, 7  ;;  %v17749_v51 = vld [vmem:[#allocation59_spill] sm:$0xff] }
 0x42b   : > { %13586 = vmatprep.subr.bf16.mxu1 %v14769_v41  ;;  %v7844_v45 = vor.u32 %v17727_v34, %v7841_v21  ;;  %v14773_v21 = vld [vmem:[%s17452_s2 + $0x158] sm:$0xff]  }
 0x42c   : > { %v7868_v55 = vor.u32 %v17732_v43, %v7865_v47  ;;  %v7877_v6 = vsel %vm7210_vm8, %v7865_v47, %v7876_v17  ;;  %v14785_v34 = vld [vmem:[%s17452_s2 + $0x1b8] sm:$0xff]   ;;  %v17750_v47 = vld [vmem:[#allocation60_spill] sm:$0xff]  ;;  %v17752_v43 = vld [vmem:[#allocation63_spill] sm:$0xff] }
 0x42d   : > { %v7845_v13 = vsel %vm7210_vm8, %v7833_v37, %v7844_v45  ;;  %v17745_v45 = vld [vmem:[#allocation55_spill] sm:$0xff] }
 0x42e   : > { %13587 = vmatpush3.bf16.msra.mxu1 %v14769_v41  ;;  %v17731_v41 = vshll.u32 %v16346_v57, 16  ;;  %v7869_v37 = vsel %vm7210_vm8, %v7857_v52, %v7868_v55  ;;  %v14803_v55 = vld [vmem:[%s17456_s6 + $0x20] sm:$0xff]  }
 0x42f   : > { %13624 = vmatprep.subr.bf16.mxu1 %v14770_v10 }
 0x430   : > { %v7860_v29 = vor.u32 %v17731_v41, %v7857_v52  ;;  %v17748_v52 = vld [vmem:[#allocation58_spill] sm:$0xff]  ;;  %v14801_v41 = vld [vmem:[%s17456_s6 + $0x18] sm:$0xff]  }
 0x431   : > { %13553 = vmatmul.mubr.bf16.gmra.mrb[36].mxu1 %v7829_v24  ;;  %v17736_v24 = vld [vmem:[#allocation40_spill] sm:$0xff] }
 0x432   : > { %13556 = vmatprep.mubr.bf16.mxu1 %v7837_v28  ;;  %v7861_v46 = vsel %vm7210_vm8, %v7849_v48, %v7860_v29  ;;  %v14795_v28 = vld [vmem:[%s17456_s6] sm:$0xff]   ;;  %v14784_v48 = vld [vmem:[%s17452_s2 + $0x1b0] sm:$0xff]   ;;  %v17751_v29 = vld [vmem:[#allocation61_spill] sm:$0xff] }
 0x433   : > { %13832 = vmatprep.subr.bf16.mxu0 %v14795_v28 }
 0x434   : > { %13833 = vmatpush3.bf16.msra.mxu0 %v14795_v28  ;;  %v14787_v28 = vld [vmem:[%s17452_s2 + $0x1c8] sm:$0xff]  }
 0x435   : > { %13834 = vmatprep.subr.bf16.mxu0 %v14797_v16 }
 0x438   : > { %13835 = vmatpush3.bf16.msra.mxu0 %v14797_v16 }
 0x439   : > { %13557 = vmatmul.mubr.bf16.gmra.mrb[40].mxu1 %v7845_v13  ;;  %v14786_v13 = vld [vmem:[%s17452_s2 + $0x1c0] sm:$0xff]  }
 0x43a   : > { %13560 = vmatprep.mubr.bf16.mxu1 %v7853_v12  ;;  %v14799_v12 = vld [vmem:[%s17456_s6 + $0x10] sm:$0xff]  }
 0x43b   : > { %13836 = vmatprep.subr.bf16.mxu0 %v14799_v12 }
 0x43c   : > { %13837 = vmatpush3.bf16.msra.mxu0 %v14799_v12 }
 0x43d   : > { %13838 = vmatprep.subr.bf16.mxu0 %v14801_v41 }
 0x440   : > { %13839 = vmatpush3.bf16.msra.mxu0 %v14801_v41  ;;  %v14788_v41 = vld [vmem:[%s17452_s2 + $0x1d0] sm:$0xff]  }
 0x441   : > { %13561 = vmatmul.mubr.bf16.gmra.mrb[44].mxu1 %v7861_v46  ;;  %v9148_v46 = vld [vmem:[#allocation3 + $0x18] sm:$0xff]  ;;  %13840 = vmatprep.subr.bf16.mxu0 %v14803_v55 }
 0x442   : > { %13564 = vmatprep.mubr.bf16.mxu1 %v7869_v37  ;;  %v8631_v37 = vld [vmem:[#allocation3 + $0xa0] sm:$0x1]  ;;  %v9187_v3 = vshll.u32 %v9148_v46, 16 }
 0x443   : > { %v8793_v17 = vshll.u32 %v8631_v37, 16 }
 0x444   : > { %13841 = vmatpush3.bf16.msra.mxu0 %v14803_v55 }
 0x449   : > { %13565 = vmatmul.mubr.bf16.gmra.mrb[48].mxu1 %v7877_v6  ;;  %v17753_v6 = vld [vmem:[#allocation69_spill] sm:$0xff] }
 0x44a   : > { %13568 = vmatprep.mubr.bf16.mxu1 %v17734_v50  ;;  %v17754_v50 = vld [vmem:[#allocation68_spill] sm:$0xff] }
 0x451   : > { %13569 = vmatmul.mubr.bf16.gmra.mrb[52].mxu1 %v17735_v59  ;;  %v14805_v59 = vld [vmem:[%s17456_s6 + $0x28] sm:$0xff]  }
 0x452   : > { %13588 = vmatprep.mubr.bf16.mxu1 %v17736_v24  ;;  %v9189_v24 = vrot.slane %v9187_v3, 1  ;;  %13842 = vmatprep.subr.bf16.mxu0 %v14805_v59 }
 0x453   : > { %13843 = vmatpush3.bf16.msra.mxu0 %v14805_v59  ;;  %v14789_v59 = vld [vmem:[%s17452_s2 + $0x1d8] sm:$0xff]  }
 0x459   : > { %13589 = vmatmul.mubr.bf16.vlgmr.msra.gmra.mrb[20].mxu1 %v16268_v7  ;;  %v14774_v7 = vld [vmem:[%s17452_s2 + $0x160] sm:$0xff]  }
 0x45a   : > { %13592 = vmatprep.mubr.bf16.mxu1 %v16279_v30  ;;  %13625 = vmatpush3.bf16.msra.mxu1 %v14770_v10  ;;  %v14775_v30 = vld [vmem:[%s17452_s2 + $0x168] sm:$0xff]   ;;  %v17743_v10 = vld [vmem:[#allocation53_spill] sm:$0xff] }
 0x45b   : > { %13626 = vmatprep.subr.bf16.mxu1 %v14771_v15 }
 0x45e   : > { %13627 = vmatpush3.bf16.msra.mxu1 %v14771_v15  ;;  %v8795_v15 = vrot.slane %v8793_v17, 1 }
 0x45f   : > { %13628 = vmatprep.subr.bf16.mxu1 %v14772_v49 }
 0x461   : > { %13593 = vmatmul.mubr.bf16.gmra.mrb[24].mxu1 %v16292_v58  ;;  %v14776_v58 = vld [vmem:[%s17452_s2 + $0x170] sm:$0xff]  }
 0x462   : > { %13596 = vmatprep.mubr.bf16.mxu1 %v16294_v0  ;;  %13629 = vmatpush3.bf16.msra.mxu1 %v14772_v49  ;;  %v14777_v0 = vld [vmem:[%s17452_s2 + $0x178] sm:$0xff]   ;;  %v9185_v49 = vshrl.u32 %v9148_v46, 16 }
 0x463   : > { %13630 = vmatprep.subr.bf16.mxu1 %v14773_v21 }
 0x466   : > { %13631 = vmatpush3.bf16.msra.mxu1 %v14773_v21  ;;  %v17755_v21 = vld [vmem:[#allocation64_spill] sm:$0xff] }
 0x467   : > { %13632 = vmatprep.subr.bf16.mxu1 %v14774_v7 }
 0x469   : > { %13597 = vmatmul.mubr.bf16.gmra.mrb[28].mxu1 %v16298_v5  ;;  %v14778_v5 = vld [vmem:[%s17452_s2 + $0x180] sm:$0xff]  }
 0x46a   : > { %13600 = vmatprep.mubr.bf16.mxu1 %v16300_v36  ;;  %13633 = vmatpush3.bf16.msra.mxu1 %v14774_v7  ;;  %v14779_v36 = vld [vmem:[%s17452_s2 + $0x188] sm:$0xff]   ;;  %v17756_v7 = vshll.u32 %v17755_v21, 16 }
 0x46b   : > { %13634 = vmatprep.subr.bf16.mxu1 %v14775_v30 }
 0x46e   : > { %13635 = vmatpush3.bf16.msra.mxu1 %v14775_v30  ;;  %v9194_v30 = vrot.slane %v17756_v7, 1  ;;  %v14811_v7 = vld [vmem:[%s14917_s20 + $0x18] sm:$0xff]  }
 0x46f   : > { %13636 = vmatprep.subr.bf16.mxu1 %v14776_v58 }
 0x471   : > { %13601 = vmatmul.mubr.bf16.gmra.mrb[32].mxu1 %v16219_v31  ;;  %v17737_v31 = vld [vmem:[#allocation44_spill] sm:$0xff] }
 0x472   : > { %13604 = vmatprep.mubr.bf16.mxu1 %v16236_v44  ;;  %13637 = vmatpush3.bf16.msra.mxu1 %v14776_v58  ;;  %v17738_v44 = vld [vmem:[#allocation46_spill] sm:$0xff]  ;;  %v9190_v58 = vor.u32 %v9189_v24, %v9185_v49  ;;  %v14810_v49 = vld [vmem:[%s14917_s20 + $0x10] sm:$0xff]  }
 0x473   : > { %13638 = vmatprep.subr.bf16.mxu1 %v14777_v0  ;;  %13848 = vmatprep.mubr.bf16.mxu0 %v14810_v49  ;;  %v14826_v49 = vld [vmem:[%s14917_s20 + $0x90] sm:$0xff]  }
 0x476   : > { %13639 = vmatpush3.bf16.msra.mxu1 %v14777_v0  ;;  %v17757_v0 = vld [vmem:[#allocation62_spill] sm:$0xff] }
 0x477   : > { %13676 = vmatprep.subr.bf16.mxu1 %v14778_v5 }
 0x479   : > { %13605 = vmatmul.mubr.bf16.gmra.mrb[36].mxu1 %v16318_v38  ;;  %v17742_v38 = vld [vmem:[#allocation52_spill] sm:$0xff] }
 0x47a   : > { %13608 = vmatprep.mubr.bf16.mxu1 %v16327_v63  ;;  %v17739_v63 = vld [vmem:[#allocation48_spill] sm:$0xff] }
 0x481   : > { %13609 = vmatmul.mubr.bf16.gmra.mrb[40].mxu1 %v16329_v9  ;;  %v17740_v9 = vld [vmem:[#allocation49_spill] sm:$0xff] }
 0x482   : > { %13612 = vmatprep.mubr.bf16.mxu1 %v16337_v39  ;;  %v14781_v39 = vld [vmem:[%s17452_s2 + $0x198] sm:$0xff]  }
 0x489   : > { %13613 = vmatmul.mubr.bf16.gmra.mrb[44].mxu1 %v16346_v57  ;;  %v14780_v57 = vld [vmem:[%s17452_s2 + $0x190] sm:$0xff]  }
 0x48a   : > { %13616 = vmatprep.mubr.bf16.mxu1 %v16359_v33  ;;  %v14782_v33 = vld [vmem:[%s17452_s2 + $0x1a0] sm:$0xff]  }
 0x491   : > { %13617 = vmatmul.mubr.bf16.gmra.mrb[48].mxu1 %v16331_v56  ;;  %v17741_v56 = vld [vmem:[#allocation50_spill] sm:$0xff] }
 0x492   : > { %13620 = vmatprep.mubr.bf16.mxu1 %v16517_v40  ;;  %v14783_v40 = vld [vmem:[%s17452_s2 + $0x1a8] sm:$0xff]  }
 0x499   : > { %13621 = vmatmul.mubr.bf16.gmra.mrb[52].mxu1 %v17737_v31  ;;  %v9195_v31 = vsel %vm3486_vm3, %v9190_v58, %v9194_v30 }
 0x49a   : > { %13640 = vmatprep.mubr.bf16.mxu1 %v17738_v44  ;;  %v14807_v44 = vld [vmem:[%s17456_s6 + $0x30] sm:$0xff]  }
 0x49b   : > { %13844 = vmatprep.subr.bf16.mxu0 %v14807_v44 }
 0x49c   : > { %13845 = vmatpush3.bf16.msra.mxu0 %v14807_v44 }
 0x4a1   : > { %13641 = vmatmul.mubr.bf16.vlgmr.msra.gmra.mrb[20].mxu1 %v17739_v63 }
 0x4a2   : > { %13644 = vmatprep.mubr.bf16.mxu1 %v17740_v9  ;;  %13677 = vmatpush3.bf16.msra.mxu1 %v14778_v5  ;;  %v8796_v5 = vsel %vm3486_vm3, %v17757_v0, %v8795_v15 }
 0x4a3   : > { %13678 = vmatprep.subr.bf16.mxu1 %v14779_v36 }
 0x4a6   : > { %13679 = vmatpush3.bf16.msra.mxu1 %v14779_v36  ;;  %v17758_v36 = vld [vmem:[#allocation65_spill] sm:$0xff] }
 0x4a7   : > { %13680 = vmatprep.subr.bf16.mxu1 %v14780_v57  ;;  %v17759_v63 = vshll.u32 %v17758_v36, 16 }
 0x4a9   : > { %13645 = vmatmul.mubr.bf16.gmra.mrb[24].mxu1 %v17741_v56  ;;  %v9202_v9 = vrot.slane %v17759_v63, 1  ;;  %v17761_v56 = vld [vmem:[#allocation66_spill] sm:$0xff] }
 0x4aa   : > { %13648 = vmatprep.mubr.bf16.mxu1 %v17742_v38  ;;  %13681 = vmatpush3.bf16.msra.mxu1 %v14780_v57  ;;  %v17760_v57 = vshrl.u32 %v17755_v21, 16  ;;  %v17762_v38 = vshll.u32 %v17761_v56, 16  ;;  %v17766_v55 = vshrl.u32 %v17761_v56, 16 }
 0x4ab   : > { %13682 = vmatprep.subr.bf16.mxu1 %v14781_v39 }
 0x4ae   : > { %13683 = vmatpush3.bf16.msra.mxu1 %v14781_v39  ;;  %v9198_v39 = vor.u32 %v17760_v57, %v9194_v30  ;;  %v17769_v30 = vshll.u32 %v16536_v26, 16 }
 0x4af   : > { %13684 = vmatprep.subr.bf16.mxu1 %v14782_v33 }
 0x4b0   : > { %v9234_v58 = vrot.slane %v17769_v30, 1  ;;  %v14800_v30 = vld [vmem:[%s17452_s2 + $0x218] sm:$0xff]  }
 0x4b1   : > { %13649 = vmatmul.mubr.bf16.gmra.mrb[28].mxu1 %v17743_v10 }
 0x4b2   : > { %13652 = vmatprep.mubr.bf16.mxu1 %v17744_v4  ;;  %13685 = vmatpush3.bf16.msra.mxu1 %v14782_v33  ;;  %v9210_v33 = vrot.slane %v17762_v38, 1  ;;  %v9203_v4 = vsel %vm3486_vm3, %v9198_v39, %v9202_v9  ;;  %v17772_v39 = vld [vmem:[#allocation51_spill] sm:$0xff] }
 0x4b3   : > { %13686 = vmatprep.subr.bf16.mxu1 %v14783_v40  ;;  %v14813_v38 = vld [vmem:[%s14917_s20 + $0x28] sm:$0xff]  }
 0x4b4   : > { %v9214_v46 = vor.u32 %v17766_v55, %v9210_v33  ;;  %v14822_v55 = vld [vmem:[%s14917_s20 + $0x70] sm:$0xff]  }
 0x4b6   : > { %13687 = vmatpush3.bf16.msra.mxu1 %v14783_v40  ;;  %v17763_v40 = vshrl.u32 %v17758_v36, 16  ;;  %v17771_v36 = vshrl.u32 %v16536_v26, 16 }
 0x4b7   : > { %13688 = vmatprep.subr.bf16.mxu1 %v14784_v48 }
 0x4b8   : > { %v9206_v10 = vor.u32 %v17763_v40, %v9202_v9  ;;  %v9238_v63 = vor.u32 %v17771_v36, %v9234_v58  ;;  %v14791_v9 = vld [vmem:[%s17452_s2 + $0x1e8] sm:$0xff]   ;;  %v14793_v40 = vld [vmem:[%s17452_s2 + $0x1f8] sm:$0xff]  }
 0x4b9   : > { %13653 = vmatmul.mubr.bf16.gmra.mrb[32].mxu1 %v17745_v45  ;;  %v17764_v45 = vld [vmem:[#allocation67_spill] sm:$0xff] }
 0x4ba   : > { %13656 = vmatprep.mubr.bf16.mxu1 %v17746_v53  ;;  %13689 = vmatpush3.bf16.msra.mxu1 %v14784_v48  ;;  %v9211_v48 = vsel %vm3486_vm3, %v9206_v10, %v9210_v33  ;;  %v17765_v16 = vshll.u32 %v17764_v45, 16  ;;  %v17768_v3 = vshrl.u32 %v17764_v45, 16  ;;  %v9243_v56 = vsel %vm3486_vm3, %v9238_v63, %v17772_v39  ;;  %v14792_v33 = vld [vmem:[%s17452_s2 + $0x1f0] sm:$0xff]   ;;  %v9166_v45 = vld [vmem:[#allocation3 + $0xa8] sm:$0x1]  ;;  %v17780_v63 = vld [vmem:[#allocation74_spill] sm:$0xff] }
 0x4bb   : > { %13690 = vmatprep.subr.bf16.mxu1 %v14785_v34  ;;  %v14814_v10 = vld [vmem:[%s14917_s20 + $0x30] sm:$0xff]   ;;  %v14804_v36 = vld [vmem:[%s17452_s2 + $0x228] sm:$0xff]  }
 0x4bc   : > { %v9218_v12 = vrot.slane %v17765_v16, 1  ;;  %v17773_v16 = vshll.u32 %v16188_v14, 16  ;;  %v14806_v39 = vld [vmem:[%s17452_s2 + $0x230] sm:$0xff]  }
 0x4be   : > { %13691 = vmatpush3.bf16.msra.mxu1 %v14785_v34  ;;  %v14809_v34 = vld [vmem:[%s17456_s6 + $0x38] sm:$0xff]   ;;  %v9222_v17 = vor.u32 %v17768_v3, %v9218_v12  ;;  %v9219_v24 = vsel %vm3486_vm3, %v9214_v46, %v9218_v12  ;;  %v9322_v12 = vrot.slane %v17773_v16, 1 }
 0x4bf   : > { %13728 = vmatprep.subr.bf16.mxu1 %v14786_v13  ;;  %13846 = vmatprep.subr.bf16.mxu0 %v14809_v34  ;;  %v14823_v46 = vld [vmem:[%s14917_s20 + $0x78] sm:$0xff]  }
 0x4c0   : > { %13847 = vmatpush3.bf16.msra.mxu0 %v14809_v34  ;;  %v14819_v34 = vld [vmem:[%s14917_s20 + $0x58] sm:$0xff]  }
 0x4c1   : > { %13657 = vmatmul.mubr.bf16.gmra.mrb[36].mxu1 %v17747_v61 }
 0x4c2   : > { %13660 = vmatprep.mubr.bf16.mxu1 %v17748_v52 }
 0x4c3   : > { %13849 = vmatmul.mubr.bf16.vlgmr.msra.gmra.mrb[36].mxu0 %v14811_v7  ;;  %v14827_v7 = vld [vmem:[%s14917_s20 + $0x98] sm:$0xff]  }
 0x4c9   : > { %13661 = vmatmul.mubr.bf16.gmra.mrb[40].mxu1 %v17749_v51 }
 0x4ca   : > { %13664 = vmatprep.mubr.bf16.mxu1 %v17750_v47 }
 0x4d1   : > { %13665 = vmatmul.mubr.bf16.gmra.mrb[44].mxu1 %v17751_v29 }
 0x4d2   : > { %13668 = vmatprep.mubr.bf16.mxu1 %v17752_v43 }
 0x4d9   : > { %13669 = vmatmul.mubr.bf16.gmra.mrb[48].mxu1 %v17753_v6 }
 0x4da   : > { %13672 = vmatprep.mubr.bf16.mxu1 %v17754_v50 }
 0x4e1   : > { %13673 = vmatmul.mubr.bf16.gmra.mrb[52].mxu1 %v8796_v5  ;;  %v14790_v5 = vld [vmem:[%s17452_s2 + $0x1e0] sm:$0xff]  }
 0x4e2   : > { %13692 = vmatprep.mubr.bf16.mxu1 %v9195_v31  ;;  %v17770_v31 = vshrl.u32 %v16534_v8, 16 }
 0x4e9   : > { %13693 = vmatmul.mubr.bf16.vlgmr.msra.gmra.mrb[20].mxu1 %v9203_v4  ;;  %v14794_v4 = vld [vmem:[%s17452_s2 + $0x200] sm:$0xff]  }
 0x4ea   : > { %13696 = vmatprep.mubr.bf16.mxu1 %v9211_v48  ;;  %13729 = vmatpush3.bf16.msra.mxu1 %v14786_v13  ;;  %v17767_v13 = vshll.u32 %v16534_v8, 16  ;;  %v14812_v8 = vld [vmem:[%s14917_s20 + $0x20] sm:$0xff]   ;;  %v14818_v48 = vld [vmem:[%s14917_s20 + $0x50] sm:$0xff]  }
 0x4eb   : > { %13730 = vmatprep.subr.bf16.mxu1 %v14787_v28  ;;  %13852 = vmatprep.mubr.bf16.mxu0 %v14812_v8  ;;  %v17783_v8 = vld [vmem:[#allocation77_spill] sm:$0xff] }
 0x4ec   : > { %v9226_v37 = vrot.slane %v17767_v13, 1  ;;  %13853 = vmatmul.mubr.bf16.gmra.mrb[40].mxu0 %v14813_v38  ;;  %v9683_v13 = vld [vmem:[#allocation3 + $0x18] sm:$0xfe]  ;;  %v9755_v38 = vrot.slane %v17783_v8, 1 }
 0x4ed   : > { %13856 = vmatprep.mubr.bf16.mxu0 %v14814_v10  ;;  %v9738_v3 = vrot.slane %v9683_v13, 1  ;;  %v9757_v10 = vrot.slane %v16643_v62, 1  ;;  %v9765_v62 = vrot.slane %v16680_v60, 1 }
 0x4ee   : > { %13731 = vmatpush3.bf16.msra.mxu1 %v14787_v28  ;;  %v9227_v15 = vsel %vm3486_vm3, %v9222_v17, %v9226_v37  ;;  %v9230_v44 = vor.u32 %v17770_v31, %v9226_v37  ;;  %v14815_v28 = vld [vmem:[%s14917_s20 + $0x38] sm:$0xff]   ;;  %v14824_v17 = vld [vmem:[%s14917_s20 + $0x80] sm:$0xff]  }
 0x4ef   : > { %13732 = vmatprep.subr.bf16.mxu1 %v14788_v41  ;;  %v14802_v31 = vld [vmem:[%s17452_s2 + $0x220] sm:$0xff]  }
 0x4f0   : > { %v9235_v57 = vsel %vm3486_vm3, %v9230_v44, %v9234_v58  ;;  %v17778_v58 = vld [vmem:[#allocation72_spill] sm:$0xff]  ;;  %v9751_v44 = vrot.slane %v16610_v22, 1 }
 0x4f1   : > { %13697 = vmatmul.mubr.bf16.gmra.mrb[24].mxu1 %v9219_v24  ;;  %v17776_v24 = vld [vmem:[#allocation70_spill] sm:$0xff]  ;;  %v17782_v22 = vld [vmem:[#allocation76_spill] sm:$0xff] }
 0x4f2   : > { %13700 = vmatprep.mubr.bf16.mxu1 %v9227_v15  ;;  %13733 = vmatpush3.bf16.msra.mxu1 %v14788_v41  ;;  %v17777_v15 = vld [vmem:[#allocation71_spill] sm:$0xff] }
 0x4f3   : > { %13734 = vmatprep.subr.bf16.mxu1 %v14789_v59 }
 0x4f4   : > { %13857 = vmatmul.mubr.bf16.gmra.mrb[44].mxu0 %v14815_v28  ;;  %v9759_v28 = vrot.slane %v16656_v23, 1  ;;  %v14829_v23 = vld [vmem:[#allocation3 + $0x90] sm:$0xff] }
 0x4f6   : > { %13735 = vmatpush3.bf16.msra.mxu1 %v14789_v59  ;;  %v14796_v59 = vld [vmem:[%s17452_s2 + $0x208] sm:$0xff]  }
 0x4f7   : > { %13736 = vmatprep.subr.bf16.mxu1 %v14790_v5 }
 0x4f9   : > { %13701 = vmatmul.mubr.bf16.gmra.mrb[28].mxu1 %v9235_v57 }
 0x4fa   : > { %13704 = vmatprep.mubr.bf16.mxu1 %v9243_v56  ;;  %13737 = vmatpush3.bf16.msra.mxu1 %v14790_v5  ;;  %v17779_v5 = vld [vmem:[#allocation73_spill] sm:$0xff]  ;;  %v9753_v56 = vrot.slane %v17782_v22, 1 }
 0x4fb   : > { %13738 = vmatprep.subr.bf16.mxu1 %v14791_v9 }
 0x4fe   : > { %13739 = vmatpush3.bf16.msra.mxu1 %v14791_v9  ;;  %v17781_v9 = vrot.slane %v16536_v26, 1  ;;  %v9754_v26 = vsel %vm4779_vm4, %v9751_v44, %v9753_v56 }
 0x4ff   : > { %13740 = vmatprep.subr.bf16.mxu1 %v14792_v33 }
 0x500   : > { %v9752_v57 = vsel %vm4779_vm4, %v17781_v9, %v9751_v44 }
 0x501   : > { %13705 = vmatmul.mubr.bf16.gmra.mrb[32].mxu1 %v17746_v53  ;;  %v14816_v53 = vld [vmem:[%s14917_s20 + $0x40] sm:$0xff]  }
 0x502   : > { %13708 = vmatprep.mubr.bf16.mxu1 %v17747_v61  ;;  %13741 = vmatpush3.bf16.msra.mxu1 %v14792_v33  ;;  %v14817_v61 = vld [vmem:[%s14917_s20 + $0x48] sm:$0xff]   ;;  %v14808_v33 = vld [vmem:[%s17452_s2 + $0x238] sm:$0xff]  }
 0x503   : > { %13742 = vmatprep.subr.bf16.mxu1 %v14793_v40  ;;  %13860 = vmatprep.mubr.bf16.mxu0 %v14816_v53  ;;  %v9760_v53 = vsel %vm4779_vm4, %v9757_v10, %v9759_v28 }
 0x504   : > { %13861 = vmatmul.mubr.bf16.gmra.mrb[48].mxu0 %v14817_v61  ;;  %v17784_v61 = vld [vmem:[#allocation83_spill] sm:$0xff] }
 0x505   : > { %13864 = vmatprep.mubr.bf16.mxu0 %v14818_v48  ;;  %v9761_v48 = vrot.slane %v17784_v61, 1 }
 0x506   : > { %13743 = vmatpush3.bf16.msra.mxu1 %v14793_v40  ;;  %v9756_v40 = vsel %vm4779_vm4, %v9753_v56, %v9755_v38 }
 0x507   : > { %13780 = vmatprep.subr.bf16.mxu1 %v14794_v4 }
 0x509   : > { %13709 = vmatmul.mubr.bf16.gmra.mrb[36].mxu1 %v17748_v52  ;;  %v14820_v52 = vld [vmem:[%s14917_s20 + $0x60] sm:$0xff]  }
 0x50a   : > { %13712 = vmatprep.mubr.bf16.mxu1 %v17749_v51  ;;  %v14821_v51 = vld [vmem:[%s14917_s20 + $0x68] sm:$0xff]  }
 0x50c   : > { %13865 = vmatmul.mubr.bf16.gmra.mrb[52].mxu0 %v14819_v34  ;;  %v9763_v34 = vrot.slane %v16672_v11, 1  ;;  %v14830_v11 = vld [vmem:[#allocation3] sm:$0xff] }
 0x50d   : > { %13868 = vmatprep.mubr.bf16.mxu0 %v14820_v52  ;;  %v9762_v52 = vsel %vm4779_vm4, %v9759_v28, %v9761_v48 }
 0x50e   : > { %v9766_v16 = vsel %vm4779_vm4, %v9763_v34, %v9765_v62 }
 0x511   : > { %13713 = vmatmul.mubr.bf16.gmra.mrb[40].mxu1 %v17750_v47  ;;  %v9328_v47 = vshll.u32 %v9166_v45, 16  ;;  %v9767_v45 = vrot.slane %v14829_v23, 1 }
 0x512   : > { %13716 = vmatprep.mubr.bf16.mxu1 %v17751_v29  ;;  %v9323_v29 = vsel %vm3486_vm3, %v17757_v0, %v9322_v12 }
 0x513   : > { %v9330_v41 = vrot.slane %v9328_v47, 1  ;;  %v9769_v47 = vrot.slane %v16688_v18, 1  ;;  %v17785_v18 = vld [vmem:[#allocation75_spill] sm:$0xff] }
 0x514   : > { %13869 = vmatmul.mubr.bf16.gmra.mrb[56].mxu0 %v14821_v51  ;;  %v9764_v51 = vsel %vm4779_vm4, %v9761_v48, %v9763_v34 }
 0x515   : > { %13872 = vmatprep.mubr.bf16.mxu0 %v14822_v55 }
 0x519   : > { %13717 = vmatmul.mubr.bf16.gmra.mrb[44].mxu1 %v17752_v43  ;;  %v17774_v43 = vshrl.u32 %v16188_v14, 16  ;;  %v14825_v14 = vld [vmem:[%s14917_s20 + $0x88] sm:$0xff]  }
 0x51a   : > { %13720 = vmatprep.mubr.bf16.mxu1 %v17753_v6 }
 0x51b   : > { %v9326_v6 = vor.u32 %v17774_v43, %v9322_v12  ;;  %v9768_v12 = vsel %vm4779_vm4, %v9765_v62, %v9767_v45  ;;  %v9771_v43 = vrot.slane %v14830_v11, 1 }
 0x51c   : > { %13873 = vmatmul.mubr.bf16.gmra.mrb[60].mxu0 %v14823_v46  ;;  %v9770_v46 = vsel %vm4779_vm4, %v9767_v45, %v9769_v47 }
 0x51d   : > { %v9331_v37 = vsel %vm3486_vm3, %v9326_v6, %v9330_v41  ;;  %13876 = vmatprep.mubr.bf16.mxu0 %v14824_v17  ;;  %v9701_v6 = vld [vmem:[#allocation3 + $0xa8] sm:$0x1]  ;;  %v9772_v60 = vsel %vm4779_vm4, %v9769_v47, %v9771_v43 }
 0x51e   : > { %v9773_v13 = vrot.slane %v9701_v6, 1 }
 0x521   : > { %13721 = vmatmul.mubr.bf16.gmra.mrb[48].mxu1 %v17754_v50  ;;  %v17775_v50 = vrot.slane %v17755_v21, 1  ;;  %v14798_v21 = vld [vmem:[%s17452_s2 + $0x210] sm:$0xff]  }
 0x522   : > { %13724 = vmatprep.mubr.bf16.mxu1 %v9323_v29  ;;  %v10126_v29 = vld [vmem:[#allocation3 + $0x18] sm:$0xfe] }
 0x523   : > { %v9740_v0 = vsel %vm4779_vm4, %v9738_v3, %v17775_v50  ;;  %v10163_v41 = vshrl.u32 %v10126_v29, 16  ;;  %v10166_v55 = vshll.u32 %v10126_v29, 16  ;;  %v9774_v50 = vsel %vm4779_vm4, %v9771_v43, %v9773_v13 }
 0x524   : > { %13877 = vmatmul.mubr.bf16.gmra.mrb[64].mxu0 %v14825_v14  ;;  %v17786_v14 = vld [vmem:[#allocation78_spill] sm:$0xff] }
 0x525   : > { %13880 = vmatprep.mubr.bf16.mxu0 %v14826_v49  ;;  %v10168_v3 = vrot.slane %v10166_v55, 2  ;;  %v17790_v49 = vld [vmem:[#allocation82_spill] sm:$0xff] }
 0x529   : > { %13725 = vmatmul.mubr.bf16.gmra.mrb[52].mxu1 %v9331_v37  ;;  %v10165_v37 = vrot.slane %v10163_v41, 1 }
 0x52a   : > { %13744 = vmatprep.mubr.bf16.mxu1 %v9740_v0 }
 0x52b   : > { %v10169_v0 = vor.u32 %v10168_v3, %v10165_v37  ;;  %v17203_v37 = vld [vmem:[%s17457_s7] ss:$0 sm:$0xff] }
 0x52c   : > { %13881 = vmatmul.mubr.bf16.gmra.mrb[68].mxu0 %v14827_v7  ;;  %v17791_v7 = vld [vmem:[#allocation84_spill] sm:$0xff] }
 0x52d   : > { %v10178_v17 = vsel %vm5315_vm5, %v10169_v0, %v17785_v18 }
 0x531   : > { %13745 = vmatmul.mubr.bf16.vlgmr.msra.gmra.mrb[20].mxu1 %v17776_v24  ;;  %v17788_v24 = vld [vmem:[#allocation80_spill] sm:$0xff] }
 0x532   : > { %13748 = vmatprep.mubr.bf16.mxu1 %v17777_v15  ;;  %13781 = vmatpush3.bf16.msra.mxu1 %v14794_v4  ;;  %v9758_v4 = vsel %vm4779_vm4, %v9755_v38, %v9757_v10  ;;  %v17789_v15 = vld [vmem:[#allocation81_spill] sm:$0xff] }
 0x533   : > { %13782 = vmatprep.subr.bf16.mxu1 %v14796_v59 }
 0x536   : > { %13783 = vmatpush3.bf16.msra.mxu1 %v14796_v59  ;;  %v17787_v59 = vld [vmem:[#allocation79_spill] sm:$0xff] }
 0x537   : > { %13784 = vmatprep.subr.bf16.mxu1 %v14798_v21 }
 0x539   : > { %13749 = vmatmul.mubr.bf16.gmra.mrb[24].mxu1 %v17778_v58 }
 0x53a   : > { %13752 = vmatprep.mubr.bf16.mxu1 %v17779_v5  ;;  %13785 = vmatpush3.bf16.msra.mxu1 %v14798_v21  ;;  %v10141_v21 = vld [vmem:[#allocation3 + $0x90] sm:$0xff] }
 0x53b   : > { %13786 = vmatprep.subr.bf16.mxu1 %v14800_v30  ;;  %v10300_v58 = vshll.u32 %v10141_v21, 16 }
 0x53e   : > { %13787 = vmatpush3.bf16.msra.mxu1 %v14800_v30  ;;  %v10297_v30 = vshrl.u32 %v10141_v21, 16 }
 0x53f   : > { %13788 = vmatprep.subr.bf16.mxu1 %v14802_v31 }
 0x540   : > { %v10299_v5 = vrot.slane %v10297_v30, 1 }
 0x541   : > { %13753 = vmatmul.mubr.bf16.gmra.mrb[28].mxu1 %v17780_v63 }
 0x542   : > { %13756 = vmatprep.mubr.bf16.mxu1 %v9752_v57  ;;  %13789 = vmatpush3.bf16.msra.mxu1 %v14802_v31  ;;  %v10302_v31 = vrot.slane %v10300_v58, 2  ;;  %v17226_v58 = vld [vmem:[%s17454_s4] ss:$0 sm:$0xff] }
 0x543   : > { %13790 = vmatprep.subr.bf16.mxu1 %v14804_v36 }
 0x544   : > { %v10303_v44 = vor.u32 %v10302_v31, %v10299_v5 }
 0x546   : > { %13791 = vmatpush3.bf16.msra.mxu1 %v14804_v36  ;;  %v10144_v36 = vld [vmem:[#allocation3 + $0xa8] sm:$0x3]  ;;  %v10313_v9 = vsel %vm5315_vm5, %v10303_v44, %v16745_v25 }
 0x547   : > { %13792 = vmatprep.subr.bf16.mxu1 %v14806_v39 }
 0x549   : > { %13757 = vmatmul.mubr.bf16.gmra.mrb[32].mxu1 %v9754_v26 }
 0x54a   : > { %13760 = vmatprep.mubr.bf16.mxu1 %v9756_v40  ;;  %13793 = vmatpush3.bf16.msra.mxu1 %v14806_v39 }
 0x54b   : > { %13794 = vmatprep.subr.bf16.mxu1 %v14808_v33 }
 0x54e   : > { %13795 = vmatpush3.bf16.msra.mxu1 %v14808_v33 }
 0x551   : > { %13761 = vmatmul.mubr.bf16.gmra.mrb[36].mxu1 %v9758_v4 }
 0x552   : > { %13764 = vmatprep.mubr.bf16.mxu1 %v9760_v53 }
 0x559   : > { %13765 = vmatmul.mubr.bf16.gmra.mrb[40].mxu1 %v9762_v52 }
 0x55a   : > { %13768 = vmatprep.mubr.bf16.mxu1 %v9764_v51 }
 0x561   : > { %13769 = vmatmul.mubr.bf16.gmra.mrb[44].mxu1 %v9766_v16 }
 0x562   : > { %13772 = vmatprep.mubr.bf16.mxu1 %v9768_v12 }
 0x569   : > { %13773 = vmatmul.mubr.bf16.gmra.mrb[48].mxu1 %v9770_v46 }
 0x56a   : > { %13776 = vmatprep.mubr.bf16.mxu1 %v9772_v60 }
 0x571   : > { %13777 = vmatmul.mubr.bf16.gmra.mrb[52].mxu1 %v9774_v50  ;;  %v17209_v50 = vld [vmem:[%s17458_s8] ss:$0 sm:$0xff] }
 0x572   : > { %13796 = vmatprep.mubr.bf16.mxu1 %v10178_v17 }
 0x579   : > { %13797 = vmatmul.mubr.bf16.vlgmr.msra.gmra.mrb[20].mxu1 %v17786_v14  ;;  %v17216_v14 = vld [vmem:[%s17453_s3] ss:$0 sm:$0xff] }
 0x57a   : > { %13800 = vmatprep.mubr.bf16.mxu1 %v17787_v59 }
 0x581   : > { %13801 = vmatmul.mubr.bf16.gmra.mrb[24].mxu1 %v17788_v24 }
 0x582   : > { %13804 = vmatprep.mubr.bf16.mxu1 %v17789_v15 }
 0x589   : > { %13805 = vmatmul.mubr.bf16.gmra.mrb[28].mxu1 %v17790_v49 }
 0x58a   : > { %13808 = vmatprep.mubr.bf16.mxu1 %v17791_v7 }
 0x591   : > { %13809 = vmatmul.mubr.bf16.gmra.mrb[32].mxu1 %v16685_v32  ;;  %v10304_v32 = vsel %vm5315_vm5, %v16729_v27, %v10303_v44 }
 0x592   : > { %13812 = vmatprep.mubr.bf16.mxu1 %v16691_v19  ;;  %v10324_v19 = vshrl.u32 %v10144_v36, 16 }
 0x599   : > { %13813 = vmatmul.mubr.bf16.gmra.mrb[36].mxu1 %v16695_v2  ;;  %v10327_v2 = vshll.u32 %v10144_v36, 16 }
 0x59a   : > { %13816 = vmatprep.mubr.bf16.mxu1 %v16707_v42  ;;  %v10326_v42 = vrot.slane %v10324_v19, 1 }
 0x59b   : > { %v10329_v63 = vrot.slane %v10327_v2, 2 }
 0x5a1   : > { %13817 = vmatmul.mubr.bf16.gmra.mrb[40].mxu1 %v16716_v1  ;;  %v10330_v1 = vor.u32 %v10329_v63, %v10326_v42 }
 0x5a2   : > { %13820 = vmatprep.mubr.bf16.mxu1 %v16727_v54  ;;  %v17792_v54 = vld [vmem:[#allocation85_spill] sm:$0xff] }
 0x5a3   : > { %v10331_v57 = vsel %vm5315_vm5, %v17792_v54, %v10330_v1 }
 0x5a9   : > { %13821 = vmatmul.mubr.bf16.gmra.mrb[44].mxu1 %v16741_v20  ;;  %v13850_v20 = vpop.f32.mrb[36].mxu0 }
 0x5aa   : > { %13824 = vmatprep.mubr.bf16.mxu1 %v10304_v32  ;;  %v11033_v39 = vpop.f32.mrb[37].mxu0  ;;  %v11185_v3 = vmul.f32 %v13850_v20, %v17203_v37 }
 0x5ab   : > { %v13851_v22 = vpop.f32.mrb[38].mxu0  ;;  %v11183_v0 = vmul.f32 %v17203_v37, %v11033_v39 }
 0x5ac   : > { %v11036_v27 = vpop.f32.mrb[39].mxu0  ;;  %v11228_v17 = vadd.f32 %v17209_v50, %v11185_v3  ;;  %v11186_v24 = vmul.f32 %v13851_v22, %v17203_v37 }
 0x5ad   : > { %v11226_v49 = vadd.f32 %v17209_v50, %v11183_v0  ;;  %v11184_v21 = vmul.f32 %v17203_v37, %v11036_v27 }
 0x5ae   : > { %v11229_v63 = vadd.f32 %v17209_v50, %v11186_v24 }
 0x5b1   : > { %13825 = vmatmul.mubr.bf16.gmra.mrb[48].mxu1 %v10313_v9 }
 0x5b2   : > { %13828 = vmatprep.mubr.bf16.mxu1 %v16757_v35 }
 0x5b9   : > { %13829 = vmatmul.mubr.bf16.gmra.mrb[52].mxu1 %v10331_v57  ;;  %v11227_v57 = vadd.f32 %v17209_v50, %v11184_v21 }
 0x5bf   : > { %v13854_v56 = vpop.f32.mrb[40].mxu0 }
 0x5c0   : > { %v11049_v8 = vpop.f32.mrb[41].mxu0  ;;  %v11189_v19 = vmul.f32 %v13854_v56, %v17203_v37 }
 0x5c1   : > { %v13855_v38 = vpop.f32.mrb[42].mxu0  ;;  %v11187_v2 = vmul.f32 %v17203_v37, %v11049_v8 }
 0x5c2   : > { %v17142_v33 = vpop.f32.mrb[43].mxu0  ;;  %v11190_v1 = vmul.f32 %v13855_v38, %v17203_v37  ;;  %v11232_v56 = vadd.f32 %v17209_v50, %v11189_v19 }
 0x5c3   : > { %v11230_v8 = vadd.f32 %v17209_v50, %v11187_v2  ;;  %v11188_v24 = vmul.f32 %v17203_v37, %v17142_v33  ;;  %v17795_v2 = vld [vmem:[#allocation4_spill] sm:$0xff] }
 0x5c7   : > { %v17144_v26 = vpop.f32.mrb[44].mxu0 }
 0x5c8   : > { %v17146_v25 = vpop.f32.mrb[45].mxu0  ;;  %v11193_v21 = vmul.f32 %v17144_v26, %v17203_v37 }
 0x5c9   : > { %v17148_v40 = vpop.f32.mrb[46].mxu0 }
 0x5ca   : > { %v17150_v35 = vpop.f32.mrb[47].mxu0 }
 0x5d7   : > { %v17152_v10 = vpop.f32.mrb[48].mxu0 }
 0x5d8   : > { %v17154_v28 = vpop.f32.mrb[49].mxu0 }
 0x5d9   : > { %v17156_v4 = vpop.f32.mrb[50].mxu0 }
 0x5da   : > { %v17158_v53 = vpop.f32.mrb[51].mxu0 }
 0x5df   : > { %v17160_v61 = vpop.f32.mrb[52].mxu0 }
 0x5e0   : > { %v17162_v48 = vpop.f32.mrb[53].mxu0 }
 0x5e1   : > { %v17164_v34 = vpop.f32.mrb[54].mxu0 }
 0x5e2   : > { %v17166_v52 = vpop.f32.mrb[55].mxu0 }
 0x5e7   : > { %v17168_v51 = vpop.f32.mrb[56].mxu0 }
 0x5e8   : > { %v17170_v62 = vpop.f32.mrb[57].mxu0 }
 0x5e9   : > { %v17172_v23 = vpop.f32.mrb[58].mxu0 }
 0x5ea   : > { %v17174_v45 = vpop.f32.mrb[59].mxu0 }
 0x5ef   : > { %v17176_v16 = vpop.f32.mrb[60].mxu0 }
 0x5f0   : > { %v17178_v12 = vpop.f32.mrb[61].mxu0 }
 0x5f1   : > { %v17180_v47 = vpop.f32.mrb[62].mxu0 }
 0x5f2   : > { %v17182_v29 = vpop.f32.mrb[63].mxu0 }
 0x5f7   : > { %v17184_v11 = vpop.f32.mrb[64].mxu0 }
 0x5f8   : > { %v17186_v43 = vpop.f32.mrb[65].mxu0 }
 0x5f9   : > { %v17188_v6 = vpop.f32.mrb[66].mxu0 }
 0x5fa   : > { %v17190_v41 = vpop.f32.mrb[67].mxu0 }
 0x5ff   : > { %v17192_v55 = vpop.f32.mrb[68].mxu0 }
 0x600   : > { %v17194_v46 = vpop.f32.mrb[69].mxu0 }
 0x601   : > { %v17196_v60 = vpop.f32.mrb[70].mxu0 }
 0x602   : > { %v17198_v13 = vpop.f32.mrb[71].mxu0 }
 0x64c   : > { %v13798_v18 = vpop.f32.mrb[20].mxu1 }
 0x64d   : > { %v10721_v59 = vmul.f32 %v17216_v14, %v13798_v18  ;;  %v10432_v15 = vpop.f32.mrb[21].mxu1 }
 0x64e   : > { %v10719_v7 = vmul.f32 %v17216_v14, %v10432_v15  ;;  %v13799_v30 = vpop.f32.mrb[22].mxu1 }
 0x64f   : > { %v10757_v5 = vadd.f32 %v17226_v58, %v10721_v59  ;;  %v10722_v31 = vmul.f32 %v17216_v14, %v13799_v30  ;;  %v10435_v44 = vpop.f32.mrb[23].mxu1  ;;  %v11233_v59 = vadd.f32 %v17209_v50, %v11190_v1  ;;  %v11191_v30 = vmul.f32 %v17203_v37, %v17146_v25 }
 0x650   : > { %v10755_v36 = vadd.f32 %v17226_v58, %v10719_v7  ;;  %v10720_v32 = vmul.f32 %v17216_v14, %v10435_v44  ;;  %v17794_v44 = vld [vmem:[#allocation7_spill] sm:$0xff] }
 0x651   : > { %v11264_v42 = vadd.f32 %v11228_v17, %v10757_v5  ;;  %v10758_v9 = vadd.f32 %v17226_v58, %v10722_v31  ;;  %v17793_v5 = vld [vmem:[#allocation5_spill] sm:$0xff] }
 0x652   : > { %v11262_v54 = vadd.f32 %v11226_v49, %v10755_v36  ;;  %v10756_v20 = vadd.f32 %v17226_v58, %v10720_v32 }
 0x653   : > { %v11300_v39 = vmax.f32 %v11264_v42, 0.0  ;;  %v11265_v22 = vadd.f32 %v11229_v63, %v10758_v9  ;;  %v17796_v63 = vld [vmem:[#allocation6_spill] sm:$0xff] }
 0x654   : > { %v11298_v27 = vmax.f32 %v11262_v54, 0.0  ;;  %v11263_v3 = vadd.f32 %v11227_v57, %v10756_v20  ;;  %v13802_v0 = vpop.f32.mrb[24].mxu1  ;;  %v11194_v20 = vmul.f32 %v17148_v40, %v17203_v37 }
 0x655   : > { %v11301_v18 = vmax.f32 %v11265_v22, 0.0  ;;  %v10725_v17 = vmul.f32 %v17216_v14, %v13802_v0  ;;  %v10448_v38 = vpop.f32.mrb[25].mxu1  ;;  %v11336_v31 = vmul.f32 %v11300_v39, %v17793_v5 }
 0x656   : > { %v11299_v15 = vmax.f32 %v11263_v3, 0.0  ;;  %v10723_v49 = vmul.f32 %v17216_v14, %v10448_v38  ;;  %v13803_v7 = vpop.f32.mrb[26].mxu1  ;;  %v11334_v42 = vmul.f32 %v11298_v27, %v17795_v2  ;;  %v11231_v3 = vadd.f32 %v17209_v50, %v11188_v24 }
 0x657   : > { %v11337_v36 = vmul.f32 %v11301_v18, %v17794_v44  ;;  %v10761_v32 = vadd.f32 %v17226_v58, %v10725_v17  ;;  %v10726_v19 = vmul.f32 %v17216_v14, %v13803_v7  ;;  %v10451_v33 = vpop.f32.mrb[27].mxu1  ;;  %v11192_v24 = vmul.f32 %v17203_v37, %v17150_v35 }
 0x658   : > { %v11335_v9 = vmul.f32 %v11299_v15, %v17796_v63  ;;  %v10759_v26 = vadd.f32 %v17226_v58, %v10723_v49  ;;  %v10724_v1 = vmul.f32 %v17216_v14, %v10451_v33  ;;  %v11236_v15 = vadd.f32 %v17209_v50, %v11193_v21  ;;  %v17799_v63 = vld [vmem:[#allocation8_spill] sm:$0xff] }
 0x659   : > { %v12302_v25 = vpack.c.bf16 %v11337_v36, %v11336_v31  ;;  %v11268_v54 = vadd.f32 %v11232_v56, %v10761_v32  ;;  %v10762_v57 = vadd.f32 %v17226_v58, %v10726_v19  ;;  %v11234_v56 = vadd.f32 %v17209_v50, %v11191_v30  ;;  %v17797_v30 = vld [vmem:[#allocation10_spill] sm:$0xff]  ;;  %v17798_v19 = vld [vmem:[#allocation11_spill] sm:$0xff] }
 0x65a   : > { %v12297_v39 = vpack.c.bf16 %v11335_v9, %v11334_v42  ;;  %v11266_v22 = vadd.f32 %v11230_v8, %v10759_v26  ;;  %v10760_v0 = vadd.f32 %v17226_v58, %v10724_v1  ;;  %v11237_v8 = vadd.f32 %v17209_v50, %v11194_v20  ;;  %v17800_v26 = vld [vmem:[#allocation9_spill] sm:$0xff] }
 0x65b   : > { %12385 = vst [vmem:[%s15379_s28 + $0x18] sm:$0xff] %v12302_v25   ;;  %v11304_v27 = vmax.f32 %v11268_v54, 0.0  ;;  %v11269_v18 = vadd.f32 %v11233_v59, %v10762_v57  ;;  %v11197_v36 = vmul.f32 %v17152_v10, %v17203_v37  ;;  %v11195_v21 = vmul.f32 %v17203_v37, %v17154_v28 }
 0x65c   : > { %12384 = vst [vmem:[%s15379_s28 + $0x10] sm:$0xff] %v12297_v39   ;;  %v11302_v17 = vmax.f32 %v11266_v22, 0.0  ;;  %v11267_v38 = vadd.f32 %v11231_v3, %v10760_v0  ;;  %v13806_v49 = vpop.f32.mrb[28].mxu1  ;;  %v11198_v20 = vmul.f32 %v17156_v4, %v17203_v37  ;;  %v11235_v3 = vadd.f32 %v17209_v50, %v11192_v24 }
 0x65d   : > { %v11305_v7 = vmax.f32 %v11269_v18, 0.0  ;;  %v10729_v40 = vmul.f32 %v17216_v14, %v13806_v49  ;;  %v10464_v5 = vpop.f32.mrb[29].mxu1  ;;  %v11340_v32 = vmul.f32 %v11304_v27, %v17797_v30  ;;  %v11240_v49 = vadd.f32 %v17209_v50, %v11197_v36 }
 0x65e   : > { %v11303_v31 = vmax.f32 %v11267_v38, 0.0  ;;  %v10727_v59 = vmul.f32 %v17216_v14, %v10464_v5  ;;  %v13807_v44 = vpop.f32.mrb[30].mxu1  ;;  %v11338_v9 = vmul.f32 %v11302_v17, %v17799_v63  ;;  %v11196_v24 = vmul.f32 %v17203_v37, %v17158_v53  ;;  %v17804_v63 = vld [vmem:[#allocation13_spill] sm:$0xff] }
 0x65f   : > { %v11341_v33 = vmul.f32 %v11305_v7, %v17798_v19  ;;  %v10765_v2 = vadd.f32 %v17226_v58, %v10729_v40  ;;  %v10730_v42 = vmul.f32 %v17216_v14, %v13807_v44  ;;  %v10467_v35 = vpop.f32.mrb[31].mxu1  ;;  %v11201_v44 = vmul.f32 %v17160_v61, %v17203_v37 }
 0x660   : > { %v11339_v1 = vmul.f32 %v11303_v31, %v17800_v26  ;;  %v10763_v10 = vadd.f32 %v17226_v58, %v10727_v59  ;;  %v10728_v25 = vmul.f32 %v17216_v14, %v10467_v35  ;;  %v11199_v36 = vmul.f32 %v17203_v37, %v17162_v48 }
 0x661   : > { %v12312_v28 = vpack.c.bf16 %v11341_v33, %v11340_v32  ;;  %v11272_v54 = vadd.f32 %v11236_v15, %v10765_v2  ;;  %v10766_v57 = vadd.f32 %v17226_v58, %v10730_v42  ;;  %v11238_v15 = vadd.f32 %v17209_v50, %v11195_v21  ;;  %v17801_v21 = vld [vmem:[#allocation14_spill] sm:$0xff]  ;;  %v17802_v32 = vld [vmem:[#allocation15_spill] sm:$0xff]  ;;  %v17803_v42 = vld [vmem:[#allocation12_spill] sm:$0xff] }
 0x662   : > { %v12307_v39 = vpack.c.bf16 %v11339_v1, %v11338_v9  ;;  %v11270_v22 = vadd.f32 %v11234_v56, %v10763_v10  ;;  %v10764_v0 = vadd.f32 %v17226_v58, %v10728_v25  ;;  %v11241_v56 = vadd.f32 %v17209_v50, %v11198_v20 }
 0x663   : > { %12387 = vst [vmem:[%s15379_s28 + $0x28] sm:$0xff] %v12312_v28   ;;  %v11308_v27 = vmax.f32 %v11272_v54, 0.0  ;;  %v11273_v18 = vadd.f32 %v11237_v8, %v10766_v57  ;;  %v11202_v25 = vmul.f32 %v17164_v34, %v17203_v37  ;;  %v11239_v57 = vadd.f32 %v17209_v50, %v11196_v24 }
 0x664   : > { %12386 = vst [vmem:[%s15379_s28 + $0x20] sm:$0xff] %v12307_v39   ;;  %v11306_v17 = vmax.f32 %v11270_v22, 0.0  ;;  %v11271_v38 = vadd.f32 %v11235_v3, %v10764_v0  ;;  %v13810_v7 = vpop.f32.mrb[32].mxu1  ;;  %v11203_v24 = vmul.f32 %v17203_v37, %v17170_v62 }
 0x665   : > { %v11309_v40 = vmax.f32 %v11273_v18, 0.0  ;;  %v10733_v4 = vmul.f32 %v17216_v14, %v13810_v7  ;;  %v10480_v5 = vpop.f32.mrb[33].mxu1  ;;  %v11344_v30 = vmul.f32 %v11308_v27, %v17801_v21  ;;  %v11244_v27 = vadd.f32 %v17209_v50, %v11201_v44 }
 0x666   : > { %v11307_v31 = vmax.f32 %v11271_v38, 0.0  ;;  %v10731_v8 = vmul.f32 %v17216_v14, %v10480_v5  ;;  %v13811_v59 = vpop.f32.mrb[34].mxu1  ;;  %v11342_v35 = vmul.f32 %v11306_v17, %v17803_v42  ;;  %v11242_v18 = vadd.f32 %v17209_v50, %v11199_v36 }
 0x667   : > { %v11345_v19 = vmul.f32 %v11309_v40, %v17802_v32  ;;  %v10769_v33 = vadd.f32 %v17226_v58, %v10733_v4  ;;  %v10734_v2 = vmul.f32 %v17216_v14, %v13811_v59  ;;  %v10483_v53 = vpop.f32.mrb[35].mxu1  ;;  %v11200_v7 = vmul.f32 %v17203_v37, %v17166_v52  ;;  %v17806_v59 = vld [vmem:[#allocation19_spill] sm:$0xff] }
 0x668   : > { %v11343_v9 = vmul.f32 %v11307_v31, %v17804_v63  ;;  %v10767_v61 = vadd.f32 %v17226_v58, %v10731_v8  ;;  %v10732_v26 = vmul.f32 %v17216_v14, %v10483_v53  ;;  %v11205_v5 = vmul.f32 %v17168_v51, %v17203_v37  ;;  %v17805_v31 = vld [vmem:[#allocation18_spill] sm:$0xff] }
 0x669   : > { %v12322_v48 = vpack.c.bf16 %v11345_v19, %v11344_v30  ;;  %v11276_v1 = vadd.f32 %v11240_v49, %v10769_v33  ;;  %v10770_v10 = vadd.f32 %v17226_v58, %v10734_v2  ;;  %v11245_v49 = vadd.f32 %v17209_v50, %v11202_v25  ;;  %v17807_v30 = vld [vmem:[#allocation16_spill] sm:$0xff]  ;;  %v17808_v19 = vld [vmem:[#allocation17_spill] sm:$0xff] }
 0x66a   : > { %v12317_v28 = vpack.c.bf16 %v11343_v9, %v11342_v35  ;;  %v11274_v54 = vadd.f32 %v11238_v15, %v10767_v61  ;;  %v10768_v20 = vadd.f32 %v17226_v58, %v10732_v26  ;;  %v11206_v35 = vmul.f32 %v17172_v23, %v17203_v37 }
 0x66b   : > { %12389 = vst [vmem:[%s15379_s28 + $0x38] sm:$0xff] %v12322_v48   ;;  %v11312_v39 = vmax.f32 %v11276_v1, 0.0  ;;  %v11277_v22 = vadd.f32 %v11241_v56, %v10770_v10  ;;  %v11243_v61 = vadd.f32 %v17209_v50, %v11200_v7  ;;  %v11248_v10 = vadd.f32 %v17209_v50, %v11205_v5 }
 0x66c   : > { %12388 = vst [vmem:[%s15379_s28 + $0x30] sm:$0xff] %v12317_v28   ;;  %v11310_v3 = vmax.f32 %v11274_v54, 0.0  ;;  %v11275_v0 = vadd.f32 %v11239_v57, %v10768_v20  ;;  %v13814_v17 = vpop.f32.mrb[36].mxu1  ;;  %v11246_v54 = vadd.f32 %v17209_v50, %v11203_v24  ;;  %v11204_v23 = vmul.f32 %v17203_v37, %v17174_v45  ;;  %v17809_v45 = vld [vmem:[#allocation22_spill] sm:$0xff]  ;;  %v17812_v24 = vld [vmem:[#allocation21_spill] sm:$0xff] }
 0x66d   : > { %v11313_v38 = vmax.f32 %v11277_v22, 0.0  ;;  %v10737_v34 = vmul.f32 %v17216_v14, %v13814_v17  ;;  %v10496_v15 = vpop.f32.mrb[37].mxu1  ;;  %v11348_v8 = vmul.f32 %v11312_v39, %v17805_v31  ;;  %v11249_v22 = vadd.f32 %v17209_v50, %v11206_v35 }
 0x66e   : > { %v11311_v40 = vmax.f32 %v11275_v0, 0.0  ;;  %v10735_v4 = vmul.f32 %v17216_v14, %v10496_v15  ;;  %v13815_v56 = vpop.f32.mrb[38].mxu1  ;;  %v11346_v32 = vmul.f32 %v11310_v3, %v17807_v30  ;;  %v11209_v0 = vmul.f32 %v17176_v16, %v17203_v37  ;;  %v17810_v15 = vld [vmem:[#allocation23_spill] sm:$0xff] }
 0x66f   : > { %v11349_v44 = vmul.f32 %v11313_v38, %v17806_v59  ;;  %v10773_v36 = vadd.f32 %v17226_v58, %v10737_v34  ;;  %v10738_v21 = vmul.f32 %v17216_v14, %v13815_v56  ;;  %v10499_v52 = vpop.f32.mrb[39].mxu1  ;;  %v11207_v38 = vmul.f32 %v17203_v37, %v17178_v12  ;;  %v17811_v56 = vld [vmem:[#allocation20_spill] sm:$0xff] }
 0x670   : > { %v11347_v33 = vmul.f32 %v11311_v40, %v17808_v19  ;;  %v10771_v51 = vadd.f32 %v17226_v58, %v10735_v4  ;;  %v10736_v2 = vmul.f32 %v17216_v14, %v10499_v52  ;;  %v11210_v34 = vmul.f32 %v17180_v47, %v17203_v37 }
 0x671   : > { %v12332_v62 = vpack.c.bf16 %v11349_v44, %v11348_v8  ;;  %v11280_v53 = vadd.f32 %v11244_v27, %v10773_v36  ;;  %v10774_v42 = vadd.f32 %v17226_v58, %v10738_v21  ;;  %v11208_v36 = vmul.f32 %v17203_v37, %v17182_v29 }
 0x672   : > { %v12327_v63 = vpack.c.bf16 %v11347_v33, %v11346_v32  ;;  %v11278_v9 = vadd.f32 %v11242_v18, %v10771_v51  ;;  %v10772_v26 = vadd.f32 %v17226_v58, %v10736_v2  ;;  %v11247_v30 = vadd.f32 %v17209_v50, %v11204_v23 }
 0x673   : > { %12391 = vst [vmem:[%s15379_s28 + $0x48] sm:$0xff] %v12332_v62   ;;  %v11316_v48 = vmax.f32 %v11280_v53, 0.0  ;;  %v11281_v1 = vadd.f32 %v11245_v49, %v10774_v42  ;;  %v11252_v62 = vadd.f32 %v17209_v50, %v11209_v0  ;;  %v11250_v53 = vadd.f32 %v17209_v50, %v11207_v38 }
 0x674   : > { %12390 = vst [vmem:[%s15379_s28 + $0x40] sm:$0xff] %v12327_v63   ;;  %v11314_v25 = vmax.f32 %v11278_v9, 0.0  ;;  %v11279_v28 = vadd.f32 %v11243_v61, %v10772_v26  ;;  %v13818_v57 = vpop.f32.mrb[40].mxu1  ;;  %v11253_v63 = vadd.f32 %v17209_v50, %v11210_v34  ;;  %v11251_v61 = vadd.f32 %v17209_v50, %v11208_v36 }
 0x675   : > { %v11317_v20 = vmax.f32 %v11281_v1, 0.0  ;;  %v10741_v39 = vmul.f32 %v17216_v14, %v13818_v57  ;;  %v10512_v3 = vpop.f32.mrb[41].mxu1  ;;  %v11352_v49 = vmul.f32 %v11316_v48, %v17809_v45  ;;  %v17814_v57 = vld [vmem:[#allocation27_spill] sm:$0xff]  ;;  %v11214_v45 = vmul.f32 %v17188_v6, %v17203_v37 }
 0x676   : > { %v11315_v27 = vmax.f32 %v11279_v28, 0.0  ;;  %v10739_v18 = vmul.f32 %v17216_v14, %v10512_v3  ;;  %v13819_v17 = vpop.f32.mrb[42].mxu1  ;;  %v11350_v5 = vmul.f32 %v11314_v25, %v17811_v56  ;;  %v11211_v25 = vmul.f32 %v17203_v37, %v17186_v43  ;;  %v17813_v28 = vld [vmem:[#allocation26_spill] sm:$0xff]  ;;  %v17815_v3 = vld [vmem:[#allocation24_spill] sm:$0xff] }
 0x677   : > { %v11353_v7 = vmul.f32 %v11317_v20, %v17810_v15  ;;  %v10777_v40 = vadd.f32 %v17226_v58, %v10741_v39  ;;  %v10742_v4 = vmul.f32 %v17216_v14, %v13819_v17  ;;  %v10515_v16 = vpop.f32.mrb[43].mxu1 }
 0x678   : > { %v11351_v31 = vmul.f32 %v11315_v27, %v17812_v24  ;;  %v10775_v12 = vadd.f32 %v17226_v58, %v10739_v18  ;;  %v10740_v8 = vmul.f32 %v17216_v14, %v10515_v16  ;;  %v17816_v27 = vld [vmem:[#allocation25_spill] sm:$0xff] }
 0x679   : > { %v12342_v47 = vpack.c.bf16 %v11353_v7, %v11352_v49  ;;  %v11284_v59 = vadd.f32 %v11248_v10, %v10777_v40  ;;  %v10778_v44 = vadd.f32 %v17226_v58, %v10742_v4  ;;  %v11213_v10 = vmul.f32 %v17184_v11, %v17203_v37 }
 0x67a   : > { %v12337_v21 = vpack.c.bf16 %v11351_v31, %v11350_v5  ;;  %v11282_v52 = vadd.f32 %v11246_v54, %v10775_v12  ;;  %v10776_v32 = vadd.f32 %v17226_v58, %v10740_v8  ;;  %v11212_v40 = vmul.f32 %v17203_v37, %v17190_v41 }
 0x67b   : > { %12393 = vst [vmem:[%s15379_s28 + $0x58] sm:$0xff] %v12342_v47   ;;  %v11320_v19 = vmax.f32 %v11284_v59, 0.0  ;;  %v11285_v33 = vadd.f32 %v11249_v22, %v10778_v44  ;;  %v11256_v12 = vadd.f32 %v17209_v50, %v11213_v10  ;;  %v11254_v8 = vadd.f32 %v17209_v50, %v11211_v25 }
 0x67c   : > { %12392 = vst [vmem:[%s15379_s28 + $0x50] sm:$0xff] %v12337_v21   ;;  %v11318_v51 = vmax.f32 %v11282_v52, 0.0  ;;  %v11283_v2 = vadd.f32 %v11247_v30, %v10776_v32  ;;  %v13822_v42 = vpop.f32.mrb[44].mxu1  ;;  %v11257_v44 = vadd.f32 %v17209_v50, %v11214_v45  ;;  %v11255_v36 = vadd.f32 %v17209_v50, %v11212_v40  ;;  %v17817_v52 = vld [vmem:[#allocation30_spill] sm:$0xff]  ;;  %v17818_v32 = vld [vmem:[#allocation31_spill] sm:$0xff]  ;;  %v17823_v40 = vld [vmem:[#allocation32_spill] sm:$0xff] }
 0x67d   : > { %v11321_v35 = vmax.f32 %v11285_v33, 0.0  ;;  %v10745_v29 = vmul.f32 %v17216_v14, %v13822_v42  ;;  %v10528_v9 = vpop.f32.mrb[45].mxu1  ;;  %v11356_v54 = vmul.f32 %v11320_v19, %v17813_v28  ;;  %v17820_v42 = vld [vmem:[#allocation29_spill] sm:$0xff]  ;;  %v11215_v28 = vmul.f32 %v17203_v37, %v17194_v46  ;;  %v17822_v45 = vld [vmem:[#allocation35_spill] sm:$0xff] }
 0x67e   : > { %v11319_v26 = vmax.f32 %v11283_v2, 0.0  ;;  %v10743_v48 = vmul.f32 %v17216_v14, %v10528_v9  ;;  %v13823_v1 = vpop.f32.mrb[46].mxu1  ;;  %v11354_v0 = vmul.f32 %v11318_v51, %v17815_v3 }
 0x67f   : > { %v11357_v23 = vmul.f32 %v11321_v35, %v17814_v57  ;;  %v10781_v20 = vadd.f32 %v17226_v58, %v10745_v29  ;;  %v10746_v39 = vmul.f32 %v17216_v14, %v13823_v1  ;;  %v10531_v22 = vpop.f32.mrb[47].mxu1 }
 0x680   : > { %v11355_v18 = vmul.f32 %v11319_v26, %v17816_v27  ;;  %v10779_v11 = vadd.f32 %v17226_v58, %v10743_v48  ;;  %v10744_v17 = vmul.f32 %v17216_v14, %v10531_v22  ;;  %v11217_v48 = vmul.f32 %v17192_v55, %v17203_v37 }
 0x681   : > { %v12352_v43 = vpack.c.bf16 %v11357_v23, %v11356_v54  ;;  %v11288_v38 = vadd.f32 %v11252_v62, %v10781_v20  ;;  %v10782_v34 = vadd.f32 %v17226_v58, %v10746_v39  ;;  %v17819_v62 = vld [vmem:[#allocation28_spill] sm:$0xff]  ;;  %v11218_v55 = vmul.f32 %v17196_v60, %v17203_v37 }
 0x682   : > { %v12347_v49 = vpack.c.bf16 %v11355_v18, %v11354_v0  ;;  %v11286_v15 = vadd.f32 %v11250_v53, %v10779_v11  ;;  %v10780_v7 = vadd.f32 %v17226_v58, %v10744_v17  ;;  %v11260_v3 = vadd.f32 %v17209_v50, %v11217_v48 }
 0x683   : > { %12395 = vst [vmem:[%s15379_s28 + $0x68] sm:$0xff] %v12352_v43   ;;  %v11324_v4 = vmax.f32 %v11288_v38, 0.0  ;;  %v11289_v16 = vadd.f32 %v11253_v63, %v10782_v34  ;;  %v11258_v11 = vadd.f32 %v17209_v50, %v11215_v28  ;;  %v11216_v17 = vmul.f32 %v17203_v37, %v17198_v13  ;;  %v17821_v38 = vld [vmem:[#allocation34_spill] sm:$0xff] }
 0x684   : > { %12394 = vst [vmem:[%s15379_s28 + $0x60] sm:$0xff] %v12347_v49   ;;  %v11322_v56 = vmax.f32 %v11286_v15, 0.0  ;;  %v11287_v5 = vadd.f32 %v11251_v61, %v10780_v7  ;;  %v13826_v24 = vpop.f32.mrb[48].mxu1 }
 0x685   : > { %v11325_v31 = vmax.f32 %v11289_v16, 0.0  ;;  %v10749_v6 = vmul.f32 %v17216_v14, %v13826_v24  ;;  %v10544_v47 = vpop.f32.mrb[49].mxu1  ;;  %v11360_v30 = vmul.f32 %v11324_v4, %v17817_v52  ;;  %v17824_v16 = vld [vmem:[#allocation33_spill] sm:$0xff] }
 0x686   : > { %v11323_v59 = vmax.f32 %v11287_v5, 0.0  ;;  %v10747_v41 = vmul.f32 %v17216_v14, %v10544_v47  ;;  %v13827_v21 = vpop.f32.mrb[50].mxu1  ;;  %v11358_v53 = vmul.f32 %v11322_v56, %v17819_v62  ;;  %v11259_v47 = vadd.f32 %v17209_v50, %v11216_v17  ;;  %v17828_v62 = vld [vmem:[#allocation37_spill] sm:$0xff] }
 0x687   : > { %v11361_v19 = vmul.f32 %v11325_v31, %v17818_v32  ;;  %v10785_v33 = vadd.f32 %v17226_v58, %v10749_v6  ;;  %v10750_v51 = vmul.f32 %v17216_v14, %v13827_v21  ;;  %v10547_v2 = vpop.f32.mrb[51].mxu1  ;;  %v11261_v31 = vadd.f32 %v17209_v50, %v11218_v55 }
 0x688   : > { %v11359_v35 = vmul.f32 %v11323_v59, %v17820_v42  ;;  %v10783_v29 = vadd.f32 %v17226_v58, %v10747_v41  ;;  %v10748_v63 = vmul.f32 %v17216_v14, %v10547_v2 }
 0x689   : > { %v12362_v9 = vpack.c.bf16 %v11361_v19, %v11360_v30  ;;  %v11292_v61 = vadd.f32 %v11256_v12, %v10785_v33  ;;  %v10786_v26 = vadd.f32 %v17226_v58, %v10750_v51  ;;  %v17825_v30 = vld [vmem:[#allocation38_spill] sm:$0xff]  ;;  %v17826_v19 = vld [vmem:[#allocation39_spill] sm:$0xff]  ;;  %v17827_v51 = vld [vmem:[#allocation36_spill] sm:$0xff] }
 0x68a   : > { %v12357_v1 = vpack.c.bf16 %v11359_v35, %v11358_v53  ;;  %v11290_v10 = vadd.f32 %v11254_v8, %v10783_v29  ;;  %v10784_v25 = vadd.f32 %v17226_v58, %v10748_v63 }
 0x68b   : > { %12397 = vst [vmem:[%s15379_s28 + $0x78] sm:$0xff] %v12362_v9   ;;  %v11328_v54 = vmax.f32 %v11292_v61, 0.0  ;;  %v11293_v57 = vadd.f32 %v11257_v44, %v10786_v26 }
 0x68c   : > { %12396 = vst [vmem:[%s15379_s28 + $0x70] sm:$0xff] %v12357_v1   ;;  %v11326_v23 = vmax.f32 %v11290_v10, 0.0  ;;  %v11291_v20 = vadd.f32 %v11255_v36, %v10784_v25  ;;  %v13830_v39 = vpop.f32.mrb[52].mxu1 }
 0x68d   : > { %v11329_v22 = vmax.f32 %v11293_v57, 0.0  ;;  %v10753_v0 = vmul.f32 %v17216_v14, %v13830_v39  ;;  %v10560_v27 = vpop.f32.mrb[53].mxu1  ;;  %v11364_v34 = vmul.f32 %v11328_v54, %v17821_v38 }
 0x68e   : > { %v11327_v18 = vmax.f32 %v11291_v20, 0.0  ;;  %v10751_v46 = vmul.f32 %v17216_v14, %v10560_v27  ;;  %v13831_v43 = vpop.f32.mrb[54].mxu1  ;;  %v11362_v4 = vmul.f32 %v11326_v23, %v17823_v40 }
 0x68f   : > { %v11365_v49 = vmul.f32 %v11329_v22, %v17822_v45  ;;  %v10789_v15 = vadd.f32 %v17226_v58, %v10753_v0  ;;  %v10754_v7 = vmul.f32 %v17216_v14, %v13831_v43  ;;  %v10563_v60 = vpop.f32.mrb[55].mxu1 }
 0x690   : > { %v11363_v56 = vmul.f32 %v11327_v18, %v17824_v16  ;;  %v10787_v5 = vadd.f32 %v17226_v58, %v10751_v46  ;;  %v10752_v13 = vmul.f32 %v17216_v14, %v10563_v60 }
 0x691   : > { %v12372_v37 = vpack.c.bf16 %v11365_v49, %v11364_v34  ;;  %v11296_v24 = vadd.f32 %v11260_v3, %v10789_v15  ;;  %v10790_v12 = vadd.f32 %v17226_v58, %v10754_v7 }
 0x692   : > { %v12367_v8 = vpack.c.bf16 %v11363_v56, %v11362_v4  ;;  %v11294_v6 = vadd.f32 %v11258_v11, %v10787_v5  ;;  %v10788_v59 = vadd.f32 %v17226_v58, %v10752_v13 }
 0x693   : > { %12399 = vst [vmem:[%s15379_s28 + $0x88] sm:$0xff] %v12372_v37   ;;  %v11332_v44 = vmax.f32 %v11296_v24, 0.0  ;;  %v11297_v41 = vadd.f32 %v11261_v31, %v10790_v12 }
 0x694   : > { %12398 = vst [vmem:[%s15379_s28 + $0x80] sm:$0xff] %v12367_v8   ;;  %v11330_v36 = vmax.f32 %v11294_v6, 0.0  ;;  %v11295_v14 = vadd.f32 %v11259_v47, %v10788_v59 }
 0x695   : > { %v11333_v21 = vmax.f32 %v11297_v41, 0.0  ;;  %v11368_v32 = vmul.f32 %v11332_v44, %v17825_v30 }
 0x696   : > { %v11331_v52 = vmax.f32 %v11295_v14, 0.0  ;;  %v11366_v2 = vmul.f32 %v11330_v36, %v17827_v51 }
 0x697   : > { %v11369_v33 = vmul.f32 %v11333_v21, %v17826_v19 }
 0x698   : > { %v11367_v50 = vmul.f32 %v11331_v52, %v17828_v62 }
 0x699   : > { %v12382_v53 = vpack.c.bf16 %v11369_v33, %v11368_v32 }
 0x69a   : > { %v12377_v42 = vpack.c.bf16 %v11367_v50, %v11366_v2 }
 0x69b   : > { %12401 = vst [vmem:[%s15379_s28 + $0x98] sm:$0xff] %v12382_v53  }
 0x69c   : > { %12400 = vst [vmem:[%s15379_s28 + $0x90] sm:$0xff] %v12377_v42  }
 0x69d PF: > { %s19_s30 = sadd.s32 1, %s14839_s30  }
 0x69e   : > { %p16_p4 = scmp.ge.s32.totalorder %s19_s30, 4  }
 0x6a0   :  { %18 = sbr.rel (!%p16_p4) target bundleno = 1 (0x1), region = 102 }

</bundles_post_ra>
